<compile_context>
chip_gen: v6e
topology: v6e:2x2x1
jax: 0.10.0
libtpu: 0.0.40
codegen_flags: <defaults>
</compile_context>

<pallas_src>
import functools

import numpy as np
import jax
import jax.numpy as jnp
from jax.experimental import pallas as pl
from jax.experimental.pallas import tpu as pltpu


def _inception_aux_kernel(x_ref, pmat_ref, wc_ref, bc_ref, w1_ref, b1_ref,
                          w2_ref, out_ref, flat_ref):
    """Fused InceptionAux forward for one fc1/fc2 hidden-column split.

    x_ref:    (N, H*W, Cin)        input pixels, channels on lanes
    pmat_ref: (n_pix, H*W)         avg-pool matrix (1/25 entries)
    wc_ref:   (Cin, 128)           1x1 conv weight
    bc_ref:   (1, 128)             conv bias
    w1_ref:   (2048, hidden/split) fc1 weight slice (rows in (pixel, ch) order)
    b1_ref:   (1, hidden/split)    fc1 bias slice
    w2_ref:   (hidden/split, C)    fc2 weight slice
    out_ref:  (1, N, C)            partial fc2 product for this split
    flat_ref: (N, 2048)            VMEM scratch: flattened conv activations
    """
    n_batch = x_ref.shape[0]
    n_pix = pmat_ref.shape[0]          # pooled spatial positions (4*4 = 16)
    cc = wc_ref.shape[1]               # conv output channels (128)

    # --- Stage 1: avg-pool (as matmul) + 1x1 conv + bias + ReLU + flatten ---
    for n in range(n_batch):
        pooled = jnp.dot(pmat_ref[...], x_ref[n],
                         preferred_element_type=jnp.float32)          # (n_pix, Cin)
        act = jnp.dot(pooled, wc_ref[...],
                      preferred_element_type=jnp.float32) + bc_ref[...]
        act = jnp.maximum(act, 0.0)                                    # (n_pix, 128)
        # Flatten pixel-major / channel-minor into a lane-dense (N, 2048) row
        # via 128-lane-aligned stores (avoids a sublane->lane relayout).
        for p in range(n_pix):
            flat_ref[n:n + 1, p * cc:(p + 1) * cc] = act[p:p + 1, :]

    # --- Stage 2: fc1 column-slice + ReLU, then fc2 partial product ---
    h1 = jnp.dot(flat_ref[...], w1_ref[...],
                 preferred_element_type=jnp.float32) + b1_ref[...]
    h1 = jnp.maximum(h1, 0.0)                                          # (N, hidden/split)
    out_ref[0] = jnp.dot(h1, w2_ref[...],
                         preferred_element_type=jnp.float32)           # (N, num_classes)


@functools.partial(jax.jit, static_argnames=("num_splits",))
def inception_aux_forward(x, conv_w, conv_b, fc1_w, fc1_b, fc2_w, fc2_b,
                          *, num_splits=2):
    """InceptionAux.forward (eval mode) on NCHW input with torch-layout weights."""
    # TODO(synk): training-mode dropout (p=0.5) is not implemented; this is the
    # eval-mode forward where F.dropout is the identity. Would need
    # pltpu.prng_seed + pltpu.stateful_bernoulli in-kernel.
    N, Cin, H, W = x.shape
    conv_out = conv_w.shape[0]            # 128
    hidden = fc1_w.shape[0]               # 1024
    num_classes = fc2_w.shape[0]

    kp, sp = 5, 3                         # AvgPool2d(kernel_size=5, stride=3)
    ph = (H - kp) // sp + 1
    pw = (W - kp) // sp + 1
    n_pix = ph * pw
    kdim = n_pix * conv_out
    assert kdim == fc1_w.shape[1], "fc1 in-features must equal 128 * pooled spatial"
    assert hidden % num_splits == 0

    # Pooling matrix: pooled[p, :] = mean over the 5x5 window p of flattened H*W.
    pm = np.zeros((n_pix, H * W), np.float32)
    inv = 1.0 / float(kp * kp)
    for oh in range(ph):
        for ow in range(pw):
            for kh in range(kp):
                for kw in range(kp):
                    pm[oh * pw + ow, (oh * sp + kh) * W + (ow * sp + kw)] = inv
    pmat = jnp.asarray(pm)

    # One-time layout glue (tiny arrays, outside the hot loop).
    x_flat = jnp.transpose(x, (0, 2, 3, 1)).reshape(N, H * W, Cin)      # (N, H*W, Cin)
    wc = jnp.transpose(conv_w.reshape(conv_out, Cin))                   # (Cin, 128)
    bc = conv_b.reshape(1, conv_out)
    # torch.flatten gives (channel-major, pixel-minor) order; reorder fc1 rows
    # so the kernel can consume (pixel-major, channel-minor) features.
    w1k = jnp.transpose(fc1_w.reshape(hidden, conv_out, n_pix),
                        (2, 1, 0)).reshape(kdim, hidden)                 # (2048, 1024)
    b1k = fc1_b.reshape(1, hidden)
    w2k = jnp.transpose(fc2_w)                                           # (1024, C)

    hsplit = hidden // num_splits

    flops = 2 * N * (n_pix * H * W * Cin            # pool-as-matmul
                     + n_pix * Cin * conv_out       # 1x1 conv
                     + kdim * hidden                # fc1
                     + hidden * num_classes)        # fc2
    bytes_accessed = 4 * (x_flat.size + pmat.size + wc.size + bc.size
                          + w1k.size + b1k.size + w2k.size
                          + num_splits * N * num_classes)

    partials = pl.pallas_call(
        _inception_aux_kernel,
        out_shape=jax.ShapeDtypeStruct((num_splits, N, num_classes), jnp.float32),
        grid=(num_splits,),
        in_specs=[
            pl.BlockSpec((N, H * W, Cin), lambda i: (0, 0, 0)),   # x (full, resident)
            pl.BlockSpec((n_pix, H * W), lambda i: (0, 0)),       # pooling matrix
            pl.BlockSpec((Cin, conv_out), lambda i: (0, 0)),      # conv weight
            pl.BlockSpec((1, conv_out), lambda i: (0, 0)),        # conv bias
            pl.BlockSpec((kdim, hsplit), lambda i: (0, i)),       # fc1 weight slice
            pl.BlockSpec((1, hsplit), lambda i: (0, i)),          # fc1 bias slice
            pl.BlockSpec((hsplit, num_classes), lambda i: (i, 0)),# fc2 weight slice
        ],
        out_specs=pl.BlockSpec((1, N, num_classes), lambda i: (i, 0, 0)),
        scratch_shapes=[pltpu.VMEM((N, kdim), jnp.float32)],
        compiler_params=pltpu.CompilerParams(
            dimension_semantics=("parallel",)),
        cost_estimate=pl.CostEstimate(
            flops=flops, transcendentals=0, bytes_accessed=bytes_accessed),
    )(x_flat, pmat, wc, bc, w1k, b1k, w2k)

    # Reduce the 2-way hidden split and add the fc2 bias (tiny, glue-side).
    return jnp.sum(partials, axis=0) + fc2_b[None, :]


if __name__ == "__main__":
    # Small shapes consistent with the module: 14x14 pools (5,3) to 4x4, and
    # 128 conv channels * 16 pixels = 2048 = fc1 in-features.
    N, Cin, H, W = 2, 32, 14, 14
    conv_out, hidden, num_classes = 128, 1024, 10

    key = jax.random.PRNGKey(0)
    ks = jax.random.split(key, 7)

    def uniform(k, shape, fan_in):
        bound = 1.0 / np.sqrt(fan_in)
        return jax.random.uniform(k, shape, jnp.float32, -bound, bound)

    x = jax.random.normal(ks[0], (N, Cin, H, W), dtype=jnp.float32)
    conv_w = uniform(ks[1], (conv_out, Cin, 1, 1), Cin)          # nn.Conv2d(in, 128, 1)
    conv_b = uniform(ks[2], (conv_out,), Cin)
    fc1_w = uniform(ks[3], (hidden, 2048), 2048)                 # nn.Linear(2048, 1024)
    fc1_b = uniform(ks[4], (hidden,), 2048)
    fc2_w = uniform(ks[5], (num_classes, hidden), hidden)        # nn.Linear(1024, C)
    fc2_b = uniform(ks[6], (num_classes,), hidden)

    out = inception_aux_forward(x, conv_w, conv_b, fc1_w, fc1_b, fc2_w, fc2_b)
    jax.block_until_ready(out)

    # Pure-JAX reference mirroring the PyTorch module (eval mode: dropout = id).
    pooled = jax.lax.reduce_window(x, 0.0, jax.lax.add,
                                   (1, 1, 5, 5), (1, 1, 3, 3), "VALID") / 25.0
    y = jnp.einsum("nchw,oc->nohw", pooled, conv_w.reshape(conv_out, Cin))
    y = jnp.maximum(y + conv_b[None, :, None, None], 0.0)
    flat = y.reshape(N, -1)                                      # torch.flatten(x, 1)
    h1 = jnp.maximum(flat @ fc1_w.T + fc1_b, 0.0)
    ref = h1 @ fc2_w.T + fc2_b

    assert out.shape == (N, num_classes)
    max_err = float(jnp.max(jnp.abs(out - ref)))
    assert jnp.allclose(out, ref, atol=3e-3, rtol=3e-2), f"max abs err {max_err}"

    print("KERNEL_OK")
</pallas_src>

<mosaic_0001>
module attributes {stable_mosaic.version = 11 : i64} {
  func.func @_inception_aux_kernel(%arg0: i32, %arg1: memref<2x196x32xf32, #tpu.memory_space<vmem>>, %arg2: memref<16x196xf32, #tpu.memory_space<vmem>>, %arg3: memref<32x128xf32, #tpu.memory_space<vmem>>, %arg4: memref<1x128xf32, #tpu.memory_space<vmem>>, %arg5: memref<2048x512xf32, #tpu.memory_space<vmem>>, %arg6: memref<1x512xf32, #tpu.memory_space<vmem>>, %arg7: memref<512x10xf32, #tpu.memory_space<vmem>>, %arg8: memref<1x2x10xf32, #tpu.memory_space<vmem>>, %arg9: memref<2x2048xf32, #tpu.memory_space<vmem>>) attributes {dimension_semantics = [#tpu.dimension_semantics<parallel>], iteration_bounds = array<i64: 2>, scalar_prefetch = 0 : i64, scratch_operands = 1 : i64, tpu.core_type = #tpu.core_type<tc>, window_params = [{pipeline_mode = #tpu.pipeline_mode<synchronous>, transform_indices = @transform_0, window_bounds = array<i64: 2, 196, 32>}, {pipeline_mode = #tpu.pipeline_mode<synchronous>, transform_indices = @transform_1, window_bounds = array<i64: 16, 196>}, {pipeline_mode = #tpu.pipeline_mode<synchronous>, transform_indices = @transform_2, window_bounds = array<i64: 32, 128>}, {pipeline_mode = #tpu.pipeline_mode<synchronous>, transform_indices = @transform_3, window_bounds = array<i64: 1, 128>}, {transform_indices = @transform_4, window_bounds = array<i64: 2048, 512>}, {transform_indices = @transform_5, window_bounds = array<i64: 1, 512>}, {transform_indices = @transform_6, window_bounds = array<i64: 512, 10>}, {transform_indices = @transform_7, window_bounds = array<i64: 1, 2, 10>}]} {
    %c0 = arith.constant 0 : index
    %c0_0 = arith.constant 0 : index
    %0 = vector.load %arg2[%c0, %c0_0] : memref<16x196xf32, #tpu.memory_space<vmem>>, vector<16x196xf32>
    %c0_1 = arith.constant 0 : index
    %c0_2 = arith.constant 0 : index
    %c0_3 = arith.constant 0 : index
    %1 = vector.load %arg1[%c0_1, %c0_2, %c0_3] : memref<2x196x32xf32, #tpu.memory_space<vmem>>, vector<1x196x32xf32>
    %2 = vector.shape_cast %1 : vector<1x196x32xf32> to vector<196x32xf32>
    %cst = arith.constant dense<0.000000e+00> : vector<16x32xf32>
    %3 = tpu.matmul %0, %2, %cst {dimension_numbers = #tpu.dot_dimension_numbers<[1], [0], [0], [1], [0, 0, 1, 1], [], []>} : vector<16x196xf32>, vector<196x32xf32>, vector<16x32xf32> -> vector<16x32xf32>
    %c0_4 = arith.constant 0 : index
    %c0_5 = arith.constant 0 : index
    %4 = vector.load %arg3[%c0_4, %c0_5] : memref<32x128xf32, #tpu.memory_space<vmem>>, vector<32x128xf32>
    %cst_6 = arith.constant dense<0.000000e+00> : vector<16x128xf32>
    %5 = tpu.matmul %3, %4, %cst_6 {dimension_numbers = #tpu.dot_dimension_numbers<[1], [0], [0], [1], [0, 0, 1, 1], [], []>} : vector<16x32xf32>, vector<32x128xf32>, vector<16x128xf32> -> vector<16x128xf32>
    %c0_7 = arith.constant 0 : index
    %c0_8 = arith.constant 0 : index
    %6 = vector.load %arg4[%c0_7, %c0_8] : memref<1x128xf32, #tpu.memory_space<vmem>>, vector<1x128xf32>
    %7 = vector.broadcast %6 : vector<1x128xf32> to vector<16x128xf32>
    %8 = arith.addf %5, %7 : vector<16x128xf32>
    %cst_9 = arith.constant 0.000000e+00 : f32
    %9 = vector.broadcast %cst_9 : f32 to vector<16x128xf32>
    %10 = arith.maximumf %8, %9 : vector<16x128xf32>
    %11 = vector.extract_strided_slice %10 {offsets = [0, 0], sizes = [1, 128], strides = [1, 1]} : vector<16x128xf32> to vector<1x128xf32>
    %c0_10 = arith.constant 0 : index
    %c0_11 = arith.constant 0 : index
    %12 = vector.load %arg9[%c0_10, %c0_11] : memref<2x2048xf32, #tpu.memory_space<vmem>>, vector<1x128xf32>
    tpu.vector_store %arg9[%c0_10, %c0_11], %11 {strides = array<i32>} : memref<2x2048xf32, #tpu.memory_space<vmem>>, vector<1x128xf32>,
    %13 = vector.extract_strided_slice %10 {offsets = [1, 0], sizes = [1, 128], strides = [1, 1]} : vector<16x128xf32> to vector<1x128xf32>
    %c0_12 = arith.constant 0 : index
    %c128 = arith.constant 128 : index
    %14 = vector.load %arg9[%c0_12, %c128] : memref<2x2048xf32, #tpu.memory_space<vmem>>, vector<1x128xf32>
    tpu.vector_store %arg9[%c0_12, %c128], %13 {strides = array<i32>} : memref<2x2048xf32, #tpu.memory_space<vmem>>, vector<1x128xf32>,
    %15 = vector.extract_strided_slice %10 {offsets = [2, 0], sizes = [1, 128], strides = [1, 1]} : vector<16x128xf32> to vector<1x128xf32>
    %c0_13 = arith.constant 0 : index
    %c256 = arith.constant 256 : index
    %16 = vector.load %arg9[%c0_13, %c256] : memref<2x2048xf32, #tpu.memory_space<vmem>>, vector<1x128xf32>
    tpu.vector_store %arg9[%c0_13, %c256], %15 {strides = array<i32>} : memref<2x2048xf32, #tpu.memory_space<vmem>>, vector<1x128xf32>,
    %17 = vector.extract_strided_slice %10 {offsets = [3, 0], sizes = [1, 128], strides = [1, 1]} : vector<16x128xf32> to vector<1x128xf32>
    %c0_14 = arith.constant 0 : index
    %c384 = arith.constant 384 : index
    %18 = vector.load %arg9[%c0_14, %c384] : memref<2x2048xf32, #tpu.memory_space<vmem>>, vector<1x128xf32>
    tpu.vector_store %arg9[%c0_14, %c384], %17 {strides = array<i32>} : memref<2x2048xf32, #tpu.memory_space<vmem>>, vector<1x128xf32>,
    %19 = vector.extract_strided_slice %10 {offsets = [4, 0], sizes = [1, 128], strides = [1, 1]} : vector<16x128xf32> to vector<1x128xf32>
    %c0_15 = arith.constant 0 : index
    %c512 = arith.constant 512 : index
    %20 = vector.load %arg9[%c0_15, %c512] : memref<2x2048xf32, #tpu.memory_space<vmem>>, vector<1x128xf32>
    tpu.vector_store %arg9[%c0_15, %c512], %19 {strides = array<i32>} : memref<2x2048xf32, #tpu.memory_space<vmem>>, vector<1x128xf32>,
    %21 = vector.extract_strided_slice %10 {offsets = [5, 0], sizes = [1, 128], strides = [1, 1]} : vector<16x128xf32> to vector<1x128xf32>
    %c0_16 = arith.constant 0 : index
    %c640 = arith.constant 640 : index
    %22 = vector.load %arg9[%c0_16, %c640] : memref<2x2048xf32, #tpu.memory_space<vmem>>, vector<1x128xf32>
    tpu.vector_store %arg9[%c0_16, %c640], %21 {strides = array<i32>} : memref<2x2048xf32, #tpu.memory_space<vmem>>, vector<1x128xf32>,
    %23 = vector.extract_strided_slice %10 {offsets = [6, 0], sizes = [1, 128], strides = [1, 1]} : vector<16x128xf32> to vector<1x128xf32>
    %c0_17 = arith.constant 0 : index
    %c768 = arith.constant 768 : index
    %24 = vector.load %arg9[%c0_17, %c768] : memref<2x2048xf32, #tpu.memory_space<vmem>>, vector<1x128xf32>
    tpu.vector_store %arg9[%c0_17, %c768], %23 {strides = array<i32>} : memref<2x2048xf32, #tpu.memory_space<vmem>>, vector<1x128xf32>,
    %25 = vector.extract_strided_slice %10 {offsets = [7, 0], sizes = [1, 128], strides = [1, 1]} : vector<16x128xf32> to vector<1x128xf32>
    %c0_18 = arith.constant 0 : index
    %c896 = arith.constant 896 : index
    %26 = vector.load %arg9[%c0_18, %c896] : memref<2x2048xf32, #tpu.memory_space<vmem>>, vector<1x128xf32>
    tpu.vector_store %arg9[%c0_18, %c896], %25 {strides = array<i32>} : memref<2x2048xf32, #tpu.memory_space<vmem>>, vector<1x128xf32>,
    %27 = vector.extract_strided_slice %10 {offsets = [8, 0], sizes = [1, 128], strides = [1, 1]} : vector<16x128xf32> to vector<1x128xf32>
    %c0_19 = arith.constant 0 : index
    %c1024 = arith.constant 1024 : index
    %28 = vector.load %arg9[%c0_19, %c1024] : memref<2x2048xf32, #tpu.memory_space<vmem>>, vector<1x128xf32>
    tpu.vector_store %arg9[%c0_19, %c1024], %27 {strides = array<i32>} : memref<2x2048xf32, #tpu.memory_space<vmem>>, vector<1x128xf32>,
    %29 = vector.extract_strided_slice %10 {offsets = [9, 0], sizes = [1, 128], strides = [1, 1]} : vector<16x128xf32> to vector<1x128xf32>
    %c0_20 = arith.constant 0 : index
    %c1152 = arith.constant 1152 : index
    %30 = vector.load %arg9[%c0_20, %c1152] : memref<2x2048xf32, #tpu.memory_space<vmem>>, vector<1x128xf32>
    tpu.vector_store %arg9[%c0_20, %c1152], %29 {strides = array<i32>} : memref<2x2048xf32, #tpu.memory_space<vmem>>, vector<1x128xf32>,
    %31 = vector.extract_strided_slice %10 {offsets = [10, 0], sizes = [1, 128], strides = [1, 1]} : vector<16x128xf32> to vector<1x128xf32>
    %c0_21 = arith.constant 0 : index
    %c1280 = arith.constant 1280 : index
    %32 = vector.load %arg9[%c0_21, %c1280] : memref<2x2048xf32, #tpu.memory_space<vmem>>, vector<1x128xf32>
    tpu.vector_store %arg9[%c0_21, %c1280], %31 {strides = array<i32>} : memref<2x2048xf32, #tpu.memory_space<vmem>>, vector<1x128xf32>,
    %33 = vector.extract_strided_slice %10 {offsets = [11, 0], sizes = [1, 128], strides = [1, 1]} : vector<16x128xf32> to vector<1x128xf32>
    %c0_22 = arith.constant 0 : index
    %c1408 = arith.constant 1408 : index
    %34 = vector.load %arg9[%c0_22, %c1408] : memref<2x2048xf32, #tpu.memory_space<vmem>>, vector<1x128xf32>
    tpu.vector_store %arg9[%c0_22, %c1408], %33 {strides = array<i32>} : memref<2x2048xf32, #tpu.memory_space<vmem>>, vector<1x128xf32>,
    %35 = vector.extract_strided_slice %10 {offsets = [12, 0], sizes = [1, 128], strides = [1, 1]} : vector<16x128xf32> to vector<1x128xf32>
    %c0_23 = arith.constant 0 : index
    %c1536 = arith.constant 1536 : index
    %36 = vector.load %arg9[%c0_23, %c1536] : memref<2x2048xf32, #tpu.memory_space<vmem>>, vector<1x128xf32>
    tpu.vector_store %arg9[%c0_23, %c1536], %35 {strides = array<i32>} : memref<2x2048xf32, #tpu.memory_space<vmem>>, vector<1x128xf32>,
    %37 = vector.extract_strided_slice %10 {offsets = [13, 0], sizes = [1, 128], strides = [1, 1]} : vector<16x128xf32> to vector<1x128xf32>
    %c0_24 = arith.constant 0 : index
    %c1664 = arith.constant 1664 : index
    %38 = vector.load %arg9[%c0_24, %c1664] : memref<2x2048xf32, #tpu.memory_space<vmem>>, vector<1x128xf32>
    tpu.vector_store %arg9[%c0_24, %c1664], %37 {strides = array<i32>} : memref<2x2048xf32, #tpu.memory_space<vmem>>, vector<1x128xf32>,
    %39 = vector.extract_strided_slice %10 {offsets = [14, 0], sizes = [1, 128], strides = [1, 1]} : vector<16x128xf32> to vector<1x128xf32>
    %c0_25 = arith.constant 0 : index
    %c1792 = arith.constant 1792 : index
    %40 = vector.load %arg9[%c0_25, %c1792] : memref<2x2048xf32, #tpu.memory_space<vmem>>, vector<1x128xf32>
    tpu.vector_store %arg9[%c0_25, %c1792], %39 {strides = array<i32>} : memref<2x2048xf32, #tpu.memory_space<vmem>>, vector<1x128xf32>,
    %41 = vector.extract_strided_slice %10 {offsets = [15, 0], sizes = [1, 128], strides = [1, 1]} : vector<16x128xf32> to vector<1x128xf32>
    %c0_26 = arith.constant 0 : index
    %c1920 = arith.constant 1920 : index
    %42 = vector.load %arg9[%c0_26, %c1920] : memref<2x2048xf32, #tpu.memory_space<vmem>>, vector<1x128xf32>
    tpu.vector_store %arg9[%c0_26, %c1920], %41 {strides = array<i32>} : memref<2x2048xf32, #tpu.memory_space<vmem>>, vector<1x128xf32>,
    %c0_27 = arith.constant 0 : index
    %c0_28 = arith.constant 0 : index
    %43 = vector.load %arg2[%c0_27, %c0_28] : memref<16x196xf32, #tpu.memory_space<vmem>>, vector<16x196xf32>
    %c1 = arith.constant 1 : index
    %c0_29 = arith.constant 0 : index
    %c0_30 = arith.constant 0 : index
    %44 = vector.load %arg1[%c1, %c0_29, %c0_30] : memref<2x196x32xf32, #tpu.memory_space<vmem>>, vector<1x196x32xf32>
    %45 = vector.shape_cast %44 : vector<1x196x32xf32> to vector<196x32xf32>
    %cst_31 = arith.constant dense<0.000000e+00> : vector<16x32xf32>
    %46 = tpu.matmul %43, %45, %cst_31 {dimension_numbers = #tpu.dot_dimension_numbers<[1], [0], [0], [1], [0, 0, 1, 1], [], []>} : vector<16x196xf32>, vector<196x32xf32>, vector<16x32xf32> -> vector<16x32xf32>
    %c0_32 = arith.constant 0 : index
    %c0_33 = arith.constant 0 : index
    %47 = vector.load %arg3[%c0_32, %c0_33] : memref<32x128xf32, #tpu.memory_space<vmem>>, vector<32x128xf32>
    %cst_34 = arith.constant dense<0.000000e+00> : vector<16x128xf32>
    %48 = tpu.matmul %46, %47, %cst_34 {dimension_numbers = #tpu.dot_dimension_numbers<[1], [0], [0], [1], [0, 0, 1, 1], [], []>} : vector<16x32xf32>, vector<32x128xf32>, vector<16x128xf32> -> vector<16x128xf32>
    %c0_35 = arith.constant 0 : index
    %c0_36 = arith.constant 0 : index
    %49 = vector.load %arg4[%c0_35, %c0_36] : memref<1x128xf32, #tpu.memory_space<vmem>>, vector<1x128xf32>
    %50 = vector.broadcast %49 : vector<1x128xf32> to vector<16x128xf32>
    %51 = arith.addf %48, %50 : vector<16x128xf32>
    %cst_37 = arith.constant 0.000000e+00 : f32
    %52 = vector.broadcast %cst_37 : f32 to vector<16x128xf32>
    %53 = arith.maximumf %51, %52 : vector<16x128xf32>
    %54 = vector.extract_strided_slice %53 {offsets = [0, 0], sizes = [1, 128], strides = [1, 1]} : vector<16x128xf32> to vector<1x128xf32>
    %c1_38 = arith.constant 1 : index
    %c0_39 = arith.constant 0 : index
    %55 = vector.load %arg9[%c1_38, %c0_39] : memref<2x2048xf32, #tpu.memory_space<vmem>>, vector<1x128xf32>
    tpu.vector_store %arg9[%c1_38, %c0_39], %54 {strides = array<i32>} : memref<2x2048xf32, #tpu.memory_space<vmem>>, vector<1x128xf32>,
    %56 = vector.extract_strided_slice %53 {offsets = [1, 0], sizes = [1, 128], strides = [1, 1]} : vector<16x128xf32> to vector<1x128xf32>
    %c1_40 = arith.constant 1 : index
    %c128_41 = arith.constant 128 : index
    %57 = vector.load %arg9[%c1_40, %c128_41] : memref<2x2048xf32, #tpu.memory_space<vmem>>, vector<1x128xf32>
    tpu.vector_store %arg9[%c1_40, %c128_41], %56 {strides = array<i32>} : memref<2x2048xf32, #tpu.memory_space<vmem>>, vector<1x128xf32>,
    %58 = vector.extract_strided_slice %53 {offsets = [2, 0], sizes = [1, 128], strides = [1, 1]} : vector<16x128xf32> to vector<1x128xf32>
    %c1_42 = arith.constant 1 : index
    %c256_43 = arith.constant 256 : index
    %59 = vector.load %arg9[%c1_42, %c256_43] : memref<2x2048xf32, #tpu.memory_space<vmem>>, vector<1x128xf32>
    tpu.vector_store %arg9[%c1_42, %c256_43], %58 {strides = array<i32>} : memref<2x2048xf32, #tpu.memory_space<vmem>>, vector<1x128xf32>,
    %60 = vector.extract_strided_slice %53 {offsets = [3, 0], sizes = [1, 128], strides = [1, 1]} : vector<16x128xf32> to vector<1x128xf32>
    %c1_44 = arith.constant 1 : index
    %c384_45 = arith.constant 384 : index
    %61 = vector.load %arg9[%c1_44, %c384_45] : memref<2x2048xf32, #tpu.memory_space<vmem>>, vector<1x128xf32>
    tpu.vector_store %arg9[%c1_44, %c384_45], %60 {strides = array<i32>} : memref<2x2048xf32, #tpu.memory_space<vmem>>, vector<1x128xf32>,
    %62 = vector.extract_strided_slice %53 {offsets = [4, 0], sizes = [1, 128], strides = [1, 1]} : vector<16x128xf32> to vector<1x128xf32>
    %c1_46 = arith.constant 1 : index
    %c512_47 = arith.constant 512 : index
    %63 = vector.load %arg9[%c1_46, %c512_47] : memref<2x2048xf32, #tpu.memory_space<vmem>>, vector<1x128xf32>
    tpu.vector_store %arg9[%c1_46, %c512_47], %62 {strides = array<i32>} : memref<2x2048xf32, #tpu.memory_space<vmem>>, vector<1x128xf32>,
    %64 = vector.extract_strided_slice %53 {offsets = [5, 0], sizes = [1, 128], strides = [1, 1]} : vector<16x128xf32> to vector<1x128xf32>
    %c1_48 = arith.constant 1 : index
    %c640_49 = arith.constant 640 : index
    %65 = vector.load %arg9[%c1_48, %c640_49] : memref<2x2048xf32, #tpu.memory_space<vmem>>, vector<1x128xf32>
    tpu.vector_store %arg9[%c1_48, %c640_49], %64 {strides = array<i32>} : memref<2x2048xf32, #tpu.memory_space<vmem>>, vector<1x128xf32>,
    %66 = vector.extract_strided_slice %53 {offsets = [6, 0], sizes = [1, 128], strides = [1, 1]} : vector<16x128xf32> to vector<1x128xf32>
    %c1_50 = arith.constant 1 : index
    %c768_51 = arith.constant 768 : index
    %67 = vector.load %arg9[%c1_50, %c768_51] : memref<2x2048xf32, #tpu.memory_space<vmem>>, vector<1x128xf32>
    tpu.vector_store %arg9[%c1_50, %c768_51], %66 {strides = array<i32>} : memref<2x2048xf32, #tpu.memory_space<vmem>>, vector<1x128xf32>,
    %68 = vector.extract_strided_slice %53 {offsets = [7, 0], sizes = [1, 128], strides = [1, 1]} : vector<16x128xf32> to vector<1x128xf32>
    %c1_52 = arith.constant 1 : index
    %c896_53 = arith.constant 896 : index
    %69 = vector.load %arg9[%c1_52, %c896_53] : memref<2x2048xf32, #tpu.memory_space<vmem>>, vector<1x128xf32>
    tpu.vector_store %arg9[%c1_52, %c896_53], %68 {strides = array<i32>} : memref<2x2048xf32, #tpu.memory_space<vmem>>, vector<1x128xf32>,
    %70 = vector.extract_strided_slice %53 {offsets = [8, 0], sizes = [1, 128], strides = [1, 1]} : vector<16x128xf32> to vector<1x128xf32>
    %c1_54 = arith.constant 1 : index
    %c1024_55 = arith.constant 1024 : index
    %71 = vector.load %arg9[%c1_54, %c1024_55] : memref<2x2048xf32, #tpu.memory_space<vmem>>, vector<1x128xf32>
    tpu.vector_store %arg9[%c1_54, %c1024_55], %70 {strides = array<i32>} : memref<2x2048xf32, #tpu.memory_space<vmem>>, vector<1x128xf32>,
    %72 = vector.extract_strided_slice %53 {offsets = [9, 0], sizes = [1, 128], strides = [1, 1]} : vector<16x128xf32> to vector<1x128xf32>
    %c1_56 = arith.constant 1 : index
    %c1152_57 = arith.constant 1152 : index
    %73 = vector.load %arg9[%c1_56, %c1152_57] : memref<2x2048xf32, #tpu.memory_space<vmem>>, vector<1x128xf32>
    tpu.vector_store %arg9[%c1_56, %c1152_57], %72 {strides = array<i32>} : memref<2x2048xf32, #tpu.memory_space<vmem>>, vector<1x128xf32>,
    %74 = vector.extract_strided_slice %53 {offsets = [10, 0], sizes = [1, 128], strides = [1, 1]} : vector<16x128xf32> to vector<1x128xf32>
    %c1_58 = arith.constant 1 : index
    %c1280_59 = arith.constant 1280 : index
    %75 = vector.load %arg9[%c1_58, %c1280_59] : memref<2x2048xf32, #tpu.memory_space<vmem>>, vector<1x128xf32>
    tpu.vector_store %arg9[%c1_58, %c1280_59], %74 {strides = array<i32>} : memref<2x2048xf32, #tpu.memory_space<vmem>>, vector<1x128xf32>,
    %76 = vector.extract_strided_slice %53 {offsets = [11, 0], sizes = [1, 128], strides = [1, 1]} : vector<16x128xf32> to vector<1x128xf32>
    %c1_60 = arith.constant 1 : index
    %c1408_61 = arith.constant 1408 : index
    %77 = vector.load %arg9[%c1_60, %c1408_61] : memref<2x2048xf32, #tpu.memory_space<vmem>>, vector<1x128xf32>
    tpu.vector_store %arg9[%c1_60, %c1408_61], %76 {strides = array<i32>} : memref<2x2048xf32, #tpu.memory_space<vmem>>, vector<1x128xf32>,
    %78 = vector.extract_strided_slice %53 {offsets = [12, 0], sizes = [1, 128], strides = [1, 1]} : vector<16x128xf32> to vector<1x128xf32>
    %c1_62 = arith.constant 1 : index
    %c1536_63 = arith.constant 1536 : index
    %79 = vector.load %arg9[%c1_62, %c1536_63] : memref<2x2048xf32, #tpu.memory_space<vmem>>, vector<1x128xf32>
    tpu.vector_store %arg9[%c1_62, %c1536_63], %78 {strides = array<i32>} : memref<2x2048xf32, #tpu.memory_space<vmem>>, vector<1x128xf32>,
    %80 = vector.extract_strided_slice %53 {offsets = [13, 0], sizes = [1, 128], strides = [1, 1]} : vector<16x128xf32> to vector<1x128xf32>
    %c1_64 = arith.constant 1 : index
    %c1664_65 = arith.constant 1664 : index
    %81 = vector.load %arg9[%c1_64, %c1664_65] : memref<2x2048xf32, #tpu.memory_space<vmem>>, vector<1x128xf32>
    tpu.vector_store %arg9[%c1_64, %c1664_65], %80 {strides = array<i32>} : memref<2x2048xf32, #tpu.memory_space<vmem>>, vector<1x128xf32>,
    %82 = vector.extract_strided_slice %53 {offsets = [14, 0], sizes = [1, 128], strides = [1, 1]} : vector<16x128xf32> to vector<1x128xf32>
    %c1_66 = arith.constant 1 : index
    %c1792_67 = arith.constant 1792 : index
    %83 = vector.load %arg9[%c1_66, %c1792_67] : memref<2x2048xf32, #tpu.memory_space<vmem>>, vector<1x128xf32>
    tpu.vector_store %arg9[%c1_66, %c1792_67], %82 {strides = array<i32>} : memref<2x2048xf32, #tpu.memory_space<vmem>>, vector<1x128xf32>,
    %84 = vector.extract_strided_slice %53 {offsets = [15, 0], sizes = [1, 128], strides = [1, 1]} : vector<16x128xf32> to vector<1x128xf32>
    %c1_68 = arith.constant 1 : index
    %c1920_69 = arith.constant 1920 : index
    %85 = vector.load %arg9[%c1_68, %c1920_69] : memref<2x2048xf32, #tpu.memory_space<vmem>>, vector<1x128xf32>
    tpu.vector_store %arg9[%c1_68, %c1920_69], %84 {strides = array<i32>} : memref<2x2048xf32, #tpu.memory_space<vmem>>, vector<1x128xf32>,
    %c0_70 = arith.constant 0 : index
    %c0_71 = arith.constant 0 : index
    %86 = vector.load %arg9[%c0_70, %c0_71] : memref<2x2048xf32, #tpu.memory_space<vmem>>, vector<2x2048xf32>
    %c0_72 = arith.constant 0 : index
    %c0_73 = arith.constant 0 : index
    %87 = vector.load %arg5[%c0_72, %c0_73] : memref<2048x512xf32, #tpu.memory_space<vmem>>, vector<2048x512xf32>
    %cst_74 = arith.constant dense<0.000000e+00> : vector<2x512xf32>
    %88 = tpu.matmul %86, %87, %cst_74 {dimension_numbers = #tpu.dot_dimension_numbers<[1], [0], [0], [1], [0, 0, 1, 1], [], []>} : vector<2x2048xf32>, vector<2048x512xf32>, vector<2x512xf32> -> vector<2x512xf32>
    %c0_75 = arith.constant 0 : index
    %c0_76 = arith.constant 0 : index
    %89 = vector.load %arg6[%c0_75, %c0_76] : memref<1x512xf32, #tpu.memory_space<vmem>>, vector<1x512xf32>
    %90 = vector.broadcast %89 : vector<1x512xf32> to vector<2x512xf32>
    %91 = arith.addf %88, %90 : vector<2x512xf32>
    %cst_77 = arith.constant 0.000000e+00 : f32
    %92 = vector.broadcast %cst_77 : f32 to vector<2x512xf32>
    %93 = arith.maximumf %91, %92 : vector<2x512xf32>
    %c0_78 = arith.constant 0 : index
    %c0_79 = arith.constant 0 : index
    %94 = vector.load %arg7[%c0_78, %c0_79] : memref<512x10xf32, #tpu.memory_space<vmem>>, vector<512x10xf32>
    %cst_80 = arith.constant dense<0.000000e+00> : vector<2x10xf32>
    %95 = tpu.matmul %93, %94, %cst_80 {dimension_numbers = #tpu.dot_dimension_numbers<[1], [0], [0], [1], [0, 0, 1, 1], [], []>} : vector<2x512xf32>, vector<512x10xf32>, vector<2x10xf32> -> vector<2x10xf32>
    %c0_81 = arith.constant 0 : index
    %c0_82 = arith.constant 0 : index
    %c0_83 = arith.constant 0 : index
    %96 = vector.load %arg8[%c0_81, %c0_82, %c0_83] : memref<1x2x10xf32, #tpu.memory_space<vmem>>, vector<1x2x10xf32>
    %97 = vector.shape_cast %96 : vector<1x2x10xf32> to vector<2x10xf32>
    %98 = vector.shape_cast %95 : vector<2x10xf32> to vector<1x2x10xf32>
    tpu.vector_store %arg8[%c0_81, %c0_82, %c0_83], %98 {strides = array<i32>} : memref<1x2x10xf32, #tpu.memory_space<vmem>>, vector<1x2x10xf32>,
    return
  }
  func.func @transform_0(%arg0: i32) -> (i32, i32, i32) {
    %c0_i32 = arith.constant 0 : i32
    %c0_i32_0 = arith.constant 0 : i32
    %c0_i32_1 = arith.constant 0 : i32
    %c0_i32_2 = arith.constant 0 : i32
    return %c0_i32, %c0_i32_0, %c0_i32_1 : i32, i32, i32
  }
  func.func @transform_1(%arg0: i32) -> (i32, i32) {
    %c0_i32 = arith.constant 0 : i32
    %c0_i32_0 = arith.constant 0 : i32
    %c0_i32_1 = arith.constant 0 : i32
    return %c0_i32, %c0_i32_0 : i32, i32
  }
  func.func @transform_2(%arg0: i32) -> (i32, i32) {
    %c0_i32 = arith.constant 0 : i32
    %c0_i32_0 = arith.constant 0 : i32
    %c0_i32_1 = arith.constant 0 : i32
    return %c0_i32, %c0_i32_0 : i32, i32
  }
  func.func @transform_3(%arg0: i32) -> (i32, i32) {
    %c0_i32 = arith.constant 0 : i32
    %c0_i32_0 = arith.constant 0 : i32
    %c0_i32_1 = arith.constant 0 : i32
    return %c0_i32, %c0_i32_0 : i32, i32
  }
  func.func @transform_4(%arg0: i32) -> (i32, i32) {
    %c0_i32 = arith.constant 0 : i32
    %c0_i32_0 = arith.constant 0 : i32
    return %c0_i32, %arg0 : i32, i32
  }
  func.func @transform_5(%arg0: i32) -> (i32, i32) {
    %c0_i32 = arith.constant 0 : i32
    %c0_i32_0 = arith.constant 0 : i32
    return %c0_i32, %arg0 : i32, i32
  }
  func.func @transform_6(%arg0: i32) -> (i32, i32) {
    %c0_i32 = arith.constant 0 : i32
    %c0_i32_0 = arith.constant 0 : i32
    return %arg0, %c0_i32 : i32, i32
  }
  func.func @transform_7(%arg0: i32) -> (i32, i32, i32) {
    %c0_i32 = arith.constant 0 : i32
    %c0_i32_0 = arith.constant 0 : i32
    %c0_i32_1 = arith.constant 0 : i32
    return %arg0, %c0_i32, %c0_i32_0 : i32, i32, i32
  }
}

</mosaic_0001>

<bundles_post_ra>
// kernel: inception_aux_forward.1
= control target key start
LH: loop header
LB: loop body
LE: loop exit
PB: predicated region body
PF: predicated region fallthrough
CT: control target
= control target key end

     0   :  { %s5804_s24 = smov 0   ;;  %s5806_s25 = smov 0   ;;  %s9442_s0 = inlined_call_operand.vmem [shape: f32[2,196,32], index: 0, kind: input, shape index: {}]   ;;  %s9443_s1 = inlined_call_operand.vmem [shape: f32[16,196], index: 1, kind: input, shape index: {}]   ;;  %s9444_s2 = inlined_call_operand.vmem [shape: f32[32,128], index: 2, kind: input, shape index: {}]   ;;  %s9445_s3 = inlined_call_operand.vmem [shape: f32[1,128], index: 3, kind: input, shape index: {}]   ;;  %s9446_s4 = inlined_call_operand.vmem [shape: f32[2048,1024], index: 4, kind: input, shape index: {}]   ;;  %s9447_s5 = inlined_call_operand.vmem [shape: f32[1,1024], index: 5, kind: input, shape index: {}]   ;;  %s9448_s6 = inlined_call_operand.vmem [shape: f32[1024,10], index: 6, kind: input, shape index: {}]   ;;  %s9449_s7 = inlined_call_operand.vmem [shape: f32[2,2,10], index: 7, kind: output, shape index: {}]  }
   0x1   :  { %s5808_s26 = smov 0  }
   0x2 LB: > { %s5820_s27 = sadd.s32 4294967295, %s5760_s26   ;;  %s5823_s28 = sadd.s32 1, %s5760_s26   ;;  %s5760_s26 = sphi %s5808_s26, %s9454_s26   ;;  %s5756_s25 = sphi %s5806_s25, %s9453_s25   ;;  %s5752_s24 = sphi %s5804_s24, %s9452_s24  }
   0x3   : > { %s105_s29 = ssub.s32 %s5760_s26, %s5823_s28  ;;  %s108_s30 = sadd.s32 1, %s5756_s25 }
   0x4   : > { %p106_p0 = scmp.eq.s32.totalorder %s105_s29, 0  ;;  %p115_p1 = scmp.ne.s32.totalorder %s5756_s25, %s5752_s24 }
   0x5   : > { %p116_p2 = scmp.eq.s32.totalorder %s5760_s26, 0  ;;  %p5534_p4 = scmp.ge.s32.totalorder %s5760_s26, 2 }
   0x6   : > { %s5832_s8 = scalar_select %p106_p0, %s5756_s25, %s108_s30  }
   0x7   : > { %p117_p3 = por %p116_p2, %p115_p1  ;;  %231 = sbr.rel (%p5534_p4) target bundleno = 528 (0x210), region = 32 }
   0xc   : > { %234 = sbr.rel (!%p117_p3) target bundleno = 528 (0x210), region = 36  ;;  %s236_s9 = sand.u32 (%p117_p3), 1, %s5756_s25  }
   0xd   : > { %s5603_s10 = sshll.u32 (%p117_p3), %s5760_s26, 5  ;;  %s5535_s11 = sshll.u32 (%p117_p3), %s236_s9, 13 }
   0xe   : > { %s5840_s14 = scalar_lea.vmem (%p117_p3), %s9446_s4, %s5603_s10  ;;  %s5845_s15 = scalar_lea.vmem (%p117_p3), [#allocation3], %s5535_s11 }
   0xf   : > { %v254_v0 = vld [vmem:[%s5840_s14] sm:$0xff] (%p117_p3)  ;;  %v256_v1 = vld [vmem:[%s5840_s14 + $0x8] sm:$0xff] (%p117_p3)  ;;  %v258_v2 = vld [vmem:[%s5840_s14 + $0x10] sm:$0xff] (%p117_p3) }
  0x10   : > { %255 = vst [vmem:[%s5845_s15] sm:$0xff] (%p117_p3), %v254_v0  ;;  %257 = vst [vmem:[%s5845_s15 + $0x8] sm:$0xff] (%p117_p3), %v256_v1  ;;  %v260_v3 = vld [vmem:[%s5840_s14 + $0x18] sm:$0xff] (%p117_p3)  ;;  %v262_v4 = vld [vmem:[%s5840_s14 + $0x40] sm:$0xff] (%p117_p3) }
  0x11   : > { %259 = vst [vmem:[%s5845_s15 + $0x10] sm:$0xff] %v258_v2  ;;  %v264_v5 = vld [vmem:[%s5840_s14 + $0x48] sm:$0xff]  ;;  %261 = vst [vmem:[%s5845_s15 + $0x18] sm:$0xff] %v260_v3  ;;  %v266_v6 = vld [vmem:[%s5840_s14 + $0x50] sm:$0xff] }
  0x12   : > { %263 = vst [vmem:[%s5845_s15 + $0x20] sm:$0xff] %v262_v4  ;;  %265 = vst [vmem:[%s5845_s15 + $0x28] sm:$0xff] %v264_v5  ;;  %v268_v7 = vld [vmem:[%s5840_s14 + $0x58] sm:$0xff]  ;;  %v270_v8 = vld [vmem:[%s5840_s14 + $0x80] sm:$0xff] }
  0x13   : > { %267 = vst [vmem:[%s5845_s15 + $0x30] sm:$0xff] %v266_v6  ;;  %269 = vst [vmem:[%s5845_s15 + $0x38] sm:$0xff] %v268_v7  ;;  %v272_v9 = vld [vmem:[%s5840_s14 + $0x88] sm:$0xff]  ;;  %v274_v10 = vld [vmem:[%s5840_s14 + $0x90] sm:$0xff] }
  0x14   : > { %271 = vst [vmem:[%s5845_s15 + $0x40] sm:$0xff] %v270_v8  ;;  %v276_v11 = vld [vmem:[%s5840_s14 + $0x98] sm:$0xff]  ;;  %273 = vst [vmem:[%s5845_s15 + $0x48] sm:$0xff] %v272_v9  ;;  %v278_v12 = vld [vmem:[%s5840_s14 + $0xc0] sm:$0xff] }
  0x15   : > { %275 = vst [vmem:[%s5845_s15 + $0x50] sm:$0xff] %v274_v10  ;;  %277 = vst [vmem:[%s5845_s15 + $0x58] sm:$0xff] %v276_v11  ;;  %v280_v13 = vld [vmem:[%s5840_s14 + $0xc8] sm:$0xff]  ;;  %v282_v14 = vld [vmem:[%s5840_s14 + $0xd0] sm:$0xff] }
  0x16   : > { %279 = vst [vmem:[%s5845_s15 + $0x60] sm:$0xff] %v278_v12  ;;  %281 = vst [vmem:[%s5845_s15 + $0x68] sm:$0xff] %v280_v13  ;;  %v284_v15 = vld [vmem:[%s5840_s14 + $0xd8] sm:$0xff]  ;;  %v286_v16 = vld [vmem:[%s5840_s14 + $0x100] sm:$0xff] }
  0x17   : > { %283 = vst [vmem:[%s5845_s15 + $0x70] sm:$0xff] %v282_v14  ;;  %v288_v17 = vld [vmem:[%s5840_s14 + $0x108] sm:$0xff]  ;;  %285 = vst [vmem:[%s5845_s15 + $0x78] sm:$0xff] %v284_v15  ;;  %v290_v18 = vld [vmem:[%s5840_s14 + $0x110] sm:$0xff] }
  0x18   : > { %287 = vst [vmem:[%s5845_s15 + $0x80] sm:$0xff] %v286_v16  ;;  %289 = vst [vmem:[%s5845_s15 + $0x88] sm:$0xff] %v288_v17  ;;  %v292_v19 = vld [vmem:[%s5840_s14 + $0x118] sm:$0xff]  ;;  %v294_v20 = vld [vmem:[%s5840_s14 + $0x140] sm:$0xff] }
  0x19   : > { %291 = vst [vmem:[%s5845_s15 + $0x90] sm:$0xff] %v290_v18  ;;  %293 = vst [vmem:[%s5845_s15 + $0x98] sm:$0xff] %v292_v19  ;;  %v296_v21 = vld [vmem:[%s5840_s14 + $0x148] sm:$0xff]  ;;  %v298_v22 = vld [vmem:[%s5840_s14 + $0x150] sm:$0xff] }
  0x1a   : > { %295 = vst [vmem:[%s5845_s15 + $0xa0] sm:$0xff] %v294_v20  ;;  %v300_v23 = vld [vmem:[%s5840_s14 + $0x158] sm:$0xff]  ;;  %297 = vst [vmem:[%s5845_s15 + $0xa8] sm:$0xff] %v296_v21  ;;  %v302_v24 = vld [vmem:[%s5840_s14 + $0x180] sm:$0xff] }
  0x1b   : > { %299 = vst [vmem:[%s5845_s15 + $0xb0] sm:$0xff] %v298_v22  ;;  %301 = vst [vmem:[%s5845_s15 + $0xb8] sm:$0xff] %v300_v23  ;;  %v304_v25 = vld [vmem:[%s5840_s14 + $0x188] sm:$0xff]  ;;  %v306_v26 = vld [vmem:[%s5840_s14 + $0x190] sm:$0xff] }
  0x1c   : > { %303 = vst [vmem:[%s5845_s15 + $0xc0] sm:$0xff] %v302_v24  ;;  %305 = vst [vmem:[%s5845_s15 + $0xc8] sm:$0xff] %v304_v25  ;;  %v308_v27 = vld [vmem:[%s5840_s14 + $0x198] sm:$0xff]  ;;  %v310_v28 = vld [vmem:[%s5840_s14 + $0x1c0] sm:$0xff] }
  0x1d   : > { %307 = vst [vmem:[%s5845_s15 + $0xd0] sm:$0xff] %v306_v26  ;;  %v312_v29 = vld [vmem:[%s5840_s14 + $0x1c8] sm:$0xff]  ;;  %309 = vst [vmem:[%s5845_s15 + $0xd8] sm:$0xff] %v308_v27  ;;  %v314_v30 = vld [vmem:[%s5840_s14 + $0x1d0] sm:$0xff] }
  0x1e   : > { %311 = vst [vmem:[%s5845_s15 + $0xe0] sm:$0xff] %v310_v28  ;;  %313 = vst [vmem:[%s5845_s15 + $0xe8] sm:$0xff] %v312_v29  ;;  %v316_v31 = vld [vmem:[%s5840_s14 + $0x1d8] sm:$0xff]  ;;  %v318_v32 = vld [vmem:[%s5840_s14 + $0x200] sm:$0xff] }
  0x1f   : > { %315 = vst [vmem:[%s5845_s15 + $0xf0] sm:$0xff] %v314_v30  ;;  %317 = vst [vmem:[%s5845_s15 + $0xf8] sm:$0xff] %v316_v31  ;;  %v320_v33 = vld [vmem:[%s5840_s14 + $0x208] sm:$0xff]  ;;  %v322_v34 = vld [vmem:[%s5840_s14 + $0x210] sm:$0xff] }
  0x20   : > { %319 = vst [vmem:[%s5845_s15 + $0x100] sm:$0xff] %v318_v32  ;;  %v324_v35 = vld [vmem:[%s5840_s14 + $0x218] sm:$0xff]  ;;  %321 = vst [vmem:[%s5845_s15 + $0x108] sm:$0xff] %v320_v33  ;;  %v326_v36 = vld [vmem:[%s5840_s14 + $0x240] sm:$0xff] }
  0x21   : > { %323 = vst [vmem:[%s5845_s15 + $0x110] sm:$0xff] %v322_v34  ;;  %325 = vst [vmem:[%s5845_s15 + $0x118] sm:$0xff] %v324_v35  ;;  %v328_v37 = vld [vmem:[%s5840_s14 + $0x248] sm:$0xff]  ;;  %v330_v38 = vld [vmem:[%s5840_s14 + $0x250] sm:$0xff] }
  0x22   : > { %327 = vst [vmem:[%s5845_s15 + $0x120] sm:$0xff] %v326_v36  ;;  %329 = vst [vmem:[%s5845_s15 + $0x128] sm:$0xff] %v328_v37  ;;  %v332_v39 = vld [vmem:[%s5840_s14 + $0x258] sm:$0xff]  ;;  %v334_v40 = vld [vmem:[%s5840_s14 + $0x280] sm:$0xff] }
  0x23   : > { %331 = vst [vmem:[%s5845_s15 + $0x130] sm:$0xff] %v330_v38  ;;  %v336_v41 = vld [vmem:[%s5840_s14 + $0x288] sm:$0xff]  ;;  %333 = vst [vmem:[%s5845_s15 + $0x138] sm:$0xff] %v332_v39  ;;  %v338_v42 = vld [vmem:[%s5840_s14 + $0x290] sm:$0xff] }
  0x24   : > { %335 = vst [vmem:[%s5845_s15 + $0x140] sm:$0xff] %v334_v40  ;;  %337 = vst [vmem:[%s5845_s15 + $0x148] sm:$0xff] %v336_v41  ;;  %v340_v43 = vld [vmem:[%s5840_s14 + $0x298] sm:$0xff]  ;;  %v342_v44 = vld [vmem:[%s5840_s14 + $0x2c0] sm:$0xff] }
  0x25   : > { %339 = vst [vmem:[%s5845_s15 + $0x150] sm:$0xff] %v338_v42  ;;  %341 = vst [vmem:[%s5845_s15 + $0x158] sm:$0xff] %v340_v43  ;;  %v344_v45 = vld [vmem:[%s5840_s14 + $0x2c8] sm:$0xff]  ;;  %v346_v46 = vld [vmem:[%s5840_s14 + $0x2d0] sm:$0xff] }
  0x26   : > { %343 = vst [vmem:[%s5845_s15 + $0x160] sm:$0xff] %v342_v44  ;;  %v348_v47 = vld [vmem:[%s5840_s14 + $0x2d8] sm:$0xff]  ;;  %345 = vst [vmem:[%s5845_s15 + $0x168] sm:$0xff] %v344_v45  ;;  %v350_v48 = vld [vmem:[%s5840_s14 + $0x300] sm:$0xff] }
  0x27   : > { %347 = vst [vmem:[%s5845_s15 + $0x170] sm:$0xff] %v346_v46  ;;  %349 = vst [vmem:[%s5845_s15 + $0x178] sm:$0xff] %v348_v47  ;;  %v352_v49 = vld [vmem:[%s5840_s14 + $0x308] sm:$0xff]  ;;  %v354_v50 = vld [vmem:[%s5840_s14 + $0x310] sm:$0xff] }
  0x28   : > { %351 = vst [vmem:[%s5845_s15 + $0x180] sm:$0xff] %v350_v48  ;;  %353 = vst [vmem:[%s5845_s15 + $0x188] sm:$0xff] %v352_v49  ;;  %v356_v51 = vld [vmem:[%s5840_s14 + $0x318] sm:$0xff]  ;;  %v358_v52 = vld [vmem:[%s5840_s14 + $0x340] sm:$0xff] }
  0x29   : > { %355 = vst [vmem:[%s5845_s15 + $0x190] sm:$0xff] %v354_v50  ;;  %v360_v53 = vld [vmem:[%s5840_s14 + $0x348] sm:$0xff]  ;;  %357 = vst [vmem:[%s5845_s15 + $0x198] sm:$0xff] %v356_v51  ;;  %v362_v54 = vld [vmem:[%s5840_s14 + $0x350] sm:$0xff] }
  0x2a   : > { %359 = vst [vmem:[%s5845_s15 + $0x1a0] sm:$0xff] %v358_v52  ;;  %361 = vst [vmem:[%s5845_s15 + $0x1a8] sm:$0xff] %v360_v53  ;;  %v364_v55 = vld [vmem:[%s5840_s14 + $0x358] sm:$0xff]  ;;  %v366_v56 = vld [vmem:[%s5840_s14 + $0x380] sm:$0xff] }
  0x2b   : > { %363 = vst [vmem:[%s5845_s15 + $0x1b0] sm:$0xff] %v362_v54  ;;  %365 = vst [vmem:[%s5845_s15 + $0x1b8] sm:$0xff] %v364_v55  ;;  %v368_v57 = vld [vmem:[%s5840_s14 + $0x388] sm:$0xff]  ;;  %v370_v58 = vld [vmem:[%s5840_s14 + $0x390] sm:$0xff] }
  0x2c   : > { %367 = vst [vmem:[%s5845_s15 + $0x1c0] sm:$0xff] %v366_v56  ;;  %v372_v59 = vld [vmem:[%s5840_s14 + $0x398] sm:$0xff]  ;;  %369 = vst [vmem:[%s5845_s15 + $0x1c8] sm:$0xff] %v368_v57  ;;  %v374_v60 = vld [vmem:[%s5840_s14 + $0x3c0] sm:$0xff] }
  0x2d   : > { %371 = vst [vmem:[%s5845_s15 + $0x1d0] sm:$0xff] %v370_v58  ;;  %373 = vst [vmem:[%s5845_s15 + $0x1d8] sm:$0xff] %v372_v59  ;;  %v376_v61 = vld [vmem:[%s5840_s14 + $0x3c8] sm:$0xff]  ;;  %v378_v62 = vld [vmem:[%s5840_s14 + $0x3d0] sm:$0xff] }
  0x2e   : > { %375 = vst [vmem:[%s5845_s15 + $0x1e0] sm:$0xff] %v374_v60  ;;  %377 = vst [vmem:[%s5845_s15 + $0x1e8] sm:$0xff] %v376_v61  ;;  %v380_v63 = vld [vmem:[%s5840_s14 + $0x3d8] sm:$0xff]  ;;  %v382_v0 = vld [vmem:[%s5840_s14 + $0x400] sm:$0xff] }
  0x2f   : > { %379 = vst [vmem:[%s5845_s15 + $0x1f0] sm:$0xff] %v378_v62  ;;  %v384_v1 = vld [vmem:[%s5840_s14 + $0x408] sm:$0xff]  ;;  %381 = vst [vmem:[%s5845_s15 + $0x1f8] sm:$0xff] %v380_v63  ;;  %v386_v2 = vld [vmem:[%s5840_s14 + $0x410] sm:$0xff] }
  0x30   : > { %383 = vst [vmem:[%s5845_s15 + $0x200] sm:$0xff] %v382_v0  ;;  %385 = vst [vmem:[%s5845_s15 + $0x208] sm:$0xff] %v384_v1  ;;  %v388_v3 = vld [vmem:[%s5840_s14 + $0x418] sm:$0xff]  ;;  %v390_v4 = vld [vmem:[%s5840_s14 + $0x440] sm:$0xff] }
  0x31   : > { %387 = vst [vmem:[%s5845_s15 + $0x210] sm:$0xff] %v386_v2  ;;  %389 = vst [vmem:[%s5845_s15 + $0x218] sm:$0xff] %v388_v3  ;;  %v392_v5 = vld [vmem:[%s5840_s14 + $0x448] sm:$0xff]  ;;  %v394_v6 = vld [vmem:[%s5840_s14 + $0x450] sm:$0xff] }
  0x32   : > { %391 = vst [vmem:[%s5845_s15 + $0x220] sm:$0xff] %v390_v4  ;;  %v396_v7 = vld [vmem:[%s5840_s14 + $0x458] sm:$0xff]  ;;  %393 = vst [vmem:[%s5845_s15 + $0x228] sm:$0xff] %v392_v5  ;;  %v398_v8 = vld [vmem:[%s5840_s14 + $0x480] sm:$0xff] }
  0x33   : > { %395 = vst [vmem:[%s5845_s15 + $0x230] sm:$0xff] %v394_v6  ;;  %397 = vst [vmem:[%s5845_s15 + $0x238] sm:$0xff] %v396_v7  ;;  %v400_v9 = vld [vmem:[%s5840_s14 + $0x488] sm:$0xff]  ;;  %v402_v10 = vld [vmem:[%s5840_s14 + $0x490] sm:$0xff] }
  0x34   : > { %399 = vst [vmem:[%s5845_s15 + $0x240] sm:$0xff] %v398_v8  ;;  %401 = vst [vmem:[%s5845_s15 + $0x248] sm:$0xff] %v400_v9  ;;  %v404_v11 = vld [vmem:[%s5840_s14 + $0x498] sm:$0xff]  ;;  %v406_v12 = vld [vmem:[%s5840_s14 + $0x4c0] sm:$0xff] }
  0x35   : > { %403 = vst [vmem:[%s5845_s15 + $0x250] sm:$0xff] %v402_v10  ;;  %v408_v13 = vld [vmem:[%s5840_s14 + $0x4c8] sm:$0xff]  ;;  %405 = vst [vmem:[%s5845_s15 + $0x258] sm:$0xff] %v404_v11  ;;  %v410_v14 = vld [vmem:[%s5840_s14 + $0x4d0] sm:$0xff] }
  0x36   : > { %407 = vst [vmem:[%s5845_s15 + $0x260] sm:$0xff] %v406_v12  ;;  %409 = vst [vmem:[%s5845_s15 + $0x268] sm:$0xff] %v408_v13  ;;  %v412_v15 = vld [vmem:[%s5840_s14 + $0x4d8] sm:$0xff]  ;;  %v414_v16 = vld [vmem:[%s5840_s14 + $0x500] sm:$0xff] }
  0x37   : > { %411 = vst [vmem:[%s5845_s15 + $0x270] sm:$0xff] %v410_v14  ;;  %413 = vst [vmem:[%s5845_s15 + $0x278] sm:$0xff] %v412_v15  ;;  %v416_v17 = vld [vmem:[%s5840_s14 + $0x508] sm:$0xff]  ;;  %v418_v18 = vld [vmem:[%s5840_s14 + $0x510] sm:$0xff] }
  0x38   : > { %415 = vst [vmem:[%s5845_s15 + $0x280] sm:$0xff] %v414_v16  ;;  %v420_v19 = vld [vmem:[%s5840_s14 + $0x518] sm:$0xff]  ;;  %417 = vst [vmem:[%s5845_s15 + $0x288] sm:$0xff] %v416_v17  ;;  %v422_v20 = vld [vmem:[%s5840_s14 + $0x540] sm:$0xff] }
  0x39   : > { %419 = vst [vmem:[%s5845_s15 + $0x290] sm:$0xff] %v418_v18  ;;  %421 = vst [vmem:[%s5845_s15 + $0x298] sm:$0xff] %v420_v19  ;;  %v424_v21 = vld [vmem:[%s5840_s14 + $0x548] sm:$0xff]  ;;  %v426_v22 = vld [vmem:[%s5840_s14 + $0x550] sm:$0xff] }
  0x3a   : > { %423 = vst [vmem:[%s5845_s15 + $0x2a0] sm:$0xff] %v422_v20  ;;  %425 = vst [vmem:[%s5845_s15 + $0x2a8] sm:$0xff] %v424_v21  ;;  %v428_v23 = vld [vmem:[%s5840_s14 + $0x558] sm:$0xff]  ;;  %v430_v24 = vld [vmem:[%s5840_s14 + $0x580] sm:$0xff] }
  0x3b   : > { %427 = vst [vmem:[%s5845_s15 + $0x2b0] sm:$0xff] %v426_v22  ;;  %v432_v25 = vld [vmem:[%s5840_s14 + $0x588] sm:$0xff]  ;;  %429 = vst [vmem:[%s5845_s15 + $0x2b8] sm:$0xff] %v428_v23  ;;  %v434_v26 = vld [vmem:[%s5840_s14 + $0x590] sm:$0xff] }
  0x3c   : > { %431 = vst [vmem:[%s5845_s15 + $0x2c0] sm:$0xff] %v430_v24  ;;  %433 = vst [vmem:[%s5845_s15 + $0x2c8] sm:$0xff] %v432_v25  ;;  %v436_v27 = vld [vmem:[%s5840_s14 + $0x598] sm:$0xff]  ;;  %v438_v28 = vld [vmem:[%s5840_s14 + $0x5c0] sm:$0xff] }
  0x3d   : > { %435 = vst [vmem:[%s5845_s15 + $0x2d0] sm:$0xff] %v434_v26  ;;  %437 = vst [vmem:[%s5845_s15 + $0x2d8] sm:$0xff] %v436_v27  ;;  %v440_v29 = vld [vmem:[%s5840_s14 + $0x5c8] sm:$0xff]  ;;  %v442_v30 = vld [vmem:[%s5840_s14 + $0x5d0] sm:$0xff] }
  0x3e   : > { %439 = vst [vmem:[%s5845_s15 + $0x2e0] sm:$0xff] %v438_v28  ;;  %v444_v31 = vld [vmem:[%s5840_s14 + $0x5d8] sm:$0xff]  ;;  %441 = vst [vmem:[%s5845_s15 + $0x2e8] sm:$0xff] %v440_v29  ;;  %v446_v32 = vld [vmem:[%s5840_s14 + $0x600] sm:$0xff] }
  0x3f   : > { %443 = vst [vmem:[%s5845_s15 + $0x2f0] sm:$0xff] %v442_v30  ;;  %445 = vst [vmem:[%s5845_s15 + $0x2f8] sm:$0xff] %v444_v31  ;;  %v448_v33 = vld [vmem:[%s5840_s14 + $0x608] sm:$0xff]  ;;  %v450_v34 = vld [vmem:[%s5840_s14 + $0x610] sm:$0xff] }
  0x40   : > { %447 = vst [vmem:[%s5845_s15 + $0x300] sm:$0xff] %v446_v32  ;;  %449 = vst [vmem:[%s5845_s15 + $0x308] sm:$0xff] %v448_v33  ;;  %v452_v35 = vld [vmem:[%s5840_s14 + $0x618] sm:$0xff]  ;;  %v454_v36 = vld [vmem:[%s5840_s14 + $0x640] sm:$0xff] }
  0x41   : > { %451 = vst [vmem:[%s5845_s15 + $0x310] sm:$0xff] %v450_v34  ;;  %v456_v37 = vld [vmem:[%s5840_s14 + $0x648] sm:$0xff]  ;;  %453 = vst [vmem:[%s5845_s15 + $0x318] sm:$0xff] %v452_v35  ;;  %v458_v38 = vld [vmem:[%s5840_s14 + $0x650] sm:$0xff] }
  0x42   : > { %455 = vst [vmem:[%s5845_s15 + $0x320] sm:$0xff] %v454_v36  ;;  %457 = vst [vmem:[%s5845_s15 + $0x328] sm:$0xff] %v456_v37  ;;  %v460_v39 = vld [vmem:[%s5840_s14 + $0x658] sm:$0xff]  ;;  %v462_v40 = vld [vmem:[%s5840_s14 + $0x680] sm:$0xff] }
  0x43   : > { %459 = vst [vmem:[%s5845_s15 + $0x330] sm:$0xff] %v458_v38  ;;  %461 = vst [vmem:[%s5845_s15 + $0x338] sm:$0xff] %v460_v39  ;;  %v464_v41 = vld [vmem:[%s5840_s14 + $0x688] sm:$0xff]  ;;  %v466_v42 = vld [vmem:[%s5840_s14 + $0x690] sm:$0xff] }
  0x44   : > { %463 = vst [vmem:[%s5845_s15 + $0x340] sm:$0xff] %v462_v40  ;;  %v468_v43 = vld [vmem:[%s5840_s14 + $0x698] sm:$0xff]  ;;  %465 = vst [vmem:[%s5845_s15 + $0x348] sm:$0xff] %v464_v41  ;;  %v470_v44 = vld [vmem:[%s5840_s14 + $0x6c0] sm:$0xff] }
  0x45   : > { %467 = vst [vmem:[%s5845_s15 + $0x350] sm:$0xff] %v466_v42  ;;  %469 = vst [vmem:[%s5845_s15 + $0x358] sm:$0xff] %v468_v43  ;;  %v472_v45 = vld [vmem:[%s5840_s14 + $0x6c8] sm:$0xff]  ;;  %v474_v46 = vld [vmem:[%s5840_s14 + $0x6d0] sm:$0xff] }
  0x46   : > { %471 = vst [vmem:[%s5845_s15 + $0x360] sm:$0xff] %v470_v44  ;;  %473 = vst [vmem:[%s5845_s15 + $0x368] sm:$0xff] %v472_v45  ;;  %v476_v47 = vld [vmem:[%s5840_s14 + $0x6d8] sm:$0xff]  ;;  %v478_v48 = vld [vmem:[%s5840_s14 + $0x700] sm:$0xff] }
  0x47   : > { %475 = vst [vmem:[%s5845_s15 + $0x370] sm:$0xff] %v474_v46  ;;  %v480_v49 = vld [vmem:[%s5840_s14 + $0x708] sm:$0xff]  ;;  %477 = vst [vmem:[%s5845_s15 + $0x378] sm:$0xff] %v476_v47  ;;  %v482_v50 = vld [vmem:[%s5840_s14 + $0x710] sm:$0xff] }
  0x48   : > { %479 = vst [vmem:[%s5845_s15 + $0x380] sm:$0xff] %v478_v48  ;;  %481 = vst [vmem:[%s5845_s15 + $0x388] sm:$0xff] %v480_v49  ;;  %v484_v51 = vld [vmem:[%s5840_s14 + $0x718] sm:$0xff]  ;;  %v486_v52 = vld [vmem:[%s5840_s14 + $0x740] sm:$0xff] }
  0x49   : > { %483 = vst [vmem:[%s5845_s15 + $0x390] sm:$0xff] %v482_v50  ;;  %485 = vst [vmem:[%s5845_s15 + $0x398] sm:$0xff] %v484_v51  ;;  %v488_v53 = vld [vmem:[%s5840_s14 + $0x748] sm:$0xff]  ;;  %v490_v54 = vld [vmem:[%s5840_s14 + $0x750] sm:$0xff] }
  0x4a   : > { %487 = vst [vmem:[%s5845_s15 + $0x3a0] sm:$0xff] %v486_v52  ;;  %v492_v55 = vld [vmem:[%s5840_s14 + $0x758] sm:$0xff]  ;;  %489 = vst [vmem:[%s5845_s15 + $0x3a8] sm:$0xff] %v488_v53  ;;  %v494_v56 = vld [vmem:[%s5840_s14 + $0x780] sm:$0xff] }
  0x4b   : > { %491 = vst [vmem:[%s5845_s15 + $0x3b0] sm:$0xff] %v490_v54  ;;  %493 = vst [vmem:[%s5845_s15 + $0x3b8] sm:$0xff] %v492_v55  ;;  %v496_v57 = vld [vmem:[%s5840_s14 + $0x788] sm:$0xff]  ;;  %v498_v58 = vld [vmem:[%s5840_s14 + $0x790] sm:$0xff] }
  0x4c   : > { %495 = vst [vmem:[%s5845_s15 + $0x3c0] sm:$0xff] %v494_v56  ;;  %497 = vst [vmem:[%s5845_s15 + $0x3c8] sm:$0xff] %v496_v57  ;;  %v500_v59 = vld [vmem:[%s5840_s14 + $0x798] sm:$0xff]  ;;  %v502_v60 = vld [vmem:[%s5840_s14 + $0x7c0] sm:$0xff] }
  0x4d   : > { %499 = vst [vmem:[%s5845_s15 + $0x3d0] sm:$0xff] %v498_v58  ;;  %v504_v61 = vld [vmem:[%s5840_s14 + $0x7c8] sm:$0xff]  ;;  %501 = vst [vmem:[%s5845_s15 + $0x3d8] sm:$0xff] %v500_v59  ;;  %v506_v62 = vld [vmem:[%s5840_s14 + $0x7d0] sm:$0xff] }
  0x4e   : > { %503 = vst [vmem:[%s5845_s15 + $0x3e0] sm:$0xff] %v502_v60  ;;  %505 = vst [vmem:[%s5845_s15 + $0x3e8] sm:$0xff] %v504_v61  ;;  %v508_v63 = vld [vmem:[%s5840_s14 + $0x7d8] sm:$0xff]  ;;  %v510_v0 = vld [vmem:[%s5840_s14 + $0x800] sm:$0xff] }
  0x4f   : > { %507 = vst [vmem:[%s5845_s15 + $0x3f0] sm:$0xff] %v506_v62  ;;  %509 = vst [vmem:[%s5845_s15 + $0x3f8] sm:$0xff] %v508_v63  ;;  %v512_v1 = vld [vmem:[%s5840_s14 + $0x808] sm:$0xff]  ;;  %v514_v2 = vld [vmem:[%s5840_s14 + $0x810] sm:$0xff] }
  0x50   : > { %511 = vst [vmem:[%s5845_s15 + $0x400] sm:$0xff] %v510_v0  ;;  %v516_v3 = vld [vmem:[%s5840_s14 + $0x818] sm:$0xff]  ;;  %513 = vst [vmem:[%s5845_s15 + $0x408] sm:$0xff] %v512_v1  ;;  %v518_v4 = vld [vmem:[%s5840_s14 + $0x840] sm:$0xff] }
  0x51   : > { %515 = vst [vmem:[%s5845_s15 + $0x410] sm:$0xff] %v514_v2  ;;  %517 = vst [vmem:[%s5845_s15 + $0x418] sm:$0xff] %v516_v3  ;;  %v520_v5 = vld [vmem:[%s5840_s14 + $0x848] sm:$0xff]  ;;  %v522_v6 = vld [vmem:[%s5840_s14 + $0x850] sm:$0xff] }
  0x52   : > { %519 = vst [vmem:[%s5845_s15 + $0x420] sm:$0xff] %v518_v4  ;;  %521 = vst [vmem:[%s5845_s15 + $0x428] sm:$0xff] %v520_v5  ;;  %v524_v7 = vld [vmem:[%s5840_s14 + $0x858] sm:$0xff]  ;;  %v526_v8 = vld [vmem:[%s5840_s14 + $0x880] sm:$0xff] }
  0x53   : > { %523 = vst [vmem:[%s5845_s15 + $0x430] sm:$0xff] %v522_v6  ;;  %v528_v9 = vld [vmem:[%s5840_s14 + $0x888] sm:$0xff]  ;;  %525 = vst [vmem:[%s5845_s15 + $0x438] sm:$0xff] %v524_v7  ;;  %v530_v10 = vld [vmem:[%s5840_s14 + $0x890] sm:$0xff] }
  0x54   : > { %527 = vst [vmem:[%s5845_s15 + $0x440] sm:$0xff] %v526_v8  ;;  %529 = vst [vmem:[%s5845_s15 + $0x448] sm:$0xff] %v528_v9  ;;  %v532_v11 = vld [vmem:[%s5840_s14 + $0x898] sm:$0xff]  ;;  %v534_v12 = vld [vmem:[%s5840_s14 + $0x8c0] sm:$0xff] }
  0x55   : > { %531 = vst [vmem:[%s5845_s15 + $0x450] sm:$0xff] %v530_v10  ;;  %533 = vst [vmem:[%s5845_s15 + $0x458] sm:$0xff] %v532_v11  ;;  %v536_v13 = vld [vmem:[%s5840_s14 + $0x8c8] sm:$0xff]  ;;  %v538_v14 = vld [vmem:[%s5840_s14 + $0x8d0] sm:$0xff] }
  0x56   : > { %535 = vst [vmem:[%s5845_s15 + $0x460] sm:$0xff] %v534_v12  ;;  %v540_v15 = vld [vmem:[%s5840_s14 + $0x8d8] sm:$0xff]  ;;  %537 = vst [vmem:[%s5845_s15 + $0x468] sm:$0xff] %v536_v13  ;;  %v542_v16 = vld [vmem:[%s5840_s14 + $0x900] sm:$0xff] }
  0x57   : > { %539 = vst [vmem:[%s5845_s15 + $0x470] sm:$0xff] %v538_v14  ;;  %541 = vst [vmem:[%s5845_s15 + $0x478] sm:$0xff] %v540_v15  ;;  %v544_v17 = vld [vmem:[%s5840_s14 + $0x908] sm:$0xff]  ;;  %v546_v18 = vld [vmem:[%s5840_s14 + $0x910] sm:$0xff] }
  0x58   : > { %543 = vst [vmem:[%s5845_s15 + $0x480] sm:$0xff] %v542_v16  ;;  %545 = vst [vmem:[%s5845_s15 + $0x488] sm:$0xff] %v544_v17  ;;  %v548_v19 = vld [vmem:[%s5840_s14 + $0x918] sm:$0xff]  ;;  %v550_v20 = vld [vmem:[%s5840_s14 + $0x940] sm:$0xff] }
  0x59   : > { %547 = vst [vmem:[%s5845_s15 + $0x490] sm:$0xff] %v546_v18  ;;  %v552_v21 = vld [vmem:[%s5840_s14 + $0x948] sm:$0xff]  ;;  %549 = vst [vmem:[%s5845_s15 + $0x498] sm:$0xff] %v548_v19  ;;  %v554_v22 = vld [vmem:[%s5840_s14 + $0x950] sm:$0xff] }
  0x5a   : > { %551 = vst [vmem:[%s5845_s15 + $0x4a0] sm:$0xff] %v550_v20  ;;  %553 = vst [vmem:[%s5845_s15 + $0x4a8] sm:$0xff] %v552_v21  ;;  %v556_v23 = vld [vmem:[%s5840_s14 + $0x958] sm:$0xff]  ;;  %v558_v24 = vld [vmem:[%s5840_s14 + $0x980] sm:$0xff] }
  0x5b   : > { %555 = vst [vmem:[%s5845_s15 + $0x4b0] sm:$0xff] %v554_v22  ;;  %557 = vst [vmem:[%s5845_s15 + $0x4b8] sm:$0xff] %v556_v23  ;;  %v560_v25 = vld [vmem:[%s5840_s14 + $0x988] sm:$0xff]  ;;  %v562_v26 = vld [vmem:[%s5840_s14 + $0x990] sm:$0xff] }
  0x5c   : > { %559 = vst [vmem:[%s5845_s15 + $0x4c0] sm:$0xff] %v558_v24  ;;  %v564_v27 = vld [vmem:[%s5840_s14 + $0x998] sm:$0xff]  ;;  %561 = vst [vmem:[%s5845_s15 + $0x4c8] sm:$0xff] %v560_v25  ;;  %v566_v28 = vld [vmem:[%s5840_s14 + $0x9c0] sm:$0xff] }
  0x5d   : > { %563 = vst [vmem:[%s5845_s15 + $0x4d0] sm:$0xff] %v562_v26  ;;  %565 = vst [vmem:[%s5845_s15 + $0x4d8] sm:$0xff] %v564_v27  ;;  %v568_v29 = vld [vmem:[%s5840_s14 + $0x9c8] sm:$0xff]  ;;  %v570_v30 = vld [vmem:[%s5840_s14 + $0x9d0] sm:$0xff] }
  0x5e   : > { %567 = vst [vmem:[%s5845_s15 + $0x4e0] sm:$0xff] %v566_v28  ;;  %569 = vst [vmem:[%s5845_s15 + $0x4e8] sm:$0xff] %v568_v29  ;;  %v572_v31 = vld [vmem:[%s5840_s14 + $0x9d8] sm:$0xff]  ;;  %v574_v32 = vld [vmem:[%s5840_s14 + $0xa00] sm:$0xff] }
  0x5f   : > { %571 = vst [vmem:[%s5845_s15 + $0x4f0] sm:$0xff] %v570_v30  ;;  %v576_v33 = vld [vmem:[%s5840_s14 + $0xa08] sm:$0xff]  ;;  %573 = vst [vmem:[%s5845_s15 + $0x4f8] sm:$0xff] %v572_v31  ;;  %v578_v34 = vld [vmem:[%s5840_s14 + $0xa10] sm:$0xff] }
  0x60   : > { %575 = vst [vmem:[%s5845_s15 + $0x500] sm:$0xff] %v574_v32  ;;  %577 = vst [vmem:[%s5845_s15 + $0x508] sm:$0xff] %v576_v33  ;;  %v580_v35 = vld [vmem:[%s5840_s14 + $0xa18] sm:$0xff]  ;;  %v582_v36 = vld [vmem:[%s5840_s14 + $0xa40] sm:$0xff] }
  0x61   : > { %579 = vst [vmem:[%s5845_s15 + $0x510] sm:$0xff] %v578_v34  ;;  %581 = vst [vmem:[%s5845_s15 + $0x518] sm:$0xff] %v580_v35  ;;  %v584_v37 = vld [vmem:[%s5840_s14 + $0xa48] sm:$0xff]  ;;  %v586_v38 = vld [vmem:[%s5840_s14 + $0xa50] sm:$0xff] }
  0x62   : > { %583 = vst [vmem:[%s5845_s15 + $0x520] sm:$0xff] %v582_v36  ;;  %v588_v39 = vld [vmem:[%s5840_s14 + $0xa58] sm:$0xff]  ;;  %585 = vst [vmem:[%s5845_s15 + $0x528] sm:$0xff] %v584_v37  ;;  %v590_v40 = vld [vmem:[%s5840_s14 + $0xa80] sm:$0xff] }
  0x63   : > { %587 = vst [vmem:[%s5845_s15 + $0x530] sm:$0xff] %v586_v38  ;;  %589 = vst [vmem:[%s5845_s15 + $0x538] sm:$0xff] %v588_v39  ;;  %v592_v41 = vld [vmem:[%s5840_s14 + $0xa88] sm:$0xff]  ;;  %v594_v42 = vld [vmem:[%s5840_s14 + $0xa90] sm:$0xff] }
  0x64   : > { %591 = vst [vmem:[%s5845_s15 + $0x540] sm:$0xff] %v590_v40  ;;  %593 = vst [vmem:[%s5845_s15 + $0x548] sm:$0xff] %v592_v41  ;;  %v596_v43 = vld [vmem:[%s5840_s14 + $0xa98] sm:$0xff]  ;;  %v598_v44 = vld [vmem:[%s5840_s14 + $0xac0] sm:$0xff] }
  0x65   : > { %595 = vst [vmem:[%s5845_s15 + $0x550] sm:$0xff] %v594_v42  ;;  %v600_v45 = vld [vmem:[%s5840_s14 + $0xac8] sm:$0xff]  ;;  %597 = vst [vmem:[%s5845_s15 + $0x558] sm:$0xff] %v596_v43  ;;  %v602_v46 = vld [vmem:[%s5840_s14 + $0xad0] sm:$0xff] }
  0x66   : > { %599 = vst [vmem:[%s5845_s15 + $0x560] sm:$0xff] %v598_v44  ;;  %601 = vst [vmem:[%s5845_s15 + $0x568] sm:$0xff] %v600_v45  ;;  %v604_v47 = vld [vmem:[%s5840_s14 + $0xad8] sm:$0xff]  ;;  %v606_v48 = vld [vmem:[%s5840_s14 + $0xb00] sm:$0xff] }
  0x67   : > { %603 = vst [vmem:[%s5845_s15 + $0x570] sm:$0xff] %v602_v46  ;;  %605 = vst [vmem:[%s5845_s15 + $0x578] sm:$0xff] %v604_v47  ;;  %v608_v49 = vld [vmem:[%s5840_s14 + $0xb08] sm:$0xff]  ;;  %v610_v50 = vld [vmem:[%s5840_s14 + $0xb10] sm:$0xff] }
  0x68   : > { %607 = vst [vmem:[%s5845_s15 + $0x580] sm:$0xff] %v606_v48  ;;  %v612_v51 = vld [vmem:[%s5840_s14 + $0xb18] sm:$0xff]  ;;  %609 = vst [vmem:[%s5845_s15 + $0x588] sm:$0xff] %v608_v49  ;;  %v614_v52 = vld [vmem:[%s5840_s14 + $0xb40] sm:$0xff] }
  0x69   : > { %611 = vst [vmem:[%s5845_s15 + $0x590] sm:$0xff] %v610_v50  ;;  %613 = vst [vmem:[%s5845_s15 + $0x598] sm:$0xff] %v612_v51  ;;  %v616_v53 = vld [vmem:[%s5840_s14 + $0xb48] sm:$0xff]  ;;  %v618_v54 = vld [vmem:[%s5840_s14 + $0xb50] sm:$0xff] }
  0x6a   : > { %615 = vst [vmem:[%s5845_s15 + $0x5a0] sm:$0xff] %v614_v52  ;;  %617 = vst [vmem:[%s5845_s15 + $0x5a8] sm:$0xff] %v616_v53  ;;  %v620_v55 = vld [vmem:[%s5840_s14 + $0xb58] sm:$0xff]  ;;  %v622_v56 = vld [vmem:[%s5840_s14 + $0xb80] sm:$0xff] }
  0x6b   : > { %619 = vst [vmem:[%s5845_s15 + $0x5b0] sm:$0xff] %v618_v54  ;;  %v624_v57 = vld [vmem:[%s5840_s14 + $0xb88] sm:$0xff]  ;;  %621 = vst [vmem:[%s5845_s15 + $0x5b8] sm:$0xff] %v620_v55  ;;  %v626_v58 = vld [vmem:[%s5840_s14 + $0xb90] sm:$0xff] }
  0x6c   : > { %623 = vst [vmem:[%s5845_s15 + $0x5c0] sm:$0xff] %v622_v56  ;;  %625 = vst [vmem:[%s5845_s15 + $0x5c8] sm:$0xff] %v624_v57  ;;  %v628_v59 = vld [vmem:[%s5840_s14 + $0xb98] sm:$0xff]  ;;  %v630_v60 = vld [vmem:[%s5840_s14 + $0xbc0] sm:$0xff] }
  0x6d   : > { %627 = vst [vmem:[%s5845_s15 + $0x5d0] sm:$0xff] %v626_v58  ;;  %629 = vst [vmem:[%s5845_s15 + $0x5d8] sm:$0xff] %v628_v59  ;;  %v632_v61 = vld [vmem:[%s5840_s14 + $0xbc8] sm:$0xff]  ;;  %v634_v62 = vld [vmem:[%s5840_s14 + $0xbd0] sm:$0xff] }
  0x6e   : > { %631 = vst [vmem:[%s5845_s15 + $0x5e0] sm:$0xff] %v630_v60  ;;  %v636_v63 = vld [vmem:[%s5840_s14 + $0xbd8] sm:$0xff]  ;;  %633 = vst [vmem:[%s5845_s15 + $0x5e8] sm:$0xff] %v632_v61  ;;  %v638_v0 = vld [vmem:[%s5840_s14 + $0xc00] sm:$0xff] }
  0x6f   : > { %635 = vst [vmem:[%s5845_s15 + $0x5f0] sm:$0xff] %v634_v62  ;;  %637 = vst [vmem:[%s5845_s15 + $0x5f8] sm:$0xff] %v636_v63  ;;  %v640_v1 = vld [vmem:[%s5840_s14 + $0xc08] sm:$0xff]  ;;  %v642_v2 = vld [vmem:[%s5840_s14 + $0xc10] sm:$0xff] }
  0x70   : > { %639 = vst [vmem:[%s5845_s15 + $0x600] sm:$0xff] %v638_v0  ;;  %641 = vst [vmem:[%s5845_s15 + $0x608] sm:$0xff] %v640_v1  ;;  %v644_v3 = vld [vmem:[%s5840_s14 + $0xc18] sm:$0xff]  ;;  %v646_v4 = vld [vmem:[%s5840_s14 + $0xc40] sm:$0xff] }
  0x71   : > { %643 = vst [vmem:[%s5845_s15 + $0x610] sm:$0xff] %v642_v2  ;;  %v648_v5 = vld [vmem:[%s5840_s14 + $0xc48] sm:$0xff]  ;;  %645 = vst [vmem:[%s5845_s15 + $0x618] sm:$0xff] %v644_v3  ;;  %v650_v6 = vld [vmem:[%s5840_s14 + $0xc50] sm:$0xff] }
  0x72   : > { %647 = vst [vmem:[%s5845_s15 + $0x620] sm:$0xff] %v646_v4  ;;  %649 = vst [vmem:[%s5845_s15 + $0x628] sm:$0xff] %v648_v5  ;;  %v652_v7 = vld [vmem:[%s5840_s14 + $0xc58] sm:$0xff]  ;;  %v654_v8 = vld [vmem:[%s5840_s14 + $0xc80] sm:$0xff] }
  0x73   : > { %651 = vst [vmem:[%s5845_s15 + $0x630] sm:$0xff] %v650_v6  ;;  %653 = vst [vmem:[%s5845_s15 + $0x638] sm:$0xff] %v652_v7  ;;  %v656_v9 = vld [vmem:[%s5840_s14 + $0xc88] sm:$0xff]  ;;  %v658_v10 = vld [vmem:[%s5840_s14 + $0xc90] sm:$0xff] }
  0x74   : > { %655 = vst [vmem:[%s5845_s15 + $0x640] sm:$0xff] %v654_v8  ;;  %v660_v11 = vld [vmem:[%s5840_s14 + $0xc98] sm:$0xff]  ;;  %657 = vst [vmem:[%s5845_s15 + $0x648] sm:$0xff] %v656_v9  ;;  %v662_v12 = vld [vmem:[%s5840_s14 + $0xcc0] sm:$0xff] }
  0x75   : > { %659 = vst [vmem:[%s5845_s15 + $0x650] sm:$0xff] %v658_v10  ;;  %661 = vst [vmem:[%s5845_s15 + $0x658] sm:$0xff] %v660_v11  ;;  %v664_v13 = vld [vmem:[%s5840_s14 + $0xcc8] sm:$0xff]  ;;  %v666_v14 = vld [vmem:[%s5840_s14 + $0xcd0] sm:$0xff] }
  0x76   : > { %663 = vst [vmem:[%s5845_s15 + $0x660] sm:$0xff] %v662_v12  ;;  %665 = vst [vmem:[%s5845_s15 + $0x668] sm:$0xff] %v664_v13  ;;  %v668_v15 = vld [vmem:[%s5840_s14 + $0xcd8] sm:$0xff]  ;;  %v670_v16 = vld [vmem:[%s5840_s14 + $0xd00] sm:$0xff] }
  0x77   : > { %667 = vst [vmem:[%s5845_s15 + $0x670] sm:$0xff] %v666_v14  ;;  %v672_v17 = vld [vmem:[%s5840_s14 + $0xd08] sm:$0xff]  ;;  %669 = vst [vmem:[%s5845_s15 + $0x678] sm:$0xff] %v668_v15  ;;  %v674_v18 = vld [vmem:[%s5840_s14 + $0xd10] sm:$0xff] }
  0x78   : > { %671 = vst [vmem:[%s5845_s15 + $0x680] sm:$0xff] %v670_v16  ;;  %673 = vst [vmem:[%s5845_s15 + $0x688] sm:$0xff] %v672_v17  ;;  %v676_v19 = vld [vmem:[%s5840_s14 + $0xd18] sm:$0xff]  ;;  %v678_v20 = vld [vmem:[%s5840_s14 + $0xd40] sm:$0xff] }
  0x79   : > { %675 = vst [vmem:[%s5845_s15 + $0x690] sm:$0xff] %v674_v18  ;;  %677 = vst [vmem:[%s5845_s15 + $0x698] sm:$0xff] %v676_v19  ;;  %v680_v21 = vld [vmem:[%s5840_s14 + $0xd48] sm:$0xff]  ;;  %v682_v22 = vld [vmem:[%s5840_s14 + $0xd50] sm:$0xff] }
  0x7a   : > { %679 = vst [vmem:[%s5845_s15 + $0x6a0] sm:$0xff] %v678_v20  ;;  %v684_v23 = vld [vmem:[%s5840_s14 + $0xd58] sm:$0xff]  ;;  %681 = vst [vmem:[%s5845_s15 + $0x6a8] sm:$0xff] %v680_v21  ;;  %v686_v24 = vld [vmem:[%s5840_s14 + $0xd80] sm:$0xff] }
  0x7b   : > { %683 = vst [vmem:[%s5845_s15 + $0x6b0] sm:$0xff] %v682_v22  ;;  %685 = vst [vmem:[%s5845_s15 + $0x6b8] sm:$0xff] %v684_v23  ;;  %v688_v25 = vld [vmem:[%s5840_s14 + $0xd88] sm:$0xff]  ;;  %v690_v26 = vld [vmem:[%s5840_s14 + $0xd90] sm:$0xff] }
  0x7c   : > { %687 = vst [vmem:[%s5845_s15 + $0x6c0] sm:$0xff] %v686_v24  ;;  %689 = vst [vmem:[%s5845_s15 + $0x6c8] sm:$0xff] %v688_v25  ;;  %v692_v27 = vld [vmem:[%s5840_s14 + $0xd98] sm:$0xff]  ;;  %v694_v28 = vld [vmem:[%s5840_s14 + $0xdc0] sm:$0xff] }
  0x7d   : > { %691 = vst [vmem:[%s5845_s15 + $0x6d0] sm:$0xff] %v690_v26  ;;  %v696_v29 = vld [vmem:[%s5840_s14 + $0xdc8] sm:$0xff]  ;;  %693 = vst [vmem:[%s5845_s15 + $0x6d8] sm:$0xff] %v692_v27  ;;  %v698_v30 = vld [vmem:[%s5840_s14 + $0xdd0] sm:$0xff] }
  0x7e   : > { %695 = vst [vmem:[%s5845_s15 + $0x6e0] sm:$0xff] %v694_v28  ;;  %697 = vst [vmem:[%s5845_s15 + $0x6e8] sm:$0xff] %v696_v29  ;;  %v700_v31 = vld [vmem:[%s5840_s14 + $0xdd8] sm:$0xff]  ;;  %v702_v32 = vld [vmem:[%s5840_s14 + $0xe00] sm:$0xff] }
  0x7f   : > { %699 = vst [vmem:[%s5845_s15 + $0x6f0] sm:$0xff] %v698_v30  ;;  %701 = vst [vmem:[%s5845_s15 + $0x6f8] sm:$0xff] %v700_v31  ;;  %v704_v33 = vld [vmem:[%s5840_s14 + $0xe08] sm:$0xff]  ;;  %v706_v34 = vld [vmem:[%s5840_s14 + $0xe10] sm:$0xff] }
  0x80   : > { %703 = vst [vmem:[%s5845_s15 + $0x700] sm:$0xff] %v702_v32  ;;  %v708_v35 = vld [vmem:[%s5840_s14 + $0xe18] sm:$0xff]  ;;  %705 = vst [vmem:[%s5845_s15 + $0x708] sm:$0xff] %v704_v33  ;;  %v710_v36 = vld [vmem:[%s5840_s14 + $0xe40] sm:$0xff] }
  0x81   : > { %707 = vst [vmem:[%s5845_s15 + $0x710] sm:$0xff] %v706_v34  ;;  %709 = vst [vmem:[%s5845_s15 + $0x718] sm:$0xff] %v708_v35  ;;  %v712_v37 = vld [vmem:[%s5840_s14 + $0xe48] sm:$0xff]  ;;  %v714_v38 = vld [vmem:[%s5840_s14 + $0xe50] sm:$0xff] }
  0x82   : > { %711 = vst [vmem:[%s5845_s15 + $0x720] sm:$0xff] %v710_v36  ;;  %713 = vst [vmem:[%s5845_s15 + $0x728] sm:$0xff] %v712_v37  ;;  %v716_v39 = vld [vmem:[%s5840_s14 + $0xe58] sm:$0xff]  ;;  %v718_v40 = vld [vmem:[%s5840_s14 + $0xe80] sm:$0xff] }
  0x83   : > { %715 = vst [vmem:[%s5845_s15 + $0x730] sm:$0xff] %v714_v38  ;;  %v720_v41 = vld [vmem:[%s5840_s14 + $0xe88] sm:$0xff]  ;;  %717 = vst [vmem:[%s5845_s15 + $0x738] sm:$0xff] %v716_v39  ;;  %v722_v42 = vld [vmem:[%s5840_s14 + $0xe90] sm:$0xff] }
  0x84   : > { %719 = vst [vmem:[%s5845_s15 + $0x740] sm:$0xff] %v718_v40  ;;  %721 = vst [vmem:[%s5845_s15 + $0x748] sm:$0xff] %v720_v41  ;;  %v724_v43 = vld [vmem:[%s5840_s14 + $0xe98] sm:$0xff]  ;;  %v726_v44 = vld [vmem:[%s5840_s14 + $0xec0] sm:$0xff] }
  0x85   : > { %723 = vst [vmem:[%s5845_s15 + $0x750] sm:$0xff] %v722_v42  ;;  %725 = vst [vmem:[%s5845_s15 + $0x758] sm:$0xff] %v724_v43  ;;  %v728_v45 = vld [vmem:[%s5840_s14 + $0xec8] sm:$0xff]  ;;  %v730_v46 = vld [vmem:[%s5840_s14 + $0xed0] sm:$0xff] }
  0x86   : > { %727 = vst [vmem:[%s5845_s15 + $0x760] sm:$0xff] %v726_v44  ;;  %v732_v47 = vld [vmem:[%s5840_s14 + $0xed8] sm:$0xff]  ;;  %729 = vst [vmem:[%s5845_s15 + $0x768] sm:$0xff] %v728_v45  ;;  %v734_v48 = vld [vmem:[%s5840_s14 + $0xf00] sm:$0xff] }
  0x87   : > { %731 = vst [vmem:[%s5845_s15 + $0x770] sm:$0xff] %v730_v46  ;;  %733 = vst [vmem:[%s5845_s15 + $0x778] sm:$0xff] %v732_v47  ;;  %v736_v49 = vld [vmem:[%s5840_s14 + $0xf08] sm:$0xff]  ;;  %v738_v50 = vld [vmem:[%s5840_s14 + $0xf10] sm:$0xff] }
  0x88   : > { %735 = vst [vmem:[%s5845_s15 + $0x780] sm:$0xff] %v734_v48  ;;  %737 = vst [vmem:[%s5845_s15 + $0x788] sm:$0xff] %v736_v49  ;;  %v740_v51 = vld [vmem:[%s5840_s14 + $0xf18] sm:$0xff]  ;;  %v742_v52 = vld [vmem:[%s5840_s14 + $0xf40] sm:$0xff] }
  0x89   : > { %739 = vst [vmem:[%s5845_s15 + $0x790] sm:$0xff] %v738_v50  ;;  %v744_v53 = vld [vmem:[%s5840_s14 + $0xf48] sm:$0xff]  ;;  %741 = vst [vmem:[%s5845_s15 + $0x798] sm:$0xff] %v740_v51  ;;  %v746_v54 = vld [vmem:[%s5840_s14 + $0xf50] sm:$0xff] }
  0x8a   : > { %743 = vst [vmem:[%s5845_s15 + $0x7a0] sm:$0xff] %v742_v52  ;;  %745 = vst [vmem:[%s5845_s15 + $0x7a8] sm:$0xff] %v744_v53  ;;  %v748_v55 = vld [vmem:[%s5840_s14 + $0xf58] sm:$0xff]  ;;  %v750_v56 = vld [vmem:[%s5840_s14 + $0xf80] sm:$0xff] }
  0x8b   : > { %747 = vst [vmem:[%s5845_s15 + $0x7b0] sm:$0xff] %v746_v54  ;;  %749 = vst [vmem:[%s5845_s15 + $0x7b8] sm:$0xff] %v748_v55  ;;  %v752_v57 = vld [vmem:[%s5840_s14 + $0xf88] sm:$0xff]  ;;  %v754_v58 = vld [vmem:[%s5840_s14 + $0xf90] sm:$0xff] }
  0x8c   : > { %751 = vst [vmem:[%s5845_s15 + $0x7c0] sm:$0xff] %v750_v56  ;;  %v756_v59 = vld [vmem:[%s5840_s14 + $0xf98] sm:$0xff]  ;;  %753 = vst [vmem:[%s5845_s15 + $0x7c8] sm:$0xff] %v752_v57  ;;  %v758_v60 = vld [vmem:[%s5840_s14 + $0xfc0] sm:$0xff] }
  0x8d   : > { %755 = vst [vmem:[%s5845_s15 + $0x7d0] sm:$0xff] %v754_v58  ;;  %757 = vst [vmem:[%s5845_s15 + $0x7d8] sm:$0xff] %v756_v59  ;;  %v760_v61 = vld [vmem:[%s5840_s14 + $0xfc8] sm:$0xff]  ;;  %v762_v62 = vld [vmem:[%s5840_s14 + $0xfd0] sm:$0xff] }
  0x8e   : > { %759 = vst [vmem:[%s5845_s15 + $0x7e0] sm:$0xff] %v758_v60  ;;  %761 = vst [vmem:[%s5845_s15 + $0x7e8] sm:$0xff] %v760_v61  ;;  %v764_v63 = vld [vmem:[%s5840_s14 + $0xfd8] sm:$0xff]  ;;  %v766_v0 = vld [vmem:[%s5840_s14 + $0x1000] sm:$0xff] }
  0x8f   : > { %763 = vst [vmem:[%s5845_s15 + $0x7f0] sm:$0xff] %v762_v62  ;;  %v768_v1 = vld [vmem:[%s5840_s14 + $0x1008] sm:$0xff]  ;;  %765 = vst [vmem:[%s5845_s15 + $0x7f8] sm:$0xff] %v764_v63  ;;  %v770_v2 = vld [vmem:[%s5840_s14 + $0x1010] sm:$0xff] }
  0x90   : > { %767 = vst [vmem:[%s5845_s15 + $0x800] sm:$0xff] %v766_v0  ;;  %769 = vst [vmem:[%s5845_s15 + $0x808] sm:$0xff] %v768_v1  ;;  %v772_v3 = vld [vmem:[%s5840_s14 + $0x1018] sm:$0xff]  ;;  %v774_v4 = vld [vmem:[%s5840_s14 + $0x1040] sm:$0xff] }
  0x91   : > { %771 = vst [vmem:[%s5845_s15 + $0x810] sm:$0xff] %v770_v2  ;;  %773 = vst [vmem:[%s5845_s15 + $0x818] sm:$0xff] %v772_v3  ;;  %v776_v5 = vld [vmem:[%s5840_s14 + $0x1048] sm:$0xff]  ;;  %v778_v6 = vld [vmem:[%s5840_s14 + $0x1050] sm:$0xff] }
  0x92   : > { %775 = vst [vmem:[%s5845_s15 + $0x820] sm:$0xff] %v774_v4  ;;  %v780_v7 = vld [vmem:[%s5840_s14 + $0x1058] sm:$0xff]  ;;  %777 = vst [vmem:[%s5845_s15 + $0x828] sm:$0xff] %v776_v5  ;;  %v782_v8 = vld [vmem:[%s5840_s14 + $0x1080] sm:$0xff] }
  0x93   : > { %779 = vst [vmem:[%s5845_s15 + $0x830] sm:$0xff] %v778_v6  ;;  %781 = vst [vmem:[%s5845_s15 + $0x838] sm:$0xff] %v780_v7  ;;  %v784_v9 = vld [vmem:[%s5840_s14 + $0x1088] sm:$0xff]  ;;  %v786_v10 = vld [vmem:[%s5840_s14 + $0x1090] sm:$0xff] }
  0x94   : > { %783 = vst [vmem:[%s5845_s15 + $0x840] sm:$0xff] %v782_v8  ;;  %785 = vst [vmem:[%s5845_s15 + $0x848] sm:$0xff] %v784_v9  ;;  %v788_v11 = vld [vmem:[%s5840_s14 + $0x1098] sm:$0xff]  ;;  %v790_v12 = vld [vmem:[%s5840_s14 + $0x10c0] sm:$0xff] }
  0x95   : > { %787 = vst [vmem:[%s5845_s15 + $0x850] sm:$0xff] %v786_v10  ;;  %v792_v13 = vld [vmem:[%s5840_s14 + $0x10c8] sm:$0xff]  ;;  %789 = vst [vmem:[%s5845_s15 + $0x858] sm:$0xff] %v788_v11  ;;  %v794_v14 = vld [vmem:[%s5840_s14 + $0x10d0] sm:$0xff] }
  0x96   : > { %791 = vst [vmem:[%s5845_s15 + $0x860] sm:$0xff] %v790_v12  ;;  %793 = vst [vmem:[%s5845_s15 + $0x868] sm:$0xff] %v792_v13  ;;  %v796_v15 = vld [vmem:[%s5840_s14 + $0x10d8] sm:$0xff]  ;;  %v798_v16 = vld [vmem:[%s5840_s14 + $0x1100] sm:$0xff] }
  0x97   : > { %795 = vst [vmem:[%s5845_s15 + $0x870] sm:$0xff] %v794_v14  ;;  %797 = vst [vmem:[%s5845_s15 + $0x878] sm:$0xff] %v796_v15  ;;  %v800_v17 = vld [vmem:[%s5840_s14 + $0x1108] sm:$0xff]  ;;  %v802_v18 = vld [vmem:[%s5840_s14 + $0x1110] sm:$0xff] }
  0x98   : > { %799 = vst [vmem:[%s5845_s15 + $0x880] sm:$0xff] %v798_v16  ;;  %v804_v19 = vld [vmem:[%s5840_s14 + $0x1118] sm:$0xff]  ;;  %801 = vst [vmem:[%s5845_s15 + $0x888] sm:$0xff] %v800_v17  ;;  %v806_v20 = vld [vmem:[%s5840_s14 + $0x1140] sm:$0xff] }
  0x99   : > { %803 = vst [vmem:[%s5845_s15 + $0x890] sm:$0xff] %v802_v18  ;;  %805 = vst [vmem:[%s5845_s15 + $0x898] sm:$0xff] %v804_v19  ;;  %v808_v21 = vld [vmem:[%s5840_s14 + $0x1148] sm:$0xff]  ;;  %v810_v22 = vld [vmem:[%s5840_s14 + $0x1150] sm:$0xff] }
  0x9a   : > { %807 = vst [vmem:[%s5845_s15 + $0x8a0] sm:$0xff] %v806_v20  ;;  %809 = vst [vmem:[%s5845_s15 + $0x8a8] sm:$0xff] %v808_v21  ;;  %v812_v23 = vld [vmem:[%s5840_s14 + $0x1158] sm:$0xff]  ;;  %v814_v24 = vld [vmem:[%s5840_s14 + $0x1180] sm:$0xff] }
  0x9b   : > { %811 = vst [vmem:[%s5845_s15 + $0x8b0] sm:$0xff] %v810_v22  ;;  %v816_v25 = vld [vmem:[%s5840_s14 + $0x1188] sm:$0xff]  ;;  %813 = vst [vmem:[%s5845_s15 + $0x8b8] sm:$0xff] %v812_v23  ;;  %v818_v26 = vld [vmem:[%s5840_s14 + $0x1190] sm:$0xff] }
  0x9c   : > { %815 = vst [vmem:[%s5845_s15 + $0x8c0] sm:$0xff] %v814_v24  ;;  %817 = vst [vmem:[%s5845_s15 + $0x8c8] sm:$0xff] %v816_v25  ;;  %v820_v27 = vld [vmem:[%s5840_s14 + $0x1198] sm:$0xff]  ;;  %v822_v28 = vld [vmem:[%s5840_s14 + $0x11c0] sm:$0xff] }
  0x9d   : > { %819 = vst [vmem:[%s5845_s15 + $0x8d0] sm:$0xff] %v818_v26  ;;  %821 = vst [vmem:[%s5845_s15 + $0x8d8] sm:$0xff] %v820_v27  ;;  %v824_v29 = vld [vmem:[%s5840_s14 + $0x11c8] sm:$0xff]  ;;  %v826_v30 = vld [vmem:[%s5840_s14 + $0x11d0] sm:$0xff] }
  0x9e   : > { %823 = vst [vmem:[%s5845_s15 + $0x8e0] sm:$0xff] %v822_v28  ;;  %v828_v31 = vld [vmem:[%s5840_s14 + $0x11d8] sm:$0xff]  ;;  %825 = vst [vmem:[%s5845_s15 + $0x8e8] sm:$0xff] %v824_v29  ;;  %v830_v32 = vld [vmem:[%s5840_s14 + $0x1200] sm:$0xff] }
  0x9f   : > { %827 = vst [vmem:[%s5845_s15 + $0x8f0] sm:$0xff] %v826_v30  ;;  %829 = vst [vmem:[%s5845_s15 + $0x8f8] sm:$0xff] %v828_v31  ;;  %v832_v33 = vld [vmem:[%s5840_s14 + $0x1208] sm:$0xff]  ;;  %v834_v34 = vld [vmem:[%s5840_s14 + $0x1210] sm:$0xff] }
  0xa0   : > { %831 = vst [vmem:[%s5845_s15 + $0x900] sm:$0xff] %v830_v32  ;;  %833 = vst [vmem:[%s5845_s15 + $0x908] sm:$0xff] %v832_v33  ;;  %v836_v35 = vld [vmem:[%s5840_s14 + $0x1218] sm:$0xff]  ;;  %v838_v36 = vld [vmem:[%s5840_s14 + $0x1240] sm:$0xff] }
  0xa1   : > { %835 = vst [vmem:[%s5845_s15 + $0x910] sm:$0xff] %v834_v34  ;;  %v840_v37 = vld [vmem:[%s5840_s14 + $0x1248] sm:$0xff]  ;;  %837 = vst [vmem:[%s5845_s15 + $0x918] sm:$0xff] %v836_v35  ;;  %v842_v38 = vld [vmem:[%s5840_s14 + $0x1250] sm:$0xff] }
  0xa2   : > { %839 = vst [vmem:[%s5845_s15 + $0x920] sm:$0xff] %v838_v36  ;;  %841 = vst [vmem:[%s5845_s15 + $0x928] sm:$0xff] %v840_v37  ;;  %v844_v39 = vld [vmem:[%s5840_s14 + $0x1258] sm:$0xff]  ;;  %v846_v40 = vld [vmem:[%s5840_s14 + $0x1280] sm:$0xff] }
  0xa3   : > { %843 = vst [vmem:[%s5845_s15 + $0x930] sm:$0xff] %v842_v38  ;;  %845 = vst [vmem:[%s5845_s15 + $0x938] sm:$0xff] %v844_v39  ;;  %v848_v41 = vld [vmem:[%s5840_s14 + $0x1288] sm:$0xff]  ;;  %v850_v42 = vld [vmem:[%s5840_s14 + $0x1290] sm:$0xff] }
  0xa4   : > { %847 = vst [vmem:[%s5845_s15 + $0x940] sm:$0xff] %v846_v40  ;;  %v852_v43 = vld [vmem:[%s5840_s14 + $0x1298] sm:$0xff]  ;;  %849 = vst [vmem:[%s5845_s15 + $0x948] sm:$0xff] %v848_v41  ;;  %v854_v44 = vld [vmem:[%s5840_s14 + $0x12c0] sm:$0xff] }
  0xa5   : > { %851 = vst [vmem:[%s5845_s15 + $0x950] sm:$0xff] %v850_v42  ;;  %853 = vst [vmem:[%s5845_s15 + $0x958] sm:$0xff] %v852_v43  ;;  %v856_v45 = vld [vmem:[%s5840_s14 + $0x12c8] sm:$0xff]  ;;  %v858_v46 = vld [vmem:[%s5840_s14 + $0x12d0] sm:$0xff] }
  0xa6   : > { %855 = vst [vmem:[%s5845_s15 + $0x960] sm:$0xff] %v854_v44  ;;  %857 = vst [vmem:[%s5845_s15 + $0x968] sm:$0xff] %v856_v45  ;;  %v860_v47 = vld [vmem:[%s5840_s14 + $0x12d8] sm:$0xff]  ;;  %v862_v48 = vld [vmem:[%s5840_s14 + $0x1300] sm:$0xff] }
  0xa7   : > { %859 = vst [vmem:[%s5845_s15 + $0x970] sm:$0xff] %v858_v46  ;;  %v864_v49 = vld [vmem:[%s5840_s14 + $0x1308] sm:$0xff]  ;;  %861 = vst [vmem:[%s5845_s15 + $0x978] sm:$0xff] %v860_v47  ;;  %v866_v50 = vld [vmem:[%s5840_s14 + $0x1310] sm:$0xff] }
  0xa8   : > { %863 = vst [vmem:[%s5845_s15 + $0x980] sm:$0xff] %v862_v48  ;;  %865 = vst [vmem:[%s5845_s15 + $0x988] sm:$0xff] %v864_v49  ;;  %v868_v51 = vld [vmem:[%s5840_s14 + $0x1318] sm:$0xff]  ;;  %v870_v52 = vld [vmem:[%s5840_s14 + $0x1340] sm:$0xff] }
  0xa9   : > { %867 = vst [vmem:[%s5845_s15 + $0x990] sm:$0xff] %v866_v50  ;;  %869 = vst [vmem:[%s5845_s15 + $0x998] sm:$0xff] %v868_v51  ;;  %v872_v53 = vld [vmem:[%s5840_s14 + $0x1348] sm:$0xff]  ;;  %v874_v54 = vld [vmem:[%s5840_s14 + $0x1350] sm:$0xff] }
  0xaa   : > { %871 = vst [vmem:[%s5845_s15 + $0x9a0] sm:$0xff] %v870_v52  ;;  %v876_v55 = vld [vmem:[%s5840_s14 + $0x1358] sm:$0xff]  ;;  %873 = vst [vmem:[%s5845_s15 + $0x9a8] sm:$0xff] %v872_v53  ;;  %v878_v56 = vld [vmem:[%s5840_s14 + $0x1380] sm:$0xff] }
  0xab   : > { %875 = vst [vmem:[%s5845_s15 + $0x9b0] sm:$0xff] %v874_v54  ;;  %877 = vst [vmem:[%s5845_s15 + $0x9b8] sm:$0xff] %v876_v55  ;;  %v880_v57 = vld [vmem:[%s5840_s14 + $0x1388] sm:$0xff]  ;;  %v882_v58 = vld [vmem:[%s5840_s14 + $0x1390] sm:$0xff] }
  0xac   : > { %879 = vst [vmem:[%s5845_s15 + $0x9c0] sm:$0xff] %v878_v56  ;;  %881 = vst [vmem:[%s5845_s15 + $0x9c8] sm:$0xff] %v880_v57  ;;  %v884_v59 = vld [vmem:[%s5840_s14 + $0x1398] sm:$0xff]  ;;  %v886_v60 = vld [vmem:[%s5840_s14 + $0x13c0] sm:$0xff] }
  0xad   : > { %883 = vst [vmem:[%s5845_s15 + $0x9d0] sm:$0xff] %v882_v58  ;;  %v888_v61 = vld [vmem:[%s5840_s14 + $0x13c8] sm:$0xff]  ;;  %885 = vst [vmem:[%s5845_s15 + $0x9d8] sm:$0xff] %v884_v59  ;;  %v890_v62 = vld [vmem:[%s5840_s14 + $0x13d0] sm:$0xff] }
  0xae   : > { %887 = vst [vmem:[%s5845_s15 + $0x9e0] sm:$0xff] %v886_v60  ;;  %889 = vst [vmem:[%s5845_s15 + $0x9e8] sm:$0xff] %v888_v61  ;;  %v892_v63 = vld [vmem:[%s5840_s14 + $0x13d8] sm:$0xff]  ;;  %v894_v0 = vld [vmem:[%s5840_s14 + $0x1400] sm:$0xff] }
  0xaf   : > { %891 = vst [vmem:[%s5845_s15 + $0x9f0] sm:$0xff] %v890_v62  ;;  %893 = vst [vmem:[%s5845_s15 + $0x9f8] sm:$0xff] %v892_v63  ;;  %v896_v1 = vld [vmem:[%s5840_s14 + $0x1408] sm:$0xff]  ;;  %v898_v2 = vld [vmem:[%s5840_s14 + $0x1410] sm:$0xff] }
  0xb0   : > { %895 = vst [vmem:[%s5845_s15 + $0xa00] sm:$0xff] %v894_v0  ;;  %v900_v3 = vld [vmem:[%s5840_s14 + $0x1418] sm:$0xff]  ;;  %897 = vst [vmem:[%s5845_s15 + $0xa08] sm:$0xff] %v896_v1  ;;  %v902_v4 = vld [vmem:[%s5840_s14 + $0x1440] sm:$0xff] }
  0xb1   : > { %899 = vst [vmem:[%s5845_s15 + $0xa10] sm:$0xff] %v898_v2  ;;  %901 = vst [vmem:[%s5845_s15 + $0xa18] sm:$0xff] %v900_v3  ;;  %v904_v5 = vld [vmem:[%s5840_s14 + $0x1448] sm:$0xff]  ;;  %v906_v6 = vld [vmem:[%s5840_s14 + $0x1450] sm:$0xff] }
  0xb2   : > { %903 = vst [vmem:[%s5845_s15 + $0xa20] sm:$0xff] %v902_v4  ;;  %905 = vst [vmem:[%s5845_s15 + $0xa28] sm:$0xff] %v904_v5  ;;  %v908_v7 = vld [vmem:[%s5840_s14 + $0x1458] sm:$0xff]  ;;  %v910_v8 = vld [vmem:[%s5840_s14 + $0x1480] sm:$0xff] }
  0xb3   : > { %907 = vst [vmem:[%s5845_s15 + $0xa30] sm:$0xff] %v906_v6  ;;  %v912_v9 = vld [vmem:[%s5840_s14 + $0x1488] sm:$0xff]  ;;  %909 = vst [vmem:[%s5845_s15 + $0xa38] sm:$0xff] %v908_v7  ;;  %v914_v10 = vld [vmem:[%s5840_s14 + $0x1490] sm:$0xff] }
  0xb4   : > { %911 = vst [vmem:[%s5845_s15 + $0xa40] sm:$0xff] %v910_v8  ;;  %913 = vst [vmem:[%s5845_s15 + $0xa48] sm:$0xff] %v912_v9  ;;  %v916_v11 = vld [vmem:[%s5840_s14 + $0x1498] sm:$0xff]  ;;  %v918_v12 = vld [vmem:[%s5840_s14 + $0x14c0] sm:$0xff] }
  0xb5   : > { %915 = vst [vmem:[%s5845_s15 + $0xa50] sm:$0xff] %v914_v10  ;;  %917 = vst [vmem:[%s5845_s15 + $0xa58] sm:$0xff] %v916_v11  ;;  %v920_v13 = vld [vmem:[%s5840_s14 + $0x14c8] sm:$0xff]  ;;  %v922_v14 = vld [vmem:[%s5840_s14 + $0x14d0] sm:$0xff] }
  0xb6   : > { %919 = vst [vmem:[%s5845_s15 + $0xa60] sm:$0xff] %v918_v12  ;;  %v924_v15 = vld [vmem:[%s5840_s14 + $0x14d8] sm:$0xff]  ;;  %921 = vst [vmem:[%s5845_s15 + $0xa68] sm:$0xff] %v920_v13  ;;  %v926_v16 = vld [vmem:[%s5840_s14 + $0x1500] sm:$0xff] }
  0xb7   : > { %923 = vst [vmem:[%s5845_s15 + $0xa70] sm:$0xff] %v922_v14  ;;  %925 = vst [vmem:[%s5845_s15 + $0xa78] sm:$0xff] %v924_v15  ;;  %v928_v17 = vld [vmem:[%s5840_s14 + $0x1508] sm:$0xff]  ;;  %v930_v18 = vld [vmem:[%s5840_s14 + $0x1510] sm:$0xff] }
  0xb8   : > { %927 = vst [vmem:[%s5845_s15 + $0xa80] sm:$0xff] %v926_v16  ;;  %929 = vst [vmem:[%s5845_s15 + $0xa88] sm:$0xff] %v928_v17  ;;  %v932_v19 = vld [vmem:[%s5840_s14 + $0x1518] sm:$0xff]  ;;  %v934_v20 = vld [vmem:[%s5840_s14 + $0x1540] sm:$0xff] }
  0xb9   : > { %931 = vst [vmem:[%s5845_s15 + $0xa90] sm:$0xff] %v930_v18  ;;  %v936_v21 = vld [vmem:[%s5840_s14 + $0x1548] sm:$0xff]  ;;  %933 = vst [vmem:[%s5845_s15 + $0xa98] sm:$0xff] %v932_v19  ;;  %v938_v22 = vld [vmem:[%s5840_s14 + $0x1550] sm:$0xff] }
  0xba   : > { %935 = vst [vmem:[%s5845_s15 + $0xaa0] sm:$0xff] %v934_v20  ;;  %937 = vst [vmem:[%s5845_s15 + $0xaa8] sm:$0xff] %v936_v21  ;;  %v940_v23 = vld [vmem:[%s5840_s14 + $0x1558] sm:$0xff]  ;;  %v942_v24 = vld [vmem:[%s5840_s14 + $0x1580] sm:$0xff] }
  0xbb   : > { %939 = vst [vmem:[%s5845_s15 + $0xab0] sm:$0xff] %v938_v22  ;;  %941 = vst [vmem:[%s5845_s15 + $0xab8] sm:$0xff] %v940_v23  ;;  %v944_v25 = vld [vmem:[%s5840_s14 + $0x1588] sm:$0xff]  ;;  %v946_v26 = vld [vmem:[%s5840_s14 + $0x1590] sm:$0xff] }
  0xbc   : > { %943 = vst [vmem:[%s5845_s15 + $0xac0] sm:$0xff] %v942_v24  ;;  %v948_v27 = vld [vmem:[%s5840_s14 + $0x1598] sm:$0xff]  ;;  %945 = vst [vmem:[%s5845_s15 + $0xac8] sm:$0xff] %v944_v25  ;;  %v950_v28 = vld [vmem:[%s5840_s14 + $0x15c0] sm:$0xff] }
  0xbd   : > { %947 = vst [vmem:[%s5845_s15 + $0xad0] sm:$0xff] %v946_v26  ;;  %949 = vst [vmem:[%s5845_s15 + $0xad8] sm:$0xff] %v948_v27  ;;  %v952_v29 = vld [vmem:[%s5840_s14 + $0x15c8] sm:$0xff]  ;;  %v954_v30 = vld [vmem:[%s5840_s14 + $0x15d0] sm:$0xff] }
  0xbe   : > { %951 = vst [vmem:[%s5845_s15 + $0xae0] sm:$0xff] %v950_v28  ;;  %953 = vst [vmem:[%s5845_s15 + $0xae8] sm:$0xff] %v952_v29  ;;  %v956_v31 = vld [vmem:[%s5840_s14 + $0x15d8] sm:$0xff]  ;;  %v958_v32 = vld [vmem:[%s5840_s14 + $0x1600] sm:$0xff] }
  0xbf   : > { %955 = vst [vmem:[%s5845_s15 + $0xaf0] sm:$0xff] %v954_v30  ;;  %v960_v33 = vld [vmem:[%s5840_s14 + $0x1608] sm:$0xff]  ;;  %957 = vst [vmem:[%s5845_s15 + $0xaf8] sm:$0xff] %v956_v31  ;;  %v962_v34 = vld [vmem:[%s5840_s14 + $0x1610] sm:$0xff] }
  0xc0   : > { %959 = vst [vmem:[%s5845_s15 + $0xb00] sm:$0xff] %v958_v32  ;;  %961 = vst [vmem:[%s5845_s15 + $0xb08] sm:$0xff] %v960_v33  ;;  %v964_v35 = vld [vmem:[%s5840_s14 + $0x1618] sm:$0xff]  ;;  %v966_v36 = vld [vmem:[%s5840_s14 + $0x1640] sm:$0xff] }
  0xc1   : > { %963 = vst [vmem:[%s5845_s15 + $0xb10] sm:$0xff] %v962_v34  ;;  %965 = vst [vmem:[%s5845_s15 + $0xb18] sm:$0xff] %v964_v35  ;;  %v968_v37 = vld [vmem:[%s5840_s14 + $0x1648] sm:$0xff]  ;;  %v970_v38 = vld [vmem:[%s5840_s14 + $0x1650] sm:$0xff] }
  0xc2   : > { %967 = vst [vmem:[%s5845_s15 + $0xb20] sm:$0xff] %v966_v36  ;;  %v972_v39 = vld [vmem:[%s5840_s14 + $0x1658] sm:$0xff]  ;;  %969 = vst [vmem:[%s5845_s15 + $0xb28] sm:$0xff] %v968_v37  ;;  %v974_v40 = vld [vmem:[%s5840_s14 + $0x1680] sm:$0xff] }
  0xc3   : > { %971 = vst [vmem:[%s5845_s15 + $0xb30] sm:$0xff] %v970_v38  ;;  %973 = vst [vmem:[%s5845_s15 + $0xb38] sm:$0xff] %v972_v39  ;;  %v976_v41 = vld [vmem:[%s5840_s14 + $0x1688] sm:$0xff]  ;;  %v978_v42 = vld [vmem:[%s5840_s14 + $0x1690] sm:$0xff] }
  0xc4   : > { %975 = vst [vmem:[%s5845_s15 + $0xb40] sm:$0xff] %v974_v40  ;;  %977 = vst [vmem:[%s5845_s15 + $0xb48] sm:$0xff] %v976_v41  ;;  %v980_v43 = vld [vmem:[%s5840_s14 + $0x1698] sm:$0xff]  ;;  %v982_v44 = vld [vmem:[%s5840_s14 + $0x16c0] sm:$0xff] }
  0xc5   : > { %979 = vst [vmem:[%s5845_s15 + $0xb50] sm:$0xff] %v978_v42  ;;  %v984_v45 = vld [vmem:[%s5840_s14 + $0x16c8] sm:$0xff]  ;;  %981 = vst [vmem:[%s5845_s15 + $0xb58] sm:$0xff] %v980_v43  ;;  %v986_v46 = vld [vmem:[%s5840_s14 + $0x16d0] sm:$0xff] }
  0xc6   : > { %983 = vst [vmem:[%s5845_s15 + $0xb60] sm:$0xff] %v982_v44  ;;  %985 = vst [vmem:[%s5845_s15 + $0xb68] sm:$0xff] %v984_v45  ;;  %v988_v47 = vld [vmem:[%s5840_s14 + $0x16d8] sm:$0xff]  ;;  %v990_v48 = vld [vmem:[%s5840_s14 + $0x1700] sm:$0xff] }
  0xc7   : > { %987 = vst [vmem:[%s5845_s15 + $0xb70] sm:$0xff] %v986_v46  ;;  %989 = vst [vmem:[%s5845_s15 + $0xb78] sm:$0xff] %v988_v47  ;;  %v992_v49 = vld [vmem:[%s5840_s14 + $0x1708] sm:$0xff]  ;;  %v994_v50 = vld [vmem:[%s5840_s14 + $0x1710] sm:$0xff] }
  0xc8   : > { %991 = vst [vmem:[%s5845_s15 + $0xb80] sm:$0xff] %v990_v48  ;;  %v996_v51 = vld [vmem:[%s5840_s14 + $0x1718] sm:$0xff]  ;;  %993 = vst [vmem:[%s5845_s15 + $0xb88] sm:$0xff] %v992_v49  ;;  %v998_v52 = vld [vmem:[%s5840_s14 + $0x1740] sm:$0xff] }
  0xc9   : > { %995 = vst [vmem:[%s5845_s15 + $0xb90] sm:$0xff] %v994_v50  ;;  %997 = vst [vmem:[%s5845_s15 + $0xb98] sm:$0xff] %v996_v51  ;;  %v1000_v53 = vld [vmem:[%s5840_s14 + $0x1748] sm:$0xff]  ;;  %v1002_v54 = vld [vmem:[%s5840_s14 + $0x1750] sm:$0xff] }
  0xca   : > { %999 = vst [vmem:[%s5845_s15 + $0xba0] sm:$0xff] %v998_v52  ;;  %1001 = vst [vmem:[%s5845_s15 + $0xba8] sm:$0xff] %v1000_v53  ;;  %v1004_v55 = vld [vmem:[%s5840_s14 + $0x1758] sm:$0xff]  ;;  %v1006_v56 = vld [vmem:[%s5840_s14 + $0x1780] sm:$0xff] }
  0xcb   : > { %1003 = vst [vmem:[%s5845_s15 + $0xbb0] sm:$0xff] %v1002_v54  ;;  %v1008_v57 = vld [vmem:[%s5840_s14 + $0x1788] sm:$0xff]  ;;  %1005 = vst [vmem:[%s5845_s15 + $0xbb8] sm:$0xff] %v1004_v55  ;;  %v1010_v58 = vld [vmem:[%s5840_s14 + $0x1790] sm:$0xff] }
  0xcc   : > { %1007 = vst [vmem:[%s5845_s15 + $0xbc0] sm:$0xff] %v1006_v56  ;;  %1009 = vst [vmem:[%s5845_s15 + $0xbc8] sm:$0xff] %v1008_v57  ;;  %v1012_v59 = vld [vmem:[%s5840_s14 + $0x1798] sm:$0xff]  ;;  %v1014_v60 = vld [vmem:[%s5840_s14 + $0x17c0] sm:$0xff] }
  0xcd   : > { %1011 = vst [vmem:[%s5845_s15 + $0xbd0] sm:$0xff] %v1010_v58  ;;  %1013 = vst [vmem:[%s5845_s15 + $0xbd8] sm:$0xff] %v1012_v59  ;;  %v1016_v61 = vld [vmem:[%s5840_s14 + $0x17c8] sm:$0xff]  ;;  %v1018_v62 = vld [vmem:[%s5840_s14 + $0x17d0] sm:$0xff] }
  0xce   : > { %1015 = vst [vmem:[%s5845_s15 + $0xbe0] sm:$0xff] %v1014_v60  ;;  %v1020_v63 = vld [vmem:[%s5840_s14 + $0x17d8] sm:$0xff]  ;;  %1017 = vst [vmem:[%s5845_s15 + $0xbe8] sm:$0xff] %v1016_v61  ;;  %v1022_v0 = vld [vmem:[%s5840_s14 + $0x1800] sm:$0xff] }
  0xcf   : > { %1019 = vst [vmem:[%s5845_s15 + $0xbf0] sm:$0xff] %v1018_v62  ;;  %1021 = vst [vmem:[%s5845_s15 + $0xbf8] sm:$0xff] %v1020_v63  ;;  %v1024_v1 = vld [vmem:[%s5840_s14 + $0x1808] sm:$0xff]  ;;  %v1026_v2 = vld [vmem:[%s5840_s14 + $0x1810] sm:$0xff] }
  0xd0   : > { %1023 = vst [vmem:[%s5845_s15 + $0xc00] sm:$0xff] %v1022_v0  ;;  %1025 = vst [vmem:[%s5845_s15 + $0xc08] sm:$0xff] %v1024_v1  ;;  %v1028_v3 = vld [vmem:[%s5840_s14 + $0x1818] sm:$0xff]  ;;  %v1030_v4 = vld [vmem:[%s5840_s14 + $0x1840] sm:$0xff] }
  0xd1   : > { %1027 = vst [vmem:[%s5845_s15 + $0xc10] sm:$0xff] %v1026_v2  ;;  %v1032_v5 = vld [vmem:[%s5840_s14 + $0x1848] sm:$0xff]  ;;  %1029 = vst [vmem:[%s5845_s15 + $0xc18] sm:$0xff] %v1028_v3  ;;  %v1034_v6 = vld [vmem:[%s5840_s14 + $0x1850] sm:$0xff] }
  0xd2   : > { %1031 = vst [vmem:[%s5845_s15 + $0xc20] sm:$0xff] %v1030_v4  ;;  %1033 = vst [vmem:[%s5845_s15 + $0xc28] sm:$0xff] %v1032_v5  ;;  %v1036_v7 = vld [vmem:[%s5840_s14 + $0x1858] sm:$0xff]  ;;  %v1038_v8 = vld [vmem:[%s5840_s14 + $0x1880] sm:$0xff] }
  0xd3   : > { %1035 = vst [vmem:[%s5845_s15 + $0xc30] sm:$0xff] %v1034_v6  ;;  %1037 = vst [vmem:[%s5845_s15 + $0xc38] sm:$0xff] %v1036_v7  ;;  %v1040_v9 = vld [vmem:[%s5840_s14 + $0x1888] sm:$0xff]  ;;  %v1042_v10 = vld [vmem:[%s5840_s14 + $0x1890] sm:$0xff] }
  0xd4   : > { %1039 = vst [vmem:[%s5845_s15 + $0xc40] sm:$0xff] %v1038_v8  ;;  %v1044_v11 = vld [vmem:[%s5840_s14 + $0x1898] sm:$0xff]  ;;  %1041 = vst [vmem:[%s5845_s15 + $0xc48] sm:$0xff] %v1040_v9  ;;  %v1046_v12 = vld [vmem:[%s5840_s14 + $0x18c0] sm:$0xff] }
  0xd5   : > { %1043 = vst [vmem:[%s5845_s15 + $0xc50] sm:$0xff] %v1042_v10  ;;  %1045 = vst [vmem:[%s5845_s15 + $0xc58] sm:$0xff] %v1044_v11  ;;  %v1048_v13 = vld [vmem:[%s5840_s14 + $0x18c8] sm:$0xff]  ;;  %v1050_v14 = vld [vmem:[%s5840_s14 + $0x18d0] sm:$0xff] }
  0xd6   : > { %1047 = vst [vmem:[%s5845_s15 + $0xc60] sm:$0xff] %v1046_v12  ;;  %1049 = vst [vmem:[%s5845_s15 + $0xc68] sm:$0xff] %v1048_v13  ;;  %v1052_v15 = vld [vmem:[%s5840_s14 + $0x18d8] sm:$0xff]  ;;  %v1054_v16 = vld [vmem:[%s5840_s14 + $0x1900] sm:$0xff] }
  0xd7   : > { %1051 = vst [vmem:[%s5845_s15 + $0xc70] sm:$0xff] %v1050_v14  ;;  %v1056_v17 = vld [vmem:[%s5840_s14 + $0x1908] sm:$0xff]  ;;  %1053 = vst [vmem:[%s5845_s15 + $0xc78] sm:$0xff] %v1052_v15  ;;  %v1058_v18 = vld [vmem:[%s5840_s14 + $0x1910] sm:$0xff] }
  0xd8   : > { %1055 = vst [vmem:[%s5845_s15 + $0xc80] sm:$0xff] %v1054_v16  ;;  %1057 = vst [vmem:[%s5845_s15 + $0xc88] sm:$0xff] %v1056_v17  ;;  %v1060_v19 = vld [vmem:[%s5840_s14 + $0x1918] sm:$0xff]  ;;  %v1062_v20 = vld [vmem:[%s5840_s14 + $0x1940] sm:$0xff] }
  0xd9   : > { %1059 = vst [vmem:[%s5845_s15 + $0xc90] sm:$0xff] %v1058_v18  ;;  %1061 = vst [vmem:[%s5845_s15 + $0xc98] sm:$0xff] %v1060_v19  ;;  %v1064_v21 = vld [vmem:[%s5840_s14 + $0x1948] sm:$0xff]  ;;  %v1066_v22 = vld [vmem:[%s5840_s14 + $0x1950] sm:$0xff] }
  0xda   : > { %1063 = vst [vmem:[%s5845_s15 + $0xca0] sm:$0xff] %v1062_v20  ;;  %v1068_v23 = vld [vmem:[%s5840_s14 + $0x1958] sm:$0xff]  ;;  %1065 = vst [vmem:[%s5845_s15 + $0xca8] sm:$0xff] %v1064_v21  ;;  %v1070_v24 = vld [vmem:[%s5840_s14 + $0x1980] sm:$0xff] }
  0xdb   : > { %1067 = vst [vmem:[%s5845_s15 + $0xcb0] sm:$0xff] %v1066_v22  ;;  %1069 = vst [vmem:[%s5845_s15 + $0xcb8] sm:$0xff] %v1068_v23  ;;  %v1072_v25 = vld [vmem:[%s5840_s14 + $0x1988] sm:$0xff]  ;;  %v1074_v26 = vld [vmem:[%s5840_s14 + $0x1990] sm:$0xff] }
  0xdc   : > { %1071 = vst [vmem:[%s5845_s15 + $0xcc0] sm:$0xff] %v1070_v24  ;;  %1073 = vst [vmem:[%s5845_s15 + $0xcc8] sm:$0xff] %v1072_v25  ;;  %v1076_v27 = vld [vmem:[%s5840_s14 + $0x1998] sm:$0xff]  ;;  %v1078_v28 = vld [vmem:[%s5840_s14 + $0x19c0] sm:$0xff] }
  0xdd   : > { %1075 = vst [vmem:[%s5845_s15 + $0xcd0] sm:$0xff] %v1074_v26  ;;  %v1080_v29 = vld [vmem:[%s5840_s14 + $0x19c8] sm:$0xff]  ;;  %1077 = vst [vmem:[%s5845_s15 + $0xcd8] sm:$0xff] %v1076_v27  ;;  %v1082_v30 = vld [vmem:[%s5840_s14 + $0x19d0] sm:$0xff] }
  0xde   : > { %1079 = vst [vmem:[%s5845_s15 + $0xce0] sm:$0xff] %v1078_v28  ;;  %1081 = vst [vmem:[%s5845_s15 + $0xce8] sm:$0xff] %v1080_v29  ;;  %v1084_v31 = vld [vmem:[%s5840_s14 + $0x19d8] sm:$0xff]  ;;  %v1086_v32 = vld [vmem:[%s5840_s14 + $0x1a00] sm:$0xff] }
  0xdf   : > { %1083 = vst [vmem:[%s5845_s15 + $0xcf0] sm:$0xff] %v1082_v30  ;;  %1085 = vst [vmem:[%s5845_s15 + $0xcf8] sm:$0xff] %v1084_v31  ;;  %v1088_v33 = vld [vmem:[%s5840_s14 + $0x1a08] sm:$0xff]  ;;  %v1090_v34 = vld [vmem:[%s5840_s14 + $0x1a10] sm:$0xff] }
  0xe0   : > { %1087 = vst [vmem:[%s5845_s15 + $0xd00] sm:$0xff] %v1086_v32  ;;  %v1092_v35 = vld [vmem:[%s5840_s14 + $0x1a18] sm:$0xff]  ;;  %1089 = vst [vmem:[%s5845_s15 + $0xd08] sm:$0xff] %v1088_v33  ;;  %v1094_v36 = vld [vmem:[%s5840_s14 + $0x1a40] sm:$0xff] }
  0xe1   : > { %1091 = vst [vmem:[%s5845_s15 + $0xd10] sm:$0xff] %v1090_v34  ;;  %1093 = vst [vmem:[%s5845_s15 + $0xd18] sm:$0xff] %v1092_v35  ;;  %v1096_v37 = vld [vmem:[%s5840_s14 + $0x1a48] sm:$0xff]  ;;  %v1098_v38 = vld [vmem:[%s5840_s14 + $0x1a50] sm:$0xff] }
  0xe2   : > { %1095 = vst [vmem:[%s5845_s15 + $0xd20] sm:$0xff] %v1094_v36  ;;  %1097 = vst [vmem:[%s5845_s15 + $0xd28] sm:$0xff] %v1096_v37  ;;  %v1100_v39 = vld [vmem:[%s5840_s14 + $0x1a58] sm:$0xff]  ;;  %v1102_v40 = vld [vmem:[%s5840_s14 + $0x1a80] sm:$0xff] }
  0xe3   : > { %1099 = vst [vmem:[%s5845_s15 + $0xd30] sm:$0xff] %v1098_v38  ;;  %v1104_v41 = vld [vmem:[%s5840_s14 + $0x1a88] sm:$0xff]  ;;  %1101 = vst [vmem:[%s5845_s15 + $0xd38] sm:$0xff] %v1100_v39  ;;  %v1106_v42 = vld [vmem:[%s5840_s14 + $0x1a90] sm:$0xff] }
  0xe4   : > { %1103 = vst [vmem:[%s5845_s15 + $0xd40] sm:$0xff] %v1102_v40  ;;  %1105 = vst [vmem:[%s5845_s15 + $0xd48] sm:$0xff] %v1104_v41  ;;  %v1108_v43 = vld [vmem:[%s5840_s14 + $0x1a98] sm:$0xff]  ;;  %v1110_v44 = vld [vmem:[%s5840_s14 + $0x1ac0] sm:$0xff] }
  0xe5   : > { %1107 = vst [vmem:[%s5845_s15 + $0xd50] sm:$0xff] %v1106_v42  ;;  %1109 = vst [vmem:[%s5845_s15 + $0xd58] sm:$0xff] %v1108_v43  ;;  %v1112_v45 = vld [vmem:[%s5840_s14 + $0x1ac8] sm:$0xff]  ;;  %v1114_v46 = vld [vmem:[%s5840_s14 + $0x1ad0] sm:$0xff] }
  0xe6   : > { %1111 = vst [vmem:[%s5845_s15 + $0xd60] sm:$0xff] %v1110_v44  ;;  %v1116_v47 = vld [vmem:[%s5840_s14 + $0x1ad8] sm:$0xff]  ;;  %1113 = vst [vmem:[%s5845_s15 + $0xd68] sm:$0xff] %v1112_v45  ;;  %v1118_v48 = vld [vmem:[%s5840_s14 + $0x1b00] sm:$0xff] }
  0xe7   : > { %1115 = vst [vmem:[%s5845_s15 + $0xd70] sm:$0xff] %v1114_v46  ;;  %1117 = vst [vmem:[%s5845_s15 + $0xd78] sm:$0xff] %v1116_v47  ;;  %v1120_v49 = vld [vmem:[%s5840_s14 + $0x1b08] sm:$0xff]  ;;  %v1122_v50 = vld [vmem:[%s5840_s14 + $0x1b10] sm:$0xff] }
  0xe8   : > { %1119 = vst [vmem:[%s5845_s15 + $0xd80] sm:$0xff] %v1118_v48  ;;  %1121 = vst [vmem:[%s5845_s15 + $0xd88] sm:$0xff] %v1120_v49  ;;  %v1124_v51 = vld [vmem:[%s5840_s14 + $0x1b18] sm:$0xff]  ;;  %v1126_v52 = vld [vmem:[%s5840_s14 + $0x1b40] sm:$0xff] }
  0xe9   : > { %1123 = vst [vmem:[%s5845_s15 + $0xd90] sm:$0xff] %v1122_v50  ;;  %v1128_v53 = vld [vmem:[%s5840_s14 + $0x1b48] sm:$0xff]  ;;  %1125 = vst [vmem:[%s5845_s15 + $0xd98] sm:$0xff] %v1124_v51  ;;  %v1130_v54 = vld [vmem:[%s5840_s14 + $0x1b50] sm:$0xff] }
  0xea   : > { %1127 = vst [vmem:[%s5845_s15 + $0xda0] sm:$0xff] %v1126_v52  ;;  %1129 = vst [vmem:[%s5845_s15 + $0xda8] sm:$0xff] %v1128_v53  ;;  %v1132_v55 = vld [vmem:[%s5840_s14 + $0x1b58] sm:$0xff]  ;;  %v1134_v56 = vld [vmem:[%s5840_s14 + $0x1b80] sm:$0xff] }
  0xeb   : > { %1131 = vst [vmem:[%s5845_s15 + $0xdb0] sm:$0xff] %v1130_v54  ;;  %1133 = vst [vmem:[%s5845_s15 + $0xdb8] sm:$0xff] %v1132_v55  ;;  %v1136_v57 = vld [vmem:[%s5840_s14 + $0x1b88] sm:$0xff]  ;;  %v1138_v58 = vld [vmem:[%s5840_s14 + $0x1b90] sm:$0xff] }
  0xec   : > { %1135 = vst [vmem:[%s5845_s15 + $0xdc0] sm:$0xff] %v1134_v56  ;;  %v1140_v59 = vld [vmem:[%s5840_s14 + $0x1b98] sm:$0xff]  ;;  %1137 = vst [vmem:[%s5845_s15 + $0xdc8] sm:$0xff] %v1136_v57  ;;  %v1142_v60 = vld [vmem:[%s5840_s14 + $0x1bc0] sm:$0xff] }
  0xed   : > { %1139 = vst [vmem:[%s5845_s15 + $0xdd0] sm:$0xff] %v1138_v58  ;;  %1141 = vst [vmem:[%s5845_s15 + $0xdd8] sm:$0xff] %v1140_v59  ;;  %v1144_v61 = vld [vmem:[%s5840_s14 + $0x1bc8] sm:$0xff]  ;;  %v1146_v62 = vld [vmem:[%s5840_s14 + $0x1bd0] sm:$0xff] }
  0xee   : > { %1143 = vst [vmem:[%s5845_s15 + $0xde0] sm:$0xff] %v1142_v60  ;;  %1145 = vst [vmem:[%s5845_s15 + $0xde8] sm:$0xff] %v1144_v61  ;;  %v1148_v63 = vld [vmem:[%s5840_s14 + $0x1bd8] sm:$0xff]  ;;  %v1150_v0 = vld [vmem:[%s5840_s14 + $0x1c00] sm:$0xff] }
  0xef   : > { %1147 = vst [vmem:[%s5845_s15 + $0xdf0] sm:$0xff] %v1146_v62  ;;  %v1152_v1 = vld [vmem:[%s5840_s14 + $0x1c08] sm:$0xff]  ;;  %1149 = vst [vmem:[%s5845_s15 + $0xdf8] sm:$0xff] %v1148_v63  ;;  %v1154_v2 = vld [vmem:[%s5840_s14 + $0x1c10] sm:$0xff] }
  0xf0   : > { %1151 = vst [vmem:[%s5845_s15 + $0xe00] sm:$0xff] %v1150_v0  ;;  %1153 = vst [vmem:[%s5845_s15 + $0xe08] sm:$0xff] %v1152_v1  ;;  %v1156_v3 = vld [vmem:[%s5840_s14 + $0x1c18] sm:$0xff]  ;;  %v1158_v4 = vld [vmem:[%s5840_s14 + $0x1c40] sm:$0xff] }
  0xf1   : > { %1155 = vst [vmem:[%s5845_s15 + $0xe10] sm:$0xff] %v1154_v2  ;;  %1157 = vst [vmem:[%s5845_s15 + $0xe18] sm:$0xff] %v1156_v3  ;;  %v1160_v5 = vld [vmem:[%s5840_s14 + $0x1c48] sm:$0xff]  ;;  %v1162_v6 = vld [vmem:[%s5840_s14 + $0x1c50] sm:$0xff] }
  0xf2   : > { %1159 = vst [vmem:[%s5845_s15 + $0xe20] sm:$0xff] %v1158_v4  ;;  %v1164_v7 = vld [vmem:[%s5840_s14 + $0x1c58] sm:$0xff]  ;;  %1161 = vst [vmem:[%s5845_s15 + $0xe28] sm:$0xff] %v1160_v5  ;;  %v1166_v8 = vld [vmem:[%s5840_s14 + $0x1c80] sm:$0xff] }
  0xf3   : > { %1163 = vst [vmem:[%s5845_s15 + $0xe30] sm:$0xff] %v1162_v6  ;;  %1165 = vst [vmem:[%s5845_s15 + $0xe38] sm:$0xff] %v1164_v7  ;;  %v1168_v9 = vld [vmem:[%s5840_s14 + $0x1c88] sm:$0xff]  ;;  %v1170_v10 = vld [vmem:[%s5840_s14 + $0x1c90] sm:$0xff] }
  0xf4   : > { %1167 = vst [vmem:[%s5845_s15 + $0xe40] sm:$0xff] %v1166_v8  ;;  %1169 = vst [vmem:[%s5845_s15 + $0xe48] sm:$0xff] %v1168_v9  ;;  %v1172_v11 = vld [vmem:[%s5840_s14 + $0x1c98] sm:$0xff]  ;;  %v1174_v12 = vld [vmem:[%s5840_s14 + $0x1cc0] sm:$0xff] }
  0xf5   : > { %1171 = vst [vmem:[%s5845_s15 + $0xe50] sm:$0xff] %v1170_v10  ;;  %v1176_v13 = vld [vmem:[%s5840_s14 + $0x1cc8] sm:$0xff]  ;;  %1173 = vst [vmem:[%s5845_s15 + $0xe58] sm:$0xff] %v1172_v11  ;;  %v1178_v14 = vld [vmem:[%s5840_s14 + $0x1cd0] sm:$0xff] }
  0xf6   : > { %1175 = vst [vmem:[%s5845_s15 + $0xe60] sm:$0xff] %v1174_v12  ;;  %1177 = vst [vmem:[%s5845_s15 + $0xe68] sm:$0xff] %v1176_v13  ;;  %v1180_v15 = vld [vmem:[%s5840_s14 + $0x1cd8] sm:$0xff]  ;;  %v1182_v16 = vld [vmem:[%s5840_s14 + $0x1d00] sm:$0xff] }
  0xf7   : > { %1179 = vst [vmem:[%s5845_s15 + $0xe70] sm:$0xff] %v1178_v14  ;;  %1181 = vst [vmem:[%s5845_s15 + $0xe78] sm:$0xff] %v1180_v15  ;;  %v1184_v17 = vld [vmem:[%s5840_s14 + $0x1d08] sm:$0xff]  ;;  %v1186_v18 = vld [vmem:[%s5840_s14 + $0x1d10] sm:$0xff] }
  0xf8   : > { %1183 = vst [vmem:[%s5845_s15 + $0xe80] sm:$0xff] %v1182_v16  ;;  %v1188_v19 = vld [vmem:[%s5840_s14 + $0x1d18] sm:$0xff]  ;;  %1185 = vst [vmem:[%s5845_s15 + $0xe88] sm:$0xff] %v1184_v17  ;;  %v1190_v20 = vld [vmem:[%s5840_s14 + $0x1d40] sm:$0xff] }
  0xf9   : > { %1187 = vst [vmem:[%s5845_s15 + $0xe90] sm:$0xff] %v1186_v18  ;;  %1189 = vst [vmem:[%s5845_s15 + $0xe98] sm:$0xff] %v1188_v19  ;;  %v1192_v21 = vld [vmem:[%s5840_s14 + $0x1d48] sm:$0xff]  ;;  %v1194_v22 = vld [vmem:[%s5840_s14 + $0x1d50] sm:$0xff] }
  0xfa   : > { %1191 = vst [vmem:[%s5845_s15 + $0xea0] sm:$0xff] %v1190_v20  ;;  %1193 = vst [vmem:[%s5845_s15 + $0xea8] sm:$0xff] %v1192_v21  ;;  %v1196_v23 = vld [vmem:[%s5840_s14 + $0x1d58] sm:$0xff]  ;;  %v1198_v24 = vld [vmem:[%s5840_s14 + $0x1d80] sm:$0xff] }
  0xfb   : > { %1195 = vst [vmem:[%s5845_s15 + $0xeb0] sm:$0xff] %v1194_v22  ;;  %v1200_v25 = vld [vmem:[%s5840_s14 + $0x1d88] sm:$0xff]  ;;  %1197 = vst [vmem:[%s5845_s15 + $0xeb8] sm:$0xff] %v1196_v23  ;;  %v1202_v26 = vld [vmem:[%s5840_s14 + $0x1d90] sm:$0xff] }
  0xfc   : > { %1199 = vst [vmem:[%s5845_s15 + $0xec0] sm:$0xff] %v1198_v24  ;;  %1201 = vst [vmem:[%s5845_s15 + $0xec8] sm:$0xff] %v1200_v25  ;;  %v1204_v27 = vld [vmem:[%s5840_s14 + $0x1d98] sm:$0xff]  ;;  %v1206_v28 = vld [vmem:[%s5840_s14 + $0x1dc0] sm:$0xff] }
  0xfd   : > { %1203 = vst [vmem:[%s5845_s15 + $0xed0] sm:$0xff] %v1202_v26  ;;  %1205 = vst [vmem:[%s5845_s15 + $0xed8] sm:$0xff] %v1204_v27  ;;  %v1208_v29 = vld [vmem:[%s5840_s14 + $0x1dc8] sm:$0xff]  ;;  %v1210_v30 = vld [vmem:[%s5840_s14 + $0x1dd0] sm:$0xff] }
  0xfe   : > { %1207 = vst [vmem:[%s5845_s15 + $0xee0] sm:$0xff] %v1206_v28  ;;  %v1212_v31 = vld [vmem:[%s5840_s14 + $0x1dd8] sm:$0xff]  ;;  %1209 = vst [vmem:[%s5845_s15 + $0xee8] sm:$0xff] %v1208_v29  ;;  %v1214_v32 = vld [vmem:[%s5840_s14 + $0x1e00] sm:$0xff] }
  0xff   : > { %1211 = vst [vmem:[%s5845_s15 + $0xef0] sm:$0xff] %v1210_v30  ;;  %1213 = vst [vmem:[%s5845_s15 + $0xef8] sm:$0xff] %v1212_v31  ;;  %v1216_v33 = vld [vmem:[%s5840_s14 + $0x1e08] sm:$0xff]  ;;  %v1218_v34 = vld [vmem:[%s5840_s14 + $0x1e10] sm:$0xff] }
 0x100   : > { %1215 = vst [vmem:[%s5845_s15 + $0xf00] sm:$0xff] %v1214_v32  ;;  %1217 = vst [vmem:[%s5845_s15 + $0xf08] sm:$0xff] %v1216_v33  ;;  %v1220_v35 = vld [vmem:[%s5840_s14 + $0x1e18] sm:$0xff]  ;;  %v1222_v36 = vld [vmem:[%s5840_s14 + $0x1e40] sm:$0xff] }
 0x101   : > { %1219 = vst [vmem:[%s5845_s15 + $0xf10] sm:$0xff] %v1218_v34  ;;  %v1224_v37 = vld [vmem:[%s5840_s14 + $0x1e48] sm:$0xff]  ;;  %1221 = vst [vmem:[%s5845_s15 + $0xf18] sm:$0xff] %v1220_v35  ;;  %v1226_v38 = vld [vmem:[%s5840_s14 + $0x1e50] sm:$0xff] }
 0x102   : > { %1223 = vst [vmem:[%s5845_s15 + $0xf20] sm:$0xff] %v1222_v36  ;;  %1225 = vst [vmem:[%s5845_s15 + $0xf28] sm:$0xff] %v1224_v37  ;;  %v1228_v39 = vld [vmem:[%s5840_s14 + $0x1e58] sm:$0xff]  ;;  %v1230_v40 = vld [vmem:[%s5840_s14 + $0x1e80] sm:$0xff] }
 0x103   : > { %1227 = vst [vmem:[%s5845_s15 + $0xf30] sm:$0xff] %v1226_v38  ;;  %1229 = vst [vmem:[%s5845_s15 + $0xf38] sm:$0xff] %v1228_v39  ;;  %v1232_v41 = vld [vmem:[%s5840_s14 + $0x1e88] sm:$0xff]  ;;  %v1234_v42 = vld [vmem:[%s5840_s14 + $0x1e90] sm:$0xff] }
 0x104   : > { %1231 = vst [vmem:[%s5845_s15 + $0xf40] sm:$0xff] %v1230_v40  ;;  %v1236_v43 = vld [vmem:[%s5840_s14 + $0x1e98] sm:$0xff]  ;;  %1233 = vst [vmem:[%s5845_s15 + $0xf48] sm:$0xff] %v1232_v41  ;;  %v1238_v44 = vld [vmem:[%s5840_s14 + $0x1ec0] sm:$0xff] }
 0x105   : > { %1235 = vst [vmem:[%s5845_s15 + $0xf50] sm:$0xff] %v1234_v42  ;;  %1237 = vst [vmem:[%s5845_s15 + $0xf58] sm:$0xff] %v1236_v43  ;;  %v1240_v45 = vld [vmem:[%s5840_s14 + $0x1ec8] sm:$0xff]  ;;  %v1242_v46 = vld [vmem:[%s5840_s14 + $0x1ed0] sm:$0xff] }
 0x106   : > { %1239 = vst [vmem:[%s5845_s15 + $0xf60] sm:$0xff] %v1238_v44  ;;  %1241 = vst [vmem:[%s5845_s15 + $0xf68] sm:$0xff] %v1240_v45  ;;  %v1244_v47 = vld [vmem:[%s5840_s14 + $0x1ed8] sm:$0xff]  ;;  %v1246_v48 = vld [vmem:[%s5840_s14 + $0x1f00] sm:$0xff] }
 0x107   : > { %1243 = vst [vmem:[%s5845_s15 + $0xf70] sm:$0xff] %v1242_v46  ;;  %v1248_v49 = vld [vmem:[%s5840_s14 + $0x1f08] sm:$0xff]  ;;  %1245 = vst [vmem:[%s5845_s15 + $0xf78] sm:$0xff] %v1244_v47  ;;  %v1250_v50 = vld [vmem:[%s5840_s14 + $0x1f10] sm:$0xff] }
 0x108   : > { %1247 = vst [vmem:[%s5845_s15 + $0xf80] sm:$0xff] %v1246_v48  ;;  %1249 = vst [vmem:[%s5845_s15 + $0xf88] sm:$0xff] %v1248_v49  ;;  %v1252_v51 = vld [vmem:[%s5840_s14 + $0x1f18] sm:$0xff]  ;;  %v1254_v52 = vld [vmem:[%s5840_s14 + $0x1f40] sm:$0xff] }
 0x109   : > { %1251 = vst [vmem:[%s5845_s15 + $0xf90] sm:$0xff] %v1250_v50  ;;  %1253 = vst [vmem:[%s5845_s15 + $0xf98] sm:$0xff] %v1252_v51  ;;  %v1256_v53 = vld [vmem:[%s5840_s14 + $0x1f48] sm:$0xff]  ;;  %v1258_v54 = vld [vmem:[%s5840_s14 + $0x1f50] sm:$0xff] }
 0x10a   : > { %1255 = vst [vmem:[%s5845_s15 + $0xfa0] sm:$0xff] %v1254_v52  ;;  %v1260_v55 = vld [vmem:[%s5840_s14 + $0x1f58] sm:$0xff]  ;;  %1257 = vst [vmem:[%s5845_s15 + $0xfa8] sm:$0xff] %v1256_v53  ;;  %v1262_v56 = vld [vmem:[%s5840_s14 + $0x1f80] sm:$0xff] }
 0x10b   : > { %1259 = vst [vmem:[%s5845_s15 + $0xfb0] sm:$0xff] %v1258_v54  ;;  %1261 = vst [vmem:[%s5845_s15 + $0xfb8] sm:$0xff] %v1260_v55  ;;  %v1264_v57 = vld [vmem:[%s5840_s14 + $0x1f88] sm:$0xff]  ;;  %v1266_v58 = vld [vmem:[%s5840_s14 + $0x1f90] sm:$0xff] }
 0x10c   : > { %1263 = vst [vmem:[%s5845_s15 + $0xfc0] sm:$0xff] %v1262_v56  ;;  %1265 = vst [vmem:[%s5845_s15 + $0xfc8] sm:$0xff] %v1264_v57  ;;  %v1268_v59 = vld [vmem:[%s5840_s14 + $0x1f98] sm:$0xff]  ;;  %v1270_v60 = vld [vmem:[%s5840_s14 + $0x1fc0] sm:$0xff] }
 0x10d   : > { %1267 = vst [vmem:[%s5845_s15 + $0xfd0] sm:$0xff] %v1266_v58  ;;  %v1272_v61 = vld [vmem:[%s5840_s14 + $0x1fc8] sm:$0xff]  ;;  %1269 = vst [vmem:[%s5845_s15 + $0xfd8] sm:$0xff] %v1268_v59  ;;  %v1274_v62 = vld [vmem:[%s5840_s14 + $0x1fd0] sm:$0xff] }
 0x10e   : > { %1271 = vst [vmem:[%s5845_s15 + $0xfe0] sm:$0xff] %v1270_v60  ;;  %1273 = vst [vmem:[%s5845_s15 + $0xfe8] sm:$0xff] %v1272_v61  ;;  %v1276_v63 = vld [vmem:[%s5840_s14 + $0x1fd8] sm:$0xff]  ;;  %v1278_v0 = vld [vmem:[%s5840_s14 + $0x2000] sm:$0xff] }
 0x10f   : > { %1275 = vst [vmem:[%s5845_s15 + $0xff0] sm:$0xff] %v1274_v62  ;;  %1277 = vst [vmem:[%s5845_s15 + $0xff8] sm:$0xff] %v1276_v63  ;;  %v1280_v1 = vld [vmem:[%s5840_s14 + $0x2008] sm:$0xff]  ;;  %v1282_v2 = vld [vmem:[%s5840_s14 + $0x2010] sm:$0xff] }
 0x110   : > { %1279 = vst [vmem:[%s5845_s15 + $0x1000] sm:$0xff] %v1278_v0  ;;  %v1284_v3 = vld [vmem:[%s5840_s14 + $0x2018] sm:$0xff]  ;;  %1281 = vst [vmem:[%s5845_s15 + $0x1008] sm:$0xff] %v1280_v1  ;;  %v1286_v4 = vld [vmem:[%s5840_s14 + $0x2040] sm:$0xff] }
 0x111   : > { %1283 = vst [vmem:[%s5845_s15 + $0x1010] sm:$0xff] %v1282_v2  ;;  %1285 = vst [vmem:[%s5845_s15 + $0x1018] sm:$0xff] %v1284_v3  ;;  %v1288_v5 = vld [vmem:[%s5840_s14 + $0x2048] sm:$0xff]  ;;  %v1290_v6 = vld [vmem:[%s5840_s14 + $0x2050] sm:$0xff] }
 0x112   : > { %1287 = vst [vmem:[%s5845_s15 + $0x1020] sm:$0xff] %v1286_v4  ;;  %1289 = vst [vmem:[%s5845_s15 + $0x1028] sm:$0xff] %v1288_v5  ;;  %v1292_v7 = vld [vmem:[%s5840_s14 + $0x2058] sm:$0xff]  ;;  %v1294_v8 = vld [vmem:[%s5840_s14 + $0x2080] sm:$0xff] }
 0x113   : > { %1291 = vst [vmem:[%s5845_s15 + $0x1030] sm:$0xff] %v1290_v6  ;;  %v1296_v9 = vld [vmem:[%s5840_s14 + $0x2088] sm:$0xff]  ;;  %1293 = vst [vmem:[%s5845_s15 + $0x1038] sm:$0xff] %v1292_v7  ;;  %v1298_v10 = vld [vmem:[%s5840_s14 + $0x2090] sm:$0xff] }
 0x114   : > { %1295 = vst [vmem:[%s5845_s15 + $0x1040] sm:$0xff] %v1294_v8  ;;  %1297 = vst [vmem:[%s5845_s15 + $0x1048] sm:$0xff] %v1296_v9  ;;  %v1300_v11 = vld [vmem:[%s5840_s14 + $0x2098] sm:$0xff]  ;;  %v1302_v12 = vld [vmem:[%s5840_s14 + $0x20c0] sm:$0xff] }
 0x115   : > { %1299 = vst [vmem:[%s5845_s15 + $0x1050] sm:$0xff] %v1298_v10  ;;  %1301 = vst [vmem:[%s5845_s15 + $0x1058] sm:$0xff] %v1300_v11  ;;  %v1304_v13 = vld [vmem:[%s5840_s14 + $0x20c8] sm:$0xff]  ;;  %v1306_v14 = vld [vmem:[%s5840_s14 + $0x20d0] sm:$0xff] }
 0x116   : > { %1303 = vst [vmem:[%s5845_s15 + $0x1060] sm:$0xff] %v1302_v12  ;;  %v1308_v15 = vld [vmem:[%s5840_s14 + $0x20d8] sm:$0xff]  ;;  %1305 = vst [vmem:[%s5845_s15 + $0x1068] sm:$0xff] %v1304_v13  ;;  %v1310_v16 = vld [vmem:[%s5840_s14 + $0x2100] sm:$0xff] }
 0x117   : > { %1307 = vst [vmem:[%s5845_s15 + $0x1070] sm:$0xff] %v1306_v14  ;;  %1309 = vst [vmem:[%s5845_s15 + $0x1078] sm:$0xff] %v1308_v15  ;;  %v1312_v17 = vld [vmem:[%s5840_s14 + $0x2108] sm:$0xff]  ;;  %v1314_v18 = vld [vmem:[%s5840_s14 + $0x2110] sm:$0xff] }
 0x118   : > { %1311 = vst [vmem:[%s5845_s15 + $0x1080] sm:$0xff] %v1310_v16  ;;  %1313 = vst [vmem:[%s5845_s15 + $0x1088] sm:$0xff] %v1312_v17  ;;  %v1316_v19 = vld [vmem:[%s5840_s14 + $0x2118] sm:$0xff]  ;;  %v1318_v20 = vld [vmem:[%s5840_s14 + $0x2140] sm:$0xff] }
 0x119   : > { %1315 = vst [vmem:[%s5845_s15 + $0x1090] sm:$0xff] %v1314_v18  ;;  %v1320_v21 = vld [vmem:[%s5840_s14 + $0x2148] sm:$0xff]  ;;  %1317 = vst [vmem:[%s5845_s15 + $0x1098] sm:$0xff] %v1316_v19  ;;  %v1322_v22 = vld [vmem:[%s5840_s14 + $0x2150] sm:$0xff] }
 0x11a   : > { %1319 = vst [vmem:[%s5845_s15 + $0x10a0] sm:$0xff] %v1318_v20  ;;  %1321 = vst [vmem:[%s5845_s15 + $0x10a8] sm:$0xff] %v1320_v21  ;;  %v1324_v23 = vld [vmem:[%s5840_s14 + $0x2158] sm:$0xff]  ;;  %v1326_v24 = vld [vmem:[%s5840_s14 + $0x2180] sm:$0xff] }
 0x11b   : > { %1323 = vst [vmem:[%s5845_s15 + $0x10b0] sm:$0xff] %v1322_v22  ;;  %1325 = vst [vmem:[%s5845_s15 + $0x10b8] sm:$0xff] %v1324_v23  ;;  %v1328_v25 = vld [vmem:[%s5840_s14 + $0x2188] sm:$0xff]  ;;  %v1330_v26 = vld [vmem:[%s5840_s14 + $0x2190] sm:$0xff] }
 0x11c   : > { %1327 = vst [vmem:[%s5845_s15 + $0x10c0] sm:$0xff] %v1326_v24  ;;  %v1332_v27 = vld [vmem:[%s5840_s14 + $0x2198] sm:$0xff]  ;;  %1329 = vst [vmem:[%s5845_s15 + $0x10c8] sm:$0xff] %v1328_v25  ;;  %v1334_v28 = vld [vmem:[%s5840_s14 + $0x21c0] sm:$0xff] }
 0x11d   : > { %1331 = vst [vmem:[%s5845_s15 + $0x10d0] sm:$0xff] %v1330_v26  ;;  %1333 = vst [vmem:[%s5845_s15 + $0x10d8] sm:$0xff] %v1332_v27  ;;  %v1336_v29 = vld [vmem:[%s5840_s14 + $0x21c8] sm:$0xff]  ;;  %v1338_v30 = vld [vmem:[%s5840_s14 + $0x21d0] sm:$0xff] }
 0x11e   : > { %1335 = vst [vmem:[%s5845_s15 + $0x10e0] sm:$0xff] %v1334_v28  ;;  %1337 = vst [vmem:[%s5845_s15 + $0x10e8] sm:$0xff] %v1336_v29  ;;  %v1340_v31 = vld [vmem:[%s5840_s14 + $0x21d8] sm:$0xff]  ;;  %v1342_v32 = vld [vmem:[%s5840_s14 + $0x2200] sm:$0xff] }
 0x11f   : > { %1339 = vst [vmem:[%s5845_s15 + $0x10f0] sm:$0xff] %v1338_v30  ;;  %v1344_v33 = vld [vmem:[%s5840_s14 + $0x2208] sm:$0xff]  ;;  %1341 = vst [vmem:[%s5845_s15 + $0x10f8] sm:$0xff] %v1340_v31  ;;  %v1346_v34 = vld [vmem:[%s5840_s14 + $0x2210] sm:$0xff] }
 0x120   : > { %1343 = vst [vmem:[%s5845_s15 + $0x1100] sm:$0xff] %v1342_v32  ;;  %1345 = vst [vmem:[%s5845_s15 + $0x1108] sm:$0xff] %v1344_v33  ;;  %v1348_v35 = vld [vmem:[%s5840_s14 + $0x2218] sm:$0xff]  ;;  %v1350_v36 = vld [vmem:[%s5840_s14 + $0x2240] sm:$0xff] }
 0x121   : > { %1347 = vst [vmem:[%s5845_s15 + $0x1110] sm:$0xff] %v1346_v34  ;;  %1349 = vst [vmem:[%s5845_s15 + $0x1118] sm:$0xff] %v1348_v35  ;;  %v1352_v37 = vld [vmem:[%s5840_s14 + $0x2248] sm:$0xff]  ;;  %v1354_v38 = vld [vmem:[%s5840_s14 + $0x2250] sm:$0xff] }
 0x122   : > { %1351 = vst [vmem:[%s5845_s15 + $0x1120] sm:$0xff] %v1350_v36  ;;  %v1356_v39 = vld [vmem:[%s5840_s14 + $0x2258] sm:$0xff]  ;;  %1353 = vst [vmem:[%s5845_s15 + $0x1128] sm:$0xff] %v1352_v37  ;;  %v1358_v40 = vld [vmem:[%s5840_s14 + $0x2280] sm:$0xff] }
 0x123   : > { %1355 = vst [vmem:[%s5845_s15 + $0x1130] sm:$0xff] %v1354_v38  ;;  %1357 = vst [vmem:[%s5845_s15 + $0x1138] sm:$0xff] %v1356_v39  ;;  %v1360_v41 = vld [vmem:[%s5840_s14 + $0x2288] sm:$0xff]  ;;  %v1362_v42 = vld [vmem:[%s5840_s14 + $0x2290] sm:$0xff] }
 0x124   : > { %1359 = vst [vmem:[%s5845_s15 + $0x1140] sm:$0xff] %v1358_v40  ;;  %1361 = vst [vmem:[%s5845_s15 + $0x1148] sm:$0xff] %v1360_v41  ;;  %v1364_v43 = vld [vmem:[%s5840_s14 + $0x2298] sm:$0xff]  ;;  %v1366_v44 = vld [vmem:[%s5840_s14 + $0x22c0] sm:$0xff] }
 0x125   : > { %1363 = vst [vmem:[%s5845_s15 + $0x1150] sm:$0xff] %v1362_v42  ;;  %v1368_v45 = vld [vmem:[%s5840_s14 + $0x22c8] sm:$0xff]  ;;  %1365 = vst [vmem:[%s5845_s15 + $0x1158] sm:$0xff] %v1364_v43  ;;  %v1370_v46 = vld [vmem:[%s5840_s14 + $0x22d0] sm:$0xff] }
 0x126   : > { %1367 = vst [vmem:[%s5845_s15 + $0x1160] sm:$0xff] %v1366_v44  ;;  %1369 = vst [vmem:[%s5845_s15 + $0x1168] sm:$0xff] %v1368_v45  ;;  %v1372_v47 = vld [vmem:[%s5840_s14 + $0x22d8] sm:$0xff]  ;;  %v1374_v48 = vld [vmem:[%s5840_s14 + $0x2300] sm:$0xff] }
 0x127   : > { %1371 = vst [vmem:[%s5845_s15 + $0x1170] sm:$0xff] %v1370_v46  ;;  %1373 = vst [vmem:[%s5845_s15 + $0x1178] sm:$0xff] %v1372_v47  ;;  %v1376_v49 = vld [vmem:[%s5840_s14 + $0x2308] sm:$0xff]  ;;  %v1378_v50 = vld [vmem:[%s5840_s14 + $0x2310] sm:$0xff] }
 0x128   : > { %1375 = vst [vmem:[%s5845_s15 + $0x1180] sm:$0xff] %v1374_v48  ;;  %v1380_v51 = vld [vmem:[%s5840_s14 + $0x2318] sm:$0xff]  ;;  %1377 = vst [vmem:[%s5845_s15 + $0x1188] sm:$0xff] %v1376_v49  ;;  %v1382_v52 = vld [vmem:[%s5840_s14 + $0x2340] sm:$0xff] }
 0x129   : > { %1379 = vst [vmem:[%s5845_s15 + $0x1190] sm:$0xff] %v1378_v50  ;;  %1381 = vst [vmem:[%s5845_s15 + $0x1198] sm:$0xff] %v1380_v51  ;;  %v1384_v53 = vld [vmem:[%s5840_s14 + $0x2348] sm:$0xff]  ;;  %v1386_v54 = vld [vmem:[%s5840_s14 + $0x2350] sm:$0xff] }
 0x12a   : > { %1383 = vst [vmem:[%s5845_s15 + $0x11a0] sm:$0xff] %v1382_v52  ;;  %1385 = vst [vmem:[%s5845_s15 + $0x11a8] sm:$0xff] %v1384_v53  ;;  %v1388_v55 = vld [vmem:[%s5840_s14 + $0x2358] sm:$0xff]  ;;  %v1390_v56 = vld [vmem:[%s5840_s14 + $0x2380] sm:$0xff] }
 0x12b   : > { %1387 = vst [vmem:[%s5845_s15 + $0x11b0] sm:$0xff] %v1386_v54  ;;  %v1392_v57 = vld [vmem:[%s5840_s14 + $0x2388] sm:$0xff]  ;;  %1389 = vst [vmem:[%s5845_s15 + $0x11b8] sm:$0xff] %v1388_v55  ;;  %v1394_v58 = vld [vmem:[%s5840_s14 + $0x2390] sm:$0xff] }
 0x12c   : > { %1391 = vst [vmem:[%s5845_s15 + $0x11c0] sm:$0xff] %v1390_v56  ;;  %1393 = vst [vmem:[%s5845_s15 + $0x11c8] sm:$0xff] %v1392_v57  ;;  %v1396_v59 = vld [vmem:[%s5840_s14 + $0x2398] sm:$0xff]  ;;  %v1398_v60 = vld [vmem:[%s5840_s14 + $0x23c0] sm:$0xff] }
 0x12d   : > { %1395 = vst [vmem:[%s5845_s15 + $0x11d0] sm:$0xff] %v1394_v58  ;;  %1397 = vst [vmem:[%s5845_s15 + $0x11d8] sm:$0xff] %v1396_v59  ;;  %v1400_v61 = vld [vmem:[%s5840_s14 + $0x23c8] sm:$0xff]  ;;  %v1402_v62 = vld [vmem:[%s5840_s14 + $0x23d0] sm:$0xff] }
 0x12e   : > { %1399 = vst [vmem:[%s5845_s15 + $0x11e0] sm:$0xff] %v1398_v60  ;;  %v1404_v63 = vld [vmem:[%s5840_s14 + $0x23d8] sm:$0xff]  ;;  %1401 = vst [vmem:[%s5845_s15 + $0x11e8] sm:$0xff] %v1400_v61  ;;  %v1406_v0 = vld [vmem:[%s5840_s14 + $0x2400] sm:$0xff] }
 0x12f   : > { %1403 = vst [vmem:[%s5845_s15 + $0x11f0] sm:$0xff] %v1402_v62  ;;  %1405 = vst [vmem:[%s5845_s15 + $0x11f8] sm:$0xff] %v1404_v63  ;;  %v1408_v1 = vld [vmem:[%s5840_s14 + $0x2408] sm:$0xff]  ;;  %v1410_v2 = vld [vmem:[%s5840_s14 + $0x2410] sm:$0xff] }
 0x130   : > { %1407 = vst [vmem:[%s5845_s15 + $0x1200] sm:$0xff] %v1406_v0  ;;  %1409 = vst [vmem:[%s5845_s15 + $0x1208] sm:$0xff] %v1408_v1  ;;  %v1412_v3 = vld [vmem:[%s5840_s14 + $0x2418] sm:$0xff]  ;;  %v1414_v4 = vld [vmem:[%s5840_s14 + $0x2440] sm:$0xff] }
 0x131   : > { %1411 = vst [vmem:[%s5845_s15 + $0x1210] sm:$0xff] %v1410_v2  ;;  %v1416_v5 = vld [vmem:[%s5840_s14 + $0x2448] sm:$0xff]  ;;  %1413 = vst [vmem:[%s5845_s15 + $0x1218] sm:$0xff] %v1412_v3  ;;  %v1418_v6 = vld [vmem:[%s5840_s14 + $0x2450] sm:$0xff] }
 0x132   : > { %1415 = vst [vmem:[%s5845_s15 + $0x1220] sm:$0xff] %v1414_v4  ;;  %1417 = vst [vmem:[%s5845_s15 + $0x1228] sm:$0xff] %v1416_v5  ;;  %v1420_v7 = vld [vmem:[%s5840_s14 + $0x2458] sm:$0xff]  ;;  %v1422_v8 = vld [vmem:[%s5840_s14 + $0x2480] sm:$0xff] }
 0x133   : > { %1419 = vst [vmem:[%s5845_s15 + $0x1230] sm:$0xff] %v1418_v6  ;;  %1421 = vst [vmem:[%s5845_s15 + $0x1238] sm:$0xff] %v1420_v7  ;;  %v1424_v9 = vld [vmem:[%s5840_s14 + $0x2488] sm:$0xff]  ;;  %v1426_v10 = vld [vmem:[%s5840_s14 + $0x2490] sm:$0xff] }
 0x134   : > { %1423 = vst [vmem:[%s5845_s15 + $0x1240] sm:$0xff] %v1422_v8  ;;  %v1428_v11 = vld [vmem:[%s5840_s14 + $0x2498] sm:$0xff]  ;;  %1425 = vst [vmem:[%s5845_s15 + $0x1248] sm:$0xff] %v1424_v9  ;;  %v1430_v12 = vld [vmem:[%s5840_s14 + $0x24c0] sm:$0xff] }
 0x135   : > { %1427 = vst [vmem:[%s5845_s15 + $0x1250] sm:$0xff] %v1426_v10  ;;  %1429 = vst [vmem:[%s5845_s15 + $0x1258] sm:$0xff] %v1428_v11  ;;  %v1432_v13 = vld [vmem:[%s5840_s14 + $0x24c8] sm:$0xff]  ;;  %v1434_v14 = vld [vmem:[%s5840_s14 + $0x24d0] sm:$0xff] }
 0x136   : > { %1431 = vst [vmem:[%s5845_s15 + $0x1260] sm:$0xff] %v1430_v12  ;;  %1433 = vst [vmem:[%s5845_s15 + $0x1268] sm:$0xff] %v1432_v13  ;;  %v1436_v15 = vld [vmem:[%s5840_s14 + $0x24d8] sm:$0xff]  ;;  %v1438_v16 = vld [vmem:[%s5840_s14 + $0x2500] sm:$0xff] }
 0x137   : > { %1435 = vst [vmem:[%s5845_s15 + $0x1270] sm:$0xff] %v1434_v14  ;;  %v1440_v17 = vld [vmem:[%s5840_s14 + $0x2508] sm:$0xff]  ;;  %1437 = vst [vmem:[%s5845_s15 + $0x1278] sm:$0xff] %v1436_v15  ;;  %v1442_v18 = vld [vmem:[%s5840_s14 + $0x2510] sm:$0xff] }
 0x138   : > { %1439 = vst [vmem:[%s5845_s15 + $0x1280] sm:$0xff] %v1438_v16  ;;  %1441 = vst [vmem:[%s5845_s15 + $0x1288] sm:$0xff] %v1440_v17  ;;  %v1444_v19 = vld [vmem:[%s5840_s14 + $0x2518] sm:$0xff]  ;;  %v1446_v20 = vld [vmem:[%s5840_s14 + $0x2540] sm:$0xff] }
 0x139   : > { %1443 = vst [vmem:[%s5845_s15 + $0x1290] sm:$0xff] %v1442_v18  ;;  %1445 = vst [vmem:[%s5845_s15 + $0x1298] sm:$0xff] %v1444_v19  ;;  %v1448_v21 = vld [vmem:[%s5840_s14 + $0x2548] sm:$0xff]  ;;  %v1450_v22 = vld [vmem:[%s5840_s14 + $0x2550] sm:$0xff] }
 0x13a   : > { %1447 = vst [vmem:[%s5845_s15 + $0x12a0] sm:$0xff] %v1446_v20  ;;  %v1452_v23 = vld [vmem:[%s5840_s14 + $0x2558] sm:$0xff]  ;;  %1449 = vst [vmem:[%s5845_s15 + $0x12a8] sm:$0xff] %v1448_v21  ;;  %v1454_v24 = vld [vmem:[%s5840_s14 + $0x2580] sm:$0xff] }
 0x13b   : > { %1451 = vst [vmem:[%s5845_s15 + $0x12b0] sm:$0xff] %v1450_v22  ;;  %1453 = vst [vmem:[%s5845_s15 + $0x12b8] sm:$0xff] %v1452_v23  ;;  %v1456_v25 = vld [vmem:[%s5840_s14 + $0x2588] sm:$0xff]  ;;  %v1458_v26 = vld [vmem:[%s5840_s14 + $0x2590] sm:$0xff] }
 0x13c   : > { %1455 = vst [vmem:[%s5845_s15 + $0x12c0] sm:$0xff] %v1454_v24  ;;  %1457 = vst [vmem:[%s5845_s15 + $0x12c8] sm:$0xff] %v1456_v25  ;;  %v1460_v27 = vld [vmem:[%s5840_s14 + $0x2598] sm:$0xff]  ;;  %v1462_v28 = vld [vmem:[%s5840_s14 + $0x25c0] sm:$0xff] }
 0x13d   : > { %1459 = vst [vmem:[%s5845_s15 + $0x12d0] sm:$0xff] %v1458_v26  ;;  %v1464_v29 = vld [vmem:[%s5840_s14 + $0x25c8] sm:$0xff]  ;;  %1461 = vst [vmem:[%s5845_s15 + $0x12d8] sm:$0xff] %v1460_v27  ;;  %v1466_v30 = vld [vmem:[%s5840_s14 + $0x25d0] sm:$0xff] }
 0x13e   : > { %1463 = vst [vmem:[%s5845_s15 + $0x12e0] sm:$0xff] %v1462_v28  ;;  %1465 = vst [vmem:[%s5845_s15 + $0x12e8] sm:$0xff] %v1464_v29  ;;  %v1468_v31 = vld [vmem:[%s5840_s14 + $0x25d8] sm:$0xff]  ;;  %v1470_v32 = vld [vmem:[%s5840_s14 + $0x2600] sm:$0xff] }
 0x13f   : > { %1467 = vst [vmem:[%s5845_s15 + $0x12f0] sm:$0xff] %v1466_v30  ;;  %1469 = vst [vmem:[%s5845_s15 + $0x12f8] sm:$0xff] %v1468_v31  ;;  %v1472_v33 = vld [vmem:[%s5840_s14 + $0x2608] sm:$0xff]  ;;  %v1474_v34 = vld [vmem:[%s5840_s14 + $0x2610] sm:$0xff] }
 0x140   : > { %1471 = vst [vmem:[%s5845_s15 + $0x1300] sm:$0xff] %v1470_v32  ;;  %v1476_v35 = vld [vmem:[%s5840_s14 + $0x2618] sm:$0xff]  ;;  %1473 = vst [vmem:[%s5845_s15 + $0x1308] sm:$0xff] %v1472_v33  ;;  %v1478_v36 = vld [vmem:[%s5840_s14 + $0x2640] sm:$0xff] }
 0x141   : > { %1475 = vst [vmem:[%s5845_s15 + $0x1310] sm:$0xff] %v1474_v34  ;;  %1477 = vst [vmem:[%s5845_s15 + $0x1318] sm:$0xff] %v1476_v35  ;;  %v1480_v37 = vld [vmem:[%s5840_s14 + $0x2648] sm:$0xff]  ;;  %v1482_v38 = vld [vmem:[%s5840_s14 + $0x2650] sm:$0xff] }
 0x142   : > { %1479 = vst [vmem:[%s5845_s15 + $0x1320] sm:$0xff] %v1478_v36  ;;  %1481 = vst [vmem:[%s5845_s15 + $0x1328] sm:$0xff] %v1480_v37  ;;  %v1484_v39 = vld [vmem:[%s5840_s14 + $0x2658] sm:$0xff]  ;;  %v1486_v40 = vld [vmem:[%s5840_s14 + $0x2680] sm:$0xff] }
 0x143   : > { %1483 = vst [vmem:[%s5845_s15 + $0x1330] sm:$0xff] %v1482_v38  ;;  %v1488_v41 = vld [vmem:[%s5840_s14 + $0x2688] sm:$0xff]  ;;  %1485 = vst [vmem:[%s5845_s15 + $0x1338] sm:$0xff] %v1484_v39  ;;  %v1490_v42 = vld [vmem:[%s5840_s14 + $0x2690] sm:$0xff] }
 0x144   : > { %1487 = vst [vmem:[%s5845_s15 + $0x1340] sm:$0xff] %v1486_v40  ;;  %1489 = vst [vmem:[%s5845_s15 + $0x1348] sm:$0xff] %v1488_v41  ;;  %v1492_v43 = vld [vmem:[%s5840_s14 + $0x2698] sm:$0xff]  ;;  %v1494_v44 = vld [vmem:[%s5840_s14 + $0x26c0] sm:$0xff] }
 0x145   : > { %1491 = vst [vmem:[%s5845_s15 + $0x1350] sm:$0xff] %v1490_v42  ;;  %1493 = vst [vmem:[%s5845_s15 + $0x1358] sm:$0xff] %v1492_v43  ;;  %v1496_v45 = vld [vmem:[%s5840_s14 + $0x26c8] sm:$0xff]  ;;  %v1498_v46 = vld [vmem:[%s5840_s14 + $0x26d0] sm:$0xff] }
 0x146   : > { %1495 = vst [vmem:[%s5845_s15 + $0x1360] sm:$0xff] %v1494_v44  ;;  %v1500_v47 = vld [vmem:[%s5840_s14 + $0x26d8] sm:$0xff]  ;;  %1497 = vst [vmem:[%s5845_s15 + $0x1368] sm:$0xff] %v1496_v45  ;;  %v1502_v48 = vld [vmem:[%s5840_s14 + $0x2700] sm:$0xff] }
 0x147   : > { %1499 = vst [vmem:[%s5845_s15 + $0x1370] sm:$0xff] %v1498_v46  ;;  %1501 = vst [vmem:[%s5845_s15 + $0x1378] sm:$0xff] %v1500_v47  ;;  %v1504_v49 = vld [vmem:[%s5840_s14 + $0x2708] sm:$0xff]  ;;  %v1506_v50 = vld [vmem:[%s5840_s14 + $0x2710] sm:$0xff] }
 0x148   : > { %1503 = vst [vmem:[%s5845_s15 + $0x1380] sm:$0xff] %v1502_v48  ;;  %1505 = vst [vmem:[%s5845_s15 + $0x1388] sm:$0xff] %v1504_v49  ;;  %v1508_v51 = vld [vmem:[%s5840_s14 + $0x2718] sm:$0xff]  ;;  %v1510_v52 = vld [vmem:[%s5840_s14 + $0x2740] sm:$0xff] }
 0x149   : > { %1507 = vst [vmem:[%s5845_s15 + $0x1390] sm:$0xff] %v1506_v50  ;;  %v1512_v53 = vld [vmem:[%s5840_s14 + $0x2748] sm:$0xff]  ;;  %1509 = vst [vmem:[%s5845_s15 + $0x1398] sm:$0xff] %v1508_v51  ;;  %v1514_v54 = vld [vmem:[%s5840_s14 + $0x2750] sm:$0xff] }
 0x14a   : > { %1511 = vst [vmem:[%s5845_s15 + $0x13a0] sm:$0xff] %v1510_v52  ;;  %1513 = vst [vmem:[%s5845_s15 + $0x13a8] sm:$0xff] %v1512_v53  ;;  %v1516_v55 = vld [vmem:[%s5840_s14 + $0x2758] sm:$0xff]  ;;  %v1518_v56 = vld [vmem:[%s5840_s14 + $0x2780] sm:$0xff] }
 0x14b   : > { %1515 = vst [vmem:[%s5845_s15 + $0x13b0] sm:$0xff] %v1514_v54  ;;  %1517 = vst [vmem:[%s5845_s15 + $0x13b8] sm:$0xff] %v1516_v55  ;;  %v1520_v57 = vld [vmem:[%s5840_s14 + $0x2788] sm:$0xff]  ;;  %v1522_v58 = vld [vmem:[%s5840_s14 + $0x2790] sm:$0xff] }
 0x14c   : > { %1519 = vst [vmem:[%s5845_s15 + $0x13c0] sm:$0xff] %v1518_v56  ;;  %v1524_v59 = vld [vmem:[%s5840_s14 + $0x2798] sm:$0xff]  ;;  %1521 = vst [vmem:[%s5845_s15 + $0x13c8] sm:$0xff] %v1520_v57  ;;  %v1526_v60 = vld [vmem:[%s5840_s14 + $0x27c0] sm:$0xff] }
 0x14d   : > { %1523 = vst [vmem:[%s5845_s15 + $0x13d0] sm:$0xff] %v1522_v58  ;;  %1525 = vst [vmem:[%s5845_s15 + $0x13d8] sm:$0xff] %v1524_v59  ;;  %v1528_v61 = vld [vmem:[%s5840_s14 + $0x27c8] sm:$0xff]  ;;  %v1530_v62 = vld [vmem:[%s5840_s14 + $0x27d0] sm:$0xff] }
 0x14e   : > { %1527 = vst [vmem:[%s5845_s15 + $0x13e0] sm:$0xff] %v1526_v60  ;;  %1529 = vst [vmem:[%s5845_s15 + $0x13e8] sm:$0xff] %v1528_v61  ;;  %v1532_v63 = vld [vmem:[%s5840_s14 + $0x27d8] sm:$0xff]  ;;  %v1534_v0 = vld [vmem:[%s5840_s14 + $0x2800] sm:$0xff] }
 0x14f   : > { %1531 = vst [vmem:[%s5845_s15 + $0x13f0] sm:$0xff] %v1530_v62  ;;  %v1536_v1 = vld [vmem:[%s5840_s14 + $0x2808] sm:$0xff]  ;;  %1533 = vst [vmem:[%s5845_s15 + $0x13f8] sm:$0xff] %v1532_v63  ;;  %v1538_v2 = vld [vmem:[%s5840_s14 + $0x2810] sm:$0xff] }
 0x150   : > { %1535 = vst [vmem:[%s5845_s15 + $0x1400] sm:$0xff] %v1534_v0  ;;  %1537 = vst [vmem:[%s5845_s15 + $0x1408] sm:$0xff] %v1536_v1  ;;  %v1540_v3 = vld [vmem:[%s5840_s14 + $0x2818] sm:$0xff]  ;;  %v1542_v4 = vld [vmem:[%s5840_s14 + $0x2840] sm:$0xff] }
 0x151   : > { %1539 = vst [vmem:[%s5845_s15 + $0x1410] sm:$0xff] %v1538_v2  ;;  %1541 = vst [vmem:[%s5845_s15 + $0x1418] sm:$0xff] %v1540_v3  ;;  %v1544_v5 = vld [vmem:[%s5840_s14 + $0x2848] sm:$0xff]  ;;  %v1546_v6 = vld [vmem:[%s5840_s14 + $0x2850] sm:$0xff] }
 0x152   : > { %1543 = vst [vmem:[%s5845_s15 + $0x1420] sm:$0xff] %v1542_v4  ;;  %v1548_v7 = vld [vmem:[%s5840_s14 + $0x2858] sm:$0xff]  ;;  %1545 = vst [vmem:[%s5845_s15 + $0x1428] sm:$0xff] %v1544_v5  ;;  %v1550_v8 = vld [vmem:[%s5840_s14 + $0x2880] sm:$0xff] }
 0x153   : > { %1547 = vst [vmem:[%s5845_s15 + $0x1430] sm:$0xff] %v1546_v6  ;;  %1549 = vst [vmem:[%s5845_s15 + $0x1438] sm:$0xff] %v1548_v7  ;;  %v1552_v9 = vld [vmem:[%s5840_s14 + $0x2888] sm:$0xff]  ;;  %v1554_v10 = vld [vmem:[%s5840_s14 + $0x2890] sm:$0xff] }
 0x154   : > { %1551 = vst [vmem:[%s5845_s15 + $0x1440] sm:$0xff] %v1550_v8  ;;  %1553 = vst [vmem:[%s5845_s15 + $0x1448] sm:$0xff] %v1552_v9  ;;  %v1556_v11 = vld [vmem:[%s5840_s14 + $0x2898] sm:$0xff]  ;;  %v1558_v12 = vld [vmem:[%s5840_s14 + $0x28c0] sm:$0xff] }
 0x155   : > { %1555 = vst [vmem:[%s5845_s15 + $0x1450] sm:$0xff] %v1554_v10  ;;  %v1560_v13 = vld [vmem:[%s5840_s14 + $0x28c8] sm:$0xff]  ;;  %1557 = vst [vmem:[%s5845_s15 + $0x1458] sm:$0xff] %v1556_v11  ;;  %v1562_v14 = vld [vmem:[%s5840_s14 + $0x28d0] sm:$0xff] }
 0x156   : > { %1559 = vst [vmem:[%s5845_s15 + $0x1460] sm:$0xff] %v1558_v12  ;;  %1561 = vst [vmem:[%s5845_s15 + $0x1468] sm:$0xff] %v1560_v13  ;;  %v1564_v15 = vld [vmem:[%s5840_s14 + $0x28d8] sm:$0xff]  ;;  %v1566_v16 = vld [vmem:[%s5840_s14 + $0x2900] sm:$0xff] }
 0x157   : > { %1563 = vst [vmem:[%s5845_s15 + $0x1470] sm:$0xff] %v1562_v14  ;;  %1565 = vst [vmem:[%s5845_s15 + $0x1478] sm:$0xff] %v1564_v15  ;;  %v1568_v17 = vld [vmem:[%s5840_s14 + $0x2908] sm:$0xff]  ;;  %v1570_v18 = vld [vmem:[%s5840_s14 + $0x2910] sm:$0xff] }
 0x158   : > { %1567 = vst [vmem:[%s5845_s15 + $0x1480] sm:$0xff] %v1566_v16  ;;  %v1572_v19 = vld [vmem:[%s5840_s14 + $0x2918] sm:$0xff]  ;;  %1569 = vst [vmem:[%s5845_s15 + $0x1488] sm:$0xff] %v1568_v17  ;;  %v1574_v20 = vld [vmem:[%s5840_s14 + $0x2940] sm:$0xff] }
 0x159   : > { %1571 = vst [vmem:[%s5845_s15 + $0x1490] sm:$0xff] %v1570_v18  ;;  %1573 = vst [vmem:[%s5845_s15 + $0x1498] sm:$0xff] %v1572_v19  ;;  %v1576_v21 = vld [vmem:[%s5840_s14 + $0x2948] sm:$0xff]  ;;  %v1578_v22 = vld [vmem:[%s5840_s14 + $0x2950] sm:$0xff] }
 0x15a   : > { %1575 = vst [vmem:[%s5845_s15 + $0x14a0] sm:$0xff] %v1574_v20  ;;  %1577 = vst [vmem:[%s5845_s15 + $0x14a8] sm:$0xff] %v1576_v21  ;;  %v1580_v23 = vld [vmem:[%s5840_s14 + $0x2958] sm:$0xff]  ;;  %v1582_v24 = vld [vmem:[%s5840_s14 + $0x2980] sm:$0xff] }
 0x15b   : > { %1579 = vst [vmem:[%s5845_s15 + $0x14b0] sm:$0xff] %v1578_v22  ;;  %v1584_v25 = vld [vmem:[%s5840_s14 + $0x2988] sm:$0xff]  ;;  %1581 = vst [vmem:[%s5845_s15 + $0x14b8] sm:$0xff] %v1580_v23  ;;  %v1586_v26 = vld [vmem:[%s5840_s14 + $0x2990] sm:$0xff] }
 0x15c   : > { %1583 = vst [vmem:[%s5845_s15 + $0x14c0] sm:$0xff] %v1582_v24  ;;  %1585 = vst [vmem:[%s5845_s15 + $0x14c8] sm:$0xff] %v1584_v25  ;;  %v1588_v27 = vld [vmem:[%s5840_s14 + $0x2998] sm:$0xff]  ;;  %v1590_v28 = vld [vmem:[%s5840_s14 + $0x29c0] sm:$0xff] }
 0x15d   : > { %1587 = vst [vmem:[%s5845_s15 + $0x14d0] sm:$0xff] %v1586_v26  ;;  %1589 = vst [vmem:[%s5845_s15 + $0x14d8] sm:$0xff] %v1588_v27  ;;  %v1592_v29 = vld [vmem:[%s5840_s14 + $0x29c8] sm:$0xff]  ;;  %v1594_v30 = vld [vmem:[%s5840_s14 + $0x29d0] sm:$0xff] }
 0x15e   : > { %1591 = vst [vmem:[%s5845_s15 + $0x14e0] sm:$0xff] %v1590_v28  ;;  %v1596_v31 = vld [vmem:[%s5840_s14 + $0x29d8] sm:$0xff]  ;;  %1593 = vst [vmem:[%s5845_s15 + $0x14e8] sm:$0xff] %v1592_v29  ;;  %v1598_v32 = vld [vmem:[%s5840_s14 + $0x2a00] sm:$0xff] }
 0x15f   : > { %1595 = vst [vmem:[%s5845_s15 + $0x14f0] sm:$0xff] %v1594_v30  ;;  %1597 = vst [vmem:[%s5845_s15 + $0x14f8] sm:$0xff] %v1596_v31  ;;  %v1600_v33 = vld [vmem:[%s5840_s14 + $0x2a08] sm:$0xff]  ;;  %v1602_v34 = vld [vmem:[%s5840_s14 + $0x2a10] sm:$0xff] }
 0x160   : > { %1599 = vst [vmem:[%s5845_s15 + $0x1500] sm:$0xff] %v1598_v32  ;;  %1601 = vst [vmem:[%s5845_s15 + $0x1508] sm:$0xff] %v1600_v33  ;;  %v1604_v35 = vld [vmem:[%s5840_s14 + $0x2a18] sm:$0xff]  ;;  %v1606_v36 = vld [vmem:[%s5840_s14 + $0x2a40] sm:$0xff] }
 0x161   : > { %1603 = vst [vmem:[%s5845_s15 + $0x1510] sm:$0xff] %v1602_v34  ;;  %v1608_v37 = vld [vmem:[%s5840_s14 + $0x2a48] sm:$0xff]  ;;  %1605 = vst [vmem:[%s5845_s15 + $0x1518] sm:$0xff] %v1604_v35  ;;  %v1610_v38 = vld [vmem:[%s5840_s14 + $0x2a50] sm:$0xff] }
 0x162   : > { %1607 = vst [vmem:[%s5845_s15 + $0x1520] sm:$0xff] %v1606_v36  ;;  %1609 = vst [vmem:[%s5845_s15 + $0x1528] sm:$0xff] %v1608_v37  ;;  %v1612_v39 = vld [vmem:[%s5840_s14 + $0x2a58] sm:$0xff]  ;;  %v1614_v40 = vld [vmem:[%s5840_s14 + $0x2a80] sm:$0xff] }
 0x163   : > { %1611 = vst [vmem:[%s5845_s15 + $0x1530] sm:$0xff] %v1610_v38  ;;  %1613 = vst [vmem:[%s5845_s15 + $0x1538] sm:$0xff] %v1612_v39  ;;  %v1616_v41 = vld [vmem:[%s5840_s14 + $0x2a88] sm:$0xff]  ;;  %v1618_v42 = vld [vmem:[%s5840_s14 + $0x2a90] sm:$0xff] }
 0x164   : > { %1615 = vst [vmem:[%s5845_s15 + $0x1540] sm:$0xff] %v1614_v40  ;;  %v1620_v43 = vld [vmem:[%s5840_s14 + $0x2a98] sm:$0xff]  ;;  %1617 = vst [vmem:[%s5845_s15 + $0x1548] sm:$0xff] %v1616_v41  ;;  %v1622_v44 = vld [vmem:[%s5840_s14 + $0x2ac0] sm:$0xff] }
 0x165   : > { %1619 = vst [vmem:[%s5845_s15 + $0x1550] sm:$0xff] %v1618_v42  ;;  %1621 = vst [vmem:[%s5845_s15 + $0x1558] sm:$0xff] %v1620_v43  ;;  %v1624_v45 = vld [vmem:[%s5840_s14 + $0x2ac8] sm:$0xff]  ;;  %v1626_v46 = vld [vmem:[%s5840_s14 + $0x2ad0] sm:$0xff] }
 0x166   : > { %1623 = vst [vmem:[%s5845_s15 + $0x1560] sm:$0xff] %v1622_v44  ;;  %1625 = vst [vmem:[%s5845_s15 + $0x1568] sm:$0xff] %v1624_v45  ;;  %v1628_v47 = vld [vmem:[%s5840_s14 + $0x2ad8] sm:$0xff]  ;;  %v1630_v48 = vld [vmem:[%s5840_s14 + $0x2b00] sm:$0xff] }
 0x167   : > { %1627 = vst [vmem:[%s5845_s15 + $0x1570] sm:$0xff] %v1626_v46  ;;  %v1632_v49 = vld [vmem:[%s5840_s14 + $0x2b08] sm:$0xff]  ;;  %1629 = vst [vmem:[%s5845_s15 + $0x1578] sm:$0xff] %v1628_v47  ;;  %v1634_v50 = vld [vmem:[%s5840_s14 + $0x2b10] sm:$0xff] }
 0x168   : > { %1631 = vst [vmem:[%s5845_s15 + $0x1580] sm:$0xff] %v1630_v48  ;;  %1633 = vst [vmem:[%s5845_s15 + $0x1588] sm:$0xff] %v1632_v49  ;;  %v1636_v51 = vld [vmem:[%s5840_s14 + $0x2b18] sm:$0xff]  ;;  %v1638_v52 = vld [vmem:[%s5840_s14 + $0x2b40] sm:$0xff] }
 0x169   : > { %1635 = vst [vmem:[%s5845_s15 + $0x1590] sm:$0xff] %v1634_v50  ;;  %1637 = vst [vmem:[%s5845_s15 + $0x1598] sm:$0xff] %v1636_v51  ;;  %v1640_v53 = vld [vmem:[%s5840_s14 + $0x2b48] sm:$0xff]  ;;  %v1642_v54 = vld [vmem:[%s5840_s14 + $0x2b50] sm:$0xff] }
 0x16a   : > { %1639 = vst [vmem:[%s5845_s15 + $0x15a0] sm:$0xff] %v1638_v52  ;;  %v1644_v55 = vld [vmem:[%s5840_s14 + $0x2b58] sm:$0xff]  ;;  %1641 = vst [vmem:[%s5845_s15 + $0x15a8] sm:$0xff] %v1640_v53  ;;  %v1646_v56 = vld [vmem:[%s5840_s14 + $0x2b80] sm:$0xff] }
 0x16b   : > { %1643 = vst [vmem:[%s5845_s15 + $0x15b0] sm:$0xff] %v1642_v54  ;;  %1645 = vst [vmem:[%s5845_s15 + $0x15b8] sm:$0xff] %v1644_v55  ;;  %v1648_v57 = vld [vmem:[%s5840_s14 + $0x2b88] sm:$0xff]  ;;  %v1650_v58 = vld [vmem:[%s5840_s14 + $0x2b90] sm:$0xff] }
 0x16c   : > { %1647 = vst [vmem:[%s5845_s15 + $0x15c0] sm:$0xff] %v1646_v56  ;;  %1649 = vst [vmem:[%s5845_s15 + $0x15c8] sm:$0xff] %v1648_v57  ;;  %v1652_v59 = vld [vmem:[%s5840_s14 + $0x2b98] sm:$0xff]  ;;  %v1654_v60 = vld [vmem:[%s5840_s14 + $0x2bc0] sm:$0xff] }
 0x16d   : > { %1651 = vst [vmem:[%s5845_s15 + $0x15d0] sm:$0xff] %v1650_v58  ;;  %v1656_v61 = vld [vmem:[%s5840_s14 + $0x2bc8] sm:$0xff]  ;;  %1653 = vst [vmem:[%s5845_s15 + $0x15d8] sm:$0xff] %v1652_v59  ;;  %v1658_v62 = vld [vmem:[%s5840_s14 + $0x2bd0] sm:$0xff] }
 0x16e   : > { %1655 = vst [vmem:[%s5845_s15 + $0x15e0] sm:$0xff] %v1654_v60  ;;  %1657 = vst [vmem:[%s5845_s15 + $0x15e8] sm:$0xff] %v1656_v61  ;;  %v1660_v63 = vld [vmem:[%s5840_s14 + $0x2bd8] sm:$0xff]  ;;  %v1662_v0 = vld [vmem:[%s5840_s14 + $0x2c00] sm:$0xff] }
 0x16f   : > { %1659 = vst [vmem:[%s5845_s15 + $0x15f0] sm:$0xff] %v1658_v62  ;;  %1661 = vst [vmem:[%s5845_s15 + $0x15f8] sm:$0xff] %v1660_v63  ;;  %v1664_v1 = vld [vmem:[%s5840_s14 + $0x2c08] sm:$0xff]  ;;  %v1666_v2 = vld [vmem:[%s5840_s14 + $0x2c10] sm:$0xff] }
 0x170   : > { %1663 = vst [vmem:[%s5845_s15 + $0x1600] sm:$0xff] %v1662_v0  ;;  %v1668_v3 = vld [vmem:[%s5840_s14 + $0x2c18] sm:$0xff]  ;;  %1665 = vst [vmem:[%s5845_s15 + $0x1608] sm:$0xff] %v1664_v1  ;;  %v1670_v4 = vld [vmem:[%s5840_s14 + $0x2c40] sm:$0xff] }
 0x171   : > { %1667 = vst [vmem:[%s5845_s15 + $0x1610] sm:$0xff] %v1666_v2  ;;  %1669 = vst [vmem:[%s5845_s15 + $0x1618] sm:$0xff] %v1668_v3  ;;  %v1672_v5 = vld [vmem:[%s5840_s14 + $0x2c48] sm:$0xff]  ;;  %v1674_v6 = vld [vmem:[%s5840_s14 + $0x2c50] sm:$0xff] }
 0x172   : > { %1671 = vst [vmem:[%s5845_s15 + $0x1620] sm:$0xff] %v1670_v4  ;;  %1673 = vst [vmem:[%s5845_s15 + $0x1628] sm:$0xff] %v1672_v5  ;;  %v1676_v7 = vld [vmem:[%s5840_s14 + $0x2c58] sm:$0xff]  ;;  %v1678_v8 = vld [vmem:[%s5840_s14 + $0x2c80] sm:$0xff] }
 0x173   : > { %1675 = vst [vmem:[%s5845_s15 + $0x1630] sm:$0xff] %v1674_v6  ;;  %v1680_v9 = vld [vmem:[%s5840_s14 + $0x2c88] sm:$0xff]  ;;  %1677 = vst [vmem:[%s5845_s15 + $0x1638] sm:$0xff] %v1676_v7  ;;  %v1682_v10 = vld [vmem:[%s5840_s14 + $0x2c90] sm:$0xff] }
 0x174   : > { %1679 = vst [vmem:[%s5845_s15 + $0x1640] sm:$0xff] %v1678_v8  ;;  %1681 = vst [vmem:[%s5845_s15 + $0x1648] sm:$0xff] %v1680_v9  ;;  %v1684_v11 = vld [vmem:[%s5840_s14 + $0x2c98] sm:$0xff]  ;;  %v1686_v12 = vld [vmem:[%s5840_s14 + $0x2cc0] sm:$0xff] }
 0x175   : > { %1683 = vst [vmem:[%s5845_s15 + $0x1650] sm:$0xff] %v1682_v10  ;;  %1685 = vst [vmem:[%s5845_s15 + $0x1658] sm:$0xff] %v1684_v11  ;;  %v1688_v13 = vld [vmem:[%s5840_s14 + $0x2cc8] sm:$0xff]  ;;  %v1690_v14 = vld [vmem:[%s5840_s14 + $0x2cd0] sm:$0xff] }
 0x176   : > { %1687 = vst [vmem:[%s5845_s15 + $0x1660] sm:$0xff] %v1686_v12  ;;  %v1692_v15 = vld [vmem:[%s5840_s14 + $0x2cd8] sm:$0xff]  ;;  %1689 = vst [vmem:[%s5845_s15 + $0x1668] sm:$0xff] %v1688_v13  ;;  %v1694_v16 = vld [vmem:[%s5840_s14 + $0x2d00] sm:$0xff] }
 0x177   : > { %1691 = vst [vmem:[%s5845_s15 + $0x1670] sm:$0xff] %v1690_v14  ;;  %1693 = vst [vmem:[%s5845_s15 + $0x1678] sm:$0xff] %v1692_v15  ;;  %v1696_v17 = vld [vmem:[%s5840_s14 + $0x2d08] sm:$0xff]  ;;  %v1698_v18 = vld [vmem:[%s5840_s14 + $0x2d10] sm:$0xff] }
 0x178   : > { %1695 = vst [vmem:[%s5845_s15 + $0x1680] sm:$0xff] %v1694_v16  ;;  %1697 = vst [vmem:[%s5845_s15 + $0x1688] sm:$0xff] %v1696_v17  ;;  %v1700_v19 = vld [vmem:[%s5840_s14 + $0x2d18] sm:$0xff]  ;;  %v1702_v20 = vld [vmem:[%s5840_s14 + $0x2d40] sm:$0xff] }
 0x179   : > { %1699 = vst [vmem:[%s5845_s15 + $0x1690] sm:$0xff] %v1698_v18  ;;  %v1704_v21 = vld [vmem:[%s5840_s14 + $0x2d48] sm:$0xff]  ;;  %1701 = vst [vmem:[%s5845_s15 + $0x1698] sm:$0xff] %v1700_v19  ;;  %v1706_v22 = vld [vmem:[%s5840_s14 + $0x2d50] sm:$0xff] }
 0x17a   : > { %1703 = vst [vmem:[%s5845_s15 + $0x16a0] sm:$0xff] %v1702_v20  ;;  %1705 = vst [vmem:[%s5845_s15 + $0x16a8] sm:$0xff] %v1704_v21  ;;  %v1708_v23 = vld [vmem:[%s5840_s14 + $0x2d58] sm:$0xff]  ;;  %v1710_v24 = vld [vmem:[%s5840_s14 + $0x2d80] sm:$0xff] }
 0x17b   : > { %1707 = vst [vmem:[%s5845_s15 + $0x16b0] sm:$0xff] %v1706_v22  ;;  %1709 = vst [vmem:[%s5845_s15 + $0x16b8] sm:$0xff] %v1708_v23  ;;  %v1712_v25 = vld [vmem:[%s5840_s14 + $0x2d88] sm:$0xff]  ;;  %v1714_v26 = vld [vmem:[%s5840_s14 + $0x2d90] sm:$0xff] }
 0x17c   : > { %1711 = vst [vmem:[%s5845_s15 + $0x16c0] sm:$0xff] %v1710_v24  ;;  %v1716_v27 = vld [vmem:[%s5840_s14 + $0x2d98] sm:$0xff]  ;;  %1713 = vst [vmem:[%s5845_s15 + $0x16c8] sm:$0xff] %v1712_v25  ;;  %v1718_v28 = vld [vmem:[%s5840_s14 + $0x2dc0] sm:$0xff] }
 0x17d   : > { %1715 = vst [vmem:[%s5845_s15 + $0x16d0] sm:$0xff] %v1714_v26  ;;  %1717 = vst [vmem:[%s5845_s15 + $0x16d8] sm:$0xff] %v1716_v27  ;;  %v1720_v29 = vld [vmem:[%s5840_s14 + $0x2dc8] sm:$0xff]  ;;  %v1722_v30 = vld [vmem:[%s5840_s14 + $0x2dd0] sm:$0xff] }
 0x17e   : > { %1719 = vst [vmem:[%s5845_s15 + $0x16e0] sm:$0xff] %v1718_v28  ;;  %1721 = vst [vmem:[%s5845_s15 + $0x16e8] sm:$0xff] %v1720_v29  ;;  %v1724_v31 = vld [vmem:[%s5840_s14 + $0x2dd8] sm:$0xff]  ;;  %v1726_v32 = vld [vmem:[%s5840_s14 + $0x2e00] sm:$0xff] }
 0x17f   : > { %1723 = vst [vmem:[%s5845_s15 + $0x16f0] sm:$0xff] %v1722_v30  ;;  %v1728_v33 = vld [vmem:[%s5840_s14 + $0x2e08] sm:$0xff]  ;;  %1725 = vst [vmem:[%s5845_s15 + $0x16f8] sm:$0xff] %v1724_v31  ;;  %v1730_v34 = vld [vmem:[%s5840_s14 + $0x2e10] sm:$0xff] }
 0x180   : > { %1727 = vst [vmem:[%s5845_s15 + $0x1700] sm:$0xff] %v1726_v32  ;;  %1729 = vst [vmem:[%s5845_s15 + $0x1708] sm:$0xff] %v1728_v33  ;;  %v1732_v35 = vld [vmem:[%s5840_s14 + $0x2e18] sm:$0xff]  ;;  %v1734_v36 = vld [vmem:[%s5840_s14 + $0x2e40] sm:$0xff] }
 0x181   : > { %1731 = vst [vmem:[%s5845_s15 + $0x1710] sm:$0xff] %v1730_v34  ;;  %1733 = vst [vmem:[%s5845_s15 + $0x1718] sm:$0xff] %v1732_v35  ;;  %v1736_v37 = vld [vmem:[%s5840_s14 + $0x2e48] sm:$0xff]  ;;  %v1738_v38 = vld [vmem:[%s5840_s14 + $0x2e50] sm:$0xff] }
 0x182   : > { %1735 = vst [vmem:[%s5845_s15 + $0x1720] sm:$0xff] %v1734_v36  ;;  %v1740_v39 = vld [vmem:[%s5840_s14 + $0x2e58] sm:$0xff]  ;;  %1737 = vst [vmem:[%s5845_s15 + $0x1728] sm:$0xff] %v1736_v37  ;;  %v1742_v40 = vld [vmem:[%s5840_s14 + $0x2e80] sm:$0xff] }
 0x183   : > { %1739 = vst [vmem:[%s5845_s15 + $0x1730] sm:$0xff] %v1738_v38  ;;  %1741 = vst [vmem:[%s5845_s15 + $0x1738] sm:$0xff] %v1740_v39  ;;  %v1744_v41 = vld [vmem:[%s5840_s14 + $0x2e88] sm:$0xff]  ;;  %v1746_v42 = vld [vmem:[%s5840_s14 + $0x2e90] sm:$0xff] }
 0x184   : > { %1743 = vst [vmem:[%s5845_s15 + $0x1740] sm:$0xff] %v1742_v40  ;;  %1745 = vst [vmem:[%s5845_s15 + $0x1748] sm:$0xff] %v1744_v41  ;;  %v1748_v43 = vld [vmem:[%s5840_s14 + $0x2e98] sm:$0xff]  ;;  %v1750_v44 = vld [vmem:[%s5840_s14 + $0x2ec0] sm:$0xff] }
 0x185   : > { %1747 = vst [vmem:[%s5845_s15 + $0x1750] sm:$0xff] %v1746_v42  ;;  %v1752_v45 = vld [vmem:[%s5840_s14 + $0x2ec8] sm:$0xff]  ;;  %1749 = vst [vmem:[%s5845_s15 + $0x1758] sm:$0xff] %v1748_v43  ;;  %v1754_v46 = vld [vmem:[%s5840_s14 + $0x2ed0] sm:$0xff] }
 0x186   : > { %1751 = vst [vmem:[%s5845_s15 + $0x1760] sm:$0xff] %v1750_v44  ;;  %1753 = vst [vmem:[%s5845_s15 + $0x1768] sm:$0xff] %v1752_v45  ;;  %v1756_v47 = vld [vmem:[%s5840_s14 + $0x2ed8] sm:$0xff]  ;;  %v1758_v48 = vld [vmem:[%s5840_s14 + $0x2f00] sm:$0xff] }
 0x187   : > { %1755 = vst [vmem:[%s5845_s15 + $0x1770] sm:$0xff] %v1754_v46  ;;  %1757 = vst [vmem:[%s5845_s15 + $0x1778] sm:$0xff] %v1756_v47  ;;  %v1760_v49 = vld [vmem:[%s5840_s14 + $0x2f08] sm:$0xff]  ;;  %v1762_v50 = vld [vmem:[%s5840_s14 + $0x2f10] sm:$0xff] }
 0x188   : > { %1759 = vst [vmem:[%s5845_s15 + $0x1780] sm:$0xff] %v1758_v48  ;;  %v1764_v51 = vld [vmem:[%s5840_s14 + $0x2f18] sm:$0xff]  ;;  %1761 = vst [vmem:[%s5845_s15 + $0x1788] sm:$0xff] %v1760_v49  ;;  %v1766_v52 = vld [vmem:[%s5840_s14 + $0x2f40] sm:$0xff] }
 0x189   : > { %1763 = vst [vmem:[%s5845_s15 + $0x1790] sm:$0xff] %v1762_v50  ;;  %1765 = vst [vmem:[%s5845_s15 + $0x1798] sm:$0xff] %v1764_v51  ;;  %v1768_v53 = vld [vmem:[%s5840_s14 + $0x2f48] sm:$0xff]  ;;  %v1770_v54 = vld [vmem:[%s5840_s14 + $0x2f50] sm:$0xff] }
 0x18a   : > { %1767 = vst [vmem:[%s5845_s15 + $0x17a0] sm:$0xff] %v1766_v52  ;;  %1769 = vst [vmem:[%s5845_s15 + $0x17a8] sm:$0xff] %v1768_v53  ;;  %v1772_v55 = vld [vmem:[%s5840_s14 + $0x2f58] sm:$0xff]  ;;  %v1774_v56 = vld [vmem:[%s5840_s14 + $0x2f80] sm:$0xff] }
 0x18b   : > { %1771 = vst [vmem:[%s5845_s15 + $0x17b0] sm:$0xff] %v1770_v54  ;;  %v1776_v57 = vld [vmem:[%s5840_s14 + $0x2f88] sm:$0xff]  ;;  %1773 = vst [vmem:[%s5845_s15 + $0x17b8] sm:$0xff] %v1772_v55  ;;  %v1778_v58 = vld [vmem:[%s5840_s14 + $0x2f90] sm:$0xff] }
 0x18c   : > { %1775 = vst [vmem:[%s5845_s15 + $0x17c0] sm:$0xff] %v1774_v56  ;;  %1777 = vst [vmem:[%s5845_s15 + $0x17c8] sm:$0xff] %v1776_v57  ;;  %v1780_v59 = vld [vmem:[%s5840_s14 + $0x2f98] sm:$0xff]  ;;  %v1782_v60 = vld [vmem:[%s5840_s14 + $0x2fc0] sm:$0xff] }
 0x18d   : > { %1779 = vst [vmem:[%s5845_s15 + $0x17d0] sm:$0xff] %v1778_v58  ;;  %1781 = vst [vmem:[%s5845_s15 + $0x17d8] sm:$0xff] %v1780_v59  ;;  %v1784_v61 = vld [vmem:[%s5840_s14 + $0x2fc8] sm:$0xff]  ;;  %v1786_v62 = vld [vmem:[%s5840_s14 + $0x2fd0] sm:$0xff] }
 0x18e   : > { %1783 = vst [vmem:[%s5845_s15 + $0x17e0] sm:$0xff] %v1782_v60  ;;  %v1788_v63 = vld [vmem:[%s5840_s14 + $0x2fd8] sm:$0xff]  ;;  %1785 = vst [vmem:[%s5845_s15 + $0x17e8] sm:$0xff] %v1784_v61  ;;  %v1790_v0 = vld [vmem:[%s5840_s14 + $0x3000] sm:$0xff] }
 0x18f   : > { %1787 = vst [vmem:[%s5845_s15 + $0x17f0] sm:$0xff] %v1786_v62  ;;  %1789 = vst [vmem:[%s5845_s15 + $0x17f8] sm:$0xff] %v1788_v63  ;;  %v1792_v1 = vld [vmem:[%s5840_s14 + $0x3008] sm:$0xff]  ;;  %v1794_v2 = vld [vmem:[%s5840_s14 + $0x3010] sm:$0xff] }
 0x190   : > { %1791 = vst [vmem:[%s5845_s15 + $0x1800] sm:$0xff] %v1790_v0  ;;  %1793 = vst [vmem:[%s5845_s15 + $0x1808] sm:$0xff] %v1792_v1  ;;  %v1796_v3 = vld [vmem:[%s5840_s14 + $0x3018] sm:$0xff]  ;;  %v1798_v4 = vld [vmem:[%s5840_s14 + $0x3040] sm:$0xff] }
 0x191   : > { %1795 = vst [vmem:[%s5845_s15 + $0x1810] sm:$0xff] %v1794_v2  ;;  %v1800_v5 = vld [vmem:[%s5840_s14 + $0x3048] sm:$0xff]  ;;  %1797 = vst [vmem:[%s5845_s15 + $0x1818] sm:$0xff] %v1796_v3  ;;  %v1802_v6 = vld [vmem:[%s5840_s14 + $0x3050] sm:$0xff] }
 0x192   : > { %1799 = vst [vmem:[%s5845_s15 + $0x1820] sm:$0xff] %v1798_v4  ;;  %1801 = vst [vmem:[%s5845_s15 + $0x1828] sm:$0xff] %v1800_v5  ;;  %v1804_v7 = vld [vmem:[%s5840_s14 + $0x3058] sm:$0xff]  ;;  %v1806_v8 = vld [vmem:[%s5840_s14 + $0x3080] sm:$0xff] }
 0x193   : > { %1803 = vst [vmem:[%s5845_s15 + $0x1830] sm:$0xff] %v1802_v6  ;;  %1805 = vst [vmem:[%s5845_s15 + $0x1838] sm:$0xff] %v1804_v7  ;;  %v1808_v9 = vld [vmem:[%s5840_s14 + $0x3088] sm:$0xff]  ;;  %v1810_v10 = vld [vmem:[%s5840_s14 + $0x3090] sm:$0xff] }
 0x194   : > { %1807 = vst [vmem:[%s5845_s15 + $0x1840] sm:$0xff] %v1806_v8  ;;  %v1812_v11 = vld [vmem:[%s5840_s14 + $0x3098] sm:$0xff]  ;;  %1809 = vst [vmem:[%s5845_s15 + $0x1848] sm:$0xff] %v1808_v9  ;;  %v1814_v12 = vld [vmem:[%s5840_s14 + $0x30c0] sm:$0xff] }
 0x195   : > { %1811 = vst [vmem:[%s5845_s15 + $0x1850] sm:$0xff] %v1810_v10  ;;  %1813 = vst [vmem:[%s5845_s15 + $0x1858] sm:$0xff] %v1812_v11  ;;  %v1816_v13 = vld [vmem:[%s5840_s14 + $0x30c8] sm:$0xff]  ;;  %v1818_v14 = vld [vmem:[%s5840_s14 + $0x30d0] sm:$0xff] }
 0x196   : > { %1815 = vst [vmem:[%s5845_s15 + $0x1860] sm:$0xff] %v1814_v12  ;;  %1817 = vst [vmem:[%s5845_s15 + $0x1868] sm:$0xff] %v1816_v13  ;;  %v1820_v15 = vld [vmem:[%s5840_s14 + $0x30d8] sm:$0xff]  ;;  %v1822_v16 = vld [vmem:[%s5840_s14 + $0x3100] sm:$0xff] }
 0x197   : > { %1819 = vst [vmem:[%s5845_s15 + $0x1870] sm:$0xff] %v1818_v14  ;;  %v1824_v17 = vld [vmem:[%s5840_s14 + $0x3108] sm:$0xff]  ;;  %1821 = vst [vmem:[%s5845_s15 + $0x1878] sm:$0xff] %v1820_v15  ;;  %v1826_v18 = vld [vmem:[%s5840_s14 + $0x3110] sm:$0xff] }
 0x198   : > { %1823 = vst [vmem:[%s5845_s15 + $0x1880] sm:$0xff] %v1822_v16  ;;  %1825 = vst [vmem:[%s5845_s15 + $0x1888] sm:$0xff] %v1824_v17  ;;  %v1828_v19 = vld [vmem:[%s5840_s14 + $0x3118] sm:$0xff]  ;;  %v1830_v20 = vld [vmem:[%s5840_s14 + $0x3140] sm:$0xff] }
 0x199   : > { %1827 = vst [vmem:[%s5845_s15 + $0x1890] sm:$0xff] %v1826_v18  ;;  %1829 = vst [vmem:[%s5845_s15 + $0x1898] sm:$0xff] %v1828_v19  ;;  %v1832_v21 = vld [vmem:[%s5840_s14 + $0x3148] sm:$0xff]  ;;  %v1834_v22 = vld [vmem:[%s5840_s14 + $0x3150] sm:$0xff] }
 0x19a   : > { %1831 = vst [vmem:[%s5845_s15 + $0x18a0] sm:$0xff] %v1830_v20  ;;  %v1836_v23 = vld [vmem:[%s5840_s14 + $0x3158] sm:$0xff]  ;;  %1833 = vst [vmem:[%s5845_s15 + $0x18a8] sm:$0xff] %v1832_v21  ;;  %v1838_v24 = vld [vmem:[%s5840_s14 + $0x3180] sm:$0xff] }
 0x19b   : > { %1835 = vst [vmem:[%s5845_s15 + $0x18b0] sm:$0xff] %v1834_v22  ;;  %1837 = vst [vmem:[%s5845_s15 + $0x18b8] sm:$0xff] %v1836_v23  ;;  %v1840_v25 = vld [vmem:[%s5840_s14 + $0x3188] sm:$0xff]  ;;  %v1842_v26 = vld [vmem:[%s5840_s14 + $0x3190] sm:$0xff] }
 0x19c   : > { %1839 = vst [vmem:[%s5845_s15 + $0x18c0] sm:$0xff] %v1838_v24  ;;  %1841 = vst [vmem:[%s5845_s15 + $0x18c8] sm:$0xff] %v1840_v25  ;;  %v1844_v27 = vld [vmem:[%s5840_s14 + $0x3198] sm:$0xff]  ;;  %v1846_v28 = vld [vmem:[%s5840_s14 + $0x31c0] sm:$0xff] }
 0x19d   : > { %1843 = vst [vmem:[%s5845_s15 + $0x18d0] sm:$0xff] %v1842_v26  ;;  %v1848_v29 = vld [vmem:[%s5840_s14 + $0x31c8] sm:$0xff]  ;;  %1845 = vst [vmem:[%s5845_s15 + $0x18d8] sm:$0xff] %v1844_v27  ;;  %v1850_v30 = vld [vmem:[%s5840_s14 + $0x31d0] sm:$0xff] }
 0x19e   : > { %1847 = vst [vmem:[%s5845_s15 + $0x18e0] sm:$0xff] %v1846_v28  ;;  %1849 = vst [vmem:[%s5845_s15 + $0x18e8] sm:$0xff] %v1848_v29  ;;  %v1852_v31 = vld [vmem:[%s5840_s14 + $0x31d8] sm:$0xff]  ;;  %v1854_v32 = vld [vmem:[%s5840_s14 + $0x3200] sm:$0xff] }
 0x19f   : > { %1851 = vst [vmem:[%s5845_s15 + $0x18f0] sm:$0xff] %v1850_v30  ;;  %1853 = vst [vmem:[%s5845_s15 + $0x18f8] sm:$0xff] %v1852_v31  ;;  %v1856_v33 = vld [vmem:[%s5840_s14 + $0x3208] sm:$0xff]  ;;  %v1858_v34 = vld [vmem:[%s5840_s14 + $0x3210] sm:$0xff] }
 0x1a0   : > { %1855 = vst [vmem:[%s5845_s15 + $0x1900] sm:$0xff] %v1854_v32  ;;  %v1860_v35 = vld [vmem:[%s5840_s14 + $0x3218] sm:$0xff]  ;;  %1857 = vst [vmem:[%s5845_s15 + $0x1908] sm:$0xff] %v1856_v33  ;;  %v1862_v36 = vld [vmem:[%s5840_s14 + $0x3240] sm:$0xff] }
 0x1a1   : > { %1859 = vst [vmem:[%s5845_s15 + $0x1910] sm:$0xff] %v1858_v34  ;;  %1861 = vst [vmem:[%s5845_s15 + $0x1918] sm:$0xff] %v1860_v35  ;;  %v1864_v37 = vld [vmem:[%s5840_s14 + $0x3248] sm:$0xff]  ;;  %v1866_v38 = vld [vmem:[%s5840_s14 + $0x3250] sm:$0xff] }
 0x1a2   : > { %1863 = vst [vmem:[%s5845_s15 + $0x1920] sm:$0xff] %v1862_v36  ;;  %1865 = vst [vmem:[%s5845_s15 + $0x1928] sm:$0xff] %v1864_v37  ;;  %v1868_v39 = vld [vmem:[%s5840_s14 + $0x3258] sm:$0xff]  ;;  %v1870_v40 = vld [vmem:[%s5840_s14 + $0x3280] sm:$0xff] }
 0x1a3   : > { %1867 = vst [vmem:[%s5845_s15 + $0x1930] sm:$0xff] %v1866_v38  ;;  %v1872_v41 = vld [vmem:[%s5840_s14 + $0x3288] sm:$0xff]  ;;  %1869 = vst [vmem:[%s5845_s15 + $0x1938] sm:$0xff] %v1868_v39  ;;  %v1874_v42 = vld [vmem:[%s5840_s14 + $0x3290] sm:$0xff] }
 0x1a4   : > { %1871 = vst [vmem:[%s5845_s15 + $0x1940] sm:$0xff] %v1870_v40  ;;  %1873 = vst [vmem:[%s5845_s15 + $0x1948] sm:$0xff] %v1872_v41  ;;  %v1876_v43 = vld [vmem:[%s5840_s14 + $0x3298] sm:$0xff]  ;;  %v1878_v44 = vld [vmem:[%s5840_s14 + $0x32c0] sm:$0xff] }
 0x1a5   : > { %1875 = vst [vmem:[%s5845_s15 + $0x1950] sm:$0xff] %v1874_v42  ;;  %1877 = vst [vmem:[%s5845_s15 + $0x1958] sm:$0xff] %v1876_v43  ;;  %v1880_v45 = vld [vmem:[%s5840_s14 + $0x32c8] sm:$0xff]  ;;  %v1882_v46 = vld [vmem:[%s5840_s14 + $0x32d0] sm:$0xff] }
 0x1a6   : > { %1879 = vst [vmem:[%s5845_s15 + $0x1960] sm:$0xff] %v1878_v44  ;;  %v1884_v47 = vld [vmem:[%s5840_s14 + $0x32d8] sm:$0xff]  ;;  %1881 = vst [vmem:[%s5845_s15 + $0x1968] sm:$0xff] %v1880_v45  ;;  %v1886_v48 = vld [vmem:[%s5840_s14 + $0x3300] sm:$0xff] }
 0x1a7   : > { %1883 = vst [vmem:[%s5845_s15 + $0x1970] sm:$0xff] %v1882_v46  ;;  %1885 = vst [vmem:[%s5845_s15 + $0x1978] sm:$0xff] %v1884_v47  ;;  %v1888_v49 = vld [vmem:[%s5840_s14 + $0x3308] sm:$0xff]  ;;  %v1890_v50 = vld [vmem:[%s5840_s14 + $0x3310] sm:$0xff] }
 0x1a8   : > { %1887 = vst [vmem:[%s5845_s15 + $0x1980] sm:$0xff] %v1886_v48  ;;  %1889 = vst [vmem:[%s5845_s15 + $0x1988] sm:$0xff] %v1888_v49  ;;  %v1892_v51 = vld [vmem:[%s5840_s14 + $0x3318] sm:$0xff]  ;;  %v1894_v52 = vld [vmem:[%s5840_s14 + $0x3340] sm:$0xff] }
 0x1a9   : > { %1891 = vst [vmem:[%s5845_s15 + $0x1990] sm:$0xff] %v1890_v50  ;;  %v1896_v53 = vld [vmem:[%s5840_s14 + $0x3348] sm:$0xff]  ;;  %1893 = vst [vmem:[%s5845_s15 + $0x1998] sm:$0xff] %v1892_v51  ;;  %v1898_v54 = vld [vmem:[%s5840_s14 + $0x3350] sm:$0xff] }
 0x1aa   : > { %1895 = vst [vmem:[%s5845_s15 + $0x19a0] sm:$0xff] %v1894_v52  ;;  %1897 = vst [vmem:[%s5845_s15 + $0x19a8] sm:$0xff] %v1896_v53  ;;  %v1900_v55 = vld [vmem:[%s5840_s14 + $0x3358] sm:$0xff]  ;;  %v1902_v56 = vld [vmem:[%s5840_s14 + $0x3380] sm:$0xff] }
 0x1ab   : > { %1899 = vst [vmem:[%s5845_s15 + $0x19b0] sm:$0xff] %v1898_v54  ;;  %1901 = vst [vmem:[%s5845_s15 + $0x19b8] sm:$0xff] %v1900_v55  ;;  %v1904_v57 = vld [vmem:[%s5840_s14 + $0x3388] sm:$0xff]  ;;  %v1906_v58 = vld [vmem:[%s5840_s14 + $0x3390] sm:$0xff] }
 0x1ac   : > { %1903 = vst [vmem:[%s5845_s15 + $0x19c0] sm:$0xff] %v1902_v56  ;;  %v1908_v59 = vld [vmem:[%s5840_s14 + $0x3398] sm:$0xff]  ;;  %1905 = vst [vmem:[%s5845_s15 + $0x19c8] sm:$0xff] %v1904_v57  ;;  %v1910_v60 = vld [vmem:[%s5840_s14 + $0x33c0] sm:$0xff] }
 0x1ad   : > { %1907 = vst [vmem:[%s5845_s15 + $0x19d0] sm:$0xff] %v1906_v58  ;;  %1909 = vst [vmem:[%s5845_s15 + $0x19d8] sm:$0xff] %v1908_v59  ;;  %v1912_v61 = vld [vmem:[%s5840_s14 + $0x33c8] sm:$0xff]  ;;  %v1914_v62 = vld [vmem:[%s5840_s14 + $0x33d0] sm:$0xff] }
 0x1ae   : > { %1911 = vst [vmem:[%s5845_s15 + $0x19e0] sm:$0xff] %v1910_v60  ;;  %1913 = vst [vmem:[%s5845_s15 + $0x19e8] sm:$0xff] %v1912_v61  ;;  %v1916_v63 = vld [vmem:[%s5840_s14 + $0x33d8] sm:$0xff]  ;;  %v1918_v0 = vld [vmem:[%s5840_s14 + $0x3400] sm:$0xff] }
 0x1af   : > { %1915 = vst [vmem:[%s5845_s15 + $0x19f0] sm:$0xff] %v1914_v62  ;;  %v1920_v1 = vld [vmem:[%s5840_s14 + $0x3408] sm:$0xff]  ;;  %1917 = vst [vmem:[%s5845_s15 + $0x19f8] sm:$0xff] %v1916_v63  ;;  %v1922_v2 = vld [vmem:[%s5840_s14 + $0x3410] sm:$0xff] }
 0x1b0   : > { %1919 = vst [vmem:[%s5845_s15 + $0x1a00] sm:$0xff] %v1918_v0  ;;  %1921 = vst [vmem:[%s5845_s15 + $0x1a08] sm:$0xff] %v1920_v1  ;;  %v1924_v3 = vld [vmem:[%s5840_s14 + $0x3418] sm:$0xff]  ;;  %v1926_v4 = vld [vmem:[%s5840_s14 + $0x3440] sm:$0xff] }
 0x1b1   : > { %1923 = vst [vmem:[%s5845_s15 + $0x1a10] sm:$0xff] %v1922_v2  ;;  %1925 = vst [vmem:[%s5845_s15 + $0x1a18] sm:$0xff] %v1924_v3  ;;  %v1928_v5 = vld [vmem:[%s5840_s14 + $0x3448] sm:$0xff]  ;;  %v1930_v6 = vld [vmem:[%s5840_s14 + $0x3450] sm:$0xff] }
 0x1b2   : > { %1927 = vst [vmem:[%s5845_s15 + $0x1a20] sm:$0xff] %v1926_v4  ;;  %v1932_v7 = vld [vmem:[%s5840_s14 + $0x3458] sm:$0xff]  ;;  %1929 = vst [vmem:[%s5845_s15 + $0x1a28] sm:$0xff] %v1928_v5  ;;  %v1934_v8 = vld [vmem:[%s5840_s14 + $0x3480] sm:$0xff] }
 0x1b3   : > { %1931 = vst [vmem:[%s5845_s15 + $0x1a30] sm:$0xff] %v1930_v6  ;;  %1933 = vst [vmem:[%s5845_s15 + $0x1a38] sm:$0xff] %v1932_v7  ;;  %v1936_v9 = vld [vmem:[%s5840_s14 + $0x3488] sm:$0xff]  ;;  %v1938_v10 = vld [vmem:[%s5840_s14 + $0x3490] sm:$0xff] }
 0x1b4   : > { %1935 = vst [vmem:[%s5845_s15 + $0x1a40] sm:$0xff] %v1934_v8  ;;  %1937 = vst [vmem:[%s5845_s15 + $0x1a48] sm:$0xff] %v1936_v9  ;;  %v1940_v11 = vld [vmem:[%s5840_s14 + $0x3498] sm:$0xff]  ;;  %v1942_v12 = vld [vmem:[%s5840_s14 + $0x34c0] sm:$0xff] }
 0x1b5   : > { %1939 = vst [vmem:[%s5845_s15 + $0x1a50] sm:$0xff] %v1938_v10  ;;  %v1944_v13 = vld [vmem:[%s5840_s14 + $0x34c8] sm:$0xff]  ;;  %1941 = vst [vmem:[%s5845_s15 + $0x1a58] sm:$0xff] %v1940_v11  ;;  %v1946_v14 = vld [vmem:[%s5840_s14 + $0x34d0] sm:$0xff] }
 0x1b6   : > { %1943 = vst [vmem:[%s5845_s15 + $0x1a60] sm:$0xff] %v1942_v12  ;;  %1945 = vst [vmem:[%s5845_s15 + $0x1a68] sm:$0xff] %v1944_v13  ;;  %v1948_v15 = vld [vmem:[%s5840_s14 + $0x34d8] sm:$0xff]  ;;  %v1950_v16 = vld [vmem:[%s5840_s14 + $0x3500] sm:$0xff] }
 0x1b7   : > { %1947 = vst [vmem:[%s5845_s15 + $0x1a70] sm:$0xff] %v1946_v14  ;;  %1949 = vst [vmem:[%s5845_s15 + $0x1a78] sm:$0xff] %v1948_v15  ;;  %v1952_v17 = vld [vmem:[%s5840_s14 + $0x3508] sm:$0xff]  ;;  %v1954_v18 = vld [vmem:[%s5840_s14 + $0x3510] sm:$0xff] }
 0x1b8   : > { %1951 = vst [vmem:[%s5845_s15 + $0x1a80] sm:$0xff] %v1950_v16  ;;  %v1956_v19 = vld [vmem:[%s5840_s14 + $0x3518] sm:$0xff]  ;;  %1953 = vst [vmem:[%s5845_s15 + $0x1a88] sm:$0xff] %v1952_v17  ;;  %v1958_v20 = vld [vmem:[%s5840_s14 + $0x3540] sm:$0xff] }
 0x1b9   : > { %1955 = vst [vmem:[%s5845_s15 + $0x1a90] sm:$0xff] %v1954_v18  ;;  %1957 = vst [vmem:[%s5845_s15 + $0x1a98] sm:$0xff] %v1956_v19  ;;  %v1960_v21 = vld [vmem:[%s5840_s14 + $0x3548] sm:$0xff]  ;;  %v1962_v22 = vld [vmem:[%s5840_s14 + $0x3550] sm:$0xff] }
 0x1ba   : > { %1959 = vst [vmem:[%s5845_s15 + $0x1aa0] sm:$0xff] %v1958_v20  ;;  %1961 = vst [vmem:[%s5845_s15 + $0x1aa8] sm:$0xff] %v1960_v21  ;;  %v1964_v23 = vld [vmem:[%s5840_s14 + $0x3558] sm:$0xff]  ;;  %v1966_v24 = vld [vmem:[%s5840_s14 + $0x3580] sm:$0xff] }
 0x1bb   : > { %1963 = vst [vmem:[%s5845_s15 + $0x1ab0] sm:$0xff] %v1962_v22  ;;  %v1968_v25 = vld [vmem:[%s5840_s14 + $0x3588] sm:$0xff]  ;;  %1965 = vst [vmem:[%s5845_s15 + $0x1ab8] sm:$0xff] %v1964_v23  ;;  %v1970_v26 = vld [vmem:[%s5840_s14 + $0x3590] sm:$0xff] }
 0x1bc   : > { %1967 = vst [vmem:[%s5845_s15 + $0x1ac0] sm:$0xff] %v1966_v24  ;;  %1969 = vst [vmem:[%s5845_s15 + $0x1ac8] sm:$0xff] %v1968_v25  ;;  %v1972_v27 = vld [vmem:[%s5840_s14 + $0x3598] sm:$0xff]  ;;  %v1974_v28 = vld [vmem:[%s5840_s14 + $0x35c0] sm:$0xff] }
 0x1bd   : > { %1971 = vst [vmem:[%s5845_s15 + $0x1ad0] sm:$0xff] %v1970_v26  ;;  %1973 = vst [vmem:[%s5845_s15 + $0x1ad8] sm:$0xff] %v1972_v27  ;;  %v1976_v29 = vld [vmem:[%s5840_s14 + $0x35c8] sm:$0xff]  ;;  %v1978_v30 = vld [vmem:[%s5840_s14 + $0x35d0] sm:$0xff] }
 0x1be   : > { %1975 = vst [vmem:[%s5845_s15 + $0x1ae0] sm:$0xff] %v1974_v28  ;;  %v1980_v31 = vld [vmem:[%s5840_s14 + $0x35d8] sm:$0xff]  ;;  %1977 = vst [vmem:[%s5845_s15 + $0x1ae8] sm:$0xff] %v1976_v29  ;;  %v1982_v32 = vld [vmem:[%s5840_s14 + $0x3600] sm:$0xff] }
 0x1bf   : > { %1979 = vst [vmem:[%s5845_s15 + $0x1af0] sm:$0xff] %v1978_v30  ;;  %1981 = vst [vmem:[%s5845_s15 + $0x1af8] sm:$0xff] %v1980_v31  ;;  %v1984_v33 = vld [vmem:[%s5840_s14 + $0x3608] sm:$0xff]  ;;  %v1986_v34 = vld [vmem:[%s5840_s14 + $0x3610] sm:$0xff] }
 0x1c0   : > { %1983 = vst [vmem:[%s5845_s15 + $0x1b00] sm:$0xff] %v1982_v32  ;;  %1985 = vst [vmem:[%s5845_s15 + $0x1b08] sm:$0xff] %v1984_v33  ;;  %v1988_v35 = vld [vmem:[%s5840_s14 + $0x3618] sm:$0xff]  ;;  %v1990_v36 = vld [vmem:[%s5840_s14 + $0x3640] sm:$0xff] }
 0x1c1   : > { %1987 = vst [vmem:[%s5845_s15 + $0x1b10] sm:$0xff] %v1986_v34  ;;  %v1992_v37 = vld [vmem:[%s5840_s14 + $0x3648] sm:$0xff]  ;;  %1989 = vst [vmem:[%s5845_s15 + $0x1b18] sm:$0xff] %v1988_v35  ;;  %v1994_v38 = vld [vmem:[%s5840_s14 + $0x3650] sm:$0xff] }
 0x1c2   : > { %1991 = vst [vmem:[%s5845_s15 + $0x1b20] sm:$0xff] %v1990_v36  ;;  %1993 = vst [vmem:[%s5845_s15 + $0x1b28] sm:$0xff] %v1992_v37  ;;  %v1996_v39 = vld [vmem:[%s5840_s14 + $0x3658] sm:$0xff]  ;;  %v1998_v40 = vld [vmem:[%s5840_s14 + $0x3680] sm:$0xff] }
 0x1c3   : > { %1995 = vst [vmem:[%s5845_s15 + $0x1b30] sm:$0xff] %v1994_v38  ;;  %1997 = vst [vmem:[%s5845_s15 + $0x1b38] sm:$0xff] %v1996_v39  ;;  %v2000_v41 = vld [vmem:[%s5840_s14 + $0x3688] sm:$0xff]  ;;  %v2002_v42 = vld [vmem:[%s5840_s14 + $0x3690] sm:$0xff] }
 0x1c4   : > { %1999 = vst [vmem:[%s5845_s15 + $0x1b40] sm:$0xff] %v1998_v40  ;;  %v2004_v43 = vld [vmem:[%s5840_s14 + $0x3698] sm:$0xff]  ;;  %2001 = vst [vmem:[%s5845_s15 + $0x1b48] sm:$0xff] %v2000_v41  ;;  %v2006_v44 = vld [vmem:[%s5840_s14 + $0x36c0] sm:$0xff] }
 0x1c5   : > { %2003 = vst [vmem:[%s5845_s15 + $0x1b50] sm:$0xff] %v2002_v42  ;;  %2005 = vst [vmem:[%s5845_s15 + $0x1b58] sm:$0xff] %v2004_v43  ;;  %v2008_v45 = vld [vmem:[%s5840_s14 + $0x36c8] sm:$0xff]  ;;  %v2010_v46 = vld [vmem:[%s5840_s14 + $0x36d0] sm:$0xff] }
 0x1c6   : > { %2007 = vst [vmem:[%s5845_s15 + $0x1b60] sm:$0xff] %v2006_v44  ;;  %2009 = vst [vmem:[%s5845_s15 + $0x1b68] sm:$0xff] %v2008_v45  ;;  %v2012_v47 = vld [vmem:[%s5840_s14 + $0x36d8] sm:$0xff]  ;;  %v2014_v48 = vld [vmem:[%s5840_s14 + $0x3700] sm:$0xff] }
 0x1c7   : > { %2011 = vst [vmem:[%s5845_s15 + $0x1b70] sm:$0xff] %v2010_v46  ;;  %v2016_v49 = vld [vmem:[%s5840_s14 + $0x3708] sm:$0xff]  ;;  %2013 = vst [vmem:[%s5845_s15 + $0x1b78] sm:$0xff] %v2012_v47  ;;  %v2018_v50 = vld [vmem:[%s5840_s14 + $0x3710] sm:$0xff] }
 0x1c8   : > { %2015 = vst [vmem:[%s5845_s15 + $0x1b80] sm:$0xff] %v2014_v48  ;;  %2017 = vst [vmem:[%s5845_s15 + $0x1b88] sm:$0xff] %v2016_v49  ;;  %v2020_v51 = vld [vmem:[%s5840_s14 + $0x3718] sm:$0xff]  ;;  %v2022_v52 = vld [vmem:[%s5840_s14 + $0x3740] sm:$0xff] }
 0x1c9   : > { %2019 = vst [vmem:[%s5845_s15 + $0x1b90] sm:$0xff] %v2018_v50  ;;  %2021 = vst [vmem:[%s5845_s15 + $0x1b98] sm:$0xff] %v2020_v51  ;;  %v2024_v53 = vld [vmem:[%s5840_s14 + $0x3748] sm:$0xff]  ;;  %v2026_v54 = vld [vmem:[%s5840_s14 + $0x3750] sm:$0xff] }
 0x1ca   : > { %2023 = vst [vmem:[%s5845_s15 + $0x1ba0] sm:$0xff] %v2022_v52  ;;  %v2028_v55 = vld [vmem:[%s5840_s14 + $0x3758] sm:$0xff]  ;;  %2025 = vst [vmem:[%s5845_s15 + $0x1ba8] sm:$0xff] %v2024_v53  ;;  %v2030_v56 = vld [vmem:[%s5840_s14 + $0x3780] sm:$0xff] }
 0x1cb   : > { %2027 = vst [vmem:[%s5845_s15 + $0x1bb0] sm:$0xff] %v2026_v54  ;;  %2029 = vst [vmem:[%s5845_s15 + $0x1bb8] sm:$0xff] %v2028_v55  ;;  %v2032_v57 = vld [vmem:[%s5840_s14 + $0x3788] sm:$0xff]  ;;  %v2034_v58 = vld [vmem:[%s5840_s14 + $0x3790] sm:$0xff] }
 0x1cc   : > { %2031 = vst [vmem:[%s5845_s15 + $0x1bc0] sm:$0xff] %v2030_v56  ;;  %2033 = vst [vmem:[%s5845_s15 + $0x1bc8] sm:$0xff] %v2032_v57  ;;  %v2036_v59 = vld [vmem:[%s5840_s14 + $0x3798] sm:$0xff]  ;;  %v2038_v60 = vld [vmem:[%s5840_s14 + $0x37c0] sm:$0xff] }
 0x1cd   : > { %2035 = vst [vmem:[%s5845_s15 + $0x1bd0] sm:$0xff] %v2034_v58  ;;  %v2040_v61 = vld [vmem:[%s5840_s14 + $0x37c8] sm:$0xff]  ;;  %2037 = vst [vmem:[%s5845_s15 + $0x1bd8] sm:$0xff] %v2036_v59  ;;  %v2042_v62 = vld [vmem:[%s5840_s14 + $0x37d0] sm:$0xff] }
 0x1ce   : > { %2039 = vst [vmem:[%s5845_s15 + $0x1be0] sm:$0xff] %v2038_v60  ;;  %2041 = vst [vmem:[%s5845_s15 + $0x1be8] sm:$0xff] %v2040_v61  ;;  %v2044_v63 = vld [vmem:[%s5840_s14 + $0x37d8] sm:$0xff]  ;;  %v2046_v0 = vld [vmem:[%s5840_s14 + $0x3800] sm:$0xff] }
 0x1cf   : > { %2043 = vst [vmem:[%s5845_s15 + $0x1bf0] sm:$0xff] %v2042_v62  ;;  %2045 = vst [vmem:[%s5845_s15 + $0x1bf8] sm:$0xff] %v2044_v63  ;;  %v2048_v1 = vld [vmem:[%s5840_s14 + $0x3808] sm:$0xff]  ;;  %v2050_v2 = vld [vmem:[%s5840_s14 + $0x3810] sm:$0xff] }
 0x1d0   : > { %2047 = vst [vmem:[%s5845_s15 + $0x1c00] sm:$0xff] %v2046_v0  ;;  %v2052_v3 = vld [vmem:[%s5840_s14 + $0x3818] sm:$0xff]  ;;  %2049 = vst [vmem:[%s5845_s15 + $0x1c08] sm:$0xff] %v2048_v1  ;;  %v2054_v4 = vld [vmem:[%s5840_s14 + $0x3840] sm:$0xff] }
 0x1d1   : > { %2051 = vst [vmem:[%s5845_s15 + $0x1c10] sm:$0xff] %v2050_v2  ;;  %2053 = vst [vmem:[%s5845_s15 + $0x1c18] sm:$0xff] %v2052_v3  ;;  %v2056_v5 = vld [vmem:[%s5840_s14 + $0x3848] sm:$0xff]  ;;  %v2058_v6 = vld [vmem:[%s5840_s14 + $0x3850] sm:$0xff] }
 0x1d2   : > { %2055 = vst [vmem:[%s5845_s15 + $0x1c20] sm:$0xff] %v2054_v4  ;;  %2057 = vst [vmem:[%s5845_s15 + $0x1c28] sm:$0xff] %v2056_v5  ;;  %v2060_v7 = vld [vmem:[%s5840_s14 + $0x3858] sm:$0xff]  ;;  %v2062_v8 = vld [vmem:[%s5840_s14 + $0x3880] sm:$0xff] }
 0x1d3   : > { %2059 = vst [vmem:[%s5845_s15 + $0x1c30] sm:$0xff] %v2058_v6  ;;  %v2064_v9 = vld [vmem:[%s5840_s14 + $0x3888] sm:$0xff]  ;;  %2061 = vst [vmem:[%s5845_s15 + $0x1c38] sm:$0xff] %v2060_v7  ;;  %v2066_v10 = vld [vmem:[%s5840_s14 + $0x3890] sm:$0xff] }
 0x1d4   : > { %2063 = vst [vmem:[%s5845_s15 + $0x1c40] sm:$0xff] %v2062_v8  ;;  %2065 = vst [vmem:[%s5845_s15 + $0x1c48] sm:$0xff] %v2064_v9  ;;  %v2068_v11 = vld [vmem:[%s5840_s14 + $0x3898] sm:$0xff]  ;;  %v2070_v12 = vld [vmem:[%s5840_s14 + $0x38c0] sm:$0xff] }
 0x1d5   : > { %2067 = vst [vmem:[%s5845_s15 + $0x1c50] sm:$0xff] %v2066_v10  ;;  %2069 = vst [vmem:[%s5845_s15 + $0x1c58] sm:$0xff] %v2068_v11  ;;  %v2072_v13 = vld [vmem:[%s5840_s14 + $0x38c8] sm:$0xff]  ;;  %v2074_v14 = vld [vmem:[%s5840_s14 + $0x38d0] sm:$0xff] }
 0x1d6   : > { %2071 = vst [vmem:[%s5845_s15 + $0x1c60] sm:$0xff] %v2070_v12  ;;  %v2076_v15 = vld [vmem:[%s5840_s14 + $0x38d8] sm:$0xff]  ;;  %2073 = vst [vmem:[%s5845_s15 + $0x1c68] sm:$0xff] %v2072_v13  ;;  %v2078_v16 = vld [vmem:[%s5840_s14 + $0x3900] sm:$0xff] }
 0x1d7   : > { %2075 = vst [vmem:[%s5845_s15 + $0x1c70] sm:$0xff] %v2074_v14  ;;  %2077 = vst [vmem:[%s5845_s15 + $0x1c78] sm:$0xff] %v2076_v15  ;;  %v2080_v17 = vld [vmem:[%s5840_s14 + $0x3908] sm:$0xff]  ;;  %v2082_v18 = vld [vmem:[%s5840_s14 + $0x3910] sm:$0xff] }
 0x1d8   : > { %2079 = vst [vmem:[%s5845_s15 + $0x1c80] sm:$0xff] %v2078_v16  ;;  %2081 = vst [vmem:[%s5845_s15 + $0x1c88] sm:$0xff] %v2080_v17  ;;  %v2084_v19 = vld [vmem:[%s5840_s14 + $0x3918] sm:$0xff]  ;;  %v2086_v20 = vld [vmem:[%s5840_s14 + $0x3940] sm:$0xff] }
 0x1d9   : > { %2083 = vst [vmem:[%s5845_s15 + $0x1c90] sm:$0xff] %v2082_v18  ;;  %v2088_v21 = vld [vmem:[%s5840_s14 + $0x3948] sm:$0xff]  ;;  %2085 = vst [vmem:[%s5845_s15 + $0x1c98] sm:$0xff] %v2084_v19  ;;  %v2090_v22 = vld [vmem:[%s5840_s14 + $0x3950] sm:$0xff] }
 0x1da   : > { %2087 = vst [vmem:[%s5845_s15 + $0x1ca0] sm:$0xff] %v2086_v20  ;;  %2089 = vst [vmem:[%s5845_s15 + $0x1ca8] sm:$0xff] %v2088_v21  ;;  %v2092_v23 = vld [vmem:[%s5840_s14 + $0x3958] sm:$0xff]  ;;  %v2094_v24 = vld [vmem:[%s5840_s14 + $0x3980] sm:$0xff] }
 0x1db   : > { %2091 = vst [vmem:[%s5845_s15 + $0x1cb0] sm:$0xff] %v2090_v22  ;;  %2093 = vst [vmem:[%s5845_s15 + $0x1cb8] sm:$0xff] %v2092_v23  ;;  %v2096_v25 = vld [vmem:[%s5840_s14 + $0x3988] sm:$0xff]  ;;  %v2098_v26 = vld [vmem:[%s5840_s14 + $0x3990] sm:$0xff] }
 0x1dc   : > { %2095 = vst [vmem:[%s5845_s15 + $0x1cc0] sm:$0xff] %v2094_v24  ;;  %v2100_v27 = vld [vmem:[%s5840_s14 + $0x3998] sm:$0xff]  ;;  %2097 = vst [vmem:[%s5845_s15 + $0x1cc8] sm:$0xff] %v2096_v25  ;;  %v2102_v28 = vld [vmem:[%s5840_s14 + $0x39c0] sm:$0xff] }
 0x1dd   : > { %2099 = vst [vmem:[%s5845_s15 + $0x1cd0] sm:$0xff] %v2098_v26  ;;  %2101 = vst [vmem:[%s5845_s15 + $0x1cd8] sm:$0xff] %v2100_v27  ;;  %v2104_v29 = vld [vmem:[%s5840_s14 + $0x39c8] sm:$0xff]  ;;  %v2106_v30 = vld [vmem:[%s5840_s14 + $0x39d0] sm:$0xff] }
 0x1de   : > { %2103 = vst [vmem:[%s5845_s15 + $0x1ce0] sm:$0xff] %v2102_v28  ;;  %2105 = vst [vmem:[%s5845_s15 + $0x1ce8] sm:$0xff] %v2104_v29  ;;  %v2108_v31 = vld [vmem:[%s5840_s14 + $0x39d8] sm:$0xff]  ;;  %v2110_v32 = vld [vmem:[%s5840_s14 + $0x3a00] sm:$0xff] }
 0x1df   : > { %2107 = vst [vmem:[%s5845_s15 + $0x1cf0] sm:$0xff] %v2106_v30  ;;  %v2112_v33 = vld [vmem:[%s5840_s14 + $0x3a08] sm:$0xff]  ;;  %2109 = vst [vmem:[%s5845_s15 + $0x1cf8] sm:$0xff] %v2108_v31  ;;  %v2114_v34 = vld [vmem:[%s5840_s14 + $0x3a10] sm:$0xff] }
 0x1e0   : > { %2111 = vst [vmem:[%s5845_s15 + $0x1d00] sm:$0xff] %v2110_v32  ;;  %2113 = vst [vmem:[%s5845_s15 + $0x1d08] sm:$0xff] %v2112_v33  ;;  %v2116_v35 = vld [vmem:[%s5840_s14 + $0x3a18] sm:$0xff]  ;;  %v2118_v36 = vld [vmem:[%s5840_s14 + $0x3a40] sm:$0xff] }
 0x1e1   : > { %2115 = vst [vmem:[%s5845_s15 + $0x1d10] sm:$0xff] %v2114_v34  ;;  %2117 = vst [vmem:[%s5845_s15 + $0x1d18] sm:$0xff] %v2116_v35  ;;  %v2120_v37 = vld [vmem:[%s5840_s14 + $0x3a48] sm:$0xff]  ;;  %v2122_v38 = vld [vmem:[%s5840_s14 + $0x3a50] sm:$0xff] }
 0x1e2   : > { %2119 = vst [vmem:[%s5845_s15 + $0x1d20] sm:$0xff] %v2118_v36  ;;  %v2124_v39 = vld [vmem:[%s5840_s14 + $0x3a58] sm:$0xff]  ;;  %2121 = vst [vmem:[%s5845_s15 + $0x1d28] sm:$0xff] %v2120_v37  ;;  %v2126_v40 = vld [vmem:[%s5840_s14 + $0x3a80] sm:$0xff] }
 0x1e3   : > { %2123 = vst [vmem:[%s5845_s15 + $0x1d30] sm:$0xff] %v2122_v38  ;;  %2125 = vst [vmem:[%s5845_s15 + $0x1d38] sm:$0xff] %v2124_v39  ;;  %v2128_v41 = vld [vmem:[%s5840_s14 + $0x3a88] sm:$0xff]  ;;  %v2130_v42 = vld [vmem:[%s5840_s14 + $0x3a90] sm:$0xff] }
 0x1e4   : > { %2127 = vst [vmem:[%s5845_s15 + $0x1d40] sm:$0xff] %v2126_v40  ;;  %2129 = vst [vmem:[%s5845_s15 + $0x1d48] sm:$0xff] %v2128_v41  ;;  %v2132_v43 = vld [vmem:[%s5840_s14 + $0x3a98] sm:$0xff]  ;;  %v2134_v44 = vld [vmem:[%s5840_s14 + $0x3ac0] sm:$0xff] }
 0x1e5   : > { %2131 = vst [vmem:[%s5845_s15 + $0x1d50] sm:$0xff] %v2130_v42  ;;  %v2136_v45 = vld [vmem:[%s5840_s14 + $0x3ac8] sm:$0xff]  ;;  %2133 = vst [vmem:[%s5845_s15 + $0x1d58] sm:$0xff] %v2132_v43  ;;  %v2138_v46 = vld [vmem:[%s5840_s14 + $0x3ad0] sm:$0xff] }
 0x1e6   : > { %2135 = vst [vmem:[%s5845_s15 + $0x1d60] sm:$0xff] %v2134_v44  ;;  %2137 = vst [vmem:[%s5845_s15 + $0x1d68] sm:$0xff] %v2136_v45  ;;  %v2140_v47 = vld [vmem:[%s5840_s14 + $0x3ad8] sm:$0xff]  ;;  %v2142_v48 = vld [vmem:[%s5840_s14 + $0x3b00] sm:$0xff] }
 0x1e7   : > { %2139 = vst [vmem:[%s5845_s15 + $0x1d70] sm:$0xff] %v2138_v46  ;;  %2141 = vst [vmem:[%s5845_s15 + $0x1d78] sm:$0xff] %v2140_v47  ;;  %v2144_v49 = vld [vmem:[%s5840_s14 + $0x3b08] sm:$0xff]  ;;  %v2146_v50 = vld [vmem:[%s5840_s14 + $0x3b10] sm:$0xff] }
 0x1e8   : > { %2143 = vst [vmem:[%s5845_s15 + $0x1d80] sm:$0xff] %v2142_v48  ;;  %v2148_v51 = vld [vmem:[%s5840_s14 + $0x3b18] sm:$0xff]  ;;  %2145 = vst [vmem:[%s5845_s15 + $0x1d88] sm:$0xff] %v2144_v49  ;;  %v2150_v52 = vld [vmem:[%s5840_s14 + $0x3b40] sm:$0xff] }
 0x1e9   : > { %2147 = vst [vmem:[%s5845_s15 + $0x1d90] sm:$0xff] %v2146_v50  ;;  %2149 = vst [vmem:[%s5845_s15 + $0x1d98] sm:$0xff] %v2148_v51  ;;  %v2152_v53 = vld [vmem:[%s5840_s14 + $0x3b48] sm:$0xff]  ;;  %v2154_v54 = vld [vmem:[%s5840_s14 + $0x3b50] sm:$0xff] }
 0x1ea   : > { %2151 = vst [vmem:[%s5845_s15 + $0x1da0] sm:$0xff] %v2150_v52  ;;  %2153 = vst [vmem:[%s5845_s15 + $0x1da8] sm:$0xff] %v2152_v53  ;;  %v2156_v55 = vld [vmem:[%s5840_s14 + $0x3b58] sm:$0xff]  ;;  %v2158_v56 = vld [vmem:[%s5840_s14 + $0x3b80] sm:$0xff] }
 0x1eb   : > { %2155 = vst [vmem:[%s5845_s15 + $0x1db0] sm:$0xff] %v2154_v54  ;;  %v2160_v57 = vld [vmem:[%s5840_s14 + $0x3b88] sm:$0xff]  ;;  %2157 = vst [vmem:[%s5845_s15 + $0x1db8] sm:$0xff] %v2156_v55  ;;  %v2162_v58 = vld [vmem:[%s5840_s14 + $0x3b90] sm:$0xff] }
 0x1ec   : > { %2159 = vst [vmem:[%s5845_s15 + $0x1dc0] sm:$0xff] %v2158_v56  ;;  %2161 = vst [vmem:[%s5845_s15 + $0x1dc8] sm:$0xff] %v2160_v57  ;;  %v2164_v59 = vld [vmem:[%s5840_s14 + $0x3b98] sm:$0xff]  ;;  %v2166_v60 = vld [vmem:[%s5840_s14 + $0x3bc0] sm:$0xff] }
 0x1ed   : > { %2163 = vst [vmem:[%s5845_s15 + $0x1dd0] sm:$0xff] %v2162_v58  ;;  %2165 = vst [vmem:[%s5845_s15 + $0x1dd8] sm:$0xff] %v2164_v59  ;;  %v2168_v61 = vld [vmem:[%s5840_s14 + $0x3bc8] sm:$0xff]  ;;  %v2170_v62 = vld [vmem:[%s5840_s14 + $0x3bd0] sm:$0xff] }
 0x1ee   : > { %2167 = vst [vmem:[%s5845_s15 + $0x1de0] sm:$0xff] %v2166_v60  ;;  %v2172_v63 = vld [vmem:[%s5840_s14 + $0x3bd8] sm:$0xff]  ;;  %2169 = vst [vmem:[%s5845_s15 + $0x1de8] sm:$0xff] %v2168_v61  ;;  %v2174_v0 = vld [vmem:[%s5840_s14 + $0x3c00] sm:$0xff] }
 0x1ef   : > { %2171 = vst [vmem:[%s5845_s15 + $0x1df0] sm:$0xff] %v2170_v62  ;;  %2173 = vst [vmem:[%s5845_s15 + $0x1df8] sm:$0xff] %v2172_v63  ;;  %v2176_v1 = vld [vmem:[%s5840_s14 + $0x3c08] sm:$0xff]  ;;  %v2178_v2 = vld [vmem:[%s5840_s14 + $0x3c10] sm:$0xff] }
 0x1f0   : > { %2175 = vst [vmem:[%s5845_s15 + $0x1e00] sm:$0xff] %v2174_v0  ;;  %2177 = vst [vmem:[%s5845_s15 + $0x1e08] sm:$0xff] %v2176_v1  ;;  %v2180_v3 = vld [vmem:[%s5840_s14 + $0x3c18] sm:$0xff]  ;;  %v2182_v4 = vld [vmem:[%s5840_s14 + $0x3c40] sm:$0xff] }
 0x1f1   : > { %2179 = vst [vmem:[%s5845_s15 + $0x1e10] sm:$0xff] %v2178_v2  ;;  %v2184_v5 = vld [vmem:[%s5840_s14 + $0x3c48] sm:$0xff]  ;;  %2181 = vst [vmem:[%s5845_s15 + $0x1e18] sm:$0xff] %v2180_v3  ;;  %v2186_v6 = vld [vmem:[%s5840_s14 + $0x3c50] sm:$0xff] }
 0x1f2   : > { %2183 = vst [vmem:[%s5845_s15 + $0x1e20] sm:$0xff] %v2182_v4  ;;  %2185 = vst [vmem:[%s5845_s15 + $0x1e28] sm:$0xff] %v2184_v5  ;;  %v2188_v7 = vld [vmem:[%s5840_s14 + $0x3c58] sm:$0xff]  ;;  %v2190_v8 = vld [vmem:[%s5840_s14 + $0x3c80] sm:$0xff] }
 0x1f3   : > { %2187 = vst [vmem:[%s5845_s15 + $0x1e30] sm:$0xff] %v2186_v6  ;;  %2189 = vst [vmem:[%s5845_s15 + $0x1e38] sm:$0xff] %v2188_v7  ;;  %v2192_v9 = vld [vmem:[%s5840_s14 + $0x3c88] sm:$0xff]  ;;  %v2194_v10 = vld [vmem:[%s5840_s14 + $0x3c90] sm:$0xff] }
 0x1f4   : > { %2191 = vst [vmem:[%s5845_s15 + $0x1e40] sm:$0xff] %v2190_v8  ;;  %v2196_v11 = vld [vmem:[%s5840_s14 + $0x3c98] sm:$0xff]  ;;  %2193 = vst [vmem:[%s5845_s15 + $0x1e48] sm:$0xff] %v2192_v9  ;;  %v2198_v12 = vld [vmem:[%s5840_s14 + $0x3cc0] sm:$0xff] }
 0x1f5   : > { %2195 = vst [vmem:[%s5845_s15 + $0x1e50] sm:$0xff] %v2194_v10  ;;  %2197 = vst [vmem:[%s5845_s15 + $0x1e58] sm:$0xff] %v2196_v11  ;;  %v2200_v13 = vld [vmem:[%s5840_s14 + $0x3cc8] sm:$0xff]  ;;  %v2202_v14 = vld [vmem:[%s5840_s14 + $0x3cd0] sm:$0xff] }
 0x1f6   : > { %2199 = vst [vmem:[%s5845_s15 + $0x1e60] sm:$0xff] %v2198_v12  ;;  %2201 = vst [vmem:[%s5845_s15 + $0x1e68] sm:$0xff] %v2200_v13  ;;  %v2204_v15 = vld [vmem:[%s5840_s14 + $0x3cd8] sm:$0xff]  ;;  %v2206_v16 = vld [vmem:[%s5840_s14 + $0x3d00] sm:$0xff] }
 0x1f7   : > { %2203 = vst [vmem:[%s5845_s15 + $0x1e70] sm:$0xff] %v2202_v14  ;;  %v2208_v17 = vld [vmem:[%s5840_s14 + $0x3d08] sm:$0xff]  ;;  %2205 = vst [vmem:[%s5845_s15 + $0x1e78] sm:$0xff] %v2204_v15  ;;  %v2210_v18 = vld [vmem:[%s5840_s14 + $0x3d10] sm:$0xff] }
 0x1f8   : > { %2207 = vst [vmem:[%s5845_s15 + $0x1e80] sm:$0xff] %v2206_v16  ;;  %2209 = vst [vmem:[%s5845_s15 + $0x1e88] sm:$0xff] %v2208_v17  ;;  %v2212_v19 = vld [vmem:[%s5840_s14 + $0x3d18] sm:$0xff]  ;;  %v2214_v20 = vld [vmem:[%s5840_s14 + $0x3d40] sm:$0xff] }
 0x1f9   : > { %2211 = vst [vmem:[%s5845_s15 + $0x1e90] sm:$0xff] %v2210_v18  ;;  %2213 = vst [vmem:[%s5845_s15 + $0x1e98] sm:$0xff] %v2212_v19  ;;  %v2216_v21 = vld [vmem:[%s5840_s14 + $0x3d48] sm:$0xff]  ;;  %v2218_v22 = vld [vmem:[%s5840_s14 + $0x3d50] sm:$0xff] }
 0x1fa   : > { %2215 = vst [vmem:[%s5845_s15 + $0x1ea0] sm:$0xff] %v2214_v20  ;;  %v2220_v23 = vld [vmem:[%s5840_s14 + $0x3d58] sm:$0xff]  ;;  %2217 = vst [vmem:[%s5845_s15 + $0x1ea8] sm:$0xff] %v2216_v21  ;;  %v2222_v24 = vld [vmem:[%s5840_s14 + $0x3d80] sm:$0xff] }
 0x1fb   : > { %2219 = vst [vmem:[%s5845_s15 + $0x1eb0] sm:$0xff] %v2218_v22  ;;  %2221 = vst [vmem:[%s5845_s15 + $0x1eb8] sm:$0xff] %v2220_v23  ;;  %v2224_v25 = vld [vmem:[%s5840_s14 + $0x3d88] sm:$0xff]  ;;  %v2226_v26 = vld [vmem:[%s5840_s14 + $0x3d90] sm:$0xff] }
 0x1fc   : > { %2223 = vst [vmem:[%s5845_s15 + $0x1ec0] sm:$0xff] %v2222_v24  ;;  %2225 = vst [vmem:[%s5845_s15 + $0x1ec8] sm:$0xff] %v2224_v25  ;;  %v2228_v27 = vld [vmem:[%s5840_s14 + $0x3d98] sm:$0xff]  ;;  %v2230_v28 = vld [vmem:[%s5840_s14 + $0x3dc0] sm:$0xff] }
 0x1fd   : > { %2227 = vst [vmem:[%s5845_s15 + $0x1ed0] sm:$0xff] %v2226_v26  ;;  %v2232_v29 = vld [vmem:[%s5840_s14 + $0x3dc8] sm:$0xff]  ;;  %2229 = vst [vmem:[%s5845_s15 + $0x1ed8] sm:$0xff] %v2228_v27  ;;  %v2234_v30 = vld [vmem:[%s5840_s14 + $0x3dd0] sm:$0xff] }
 0x1fe   : > { %2231 = vst [vmem:[%s5845_s15 + $0x1ee0] sm:$0xff] %v2230_v28  ;;  %2233 = vst [vmem:[%s5845_s15 + $0x1ee8] sm:$0xff] %v2232_v29  ;;  %v2236_v31 = vld [vmem:[%s5840_s14 + $0x3dd8] sm:$0xff]  ;;  %v2238_v32 = vld [vmem:[%s5840_s14 + $0x3e00] sm:$0xff] }
 0x1ff   : > { %2235 = vst [vmem:[%s5845_s15 + $0x1ef0] sm:$0xff] %v2234_v30  ;;  %2237 = vst [vmem:[%s5845_s15 + $0x1ef8] sm:$0xff] %v2236_v31  ;;  %v2240_v33 = vld [vmem:[%s5840_s14 + $0x3e08] sm:$0xff]  ;;  %v2242_v34 = vld [vmem:[%s5840_s14 + $0x3e10] sm:$0xff] }
 0x200   : > { %2239 = vst [vmem:[%s5845_s15 + $0x1f00] sm:$0xff] %v2238_v32  ;;  %v2244_v35 = vld [vmem:[%s5840_s14 + $0x3e18] sm:$0xff]  ;;  %2241 = vst [vmem:[%s5845_s15 + $0x1f08] sm:$0xff] %v2240_v33  ;;  %v2246_v36 = vld [vmem:[%s5840_s14 + $0x3e40] sm:$0xff] }
 0x201   : > { %2243 = vst [vmem:[%s5845_s15 + $0x1f10] sm:$0xff] %v2242_v34  ;;  %2245 = vst [vmem:[%s5845_s15 + $0x1f18] sm:$0xff] %v2244_v35  ;;  %v2248_v37 = vld [vmem:[%s5840_s14 + $0x3e48] sm:$0xff]  ;;  %v2250_v38 = vld [vmem:[%s5840_s14 + $0x3e50] sm:$0xff] }
 0x202   : > { %2247 = vst [vmem:[%s5845_s15 + $0x1f20] sm:$0xff] %v2246_v36  ;;  %2249 = vst [vmem:[%s5845_s15 + $0x1f28] sm:$0xff] %v2248_v37  ;;  %v2252_v39 = vld [vmem:[%s5840_s14 + $0x3e58] sm:$0xff]  ;;  %v2254_v40 = vld [vmem:[%s5840_s14 + $0x3e80] sm:$0xff] }
 0x203   : > { %2251 = vst [vmem:[%s5845_s15 + $0x1f30] sm:$0xff] %v2250_v38  ;;  %v2256_v41 = vld [vmem:[%s5840_s14 + $0x3e88] sm:$0xff]  ;;  %2253 = vst [vmem:[%s5845_s15 + $0x1f38] sm:$0xff] %v2252_v39  ;;  %v2258_v42 = vld [vmem:[%s5840_s14 + $0x3e90] sm:$0xff] }
 0x204   : > { %2255 = vst [vmem:[%s5845_s15 + $0x1f40] sm:$0xff] %v2254_v40  ;;  %2257 = vst [vmem:[%s5845_s15 + $0x1f48] sm:$0xff] %v2256_v41  ;;  %v2260_v43 = vld [vmem:[%s5840_s14 + $0x3e98] sm:$0xff]  ;;  %v2262_v44 = vld [vmem:[%s5840_s14 + $0x3ec0] sm:$0xff] }
 0x205   : > { %2259 = vst [vmem:[%s5845_s15 + $0x1f50] sm:$0xff] %v2258_v42  ;;  %2261 = vst [vmem:[%s5845_s15 + $0x1f58] sm:$0xff] %v2260_v43  ;;  %v2264_v45 = vld [vmem:[%s5840_s14 + $0x3ec8] sm:$0xff]  ;;  %v2266_v46 = vld [vmem:[%s5840_s14 + $0x3ed0] sm:$0xff] }
 0x206   : > { %2263 = vst [vmem:[%s5845_s15 + $0x1f60] sm:$0xff] %v2262_v44  ;;  %v2268_v47 = vld [vmem:[%s5840_s14 + $0x3ed8] sm:$0xff]  ;;  %2265 = vst [vmem:[%s5845_s15 + $0x1f68] sm:$0xff] %v2264_v45  ;;  %v2270_v48 = vld [vmem:[%s5840_s14 + $0x3f00] sm:$0xff] }
 0x207   : > { %2267 = vst [vmem:[%s5845_s15 + $0x1f70] sm:$0xff] %v2266_v46  ;;  %2269 = vst [vmem:[%s5845_s15 + $0x1f78] sm:$0xff] %v2268_v47  ;;  %v2272_v49 = vld [vmem:[%s5840_s14 + $0x3f08] sm:$0xff]  ;;  %v2274_v50 = vld [vmem:[%s5840_s14 + $0x3f10] sm:$0xff] }
 0x208   : > { %2271 = vst [vmem:[%s5845_s15 + $0x1f80] sm:$0xff] %v2270_v48  ;;  %2273 = vst [vmem:[%s5845_s15 + $0x1f88] sm:$0xff] %v2272_v49  ;;  %v2276_v51 = vld [vmem:[%s5840_s14 + $0x3f18] sm:$0xff]  ;;  %v2278_v52 = vld [vmem:[%s5840_s14 + $0x3f40] sm:$0xff] }
 0x209   : > { %2275 = vst [vmem:[%s5845_s15 + $0x1f90] sm:$0xff] %v2274_v50  ;;  %v2280_v53 = vld [vmem:[%s5840_s14 + $0x3f48] sm:$0xff]  ;;  %2277 = vst [vmem:[%s5845_s15 + $0x1f98] sm:$0xff] %v2276_v51  ;;  %v2282_v54 = vld [vmem:[%s5840_s14 + $0x3f50] sm:$0xff] }
 0x20a   : > { %2279 = vst [vmem:[%s5845_s15 + $0x1fa0] sm:$0xff] %v2278_v52  ;;  %2281 = vst [vmem:[%s5845_s15 + $0x1fa8] sm:$0xff] %v2280_v53  ;;  %v2284_v55 = vld [vmem:[%s5840_s14 + $0x3f58] sm:$0xff]  ;;  %v2286_v56 = vld [vmem:[%s5840_s14 + $0x3f80] sm:$0xff] }
 0x20b   : > { %2283 = vst [vmem:[%s5845_s15 + $0x1fb0] sm:$0xff] %v2282_v54  ;;  %2285 = vst [vmem:[%s5845_s15 + $0x1fb8] sm:$0xff] %v2284_v55  ;;  %v2288_v57 = vld [vmem:[%s5840_s14 + $0x3f88] sm:$0xff]  ;;  %v2290_v58 = vld [vmem:[%s5840_s14 + $0x3f90] sm:$0xff] }
 0x20c   : > { %2287 = vst [vmem:[%s5845_s15 + $0x1fc0] sm:$0xff] %v2286_v56  ;;  %v2292_v59 = vld [vmem:[%s5840_s14 + $0x3f98] sm:$0xff]  ;;  %2289 = vst [vmem:[%s5845_s15 + $0x1fc8] sm:$0xff] %v2288_v57  ;;  %v2294_v60 = vld [vmem:[%s5840_s14 + $0x3fc0] sm:$0xff] }
 0x20d   : > { %2291 = vst [vmem:[%s5845_s15 + $0x1fd0] sm:$0xff] %v2290_v58  ;;  %2293 = vst [vmem:[%s5845_s15 + $0x1fd8] sm:$0xff] %v2292_v59  ;;  %v2296_v61 = vld [vmem:[%s5840_s14 + $0x3fc8] sm:$0xff]  ;;  %v2298_v62 = vld [vmem:[%s5840_s14 + $0x3fd0] sm:$0xff] }
 0x20e   : > { %2295 = vst [vmem:[%s5845_s15 + $0x1fe0] sm:$0xff] %v2294_v60  ;;  %2297 = vst [vmem:[%s5845_s15 + $0x1fe8] sm:$0xff] %v2296_v61  ;;  %v2300_v63 = vld [vmem:[%s5840_s14 + $0x3fd8] sm:$0xff] }
 0x20f   : > { %2299 = vst [vmem:[%s5845_s15 + $0x1ff0] sm:$0xff] %v2298_v62  ;;  %2301 = vst [vmem:[%s5845_s15 + $0x1ff8] sm:$0xff] %v2300_v63 }
 0x210 PF: > { %p5538_p5 = scmp.ge.s32.totalorder %s5760_s26, 1  ;;  %p2323_p6 = scmp.lt.s32.totalorder %s5760_s26, 3 }
 0x212   : > { %p2324_p7 = pnand %p5538_p5, %p2323_p6 }
 0x213   : > { %s2330_s26 = sand.u32 (!%p2324_p7), 1, %s5752_s24   ;;  %s5540_s10 = sshll.u32 (!%p2324_p7), %s5820_s27, 2 }
 0x214   : > { %2327 = sbr.rel (%p2324_p7) target bundleno = 2115 (0x843), region = 67  ;;  %s5539_s29 = sshll.u32 (!%p2324_p7), %s2330_s26, 13 }
 0x215   : > { %s8155_s30 = scalar_lea.vmem (!%p2324_p7), [#allocation3], %s5539_s29  ;;  %p9214_p8 = scmp.lt.s32.totalorder (!%p2324_p7), %s5540_s10, 7 }
 0x216   : > { %s5541_s15 = sshll.u32 (!%p2324_p7), %s5820_s27, 6  ;;  %p2381_p10 = scmp.lt.s32.totalorder (!%p2324_p7), %s5820_s27, 1 }
 0x217   : > { %p9301_p9 = scmp.lt.s32.totalorder (!%p2324_p7), %s5541_s15, 127 }
 0x219   : > { %v2404_v0 = vld [vmem:[%s9442_s0 + $0x78] sm:$0xff]  ;;  %v5762_v1 = vmov 0.0   ;;  %v2403_v2 = vld [vmem:[%s9442_s0 + $0x70] sm:$0xff]  ;;  %v2402_v3 = vld [vmem:[%s9442_s0 + $0x68] sm:$0xff]  ;;  %vm2414_vm0 = vcmask 556032   ;;  %vm2421_vm1 = vcmask 1043456  }
 0x21a   : > { %2425 = vmatprep.subr.mxu0 %v5762_v1  ;;  %v2401_v4 = vld [vmem:[%s9442_s0 + $0x60] sm:$0xff]  ;;  %v2400_v5 = vld [vmem:[%s9442_s0 + $0x58] sm:$0xff]  ;;  %v7916_v6 = vld [vmem:[%s9443_s1 + $0x8] sm:$0xff]  ;;  %vm2511_vm2 = vcmask 261120   ;;  %s9456_s10 = smov (!%p9214_p8, %s5540_s10), 7  ;;  %s9458_s15 = smov (!%p9301_p9, %s5541_s15), 127 }
 0x21b   : > { %2426 = vmatpush1.msra.mxu0 %v2404_v0  ;;  %v2399_v7 = vld [vmem:[%s9442_s0 + $0x50] sm:$0xff]  ;;  %5545 = vmatprep.mubr.msk.f32.mxu0 %vm2414_vm0, %v7916_v6  ;;  %v7927_v8 = vld [vmem:[%s9444_s2 + $0x18] sm:$0xff]  ;;  %v2398_v10 = vld [vmem:[%s9442_s0 + $0x48] sm:$0xff]  ;;  %s2373_s14 = scalar_lea.vmem %s9447_s5, %s9456_s10  ;;  %s5542_s17 = sshll.u32 %s9458_s15, 3  ;;  %vm5449_vm3 = vcmask 74752  }
 0x21c   : > { %2427 = vmatprep.subr.mxu0 %v5762_v1  ;;  %5686 = vmatprep.subr.mxu1 %v7927_v8  ;;  %v7933_v9 = vld [vmem:[%s9444_s2 + $0x10] sm:$0xff]  ;;  %v2397_v11 = vld [vmem:[%s9442_s0 + $0x40] sm:$0xff]  ;;  %v2396_v12 = vld [vmem:[%s9442_s0 + $0x38] sm:$0xff]  ;;  %s9341_s20 = scalar_lea.vmem %s9448_s6, %s5542_s17  ;;  %s9460_s27 = smov (!%p2381_p10, %s5820_s27), 1 }
 0x21d   : > { %2428 = vmatpush1.msra.mxu0 %v2403_v2  ;;  %5687 = vmatpush3.msra.mxu1 %v7927_v8  ;;  %v2395_v13 = vld [vmem:[%s9442_s0 + $0x30] sm:$0xff]  ;;  %v2394_v14 = vld [vmem:[%s9442_s0 + $0x28] sm:$0xff]  ;;  %v2393_v15 = vld [vmem:[%s9442_s0 + $0x20] sm:$0xff]  ;;  %s5543_s21 = sshll.u32 %s9460_s27, 1 }
 0x21e   : > { %2429 = vmatprep.subr.mxu0 %v5762_v1  ;;  %5688 = vmatprep.subr.mxu1 %v7933_v9  ;;  %v2392_v16 = vld [vmem:[%s9442_s0 + $0x18] sm:$0xff]  ;;  %v2391_v17 = vld [vmem:[%s9442_s0 + $0x10] sm:$0xff]  ;;  %v2390_v18 = vld [vmem:[%s9442_s0 + $0x8] sm:$0xff]  ;;  %s2384_s26 = scalar_lea.vmem %s9449_s7, %s5543_s21 }
 0x21f   : > { %2430 = vmatpush1.msra.mxu0 %v2402_v3  ;;  %5689 = vmatpush3.msra.mxu1 %v7933_v9  ;;  %v2389_v19 = vld [vmem:[%s9442_s0] sm:$0xff]  ;;  %v2412_v21 = vld [vmem:[%s9442_s0 + $0xb8] sm:$0xff]  ;;  %v2411_v22 = vld [vmem:[%s9442_s0 + $0xb0] sm:$0xff] }
 0x220   : > { %2431 = vmatprep.subr.mxu0 %v5762_v1  ;;  %v2413_v20 = vld [vmem:[%s9442_s0 + $0xc0] sm:$0xf]  ;;  %v2410_v23 = vld [vmem:[%s9442_s0 + $0xa8] sm:$0xff]  ;;  %v2408_v25 = vld [vmem:[%s9442_s0 + $0x98] sm:$0xff] }
 0x221   : > { %2432 = vmatpush1.msra.mxu0 %v2401_v4  ;;  %v2409_v24 = vld [vmem:[%s9442_s0 + $0xa0] sm:$0xff]  ;;  %v2407_v26 = vld [vmem:[%s9442_s0 + $0x90] sm:$0xff]  ;;  %v2406_v27 = vld [vmem:[%s9442_s0 + $0x88] sm:$0xff] }
 0x222   : > { %2433 = vmatprep.subr.mxu0 %v5762_v1  ;;  %v2405_v28 = vld [vmem:[%s9442_s0 + $0x80] sm:$0xff]  ;;  %v8024_v30 = vld [vmem:[%s9443_s1 + $0x18] sm:$0xff]  ;;  %v8033_v31 = vld [vmem:[%s9443_s1 + $0x10] sm:$0xff] }
 0x223   : > { %2434 = vmatpush1.msra.mxu0 %v2400_v5  ;;  %v8018_v29 = vld [vmem:[%s9443_s1] sm:$0xff]  ;;  %v2501_v32 = vld [vmem:[%s9444_s2 + $0x8] sm:$0xff]  ;;  %v5574_v38 = vld [vmem:[%s9442_s0 + $0x138] sm:$0xff] }
 0x224   : > { %2435 = vmatprep.subr.mxu0 %v5762_v1  ;;  %5690 = vmatprep.subr.mxu1 %v2501_v32  ;;  %v2500_v33 = vld [vmem:[%s9444_s2] sm:$0xff]  ;;  %v5573_v40 = vld [vmem:[%s9442_s0 + $0x130] sm:$0xff]  ;;  %v5572_v41 = vld [vmem:[%s9442_s0 + $0x128] sm:$0xff] }
 0x225   : > { %2436 = vmatpush1.msra.mxu0 %v2399_v7  ;;  %5691 = vmatpush3.msra.mxu1 %v2501_v32  ;;  %v5575_v36 = vld [vmem:[%s9442_s0 + $0x140] sm:$0xff]  ;;  %v5570_v43 = vld [vmem:[%s9442_s0 + $0x118] sm:$0xff]  ;;  %v5569_v44 = vld [vmem:[%s9442_s0 + $0x110] sm:$0xff] }
 0x226   : > { %2437 = vmatprep.subr.mxu0 %v5762_v1  ;;  %5692 = vmatprep.subr.mxu1 %v2500_v33  ;;  %v5571_v42 = vld [vmem:[%s9442_s0 + $0x120] sm:$0xff]  ;;  %v5568_v45 = vld [vmem:[%s9442_s0 + $0x108] sm:$0xff]  ;;  %v5566_v47 = vld [vmem:[%s9442_s0 + $0xf8] sm:$0xff] }
 0x227   : > { %2438 = vmatpush1.msra.mxu0 %v2398_v10  ;;  %5693 = vmatpush3.msra.mxu1 %v2500_v33  ;;  %v5567_v46 = vld [vmem:[%s9442_s0 + $0x100] sm:$0xff]  ;;  %v5565_v48 = vld [vmem:[%s9442_s0 + $0xf0] sm:$0xff]  ;;  %v5564_v49 = vld [vmem:[%s9442_s0 + $0xe8] sm:$0xff] }
 0x228   : > { %2439 = vmatprep.subr.mxu0 %v5762_v1  ;;  %2716 = vmatprep.subr.mxu1 %v5762_v1  ;;  %v5563_v50 = vld [vmem:[%s9442_s0 + $0xe0] sm:$0xff]  ;;  %v5562_v51 = vld [vmem:[%s9442_s0 + $0xd8] sm:$0xff]  ;;  %v5561_v52 = vld [vmem:[%s9442_s0 + $0xd0] sm:$0xff] }
 0x229   : > { %2440 = vmatpush1.msra.mxu0 %v2397_v11  ;;  %v5560_v53 = vld [vmem:[%s9442_s0 + $0xc8] sm:$0xff]  ;;  %v5583_v55 = vld [vmem:[%s9442_s0 + $0x180] sm:$0xff]  ;;  %v5582_v56 = vld [vmem:[%s9442_s0 + $0x178] sm:$0xff] }
 0x22a   : > { %2441 = vmatprep.subr.mxu0 %v5762_v1  ;;  %v5584_v54 = vld [vmem:[%s9442_s0 + $0x188] sm:$0xf]  ;;  %v5581_v57 = vld [vmem:[%s9442_s0 + $0x170] sm:$0xff]  ;;  %v5579_v59 = vld [vmem:[%s9442_s0 + $0x160] sm:$0xff] }
 0x22b   : > { %2442 = vmatpush1.msra.mxu0 %v2396_v12  ;;  %v5580_v58 = vld [vmem:[%s9442_s0 + $0x168] sm:$0xff]  ;;  %v5578_v60 = vld [vmem:[%s9442_s0 + $0x158] sm:$0xff]  ;;  %v5577_v61 = vld [vmem:[%s9442_s0 + $0x150] sm:$0xff] }
 0x22c   : > { %2443 = vmatprep.subr.mxu0 %v5762_v1  ;;  %v5576_v62 = vld [vmem:[%s9442_s0 + $0x148] sm:$0xff]  ;;  %v3155_v3 = vld [vmem:[%s8155_s30 + $0x5c0] sm:$0xff] }
 0x22d   : > { %2444 = vmatpush1.msra.mxu0 %v2395_v13  ;;  %v3032_v63 = vld [vmem:[%s8155_s30 + $0x1e8] sm:$0xff]  ;;  %v3151_v5 = vld [vmem:[%s8155_s30 + $0x5a0] sm:$0xff] }
 0x22e   : > { %2445 = vmatprep.subr.mxu0 %v5762_v1  ;;  %v3160_v0 = vld [vmem:[%s8155_s30 + $0x5e8] sm:$0xff]  ;;  %v3147_v7 = vld [vmem:[%s8155_s30 + $0x580] sm:$0xff] }
 0x22f   : > { %2446 = vmatpush1.msra.mxu0 %v2394_v14  ;;  %v3156_v2 = vld [vmem:[%s8155_s30 + $0x5c8] sm:$0xff]  ;;  %v3139_v11 = vld [vmem:[%s8155_s30 + $0x540] sm:$0xff] }
 0x230   : > { %2447 = vmatprep.subr.mxu0 %v5762_v1  ;;  %v3152_v4 = vld [vmem:[%s8155_s30 + $0x5a8] sm:$0xff]  ;;  %v3135_v13 = vld [vmem:[%s8155_s30 + $0x520] sm:$0xff] }
 0x231   : > { %2448 = vmatpush1.msra.mxu0 %v2393_v15  ;;  %v3140_v10 = vld [vmem:[%s8155_s30 + $0x548] sm:$0xff]  ;;  %v3131_v15 = vld [vmem:[%s8155_s30 + $0x500] sm:$0xff] }
 0x232   : > { %2449 = vmatprep.subr.mxu0 %v5762_v1  ;;  %v3136_v12 = vld [vmem:[%s8155_s30 + $0x528] sm:$0xff] }
 0x233   : > { %2450 = vmatpush1.msra.mxu0 %v2392_v16  ;;  %v3132_v14 = vld [vmem:[%s8155_s30 + $0x508] sm:$0xff] }
 0x234   : > { %2451 = vmatprep.subr.mxu0 %v5762_v1  ;;  %v3128_v16 = vld [vmem:[%s8155_s30 + $0x4e8] sm:$0xff] }
 0x235   : > { %2452 = vmatpush1.msra.mxu0 %v2391_v17  ;;  %v3127_v17 = vld [vmem:[%s8155_s30 + $0x4e0] sm:$0xff] }
 0x236   : > { %2453 = vmatprep.subr.mxu0 %v5762_v1 }
 0x237   : > { %2454 = vmatpush1.msra.mxu0 %v2390_v18  ;;  %v3124_v18 = vld [vmem:[%s8155_s30 + $0x4c8] sm:$0xff] }
 0x238   : > { %2455 = vmatprep.subr.mxu0 %v5762_v1 }
 0x239   : > { %2456 = vmatpush1.msra.mxu0 %v2389_v19  ;;  %v3123_v19 = vld [vmem:[%s8155_s30 + $0x4c0] sm:$0xff] }
 0x23a   : > { %2471 = vmatprep.subr.mxu0 %v5762_v1 }
 0x23b   : > { %5544 = vmatpush2.msk.msra.mxu0 %vm2421_vm1, %v2413_v20  ;;  %v3120_v20 = vld [vmem:[%s8155_s30 + $0x4a8] sm:$0xff] }
 0x23c   : > { %2473 = vmatprep.subr.mxu0 %v5762_v1 }
 0x23d   : > { %2474 = vmatpush2.msra.mxu0 %v2412_v21  ;;  %v3119_v21 = vld [vmem:[%s8155_s30 + $0x4a0] sm:$0xff] }
 0x23e   : > { %2475 = vmatprep.subr.mxu0 %v5762_v1 }
 0x23f   : > { %2476 = vmatpush2.msra.mxu0 %v2411_v22  ;;  %v3116_v22 = vld [vmem:[%s8155_s30 + $0x488] sm:$0xff] }
 0x240   : > { %2477 = vmatprep.subr.mxu0 %v5762_v1 }
 0x241   : > { %2478 = vmatpush2.msra.mxu0 %v2410_v23  ;;  %v3115_v23 = vld [vmem:[%s8155_s30 + $0x480] sm:$0xff] }
 0x242   : > { %2479 = vmatprep.subr.mxu0 %v5762_v1 }
 0x243   : > { %2480 = vmatpush2.msra.mxu0 %v2409_v24  ;;  %v3112_v24 = vld [vmem:[%s8155_s30 + $0x468] sm:$0xff] }
 0x244   : > { %2481 = vmatprep.subr.mxu0 %v5762_v1 }
 0x245   : > { %2482 = vmatpush2.msra.mxu0 %v2408_v25  ;;  %v3111_v25 = vld [vmem:[%s8155_s30 + $0x460] sm:$0xff] }
 0x246   : > { %2483 = vmatprep.subr.mxu0 %v5762_v1 }
 0x247   : > { %2484 = vmatpush2.msra.mxu0 %v2407_v26  ;;  %v3108_v26 = vld [vmem:[%s8155_s30 + $0x448] sm:$0xff] }
 0x248   : > { %2485 = vmatprep.subr.mxu0 %v5762_v1 }
 0x249   : > { %2486 = vmatpush2.msra.mxu0 %v2406_v27  ;;  %v3107_v27 = vld [vmem:[%s8155_s30 + $0x440] sm:$0xff] }
 0x24a   : > { %2487 = vmatprep.subr.mxu0 %v5762_v1 }
 0x24b   : > { %2488 = vmatpush2.msra.mxu0 %v2405_v28  ;;  %v3104_v28 = vld [vmem:[%s8155_s30 + $0x428] sm:$0xff] }
 0x24c   : > { %2490 = vmatmul.mubr.f32.vlgmr.msra.gmra.mxu0 %v8018_v29  ;;  %5697 = vmatprep.subr.mxu0 %v7927_v8 }
 0x24d   : > { %5546 = vmatprep.mubr.msk.f32.mxu0 %vm2414_vm0, %v8024_v30  ;;  %5698 = vmatpush3.msra.mxu0 %v7927_v8  ;;  %v3144_v8 = vld [vmem:[%s8155_s30 + $0x568] sm:$0xff] }
 0x24e   : > { %5699 = vmatprep.subr.mxu0 %v7933_v9 }
 0x24f   : > { %5700 = vmatpush3.msra.mxu0 %v7933_v9  ;;  %v3143_v9 = vld [vmem:[%s8155_s30 + $0x560] sm:$0xff] }
 0x250   : > { %2495 = vmatmul.mubr.f32.gmra.mxu0 %v8033_v31  ;;  %5701 = vmatprep.subr.mxu0 %v2501_v32 }
 0x251   : > { %5702 = vmatpush3.msra.mxu0 %v2501_v32  ;;  %v3224_v32 = vld [vmem:[%s8155_s30 + $0x7e8] sm:$0xff] }
 0x252   : > { %5703 = vmatprep.subr.mxu0 %v2500_v33 }
 0x253   : > { %5704 = vmatpush3.msra.mxu0 %v2500_v33  ;;  %v3223_v33 = vld [vmem:[%s8155_s30 + $0x7e0] sm:$0xff] }
 0x254   : > { %4105 = vmatprep.subr.mxu0 %v3032_v63 }
 0x30c   : > { %v2491_v34 = vpop.f32.mrf.mxu0 }
 0x30d   : > { %5694 = vmatprep.mubr.msk.f32.mxu1 %vm2511_vm2, %v2491_v34  ;;  %v3220_v34 = vld [vmem:[%s8155_s30 + $0x7c8] sm:$0xff] }
 0x30e   : > { %v2493_v35 = vpop.f32.mrf.mxu0 }
 0x30f   : > { %v3219_v35 = vld [vmem:[%s8155_s30 + $0x7c0] sm:$0xff] }
 0x310   : > { %v2496_v37 = vpop.f32.mrf.mxu0 }
 0x311   : > { %5695 = vmatmul.mubr.msk.f32.vlgmr.msra.gmra.mxu1 %vm2511_vm2, %v2496_v37  ;;  %v5763_v37 = vmov 1983009808  }
 0x312   : > { %2717 = vmatpush1.msra.mxu1 %v5575_v36  ;;  %v2498_v39 = vpop.f32.mrf.mxu0  ;;  %5586 = vmatprep.mubr.msk.f32.mxu1 %vm2414_vm0, %v7916_v6  ;;  %v3148_v6 = vld [vmem:[%s8155_s30 + $0x588] sm:$0xff] }
 0x313   : > { %2718 = vmatprep.subr.mxu1 %v5762_v1  ;;  %v3216_v36 = vld [vmem:[%s8155_s30 + $0x7a8] sm:$0xff]  ;;  %v2600_v39 = vlaneseq }
 0x314   : > { %2719 = vmatpush1.msra.mxu1 %v5574_v38  ;;  %v2598_v38 = vunpack.c.l.s4 %v5763_v37  ;;  %v2972_v37 = vld [vmem:[%s8155_s30 + $0x8] sm:$0xff] }
 0x315   : > { %2720 = vmatprep.subr.mxu1 %v5762_v1 }
 0x316   : > { %2721 = vmatpush1.msra.mxu1 %v5573_v40  ;;  %v2599_v40 = vunpack.c.0.s8 %v2598_v38  ;;  %v2971_v38 = vld [vmem:[%s8155_s30] sm:$0xff] }
 0x317   : > { %2722 = vmatprep.subr.mxu1 %v5762_v1 }
 0x318   : > { %2723 = vmatpush1.msra.mxu1 %v5572_v41  ;;  %v8195_v41 = vshrl.u32 %v2600_v39, 7  ;;  %v3096_v39 = vld [vmem:[%s8155_s30 + $0x3e8] sm:$0xff] }
 0x319   : > { %2724 = vmatprep.subr.mxu1 %v5762_v1 }
 0x31a   : > { %2725 = vmatpush1.msra.mxu1 %v5571_v42  ;;  %v8200_v42 = vld [vmem:[%s9445_s3] ss:$0 sm:$0xff] }
 0x31b   : > { %2726 = vmatprep.subr.mxu1 %v5762_v1 }
 0x31c   : > { %2727 = vmatpush1.msra.mxu1 %v5570_v43 }
 0x31d   : > { %2728 = vmatprep.subr.mxu1 %v5762_v1 }
 0x31e   : > { %2729 = vmatpush1.msra.mxu1 %v5569_v44 }
 0x31f   : > { %2730 = vmatprep.subr.mxu1 %v5762_v1 }
 0x320   : > { %2731 = vmatpush1.msra.mxu1 %v5568_v45  ;;  %v8204_v45 = vsub.s32 %v2599_v40, %v8195_v41  ;;  %v3095_v40 = vld [vmem:[%s8155_s30 + $0x3e0] sm:$0xff] }
 0x321   : > { %2732 = vmatprep.subr.mxu1 %v5762_v1 }
 0x322   : > { %2733 = vmatpush1.msra.mxu1 %v5567_v46 }
 0x323   : > { %2734 = vmatprep.subr.mxu1 %v5762_v1 }
 0x324   : > { %2735 = vmatpush1.msra.mxu1 %v5566_v47 }
 0x325   : > { %2736 = vmatprep.subr.mxu1 %v5762_v1 }
 0x326   : > { %2737 = vmatpush1.msra.mxu1 %v5565_v48 }
 0x327   : > { %2738 = vmatprep.subr.mxu1 %v5762_v1 }
 0x328   : > { %2739 = vmatpush1.msra.mxu1 %v5564_v49 }
 0x329   : > { %2740 = vmatprep.subr.mxu1 %v5762_v1 }
 0x32a   : > { %2741 = vmatpush1.msra.mxu1 %v5563_v50 }
 0x32b   : > { %2742 = vmatprep.subr.mxu1 %v5762_v1 }
 0x32c   : > { %2743 = vmatpush1.msra.mxu1 %v5562_v51 }
 0x32d   : > { %2744 = vmatprep.subr.mxu1 %v5762_v1 }
 0x32e   : > { %2745 = vmatpush1.msra.mxu1 %v5561_v52 }
 0x32f   : > { %2746 = vmatprep.subr.mxu1 %v5762_v1 }
 0x330   : > { %2747 = vmatpush1.msra.mxu1 %v5560_v53 }
 0x331   : > { %2762 = vmatprep.subr.mxu1 %v5762_v1 }
 0x332   : > { %5585 = vmatpush2.msk.msra.mxu1 %vm2421_vm1, %v5584_v54 }
 0x333   : > { %2764 = vmatprep.subr.mxu1 %v5762_v1 }
 0x334   : > { %2765 = vmatpush2.msra.mxu1 %v5583_v55 }
 0x335   : > { %2766 = vmatprep.subr.mxu1 %v5762_v1 }
 0x336   : > { %2767 = vmatpush2.msra.mxu1 %v5582_v56 }
 0x337   : > { %2768 = vmatprep.subr.mxu1 %v5762_v1 }
 0x338   : > { %2769 = vmatpush2.msra.mxu1 %v5581_v57 }
 0x339   : > { %2770 = vmatprep.subr.mxu1 %v5762_v1 }
 0x33a   : > { %2771 = vmatpush2.msra.mxu1 %v5580_v58 }
 0x33b   : > { %2772 = vmatprep.subr.mxu1 %v5762_v1 }
 0x33c   : > { %2773 = vmatpush2.msra.mxu1 %v5579_v59 }
 0x33d   : > { %2774 = vmatprep.subr.mxu1 %v5762_v1 }
 0x33e   : > { %2775 = vmatpush2.msra.mxu1 %v5578_v60 }
 0x33f   : > { %2776 = vmatprep.subr.mxu1 %v5762_v1 }
 0x340   : > { %2777 = vmatpush2.msra.mxu1 %v5577_v61 }
 0x341   : > { %2778 = vmatprep.subr.mxu1 %v5762_v1  ;;  %v3159_v1 = vld [vmem:[%s8155_s30 + $0x5e0] sm:$0xff] }
 0x342   : > { %2779 = vmatpush2.msra.mxu1 %v5576_v62 }
 0x343   : > { %2781 = vmatmul.mubr.f32.vlgmr.msra.gmra.mxu1 %v8018_v29  ;;  %4176 = vmatprep.subr.mxu1 %v3160_v0  ;;  %v3103_v29 = vld [vmem:[%s8155_s30 + $0x420] sm:$0xff] }
 0x344   : > { %5587 = vmatprep.mubr.msk.f32.mxu1 %vm2414_vm0, %v8024_v30  ;;  %4177 = vmatpush1.msra.mxu1 %v3159_v1  ;;  %v3100_v30 = vld [vmem:[%s8155_s30 + $0x408] sm:$0xff] }
 0x345   : > { %4178 = vmatprep.subr.mxu1 %v3156_v2 }
 0x346   : > { %4179 = vmatpush1.msra.mxu1 %v3155_v3 }
 0x347   : > { %2786 = vmatmul.mubr.f32.gmra.mxu1 %v8033_v31  ;;  %4180 = vmatprep.subr.mxu1 %v3152_v4  ;;  %v3099_v31 = vld [vmem:[%s8155_s30 + $0x400] sm:$0xff] }
 0x348   : > { %4181 = vmatpush1.msra.mxu1 %v3151_v5 }
 0x349   : > { %4182 = vmatprep.subr.mxu1 %v3148_v6  ;;  %v3031_v6 = vld [vmem:[%s8155_s30 + $0x1e0] sm:$0xff] }
 0x34a   : > { %4183 = vmatpush1.msra.mxu1 %v3147_v7 }
 0x34b   : > { %4184 = vmatprep.subr.mxu1 %v3144_v8  ;;  %v3028_v8 = vld [vmem:[%s8155_s30 + $0x1c8] sm:$0xff] }
 0x34c   : > { %4185 = vmatpush1.msra.mxu1 %v3143_v9  ;;  %v3027_v9 = vld [vmem:[%s8155_s30 + $0x1c0] sm:$0xff] }
 0x34d   : > { %4186 = vmatprep.subr.mxu1 %v3140_v10 }
 0x34e   : > { %4187 = vmatpush1.msra.mxu1 %v3139_v11  ;;  %v3024_v11 = vld [vmem:[%s8155_s30 + $0x1a8] sm:$0xff] }
 0x34f   : > { %4188 = vmatprep.subr.mxu1 %v3136_v12  ;;  %v3023_v12 = vld [vmem:[%s8155_s30 + $0x1a0] sm:$0xff] }
 0x350   : > { %4189 = vmatpush1.msra.mxu1 %v3135_v13  ;;  %v3020_v13 = vld [vmem:[%s8155_s30 + $0x188] sm:$0xff] }
 0x351   : > { %4190 = vmatprep.subr.mxu1 %v3132_v14  ;;  %v3019_v14 = vld [vmem:[%s8155_s30 + $0x180] sm:$0xff] }
 0x352   : > { %4191 = vmatpush1.msra.mxu1 %v3131_v15  ;;  %v3016_v15 = vld [vmem:[%s8155_s30 + $0x168] sm:$0xff] }
 0x353   : > { %4192 = vmatprep.subr.mxu1 %v3128_v16  ;;  %v3015_v16 = vld [vmem:[%s8155_s30 + $0x160] sm:$0xff] }
 0x354   : > { %4193 = vmatpush1.msra.mxu1 %v3127_v17  ;;  %v3012_v17 = vld [vmem:[%s8155_s30 + $0x148] sm:$0xff] }
 0x355   : > { %4194 = vmatprep.subr.mxu1 %v3124_v18  ;;  %v3011_v18 = vld [vmem:[%s8155_s30 + $0x140] sm:$0xff] }
 0x356   : > { %4195 = vmatpush1.msra.mxu1 %v3123_v19  ;;  %v3008_v19 = vld [vmem:[%s8155_s30 + $0x128] sm:$0xff] }
 0x357   : > { %4196 = vmatprep.subr.mxu1 %v3120_v20  ;;  %v3007_v20 = vld [vmem:[%s8155_s30 + $0x120] sm:$0xff] }
 0x358   : > { %4197 = vmatpush1.msra.mxu1 %v3119_v21  ;;  %v3004_v21 = vld [vmem:[%s8155_s30 + $0x108] sm:$0xff] }
 0x359   : > { %4198 = vmatprep.subr.mxu1 %v3116_v22  ;;  %v3003_v22 = vld [vmem:[%s8155_s30 + $0x100] sm:$0xff] }
 0x35a   : > { %4199 = vmatpush1.msra.mxu1 %v3115_v23  ;;  %v3000_v23 = vld [vmem:[%s8155_s30 + $0xe8] sm:$0xff] }
 0x35b   : > { %4200 = vmatprep.subr.mxu1 %v3112_v24  ;;  %v2999_v24 = vld [vmem:[%s8155_s30 + $0xe0] sm:$0xff] }
 0x35c   : > { %4201 = vmatpush1.msra.mxu1 %v3111_v25  ;;  %v2996_v25 = vld [vmem:[%s8155_s30 + $0xc8] sm:$0xff] }
 0x35d   : > { %4202 = vmatprep.subr.mxu1 %v3108_v26  ;;  %v2995_v26 = vld [vmem:[%s8155_s30 + $0xc0] sm:$0xff] }
 0x35e   : > { %4203 = vmatpush1.msra.mxu1 %v3107_v27  ;;  %v2992_v27 = vld [vmem:[%s8155_s30 + $0xa8] sm:$0xff] }
 0x35f   : > { %4204 = vmatprep.subr.mxu1 %v3104_v28  ;;  %v2991_v28 = vld [vmem:[%s8155_s30 + $0xa0] sm:$0xff] }
 0x360   : > { %4205 = vmatpush1.msra.mxu1 %v3103_v29  ;;  %v2988_v29 = vld [vmem:[%s8155_s30 + $0x88] sm:$0xff] }
 0x361   : > { %4206 = vmatprep.subr.mxu1 %v3100_v30  ;;  %v2987_v30 = vld [vmem:[%s8155_s30 + $0x80] sm:$0xff] }
 0x362   : > { %4207 = vmatpush1.msra.mxu1 %v3099_v31  ;;  %v2984_v31 = vld [vmem:[%s8155_s30 + $0x68] sm:$0xff] }
 0x363   : > { %4208 = vmatprep.subr.mxu1 %v3224_v32  ;;  %v2983_v32 = vld [vmem:[%s8155_s30 + $0x60] sm:$0xff] }
 0x364   : > { %4209 = vmatpush2.msra.mxu1 %v3223_v33  ;;  %v2980_v33 = vld [vmem:[%s8155_s30 + $0x48] sm:$0xff] }
 0x365   : > { %4210 = vmatprep.subr.mxu1 %v3220_v34  ;;  %v2979_v34 = vld [vmem:[%s8155_s30 + $0x40] sm:$0xff] }
 0x366   : > { %4211 = vmatpush2.msra.mxu1 %v3219_v35  ;;  %v2976_v35 = vld [vmem:[%s8155_s30 + $0x28] sm:$0xff] }
 0x367   : > { %4212 = vmatprep.subr.mxu1 %v3216_v36  ;;  %v2975_v36 = vld [vmem:[%s8155_s30 + $0x20] sm:$0xff] }
 0x3d1   : > { %v5696_v43 = vpop.f32.mrf.mxu1 }
 0x3d2   : > { %v2590_v44 = vadd.f32 %v5696_v43, %v8200_v42  ;;  %v3092_v43 = vld [vmem:[%s8155_s30 + $0x3c8] sm:$0xff] }
 0x3d3   : > { %v2584_v46 = vpop.f32.mrf.mxu1 }
 0x3d4   : > { %v2594_v47 = vmax.f32 %v2590_v44, 0.0  ;;  %v2585_v48 = vadd.f32 %v8200_v42, %v2584_v46  ;;  %v3091_v44 = vld [vmem:[%s8155_s30 + $0x3c0] sm:$0xff]  ;;  %v3088_v46 = vld [vmem:[%s8155_s30 + $0x3a8] sm:$0xff] }
 0x3d6   : > { %2636 = vst [vmem:[#allocation2 + $0x10] sm:$0x1] %v2594_v47  ;;  %v2644_v49 = vrot.slane %v2594_v47, %v8204_v45  ;;  %v2656_v50 = vcombine.high %v2594_v47, %v2594_v47  ;;  %v2593_v51 = vmax.f32 %v2585_v48, 0.0  ;;  %v3087_v47 = vld [vmem:[%s8155_s30 + $0x3a0] sm:$0xff]  ;;  %v3084_v48 = vld [vmem:[%s8155_s30 + $0x388] sm:$0xff] }
 0x3d8   : > { %v5555_v52 = vrot.slane %v2644_v49, 9  ;;  %v2649_v53 = vcombine.high %v2644_v49, %v2644_v49  ;;  %v2663_v54 = vrot.slane %v2656_v50, %v8204_v45  ;;  %5557 = vst.sshfl [vmem:[#allocation2 + $0x18] sm:$0x1 pattern:$0x76325410] %v2656_v50  ;;  %v2603_v55 = vrot.slane %v2593_v51, %v8204_v45  ;;  %v3083_v49 = vld [vmem:[%s8155_s30 + $0x380] sm:$0xff] }
 0x3d9   : > { %2595 = vst [vmem:[#allocation2] sm:$0x1] %v2593_v51  ;;  %v2615_v56 = vcombine.high %v2593_v51, %v2593_v51  ;;  %v3215_v50 = vld [vmem:[%s8155_s30 + $0x7a0] sm:$0xff]  ;;  %v3080_v51 = vld [vmem:[%s8155_s30 + $0x368] sm:$0xff] }
 0x3da   : > { %2648 = vst [vmem:[#allocation2 + $0x12] sm:$0x1] %v5555_v52  ;;  %2651 = vst [vmem:[#allocation2 + $0x14] sm:$0x1] %v2649_v53  ;;  %v5556_v57 = vrot.slane %v2649_v53, 9  ;;  %v5558_v58 = vrot.slane %v2663_v54, 9  ;;  %v2670_v59 = vcombine.high %v2663_v54, %v2663_v54  ;;  %v2608_v61 = vcombine.high %v2603_v55, %v2603_v55  ;;  %4213 = vmatpush2.msra.mxu1 %v3215_v50 }
 0x3db   : > { %v5550_v60 = vrot.slane %v2603_v55, 9  ;;  %v2622_v62 = vrot.slane %v2615_v56, %v8204_v45  ;;  %5552 = vst.sshfl [vmem:[#allocation2 + $0x8] sm:$0x1 pattern:$0x76325410] %v2615_v56  ;;  %v3212_v52 = vld [vmem:[%s8155_s30 + $0x788] sm:$0xff] }
 0x3dc   : > { %2655 = vst [vmem:[#allocation2 + $0x16] sm:$0x1] %v5556_v57  ;;  %2669 = vst [vmem:[#allocation2 + $0x1a] sm:$0x1] %v5558_v58  ;;  %v5559_v63 = vrot.slane %v2670_v59, 9  ;;  %v5551_v0 = vrot.slane %v2608_v61, 9  ;;  %4214 = vmatprep.subr.mxu1 %v3212_v52 }
 0x3dd   : > { %2672 = vst [vmem:[#allocation2 + $0x1c] sm:$0x1] %v2670_v59  ;;  %2607 = vst [vmem:[#allocation2 + $0x2] sm:$0x1] %v5550_v60  ;;  %v5553_v1 = vrot.slane %v2622_v62, 9  ;;  %v2629_v2 = vcombine.high %v2622_v62, %v2622_v62  ;;  %v3079_v53 = vld [vmem:[%s8155_s30 + $0x360] sm:$0xff] }
 0x3de   : > { %2610 = vst [vmem:[#allocation2 + $0x4] sm:$0x1] %v2608_v61  ;;  %2676 = vst [vmem:[#allocation2 + $0x1e] sm:$0x1] %v5559_v63  ;;  %v3211_v54 = vld [vmem:[%s8155_s30 + $0x780] sm:$0xff]  ;;  %v3076_v55 = vld [vmem:[%s8155_s30 + $0x348] sm:$0xff] }
 0x3df   : > { %2614 = vst [vmem:[#allocation2 + $0x6] sm:$0x1] %v5551_v0  ;;  %2628 = vst [vmem:[#allocation2 + $0xa] sm:$0x1] %v5553_v1  ;;  %v5554_v3 = vrot.slane %v2629_v2, 9  ;;  %4215 = vmatpush2.msra.mxu1 %v3211_v54  ;;  %v3208_v56 = vld [vmem:[%s8155_s30 + $0x768] sm:$0xff] }
 0x3e0   : > { %2631 = vst [vmem:[#allocation2 + $0xc] sm:$0x1] %v2629_v2  ;;  %4216 = vmatprep.subr.mxu1 %v3208_v56  ;;  %v3075_v57 = vld [vmem:[%s8155_s30 + $0x340] sm:$0xff]  ;;  %v3072_v59 = vld [vmem:[%s8155_s30 + $0x328] sm:$0xff] }
 0x3e1   : > { %2635 = vst [vmem:[#allocation2 + $0xe] sm:$0x1] %v5554_v3  ;;  %v3207_v58 = vld [vmem:[%s8155_s30 + $0x760] sm:$0xff]  ;;  %v3204_v60 = vld [vmem:[%s8155_s30 + $0x748] sm:$0xff] }
 0x3e2   : > { %4217 = vmatpush2.msra.mxu1 %v3207_v58  ;;  %v3071_v61 = vld [vmem:[%s8155_s30 + $0x320] sm:$0xff]  ;;  %v3068_v63 = vld [vmem:[%s8155_s30 + $0x308] sm:$0xff] }
 0x3e3   : > { %4218 = vmatprep.subr.mxu1 %v3204_v60  ;;  %v3203_v62 = vld [vmem:[%s8155_s30 + $0x740] sm:$0xff]  ;;  %v3200_v0 = vld [vmem:[%s8155_s30 + $0x728] sm:$0xff] }
 0x3e4   : > { %4219 = vmatpush2.msra.mxu1 %v3203_v62  ;;  %v3067_v1 = vld [vmem:[%s8155_s30 + $0x300] sm:$0xff]  ;;  %v3064_v3 = vld [vmem:[%s8155_s30 + $0x2e8] sm:$0xff] }
 0x3e5   : > { %4220 = vmatprep.subr.mxu1 %v3200_v0  ;;  %v3199_v2 = vld [vmem:[%s8155_s30 + $0x720] sm:$0xff] }
 0x3e6   : > { %4221 = vmatpush2.msra.mxu1 %v3199_v2 }
 0x403   : > { %v2782_v4 = vpop.f32.mrf.mxu1 }
 0x404   : > { %5705 = vmatprep.mubr.msk.f32.mxu0 %vm2511_vm2, %v2782_v4  ;;  %v3196_v4 = vld [vmem:[%s8155_s30 + $0x708] sm:$0xff] }
 0x405   : > { %v2784_v5 = vpop.f32.mrf.mxu1  ;;  %4222 = vmatprep.subr.mxu1 %v3196_v4 }
 0x406   : > { %v3063_v5 = vld [vmem:[%s8155_s30 + $0x2e0] sm:$0xff] }
 0x407   : > { %v2787_v7 = vpop.f32.mrf.mxu1 }
 0x408   : > { %5706 = vmatmul.mubr.msk.f32.vlgmr.msra.gmra.mxu0 %vm2511_vm2, %v2787_v7  ;;  %v3060_v7 = vld [vmem:[%s8155_s30 + $0x2c8] sm:$0xff] }
 0x409   : > { %v2789_v10 = vpop.f32.mrf.mxu1  ;;  %4106 = vmatpush1.msra.mxu0 %v3031_v6  ;;  %v3195_v6 = vld [vmem:[%s8155_s30 + $0x700] sm:$0xff] }
 0x40a   : > { %4107 = vmatprep.subr.mxu0 %v3028_v8  ;;  %4223 = vmatpush2.msra.mxu1 %v3195_v6  ;;  %v3192_v8 = vld [vmem:[%s8155_s30 + $0x6e8] sm:$0xff]  ;;  %v3191_v10 = vld [vmem:[%s8155_s30 + $0x6e0] sm:$0xff] }
 0x40b   : > { %4108 = vmatpush1.msra.mxu0 %v3027_v9  ;;  %4224 = vmatprep.subr.mxu1 %v3192_v8  ;;  %v3059_v9 = vld [vmem:[%s8155_s30 + $0x2c0] sm:$0xff] }
 0x40c   : > { %4109 = vmatprep.subr.mxu0 %v3024_v11  ;;  %4225 = vmatpush2.msra.mxu1 %v3191_v10  ;;  %v3056_v11 = vld [vmem:[%s8155_s30 + $0x2a8] sm:$0xff] }
 0x40d   : > { %4110 = vmatpush1.msra.mxu0 %v3023_v12  ;;  %v3188_v12 = vld [vmem:[%s8155_s30 + $0x6c8] sm:$0xff] }
 0x40e   : > { %4111 = vmatprep.subr.mxu0 %v3020_v13  ;;  %4226 = vmatprep.subr.mxu1 %v3188_v12  ;;  %v3055_v13 = vld [vmem:[%s8155_s30 + $0x2a0] sm:$0xff] }
 0x40f   : > { %4112 = vmatpush1.msra.mxu0 %v3019_v14  ;;  %v3187_v14 = vld [vmem:[%s8155_s30 + $0x6c0] sm:$0xff] }
 0x410   : > { %4113 = vmatprep.subr.mxu0 %v3016_v15  ;;  %4227 = vmatpush2.msra.mxu1 %v3187_v14  ;;  %v3052_v15 = vld [vmem:[%s8155_s30 + $0x288] sm:$0xff]  ;;  %v3283_v14 = vld [vmem:[%s8155_s30 + $0x9c0] sm:$0xff] }
 0x411   : > { %4114 = vmatpush1.msra.mxu0 %v3015_v16  ;;  %v3184_v16 = vld [vmem:[%s8155_s30 + $0x6a8] sm:$0xff] }
 0x412   : > { %4115 = vmatprep.subr.mxu0 %v3012_v17  ;;  %4228 = vmatprep.subr.mxu1 %v3184_v16  ;;  %v3051_v17 = vld [vmem:[%s8155_s30 + $0x280] sm:$0xff]  ;;  %v3280_v16 = vld [vmem:[%s8155_s30 + $0x9a8] sm:$0xff] }
 0x413   : > { %4116 = vmatpush1.msra.mxu0 %v3011_v18  ;;  %v3183_v18 = vld [vmem:[%s8155_s30 + $0x6a0] sm:$0xff] }
 0x414   : > { %4117 = vmatprep.subr.mxu0 %v3008_v19  ;;  %v3048_v19 = vld [vmem:[%s8155_s30 + $0x268] sm:$0xff]  ;;  %4229 = vmatpush2.msra.mxu1 %v3183_v18 }
 0x415   : > { %4118 = vmatpush1.msra.mxu0 %v3007_v20  ;;  %v3180_v20 = vld [vmem:[%s8155_s30 + $0x688] sm:$0xff] }
 0x416   : > { %4119 = vmatprep.subr.mxu0 %v3004_v21  ;;  %v3047_v21 = vld [vmem:[%s8155_s30 + $0x260] sm:$0xff]  ;;  %4230 = vmatprep.subr.mxu1 %v3180_v20  ;;  %v3412_v18 = vld [vmem:[%s8155_s30 + $0xdc8] sm:$0xff] }
 0x417   : > { %4120 = vmatpush1.msra.mxu0 %v3003_v22  ;;  %v3179_v22 = vld [vmem:[%s8155_s30 + $0x680] sm:$0xff] }
 0x418   : > { %4121 = vmatprep.subr.mxu0 %v3000_v23  ;;  %v3044_v23 = vld [vmem:[%s8155_s30 + $0x248] sm:$0xff]  ;;  %4231 = vmatpush2.msra.mxu1 %v3179_v22  ;;  %v3411_v20 = vld [vmem:[%s8155_s30 + $0xdc0] sm:$0xff] }
 0x419   : > { %4122 = vmatpush1.msra.mxu0 %v2999_v24  ;;  %v3176_v24 = vld [vmem:[%s8155_s30 + $0x668] sm:$0xff] }
 0x41a   : > { %4123 = vmatprep.subr.mxu0 %v2996_v25  ;;  %v3043_v25 = vld [vmem:[%s8155_s30 + $0x240] sm:$0xff]  ;;  %4232 = vmatprep.subr.mxu1 %v3176_v24  ;;  %v3408_v22 = vld [vmem:[%s8155_s30 + $0xda8] sm:$0xff] }
 0x41b   : > { %4124 = vmatpush1.msra.mxu0 %v2995_v26  ;;  %v3175_v26 = vld [vmem:[%s8155_s30 + $0x660] sm:$0xff] }
 0x41c   : > { %4125 = vmatprep.subr.mxu0 %v2992_v27  ;;  %v3040_v27 = vld [vmem:[%s8155_s30 + $0x228] sm:$0xff]  ;;  %4233 = vmatpush2.msra.mxu1 %v3175_v26  ;;  %v3407_v24 = vld [vmem:[%s8155_s30 + $0xda0] sm:$0xff] }
 0x41d   : > { %4126 = vmatpush1.msra.mxu0 %v2991_v28  ;;  %v3172_v28 = vld [vmem:[%s8155_s30 + $0x648] sm:$0xff] }
 0x41e   : > { %4127 = vmatprep.subr.mxu0 %v2988_v29  ;;  %v3039_v29 = vld [vmem:[%s8155_s30 + $0x220] sm:$0xff]  ;;  %4234 = vmatprep.subr.mxu1 %v3172_v28  ;;  %v3404_v26 = vld [vmem:[%s8155_s30 + $0xd88] sm:$0xff] }
 0x41f   : > { %4128 = vmatpush1.msra.mxu0 %v2987_v30  ;;  %v3171_v30 = vld [vmem:[%s8155_s30 + $0x640] sm:$0xff] }
 0x420   : > { %4129 = vmatprep.subr.mxu0 %v2984_v31  ;;  %v3036_v31 = vld [vmem:[%s8155_s30 + $0x208] sm:$0xff]  ;;  %4235 = vmatpush2.msra.mxu1 %v3171_v30  ;;  %v3403_v28 = vld [vmem:[%s8155_s30 + $0xd80] sm:$0xff] }
 0x421   : > { %4130 = vmatpush1.msra.mxu0 %v2983_v32  ;;  %v3168_v32 = vld [vmem:[%s8155_s30 + $0x628] sm:$0xff] }
 0x422   : > { %4131 = vmatprep.subr.mxu0 %v2980_v33  ;;  %v3035_v33 = vld [vmem:[%s8155_s30 + $0x200] sm:$0xff]  ;;  %4236 = vmatprep.subr.mxu1 %v3168_v32  ;;  %v3400_v30 = vld [vmem:[%s8155_s30 + $0xd68] sm:$0xff] }
 0x423   : > { %4132 = vmatpush1.msra.mxu0 %v2979_v34  ;;  %v3167_v34 = vld [vmem:[%s8155_s30 + $0x620] sm:$0xff] }
 0x424   : > { %4133 = vmatprep.subr.mxu0 %v2976_v35  ;;  %4237 = vmatpush2.msra.mxu1 %v3167_v34  ;;  %v3164_v35 = vld [vmem:[%s8155_s30 + $0x608] sm:$0xff]  ;;  %v3399_v32 = vld [vmem:[%s8155_s30 + $0xd60] sm:$0xff] }
 0x425   : > { %4134 = vmatpush1.msra.mxu0 %v2975_v36  ;;  %v3288_v36 = vld [vmem:[%s8155_s30 + $0x9e8] sm:$0xff]  ;;  %4238 = vmatprep.subr.mxu1 %v3164_v35  ;;  %v3263_v35 = vld [vmem:[%s8155_s30 + $0x920] sm:$0xff] }
 0x426   : > { %4135 = vmatprep.subr.mxu0 %v2972_v37  ;;  %v3163_v37 = vld [vmem:[%s8155_s30 + $0x600] sm:$0xff]  ;;  %v3396_v34 = vld [vmem:[%s8155_s30 + $0xd48] sm:$0xff] }
 0x427   : > { %4136 = vmatpush1.msra.mxu0 %v2971_v38  ;;  %4239 = vmatpush2.msra.mxu1 %v3163_v37  ;;  %v3416_v38 = vld [vmem:[%s8155_s30 + $0xde8] sm:$0xff] }
 0x428   : > { %4137 = vmatprep.subr.mxu0 %v3096_v39  ;;  %4318 = vmatprep.subr.mxu1 %v3416_v38  ;;  %v3260_v37 = vld [vmem:[%s8155_s30 + $0x908] sm:$0xff] }
 0x429   : > { %4138 = vmatpush2.msra.mxu0 %v3095_v40  ;;  %v3392_v38 = vld [vmem:[%s8155_s30 + $0xd28] sm:$0xff] }
 0x42a   : > { %4139 = vmatprep.subr.mxu0 %v3092_v43 }
 0x42b   : > { %4140 = vmatpush2.msra.mxu0 %v3091_v44 }
 0x42c   : > { %4141 = vmatprep.subr.mxu0 %v3088_v46 }
 0x42d   : > { %4142 = vmatpush2.msra.mxu0 %v3087_v47 }
 0x42e   : > { %4143 = vmatprep.subr.mxu0 %v3084_v48 }
 0x42f   : > { %4144 = vmatpush2.msra.mxu0 %v3083_v49 }
 0x430   : > { %4145 = vmatprep.subr.mxu0 %v3080_v51 }
 0x431   : > { %4146 = vmatpush2.msra.mxu0 %v3079_v53 }
 0x432   : > { %4147 = vmatprep.subr.mxu0 %v3076_v55 }
 0x433   : > { %4148 = vmatpush2.msra.mxu0 %v3075_v57 }
 0x434   : > { %4149 = vmatprep.subr.mxu0 %v3072_v59 }
 0x435   : > { %4150 = vmatpush2.msra.mxu0 %v3071_v61 }
 0x436   : > { %4151 = vmatprep.subr.mxu0 %v3068_v63 }
 0x437   : > { %4152 = vmatpush2.msra.mxu0 %v3067_v1 }
 0x438   : > { %4153 = vmatprep.subr.mxu0 %v3064_v3 }
 0x439   : > { %4154 = vmatpush2.msra.mxu0 %v3063_v5 }
 0x43a   : > { %4155 = vmatprep.subr.mxu0 %v3060_v7 }
 0x43b   : > { %4156 = vmatpush2.msra.mxu0 %v3059_v9  ;;  %v3287_v9 = vld [vmem:[%s8155_s30 + $0x9e0] sm:$0xff] }
 0x43c   : > { %4157 = vmatprep.subr.mxu0 %v3056_v11  ;;  %v3284_v11 = vld [vmem:[%s8155_s30 + $0x9c8] sm:$0xff] }
 0x43d   : > { %4158 = vmatpush2.msra.mxu0 %v3055_v13 }
 0x43e   : > { %4159 = vmatprep.subr.mxu0 %v3052_v15  ;;  %v3415_v15 = vld [vmem:[%s8155_s30 + $0xde0] sm:$0xff] }
 0x43f   : > { %4160 = vmatpush2.msra.mxu0 %v3051_v17 }
 0x440   : > { %4161 = vmatprep.subr.mxu0 %v3048_v19  ;;  %v3279_v19 = vld [vmem:[%s8155_s30 + $0x9a0] sm:$0xff] }
 0x441   : > { %4162 = vmatpush2.msra.mxu0 %v3047_v21  ;;  %v3276_v21 = vld [vmem:[%s8155_s30 + $0x988] sm:$0xff] }
 0x442   : > { %4163 = vmatprep.subr.mxu0 %v3044_v23  ;;  %v3275_v23 = vld [vmem:[%s8155_s30 + $0x980] sm:$0xff] }
 0x443   : > { %4164 = vmatpush2.msra.mxu0 %v3043_v25  ;;  %v3272_v25 = vld [vmem:[%s8155_s30 + $0x968] sm:$0xff] }
 0x444   : > { %4165 = vmatprep.subr.mxu0 %v3040_v27  ;;  %v3271_v27 = vld [vmem:[%s8155_s30 + $0x960] sm:$0xff] }
 0x445   : > { %4166 = vmatpush2.msra.mxu0 %v3039_v29  ;;  %v3268_v29 = vld [vmem:[%s8155_s30 + $0x948] sm:$0xff] }
 0x446   : > { %4167 = vmatprep.subr.mxu0 %v3036_v31  ;;  %v3267_v31 = vld [vmem:[%s8155_s30 + $0x940] sm:$0xff] }
 0x447   : > { %4168 = vmatpush2.msra.mxu0 %v3035_v33  ;;  %v3264_v33 = vld [vmem:[%s8155_s30 + $0x928] sm:$0xff] }
 0x448   : > { %4247 = vmatprep.subr.mxu0 %v3288_v36  ;;  %v3395_v36 = vld [vmem:[%s8155_s30 + $0xd40] sm:$0xff] }
 0x4c8   : > { %v5707_v39 = vpop.f32.mrf.mxu0 }
 0x4c9   : > { %v2880_v40 = vadd.f32 %v5707_v39, %v8200_v42  ;;  %v3259_v39 = vld [vmem:[%s8155_s30 + $0x900] sm:$0xff] }
 0x4ca   : > { %v2874_v43 = vpop.f32.mrf.mxu0 }
 0x4cb   : > { %v2884_v44 = vmax.f32 %v2880_v40, 0.0  ;;  %v2875_v46 = vadd.f32 %v8200_v42, %v2874_v43  ;;  %v3391_v40 = vld [vmem:[%s8155_s30 + $0xd20] sm:$0xff]  ;;  %v3256_v43 = vld [vmem:[%s8155_s30 + $0x8e8] sm:$0xff] }
 0x4cd   : > { %2926 = vst [vmem:[#allocation2 + $0x11] sm:$0x1] %v2884_v44  ;;  %v2934_v47 = vrot.slane %v2884_v44, %v8204_v45  ;;  %v2946_v48 = vcombine.high %v2884_v44, %v2884_v44  ;;  %v2883_v49 = vmax.f32 %v2875_v46, 0.0  ;;  %v3388_v44 = vld [vmem:[%s8155_s30 + $0xd08] sm:$0xff]  ;;  %v3255_v46 = vld [vmem:[%s8155_s30 + $0x8e0] sm:$0xff] }
 0x4cf   : > { %v5596_v50 = vrot.slane %v2934_v47, 9  ;;  %v2939_v51 = vcombine.high %v2934_v47, %v2934_v47  ;;  %v2953_v52 = vrot.slane %v2946_v48, %v8204_v45  ;;  %5598 = vst.sshfl [vmem:[#allocation2 + $0x19] sm:$0x1 pattern:$0x76325410] %v2946_v48  ;;  %v2893_v53 = vrot.slane %v2883_v49, %v8204_v45  ;;  %v3387_v47 = vld [vmem:[%s8155_s30 + $0xd00] sm:$0xff] }
 0x4d0   : > { %2885 = vst [vmem:[#allocation2 + $0x1] sm:$0x1] %v2883_v49  ;;  %v2905_v54 = vcombine.high %v2883_v49, %v2883_v49  ;;  %v3252_v48 = vld [vmem:[%s8155_s30 + $0x8c8] sm:$0xff] }
 0x4d1   : > { %2938 = vst [vmem:[#allocation2 + $0x13] sm:$0x1] %v5596_v50  ;;  %2941 = vst [vmem:[#allocation2 + $0x15] sm:$0x1] %v2939_v51  ;;  %v5597_v55 = vrot.slane %v2939_v51, 9  ;;  %v5599_v56 = vrot.slane %v2953_v52, 9  ;;  %v2960_v57 = vcombine.high %v2953_v52, %v2953_v52  ;;  %v2898_v58 = vcombine.high %v2893_v53, %v2893_v53 }
 0x4d2   : > { %v5591_v42 = vrot.slane %v2893_v53, 9  ;;  %v2912_v59 = vrot.slane %v2905_v54, %v8204_v45  ;;  %5593 = vst.sshfl [vmem:[#allocation2 + $0x9] sm:$0x1 pattern:$0x76325410] %v2905_v54  ;;  %v3384_v49 = vld [vmem:[%s8155_s30 + $0xce8] sm:$0xff] }
 0x4d3   : > { %2945 = vst [vmem:[#allocation2 + $0x17] sm:$0x1] %v5597_v55  ;;  %2959 = vst [vmem:[#allocation2 + $0x1b] sm:$0x1] %v5599_v56  ;;  %v5600_v60 = vrot.slane %v2960_v57, 9  ;;  %v5592_v61 = vrot.slane %v2898_v58, 9 }
 0x4d4   : > { %2962 = vst [vmem:[#allocation2 + $0x1d] sm:$0x1] %v2960_v57  ;;  %2897 = vst [vmem:[#allocation2 + $0x3] sm:$0x1] %v5591_v42  ;;  %v5594_v62 = vrot.slane %v2912_v59, 9  ;;  %v2919_v63 = vcombine.high %v2912_v59, %v2912_v59  ;;  %v3251_v50 = vld [vmem:[%s8155_s30 + $0x8c0] sm:$0xff] }
 0x4d5   : > { %2900 = vst [vmem:[#allocation2 + $0x5] sm:$0x1] %v2898_v58  ;;  %2966 = vst [vmem:[#allocation2 + $0x1f] sm:$0x1] %v5600_v60  ;;  %v3383_v51 = vld [vmem:[%s8155_s30 + $0xce0] sm:$0xff]  ;;  %v3248_v52 = vld [vmem:[%s8155_s30 + $0x8a8] sm:$0xff] }
 0x4d6   : > { %2904 = vst [vmem:[#allocation2 + $0x7] sm:$0x1] %v5592_v61  ;;  %2918 = vst [vmem:[#allocation2 + $0xb] sm:$0x1] %v5594_v62  ;;  %v5595_v0 = vrot.slane %v2919_v63, 9  ;;  %v3380_v53 = vld [vmem:[%s8155_s30 + $0xcc8] sm:$0xff] }
 0x4d7   : > { %2921 = vst [vmem:[#allocation2 + $0xd] sm:$0x1] %v2919_v63  ;;  %v3247_v54 = vld [vmem:[%s8155_s30 + $0x8a0] sm:$0xff]  ;;  %v3244_v56 = vld [vmem:[%s8155_s30 + $0x888] sm:$0xff] }
 0x4d8   : > { %2925 = vst [vmem:[#allocation2 + $0xf] sm:$0x1] %v5595_v0  ;;  %v3379_v55 = vld [vmem:[%s8155_s30 + $0xcc0] sm:$0xff]  ;;  %v3376_v57 = vld [vmem:[%s8155_s30 + $0xca8] sm:$0xff] }
 0x4d9   : > { %v3243_v42 = vld [vmem:[%s8155_s30 + $0x880] sm:$0xff]  ;;  %v3240_v59 = vld [vmem:[%s8155_s30 + $0x868] sm:$0xff] }
 0x4da   : > { %v3375_v58 = vld [vmem:[%s8155_s30 + $0xca0] sm:$0xff]  ;;  %v3372_v60 = vld [vmem:[%s8155_s30 + $0xc88] sm:$0xff] }
 0x4db   : > { %v3239_v61 = vld [vmem:[%s8155_s30 + $0x860] sm:$0xff]  ;;  %v3236_v63 = vld [vmem:[%s8155_s30 + $0x848] sm:$0xff] }
 0x4dc   : > { %v3371_v62 = vld [vmem:[%s8155_s30 + $0xc80] sm:$0xff]  ;;  %v3368_v0 = vld [vmem:[%s8155_s30 + $0xc68] sm:$0xff] }
 0x4dd   : > { %v2967_v1 = vld [vmem:[#allocation2] sm:$0xff] }
 0x4de   : > { %v8312_v2 = vrot.slane %v2967_v1, %v8204_v45  ;;  %v4021_v3 = vcombine.high %v2967_v1, %v2967_v1  ;;  %v3235_v1 = vld [vmem:[%s8155_s30 + $0x840] sm:$0xff] }
 0x4df   : > { %v2968_v4 = vld [vmem:[#allocation2 + $0x8] sm:$0xff] }
 0x4e0   : > { %v8316_v5 = vcombine.high %v8312_v2, %v8312_v2  ;;  %v8319_v6 = vrot.slane %v4021_v3, %v8204_v45  ;;  %v8322_v7 = vrot.slane %v2968_v4, %v8204_v45  ;;  %v4038_v8 = vcombine.high %v2968_v4, %v2968_v4  ;;  %v3367_v3 = vld [vmem:[%s8155_s30 + $0xc60] sm:$0xff]  ;;  %v3232_v4 = vld [vmem:[%s8155_s30 + $0x828] sm:$0xff] }
 0x4e2   : > { %4169 = vmatprep.mubr.f32.mxu0 %v8316_v5  ;;  %v8328_v10 = vcombine.high %v8319_v6, %v8319_v6  ;;  %v8333_v12 = vcombine.high %v8322_v7, %v8322_v7  ;;  %v8336_v13 = vrot.slane %v4038_v8, %v8204_v45  ;;  %v3364_v8 = vld [vmem:[%s8155_s30 + $0xc48] sm:$0xff] }
 0x4e3   : > { %4170 = vmatmul.mubr.f32.vlgmr.msra.gmra.mxu0 %v8312_v2 }
 0x4e4   : > { %4248 = vmatpush1.msra.mxu0 %v3287_v9  ;;  %4240 = vmatprep.mubr.f32.mxu1 %v8328_v10  ;;  %v8345_v17 = vcombine.high %v8336_v13, %v8336_v13  ;;  %v3231_v9 = vld [vmem:[%s8155_s30 + $0x820] sm:$0xff] }
 0x4e5   : > { %4249 = vmatprep.subr.mxu0 %v3284_v11  ;;  %4311 = vmatprep.mubr.f32.mxu0 %v8333_v12  ;;  %v3363_v11 = vld [vmem:[%s8155_s30 + $0xc40] sm:$0xff] }
 0x4e6   : > { %4241 = vmatmul.mubr.f32.vlgmr.msra.gmra.mxu1 %v8319_v6  ;;  %4250 = vmatpush1.msra.mxu0 %v3283_v14  ;;  %v3228_v14 = vld [vmem:[%s8155_s30 + $0x808] sm:$0xff] }
 0x4e7   : > { %4319 = vmatpush1.msra.mxu1 %v3415_v15  ;;  %4251 = vmatprep.subr.mxu0 %v3280_v16  ;;  %v3360_v15 = vld [vmem:[%s8155_s30 + $0xc28] sm:$0xff]  ;;  %v3227_v16 = vld [vmem:[%s8155_s30 + $0x800] sm:$0xff] }
 0x4e8   : > { %4320 = vmatprep.subr.mxu1 %v3412_v18  ;;  %4382 = vmatprep.mubr.f32.mxu1 %v8345_v17  ;;  %v3359_v18 = vld [vmem:[%s8155_s30 + $0xc20] sm:$0xff] }
 0x4e9   : > { %4252 = vmatpush1.msra.mxu0 %v3279_v19  ;;  %4321 = vmatpush1.msra.mxu1 %v3411_v20  ;;  %v3352_v19 = vld [vmem:[%s8155_s30 + $0xbe8] sm:$0xff] }
 0x4ea   : > { %4253 = vmatprep.subr.mxu0 %v3276_v21  ;;  %4322 = vmatprep.subr.mxu1 %v3408_v22  ;;  %v3356_v20 = vld [vmem:[%s8155_s30 + $0xc08] sm:$0xff]  ;;  %v3351_v21 = vld [vmem:[%s8155_s30 + $0xbe0] sm:$0xff] }
 0x4eb   : > { %4254 = vmatpush1.msra.mxu0 %v3275_v23  ;;  %4323 = vmatpush1.msra.mxu1 %v3407_v24  ;;  %v3355_v22 = vld [vmem:[%s8155_s30 + $0xc00] sm:$0xff]  ;;  %v3348_v23 = vld [vmem:[%s8155_s30 + $0xbc8] sm:$0xff] }
 0x4ec   : > { %4255 = vmatprep.subr.mxu0 %v3272_v25  ;;  %4324 = vmatprep.subr.mxu1 %v3404_v26  ;;  %v3480_v24 = vld [vmem:[%s8155_s30 + $0xfe8] sm:$0xff]  ;;  %v3347_v25 = vld [vmem:[%s8155_s30 + $0xbc0] sm:$0xff] }
 0x4ed   : > { %4256 = vmatpush1.msra.mxu0 %v3271_v27  ;;  %4325 = vmatpush1.msra.mxu1 %v3403_v28  ;;  %v3479_v26 = vld [vmem:[%s8155_s30 + $0xfe0] sm:$0xff]  ;;  %v3344_v27 = vld [vmem:[%s8155_s30 + $0xba8] sm:$0xff] }
 0x4ee   : > { %4257 = vmatprep.subr.mxu0 %v3268_v29  ;;  %4326 = vmatprep.subr.mxu1 %v3400_v30  ;;  %v3476_v28 = vld [vmem:[%s8155_s30 + $0xfc8] sm:$0xff]  ;;  %v3343_v29 = vld [vmem:[%s8155_s30 + $0xba0] sm:$0xff] }
 0x4ef   : > { %4258 = vmatpush1.msra.mxu0 %v3267_v31  ;;  %4327 = vmatpush1.msra.mxu1 %v3399_v32  ;;  %v3475_v30 = vld [vmem:[%s8155_s30 + $0xfc0] sm:$0xff]  ;;  %v3340_v31 = vld [vmem:[%s8155_s30 + $0xb88] sm:$0xff] }
 0x4f0   : > { %4259 = vmatprep.subr.mxu0 %v3264_v33  ;;  %4328 = vmatprep.subr.mxu1 %v3396_v34  ;;  %v3472_v32 = vld [vmem:[%s8155_s30 + $0xfa8] sm:$0xff]  ;;  %v3339_v33 = vld [vmem:[%s8155_s30 + $0xb80] sm:$0xff] }
 0x4f1   : > { %4260 = vmatpush1.msra.mxu0 %v3263_v35  ;;  %4329 = vmatpush1.msra.mxu1 %v3395_v36  ;;  %v3471_v34 = vld [vmem:[%s8155_s30 + $0xfa0] sm:$0xff]  ;;  %v3336_v35 = vld [vmem:[%s8155_s30 + $0xb68] sm:$0xff] }
 0x4f2   : > { %4261 = vmatprep.subr.mxu0 %v3260_v37  ;;  %4330 = vmatprep.subr.mxu1 %v3392_v38  ;;  %v3468_v36 = vld [vmem:[%s8155_s30 + $0xf88] sm:$0xff]  ;;  %v3335_v37 = vld [vmem:[%s8155_s30 + $0xb60] sm:$0xff] }
 0x4f3   : > { %4262 = vmatpush1.msra.mxu0 %v3259_v39  ;;  %4331 = vmatpush1.msra.mxu1 %v3391_v40  ;;  %v3467_v38 = vld [vmem:[%s8155_s30 + $0xf80] sm:$0xff]  ;;  %v3332_v39 = vld [vmem:[%s8155_s30 + $0xb48] sm:$0xff] }
 0x4f4   : > { %4263 = vmatprep.subr.mxu0 %v3256_v43  ;;  %4332 = vmatprep.subr.mxu1 %v3388_v44  ;;  %v3464_v40 = vld [vmem:[%s8155_s30 + $0xf68] sm:$0xff]  ;;  %v3331_v43 = vld [vmem:[%s8155_s30 + $0xb40] sm:$0xff] }
 0x4f5   : > { %4264 = vmatpush1.msra.mxu0 %v3255_v46  ;;  %4333 = vmatpush1.msra.mxu1 %v3387_v47  ;;  %v3463_v44 = vld [vmem:[%s8155_s30 + $0xf60] sm:$0xff]  ;;  %v3328_v46 = vld [vmem:[%s8155_s30 + $0xb28] sm:$0xff] }
 0x4f6   : > { %4265 = vmatprep.subr.mxu0 %v3252_v48  ;;  %4334 = vmatprep.subr.mxu1 %v3384_v49  ;;  %v3460_v47 = vld [vmem:[%s8155_s30 + $0xf48] sm:$0xff]  ;;  %v3327_v48 = vld [vmem:[%s8155_s30 + $0xb20] sm:$0xff] }
 0x4f7   : > { %4266 = vmatpush1.msra.mxu0 %v3251_v50  ;;  %4335 = vmatpush1.msra.mxu1 %v3383_v51  ;;  %v3459_v49 = vld [vmem:[%s8155_s30 + $0xf40] sm:$0xff]  ;;  %v3324_v50 = vld [vmem:[%s8155_s30 + $0xb08] sm:$0xff] }
 0x4f8   : > { %4267 = vmatprep.subr.mxu0 %v3248_v52  ;;  %4336 = vmatprep.subr.mxu1 %v3380_v53  ;;  %v3456_v51 = vld [vmem:[%s8155_s30 + $0xf28] sm:$0xff]  ;;  %v3323_v52 = vld [vmem:[%s8155_s30 + $0xb00] sm:$0xff] }
 0x4f9   : > { %4268 = vmatpush1.msra.mxu0 %v3247_v54  ;;  %4337 = vmatpush1.msra.mxu1 %v3379_v55  ;;  %v3455_v53 = vld [vmem:[%s8155_s30 + $0xf20] sm:$0xff]  ;;  %v3320_v54 = vld [vmem:[%s8155_s30 + $0xae8] sm:$0xff] }
 0x4fa   : > { %4269 = vmatprep.subr.mxu0 %v3244_v56  ;;  %4338 = vmatprep.subr.mxu1 %v3376_v57  ;;  %v3452_v55 = vld [vmem:[%s8155_s30 + $0xf08] sm:$0xff]  ;;  %v3319_v56 = vld [vmem:[%s8155_s30 + $0xae0] sm:$0xff] }
 0x4fb   : > { %4270 = vmatpush1.msra.mxu0 %v3243_v42  ;;  %4339 = vmatpush1.msra.mxu1 %v3375_v58  ;;  %v3451_v57 = vld [vmem:[%s8155_s30 + $0xf00] sm:$0xff]  ;;  %v3316_v42 = vld [vmem:[%s8155_s30 + $0xac8] sm:$0xff] }
 0x4fc   : > { %4271 = vmatprep.subr.mxu0 %v3240_v59  ;;  %4340 = vmatprep.subr.mxu1 %v3372_v60  ;;  %v3448_v58 = vld [vmem:[%s8155_s30 + $0xee8] sm:$0xff]  ;;  %v3315_v59 = vld [vmem:[%s8155_s30 + $0xac0] sm:$0xff] }
 0x4fd   : > { %4272 = vmatpush1.msra.mxu0 %v3239_v61  ;;  %4341 = vmatpush1.msra.mxu1 %v3371_v62  ;;  %v3447_v60 = vld [vmem:[%s8155_s30 + $0xee0] sm:$0xff]  ;;  %v3312_v61 = vld [vmem:[%s8155_s30 + $0xaa8] sm:$0xff] }
 0x4fe   : > { %4273 = vmatprep.subr.mxu0 %v3236_v63  ;;  %4342 = vmatprep.subr.mxu1 %v3368_v0  ;;  %v3444_v62 = vld [vmem:[%s8155_s30 + $0xec8] sm:$0xff]  ;;  %v3311_v63 = vld [vmem:[%s8155_s30 + $0xaa0] sm:$0xff] }
 0x4ff   : > { %4274 = vmatpush1.msra.mxu0 %v3235_v1  ;;  %4343 = vmatpush1.msra.mxu1 %v3367_v3  ;;  %v3443_v0 = vld [vmem:[%s8155_s30 + $0xec0] sm:$0xff]  ;;  %v3308_v1 = vld [vmem:[%s8155_s30 + $0xa88] sm:$0xff] }
 0x500   : > { %4275 = vmatprep.subr.mxu0 %v3232_v4  ;;  %4344 = vmatprep.subr.mxu1 %v3364_v8  ;;  %v3440_v3 = vld [vmem:[%s8155_s30 + $0xea8] sm:$0xff]  ;;  %v3307_v4 = vld [vmem:[%s8155_s30 + $0xa80] sm:$0xff] }
 0x501   : > { %4276 = vmatpush1.msra.mxu0 %v3231_v9  ;;  %4345 = vmatpush1.msra.mxu1 %v3363_v11  ;;  %v3439_v8 = vld [vmem:[%s8155_s30 + $0xea0] sm:$0xff]  ;;  %v3304_v9 = vld [vmem:[%s8155_s30 + $0xa68] sm:$0xff] }
 0x502   : > { %4277 = vmatprep.subr.mxu0 %v3228_v14  ;;  %4346 = vmatprep.subr.mxu1 %v3360_v15  ;;  %v3436_v11 = vld [vmem:[%s8155_s30 + $0xe88] sm:$0xff]  ;;  %v3303_v14 = vld [vmem:[%s8155_s30 + $0xa60] sm:$0xff] }
 0x503   : > { %4278 = vmatpush1.msra.mxu0 %v3227_v16  ;;  %4347 = vmatpush1.msra.mxu1 %v3359_v18  ;;  %v3435_v15 = vld [vmem:[%s8155_s30 + $0xe80] sm:$0xff]  ;;  %v3300_v16 = vld [vmem:[%s8155_s30 + $0xa48] sm:$0xff] }
 0x504   : > { %4279 = vmatprep.subr.mxu0 %v3352_v19  ;;  %4348 = vmatprep.subr.mxu1 %v3356_v20  ;;  %v3432_v18 = vld [vmem:[%s8155_s30 + $0xe68] sm:$0xff]  ;;  %v3299_v19 = vld [vmem:[%s8155_s30 + $0xa40] sm:$0xff] }
 0x505   : > { %4280 = vmatpush2.msra.mxu0 %v3351_v21  ;;  %4349 = vmatpush1.msra.mxu1 %v3355_v22  ;;  %v3431_v20 = vld [vmem:[%s8155_s30 + $0xe60] sm:$0xff]  ;;  %v2969_v21 = vld [vmem:[#allocation2 + $0x10] sm:$0xff]  ;;  %v3296_v22 = vld [vmem:[%s8155_s30 + $0xa28] sm:$0xff] }
 0x506   : > { %4281 = vmatprep.subr.mxu0 %v3348_v23  ;;  %4350 = vmatprep.subr.mxu1 %v3480_v24  ;;  %v3428_v23 = vld [vmem:[%s8155_s30 + $0xe48] sm:$0xff]  ;;  %v3295_v24 = vld [vmem:[%s8155_s30 + $0xa20] sm:$0xff] }
 0x507   : > { %4282 = vmatpush2.msra.mxu0 %v3347_v25  ;;  %4351 = vmatpush2.msra.mxu1 %v3479_v26  ;;  %v3427_v25 = vld [vmem:[%s8155_s30 + $0xe40] sm:$0xff]  ;;  %v3292_v26 = vld [vmem:[%s8155_s30 + $0xa08] sm:$0xff] }
 0x508   : > { %4283 = vmatprep.subr.mxu0 %v3344_v27  ;;  %4352 = vmatprep.subr.mxu1 %v3476_v28  ;;  %v3424_v27 = vld [vmem:[%s8155_s30 + $0xe28] sm:$0xff]  ;;  %v4055_v28 = vcombine.high %v2969_v21, %v2969_v21 }
 0x509   : > { %4284 = vmatpush2.msra.mxu0 %v3343_v29  ;;  %4353 = vmatpush2.msra.mxu1 %v3475_v30  ;;  %v3291_v29 = vld [vmem:[%s8155_s30 + $0xa00] sm:$0xff] }
 0x50a   : > { %4285 = vmatprep.subr.mxu0 %v3340_v31  ;;  %4354 = vmatprep.subr.mxu1 %v3472_v32  ;;  %v3423_v30 = vld [vmem:[%s8155_s30 + $0xe20] sm:$0xff]  ;;  %v8470_v31 = vrot.slane %v2969_v21, %v8204_v45  ;;  %v3420_v32 = vld [vmem:[%s8155_s30 + $0xe08] sm:$0xff] }
 0x50b   : > { %4286 = vmatpush2.msra.mxu0 %v3339_v33  ;;  %4355 = vmatpush2.msra.mxu1 %v3471_v34  ;;  %v3544_v33 = vld [vmem:[%s8155_s30 + $0x11e8] sm:$0xff]  ;;  %v3419_v34 = vld [vmem:[%s8155_s30 + $0xe00] sm:$0xff] }
 0x50c   : > { %4287 = vmatprep.subr.mxu0 %v3336_v35  ;;  %4356 = vmatprep.subr.mxu1 %v3468_v36  ;;  %v3543_v35 = vld [vmem:[%s8155_s30 + $0x11e0] sm:$0xff]  ;;  %v8477_v36 = vrot.slane %v4055_v28, %v8204_v45  ;;  %v3504_v21 = vld [vmem:[%s8155_s30 + $0x10a8] sm:$0xff] }
 0x50d   : > { %4288 = vmatpush2.msra.mxu0 %v3335_v37  ;;  %4357 = vmatpush2.msra.mxu1 %v3467_v38  ;;  %v8482_v37 = vcombine.high %v8470_v31, %v8470_v31  ;;  %v3540_v38 = vld [vmem:[%s8155_s30 + $0x11c8] sm:$0xff]  ;;  %v3631_v28 = vld [vmem:[%s8155_s30 + $0x14a0] sm:$0xff] }
 0x50e   : > { %4289 = vmatprep.subr.mxu0 %v3332_v39  ;;  %4358 = vmatprep.subr.mxu1 %v3464_v40  ;;  %v3672_v39 = vld [vmem:[%s8155_s30 + $0x15e8] sm:$0xff]  ;;  %v3539_v40 = vld [vmem:[%s8155_s30 + $0x11c0] sm:$0xff] }
 0x50f   : > { %4290 = vmatpush2.msra.mxu0 %v3331_v43  ;;  %4359 = vmatpush2.msra.mxu1 %v3463_v44  ;;  %v3671_v43 = vld [vmem:[%s8155_s30 + $0x15e0] sm:$0xff]  ;;  %v8492_v44 = vcombine.high %v8477_v36, %v8477_v36 }
 0x510   : > { %4291 = vmatprep.subr.mxu0 %v3328_v46  ;;  %4360 = vmatprep.subr.mxu1 %v3460_v47  ;;  %v3536_v46 = vld [vmem:[%s8155_s30 + $0x11a8] sm:$0xff] }
 0x511   : > { %4292 = vmatpush2.msra.mxu0 %v3327_v48  ;;  %4361 = vmatpush2.msra.mxu1 %v3459_v49  ;;  %v3668_v47 = vld [vmem:[%s8155_s30 + $0x15c8] sm:$0xff]  ;;  %v3535_v48 = vld [vmem:[%s8155_s30 + $0x11a0] sm:$0xff] }
 0x512   : > { %4293 = vmatprep.subr.mxu0 %v3324_v50  ;;  %4362 = vmatprep.subr.mxu1 %v3456_v51  ;;  %v3667_v49 = vld [vmem:[%s8155_s30 + $0x15c0] sm:$0xff]  ;;  %v3532_v50 = vld [vmem:[%s8155_s30 + $0x1188] sm:$0xff] }
 0x513   : > { %4294 = vmatpush2.msra.mxu0 %v3323_v52  ;;  %4363 = vmatpush2.msra.mxu1 %v3455_v53  ;;  %v3664_v51 = vld [vmem:[%s8155_s30 + $0x15a8] sm:$0xff]  ;;  %v3531_v52 = vld [vmem:[%s8155_s30 + $0x1180] sm:$0xff] }
 0x514   : > { %4295 = vmatprep.subr.mxu0 %v3320_v54  ;;  %4364 = vmatprep.subr.mxu1 %v3452_v55  ;;  %v3663_v53 = vld [vmem:[%s8155_s30 + $0x15a0] sm:$0xff]  ;;  %v3528_v54 = vld [vmem:[%s8155_s30 + $0x1168] sm:$0xff] }
 0x515   : > { %4296 = vmatpush2.msra.mxu0 %v3319_v56  ;;  %4365 = vmatpush2.msra.mxu1 %v3451_v57  ;;  %v3660_v55 = vld [vmem:[%s8155_s30 + $0x1588] sm:$0xff]  ;;  %v3527_v56 = vld [vmem:[%s8155_s30 + $0x1160] sm:$0xff] }
 0x516   : > { %4297 = vmatprep.subr.mxu0 %v3316_v42  ;;  %4366 = vmatprep.subr.mxu1 %v3448_v58  ;;  %v3659_v57 = vld [vmem:[%s8155_s30 + $0x1580] sm:$0xff]  ;;  %v3524_v42 = vld [vmem:[%s8155_s30 + $0x1148] sm:$0xff] }
 0x517   : > { %4298 = vmatpush2.msra.mxu0 %v3315_v59  ;;  %4367 = vmatpush2.msra.mxu1 %v3447_v60  ;;  %v3656_v58 = vld [vmem:[%s8155_s30 + $0x1568] sm:$0xff]  ;;  %v3523_v59 = vld [vmem:[%s8155_s30 + $0x1140] sm:$0xff] }
 0x518   : > { %4299 = vmatprep.subr.mxu0 %v3312_v61  ;;  %4368 = vmatprep.subr.mxu1 %v3444_v62  ;;  %v3655_v60 = vld [vmem:[%s8155_s30 + $0x1560] sm:$0xff]  ;;  %v3520_v61 = vld [vmem:[%s8155_s30 + $0x1128] sm:$0xff] }
 0x519   : > { %4300 = vmatpush2.msra.mxu0 %v3311_v63  ;;  %4369 = vmatpush2.msra.mxu1 %v3443_v0  ;;  %v3652_v62 = vld [vmem:[%s8155_s30 + $0x1548] sm:$0xff]  ;;  %v3519_v63 = vld [vmem:[%s8155_s30 + $0x1120] sm:$0xff] }
 0x51a   : > { %4301 = vmatprep.subr.mxu0 %v3308_v1  ;;  %4370 = vmatprep.subr.mxu1 %v3440_v3  ;;  %v3651_v0 = vld [vmem:[%s8155_s30 + $0x1540] sm:$0xff]  ;;  %v3516_v1 = vld [vmem:[%s8155_s30 + $0x1108] sm:$0xff] }
 0x51b   : > { %4302 = vmatpush2.msra.mxu0 %v3307_v4  ;;  %4371 = vmatpush2.msra.mxu1 %v3439_v8  ;;  %v3648_v3 = vld [vmem:[%s8155_s30 + $0x1528] sm:$0xff]  ;;  %v3515_v4 = vld [vmem:[%s8155_s30 + $0x1100] sm:$0xff] }
 0x51c   : > { %4303 = vmatprep.subr.mxu0 %v3304_v9  ;;  %4372 = vmatprep.subr.mxu1 %v3436_v11  ;;  %v3647_v8 = vld [vmem:[%s8155_s30 + $0x1520] sm:$0xff]  ;;  %v3512_v9 = vld [vmem:[%s8155_s30 + $0x10e8] sm:$0xff] }
 0x51d   : > { %4304 = vmatpush2.msra.mxu0 %v3303_v14  ;;  %4373 = vmatpush2.msra.mxu1 %v3435_v15  ;;  %v3644_v11 = vld [vmem:[%s8155_s30 + $0x1508] sm:$0xff]  ;;  %v3511_v14 = vld [vmem:[%s8155_s30 + $0x10e0] sm:$0xff] }
 0x51e   : > { %4305 = vmatprep.subr.mxu0 %v3300_v16  ;;  %4374 = vmatprep.subr.mxu1 %v3432_v18  ;;  %v3643_v15 = vld [vmem:[%s8155_s30 + $0x1500] sm:$0xff]  ;;  %v3508_v16 = vld [vmem:[%s8155_s30 + $0x10c8] sm:$0xff] }
 0x51f   : > { %4306 = vmatpush2.msra.mxu0 %v3299_v19  ;;  %4375 = vmatpush2.msra.mxu1 %v3431_v20  ;;  %v3640_v18 = vld [vmem:[%s8155_s30 + $0x14e8] sm:$0xff]  ;;  %v3507_v19 = vld [vmem:[%s8155_s30 + $0x10c0] sm:$0xff] }
 0x520   : > { %4307 = vmatprep.subr.mxu0 %v3296_v22  ;;  %4376 = vmatprep.subr.mxu1 %v3428_v23  ;;  %v3639_v20 = vld [vmem:[%s8155_s30 + $0x14e0] sm:$0xff]  ;;  %v3636_v22 = vld [vmem:[%s8155_s30 + $0x14c8] sm:$0xff] }
 0x521   : > { %4308 = vmatpush2.msra.mxu0 %v3295_v24  ;;  %4377 = vmatpush2.msra.mxu1 %v3427_v25  ;;  %v3503_v23 = vld [vmem:[%s8155_s30 + $0x10a0] sm:$0xff]  ;;  %v3500_v25 = vld [vmem:[%s8155_s30 + $0x1088] sm:$0xff] }
 0x522   : > { %4309 = vmatprep.subr.mxu0 %v3292_v26  ;;  %4378 = vmatprep.subr.mxu1 %v3424_v27  ;;  %v3635_v24 = vld [vmem:[%s8155_s30 + $0x14c0] sm:$0xff]  ;;  %v3632_v26 = vld [vmem:[%s8155_s30 + $0x14a8] sm:$0xff] }
 0x523   : > { %4310 = vmatpush2.msra.mxu0 %v3291_v29  ;;  %4379 = vmatpush2.msra.mxu1 %v3423_v30  ;;  %v3499_v27 = vld [vmem:[%s8155_s30 + $0x1080] sm:$0xff]  ;;  %v3496_v29 = vld [vmem:[%s8155_s30 + $0x1068] sm:$0xff] }
 0x524   : > { %4312 = vmatmul.mubr.f32.vlgmr.msra.gmra.mxu0 %v8322_v7  ;;  %4380 = vmatprep.subr.mxu1 %v3420_v32  ;;  %v3628_v30 = vld [vmem:[%s8155_s30 + $0x1488] sm:$0xff]  ;;  %v3495_v32 = vld [vmem:[%s8155_s30 + $0x1060] sm:$0xff] }
 0x525   : > { %4389 = vmatprep.subr.mxu0 %v3544_v33  ;;  %4381 = vmatpush2.msra.mxu1 %v3419_v34  ;;  %v3627_v33 = vld [vmem:[%s8155_s30 + $0x1480] sm:$0xff]  ;;  %v3492_v34 = vld [vmem:[%s8155_s30 + $0x1048] sm:$0xff] }
 0x526   : > { %4390 = vmatpush1.msra.mxu0 %v3543_v35  ;;  %4453 = vmatprep.mubr.f32.mxu0 %v8482_v37  ;;  %v3624_v35 = vld [vmem:[%s8155_s30 + $0x1468] sm:$0xff] }
 0x527   : > { %4383 = vmatmul.mubr.f32.vlgmr.msra.gmra.mxu1 %v8336_v13  ;;  %4391 = vmatprep.subr.mxu0 %v3540_v38  ;;  %v3491_v38 = vld [vmem:[%s8155_s30 + $0x1040] sm:$0xff] }
 0x528   : > { %4460 = vmatprep.subr.mxu1 %v3672_v39  ;;  %4392 = vmatpush1.msra.mxu0 %v3539_v40  ;;  %v3623_v39 = vld [vmem:[%s8155_s30 + $0x1460] sm:$0xff]  ;;  %v3488_v40 = vld [vmem:[%s8155_s30 + $0x1028] sm:$0xff] }
 0x529   : > { %4461 = vmatpush1.msra.mxu1 %v3671_v43  ;;  %4524 = vmatprep.mubr.f32.mxu1 %v8492_v44  ;;  %v3620_v43 = vld [vmem:[%s8155_s30 + $0x1448] sm:$0xff] }
 0x52a   : > { %4393 = vmatprep.subr.mxu0 %v3536_v46  ;;  %4462 = vmatprep.subr.mxu1 %v3668_v47  ;;  %v3487_v46 = vld [vmem:[%s8155_s30 + $0x1020] sm:$0xff] }
 0x52b   : > { %4394 = vmatpush1.msra.mxu0 %v3535_v48  ;;  %4463 = vmatpush1.msra.mxu1 %v3667_v49  ;;  %v3619_v47 = vld [vmem:[%s8155_s30 + $0x1440] sm:$0xff]  ;;  %v3484_v48 = vld [vmem:[%s8155_s30 + $0x1008] sm:$0xff] }
 0x52c   : > { %4395 = vmatprep.subr.mxu0 %v3532_v50  ;;  %4464 = vmatprep.subr.mxu1 %v3664_v51  ;;  %v3616_v49 = vld [vmem:[%s8155_s30 + $0x1428] sm:$0xff]  ;;  %v3483_v50 = vld [vmem:[%s8155_s30 + $0x1000] sm:$0xff] }
 0x52d   : > { %4396 = vmatpush1.msra.mxu0 %v3531_v52  ;;  %4465 = vmatpush1.msra.mxu1 %v3663_v53  ;;  %v3615_v51 = vld [vmem:[%s8155_s30 + $0x1420] sm:$0xff]  ;;  %v3608_v52 = vld [vmem:[%s8155_s30 + $0x13e8] sm:$0xff] }
 0x52e   : > { %4397 = vmatprep.subr.mxu0 %v3528_v54  ;;  %4466 = vmatprep.subr.mxu1 %v3660_v55  ;;  %v3612_v53 = vld [vmem:[%s8155_s30 + $0x1408] sm:$0xff]  ;;  %v3607_v54 = vld [vmem:[%s8155_s30 + $0x13e0] sm:$0xff] }
 0x52f   : > { %4398 = vmatpush1.msra.mxu0 %v3527_v56  ;;  %4467 = vmatpush1.msra.mxu1 %v3659_v57  ;;  %v3611_v55 = vld [vmem:[%s8155_s30 + $0x1400] sm:$0xff]  ;;  %v3604_v56 = vld [vmem:[%s8155_s30 + $0x13c8] sm:$0xff] }
 0x530   : > { %4399 = vmatprep.subr.mxu0 %v3524_v42  ;;  %4468 = vmatprep.subr.mxu1 %v3656_v58  ;;  %v3736_v57 = vld [vmem:[%s8155_s30 + $0x17e8] sm:$0xff]  ;;  %v3603_v42 = vld [vmem:[%s8155_s30 + $0x13c0] sm:$0xff] }
 0x531   : > { %4400 = vmatpush1.msra.mxu0 %v3523_v59  ;;  %4469 = vmatpush1.msra.mxu1 %v3655_v60  ;;  %v3735_v58 = vld [vmem:[%s8155_s30 + $0x17e0] sm:$0xff]  ;;  %v3600_v59 = vld [vmem:[%s8155_s30 + $0x13a8] sm:$0xff] }
 0x532   : > { %4401 = vmatprep.subr.mxu0 %v3520_v61  ;;  %4470 = vmatprep.subr.mxu1 %v3652_v62  ;;  %v3732_v60 = vld [vmem:[%s8155_s30 + $0x17c8] sm:$0xff]  ;;  %v3599_v61 = vld [vmem:[%s8155_s30 + $0x13a0] sm:$0xff] }
 0x533   : > { %4402 = vmatpush1.msra.mxu0 %v3519_v63  ;;  %4471 = vmatpush1.msra.mxu1 %v3651_v0  ;;  %v3731_v62 = vld [vmem:[%s8155_s30 + $0x17c0] sm:$0xff]  ;;  %v3596_v63 = vld [vmem:[%s8155_s30 + $0x1388] sm:$0xff] }
 0x534   : > { %4403 = vmatprep.subr.mxu0 %v3516_v1  ;;  %4472 = vmatprep.subr.mxu1 %v3648_v3  ;;  %v3728_v0 = vld [vmem:[%s8155_s30 + $0x17a8] sm:$0xff]  ;;  %v3595_v1 = vld [vmem:[%s8155_s30 + $0x1380] sm:$0xff] }
 0x535   : > { %4404 = vmatpush1.msra.mxu0 %v3515_v4  ;;  %4473 = vmatpush1.msra.mxu1 %v3647_v8  ;;  %v3727_v3 = vld [vmem:[%s8155_s30 + $0x17a0] sm:$0xff]  ;;  %v3592_v4 = vld [vmem:[%s8155_s30 + $0x1368] sm:$0xff] }
 0x536   : > { %4405 = vmatprep.subr.mxu0 %v3512_v9  ;;  %4474 = vmatprep.subr.mxu1 %v3644_v11  ;;  %v3724_v8 = vld [vmem:[%s8155_s30 + $0x1788] sm:$0xff]  ;;  %v3591_v9 = vld [vmem:[%s8155_s30 + $0x1360] sm:$0xff] }
 0x537   : > { %4406 = vmatpush1.msra.mxu0 %v3511_v14  ;;  %4475 = vmatpush1.msra.mxu1 %v3643_v15  ;;  %v3723_v11 = vld [vmem:[%s8155_s30 + $0x1780] sm:$0xff]  ;;  %v3588_v14 = vld [vmem:[%s8155_s30 + $0x1348] sm:$0xff] }
 0x538   : > { %4407 = vmatprep.subr.mxu0 %v3508_v16  ;;  %4476 = vmatprep.subr.mxu1 %v3640_v18  ;;  %v3720_v15 = vld [vmem:[%s8155_s30 + $0x1768] sm:$0xff]  ;;  %v3587_v16 = vld [vmem:[%s8155_s30 + $0x1340] sm:$0xff] }
 0x539   : > { %4408 = vmatpush1.msra.mxu0 %v3507_v19  ;;  %4477 = vmatpush1.msra.mxu1 %v3639_v20  ;;  %v3719_v18 = vld [vmem:[%s8155_s30 + $0x1760] sm:$0xff]  ;;  %v3584_v19 = vld [vmem:[%s8155_s30 + $0x1328] sm:$0xff] }
 0x53a   : > { %4409 = vmatprep.subr.mxu0 %v3504_v21  ;;  %4478 = vmatprep.subr.mxu1 %v3636_v22  ;;  %v3716_v20 = vld [vmem:[%s8155_s30 + $0x1748] sm:$0xff]  ;;  %v3583_v21 = vld [vmem:[%s8155_s30 + $0x1320] sm:$0xff] }
 0x53b   : > { %4410 = vmatpush1.msra.mxu0 %v3503_v23  ;;  %4479 = vmatpush1.msra.mxu1 %v3635_v24  ;;  %v3715_v22 = vld [vmem:[%s8155_s30 + $0x1740] sm:$0xff]  ;;  %v3580_v23 = vld [vmem:[%s8155_s30 + $0x1308] sm:$0xff] }
 0x53c   : > { %4411 = vmatprep.subr.mxu0 %v3500_v25  ;;  %4480 = vmatprep.subr.mxu1 %v3632_v26  ;;  %v3712_v24 = vld [vmem:[%s8155_s30 + $0x1728] sm:$0xff]  ;;  %v3579_v25 = vld [vmem:[%s8155_s30 + $0x1300] sm:$0xff] }
 0x53d   : > { %4412 = vmatpush1.msra.mxu0 %v3499_v27  ;;  %4481 = vmatpush1.msra.mxu1 %v3631_v28  ;;  %v3711_v26 = vld [vmem:[%s8155_s30 + $0x1720] sm:$0xff]  ;;  %v3576_v27 = vld [vmem:[%s8155_s30 + $0x12e8] sm:$0xff] }
 0x53e   : > { %4413 = vmatprep.subr.mxu0 %v3496_v29  ;;  %4482 = vmatprep.subr.mxu1 %v3628_v30  ;;  %v3708_v28 = vld [vmem:[%s8155_s30 + $0x1708] sm:$0xff]  ;;  %v3575_v29 = vld [vmem:[%s8155_s30 + $0x12e0] sm:$0xff] }
 0x53f   : > { %4414 = vmatpush1.msra.mxu0 %v3495_v32  ;;  %4483 = vmatpush1.msra.mxu1 %v3627_v33  ;;  %v3707_v30 = vld [vmem:[%s8155_s30 + $0x1700] sm:$0xff]  ;;  %v3572_v32 = vld [vmem:[%s8155_s30 + $0x12c8] sm:$0xff] }
 0x540   : > { %4415 = vmatprep.subr.mxu0 %v3492_v34  ;;  %4484 = vmatprep.subr.mxu1 %v3624_v35  ;;  %v3704_v33 = vld [vmem:[%s8155_s30 + $0x16e8] sm:$0xff]  ;;  %v3571_v34 = vld [vmem:[%s8155_s30 + $0x12c0] sm:$0xff] }
 0x541   : > { %4416 = vmatpush1.msra.mxu0 %v3491_v38  ;;  %4485 = vmatpush1.msra.mxu1 %v3623_v39  ;;  %v3703_v35 = vld [vmem:[%s8155_s30 + $0x16e0] sm:$0xff]  ;;  %v3568_v38 = vld [vmem:[%s8155_s30 + $0x12a8] sm:$0xff] }
 0x542   : > { %4417 = vmatprep.subr.mxu0 %v3488_v40  ;;  %4486 = vmatprep.subr.mxu1 %v3620_v43  ;;  %v3700_v39 = vld [vmem:[%s8155_s30 + $0x16c8] sm:$0xff]  ;;  %v3567_v40 = vld [vmem:[%s8155_s30 + $0x12a0] sm:$0xff] }
 0x543   : > { %4418 = vmatpush1.msra.mxu0 %v3487_v46  ;;  %4487 = vmatpush1.msra.mxu1 %v3619_v47  ;;  %v3699_v43 = vld [vmem:[%s8155_s30 + $0x16c0] sm:$0xff]  ;;  %v3564_v46 = vld [vmem:[%s8155_s30 + $0x1288] sm:$0xff] }
 0x544   : > { %4419 = vmatprep.subr.mxu0 %v3484_v48  ;;  %4488 = vmatprep.subr.mxu1 %v3616_v49  ;;  %v3696_v47 = vld [vmem:[%s8155_s30 + $0x16a8] sm:$0xff]  ;;  %v3563_v48 = vld [vmem:[%s8155_s30 + $0x1280] sm:$0xff] }
 0x545   : > { %4420 = vmatpush1.msra.mxu0 %v3483_v50  ;;  %4489 = vmatpush1.msra.mxu1 %v3615_v51  ;;  %v3695_v49 = vld [vmem:[%s8155_s30 + $0x16a0] sm:$0xff]  ;;  %v3560_v50 = vld [vmem:[%s8155_s30 + $0x1268] sm:$0xff] }
 0x546   : > { %4421 = vmatprep.subr.mxu0 %v3608_v52  ;;  %4490 = vmatprep.subr.mxu1 %v3612_v53  ;;  %v3692_v51 = vld [vmem:[%s8155_s30 + $0x1688] sm:$0xff]  ;;  %v3559_v52 = vld [vmem:[%s8155_s30 + $0x1260] sm:$0xff] }
 0x547   : > { %4422 = vmatpush2.msra.mxu0 %v3607_v54  ;;  %4491 = vmatpush1.msra.mxu1 %v3611_v55  ;;  %v3691_v53 = vld [vmem:[%s8155_s30 + $0x1680] sm:$0xff]  ;;  %v3556_v54 = vld [vmem:[%s8155_s30 + $0x1248] sm:$0xff] }
 0x548   : > { %4423 = vmatprep.subr.mxu0 %v3604_v56  ;;  %4492 = vmatprep.subr.mxu1 %v3736_v57  ;;  %v3688_v55 = vld [vmem:[%s8155_s30 + $0x1668] sm:$0xff]  ;;  %v3555_v56 = vld [vmem:[%s8155_s30 + $0x1240] sm:$0xff] }
 0x549   : > { %4424 = vmatpush2.msra.mxu0 %v3603_v42  ;;  %4493 = vmatpush2.msra.mxu1 %v3735_v58  ;;  %v3687_v57 = vld [vmem:[%s8155_s30 + $0x1660] sm:$0xff]  ;;  %v2970_v42 = vld [vmem:[#allocation2 + $0x18] sm:$0xff]  ;;  %v3552_v58 = vld [vmem:[%s8155_s30 + $0x1228] sm:$0xff] }
 0x54a   : > { %4425 = vmatprep.subr.mxu0 %v3600_v59  ;;  %4494 = vmatprep.subr.mxu1 %v3732_v60  ;;  %v3684_v59 = vld [vmem:[%s8155_s30 + $0x1648] sm:$0xff]  ;;  %v3551_v60 = vld [vmem:[%s8155_s30 + $0x1220] sm:$0xff] }
 0x54b   : > { %4426 = vmatpush2.msra.mxu0 %v3599_v61  ;;  %4495 = vmatpush2.msra.mxu1 %v3731_v62  ;;  %v3683_v61 = vld [vmem:[%s8155_s30 + $0x1640] sm:$0xff]  ;;  %v3548_v62 = vld [vmem:[%s8155_s30 + $0x1208] sm:$0xff] }
 0x54c   : > { %4427 = vmatprep.subr.mxu0 %v3596_v63  ;;  %4496 = vmatprep.subr.mxu1 %v3728_v0  ;;  %v3680_v63 = vld [vmem:[%s8155_s30 + $0x1628] sm:$0xff]  ;;  %v4072_v0 = vcombine.high %v2970_v42, %v2970_v42 }
 0x54d   : > { %4428 = vmatpush2.msra.mxu0 %v3595_v1  ;;  %4497 = vmatpush2.msra.mxu1 %v3727_v3  ;;  %v3547_v1 = vld [vmem:[%s8155_s30 + $0x1200] sm:$0xff] }
 0x54e   : > { %4429 = vmatprep.subr.mxu0 %v3592_v4  ;;  %4498 = vmatprep.subr.mxu1 %v3724_v8  ;;  %v3679_v3 = vld [vmem:[%s8155_s30 + $0x1620] sm:$0xff]  ;;  %v8616_v4 = vrot.slane %v2970_v42, %v8204_v45  ;;  %v3676_v8 = vld [vmem:[%s8155_s30 + $0x1608] sm:$0xff] }
 0x54f   : > { %4430 = vmatpush2.msra.mxu0 %v3591_v9  ;;  %4499 = vmatpush2.msra.mxu1 %v3723_v11  ;;  %v3800_v9 = vld [vmem:[%s8155_s30 + $0x19e8] sm:$0xff]  ;;  %v3675_v11 = vld [vmem:[%s8155_s30 + $0x1600] sm:$0xff] }
 0x550   : > { %4431 = vmatprep.subr.mxu0 %v3588_v14  ;;  %4500 = vmatprep.subr.mxu1 %v3720_v15  ;;  %v3799_v14 = vld [vmem:[%s8155_s30 + $0x19e0] sm:$0xff]  ;;  %v8623_v15 = vrot.slane %v4072_v0, %v8204_v45  ;;  %v3896_v42 = vld [vmem:[%s8155_s30 + $0x1ce8] sm:$0xff] }
 0x551   : > { %4432 = vmatpush2.msra.mxu0 %v3587_v16  ;;  %4501 = vmatpush2.msra.mxu1 %v3719_v18  ;;  %v8628_v16 = vcombine.high %v8616_v4, %v8616_v4  ;;  %v3796_v18 = vld [vmem:[%s8155_s30 + $0x19c8] sm:$0xff]  ;;  %v3927_v45 = vld [vmem:[%s8155_s30 + $0x1de0] sm:$0xff] }
 0x552   : > { %4433 = vmatprep.subr.mxu0 %v3584_v19  ;;  %4502 = vmatprep.subr.mxu1 %v3716_v20  ;;  %v3928_v19 = vld [vmem:[%s8155_s30 + $0x1de8] sm:$0xff]  ;;  %v3795_v20 = vld [vmem:[%s8155_s30 + $0x19c0] sm:$0xff] }
 0x553   : > { %4434 = vmatpush2.msra.mxu0 %v3583_v21  ;;  %4503 = vmatpush2.msra.mxu1 %v3715_v22  ;;  %v8638_v21 = vcombine.high %v8623_v15, %v8623_v15  ;;  %v3792_v22 = vld [vmem:[%s8155_s30 + $0x19a8] sm:$0xff] }
 0x554   : > { %4435 = vmatprep.subr.mxu0 %v3580_v23  ;;  %4504 = vmatprep.subr.mxu1 %v3712_v24  ;;  %v3924_v23 = vld [vmem:[%s8155_s30 + $0x1dc8] sm:$0xff]  ;;  %v3791_v24 = vld [vmem:[%s8155_s30 + $0x19a0] sm:$0xff] }
 0x555   : > { %4436 = vmatpush2.msra.mxu0 %v3579_v25  ;;  %4505 = vmatpush2.msra.mxu1 %v3711_v26  ;;  %v3923_v25 = vld [vmem:[%s8155_s30 + $0x1dc0] sm:$0xff]  ;;  %v3788_v26 = vld [vmem:[%s8155_s30 + $0x1988] sm:$0xff] }
 0x556   : > { %4437 = vmatprep.subr.mxu0 %v3576_v27  ;;  %4506 = vmatprep.subr.mxu1 %v3708_v28  ;;  %v3920_v27 = vld [vmem:[%s8155_s30 + $0x1da8] sm:$0xff]  ;;  %v3787_v28 = vld [vmem:[%s8155_s30 + $0x1980] sm:$0xff] }
 0x557   : > { %4438 = vmatpush2.msra.mxu0 %v3575_v29  ;;  %4507 = vmatpush2.msra.mxu1 %v3707_v30  ;;  %v3919_v29 = vld [vmem:[%s8155_s30 + $0x1da0] sm:$0xff]  ;;  %v3784_v30 = vld [vmem:[%s8155_s30 + $0x1968] sm:$0xff] }
 0x558   : > { %4439 = vmatprep.subr.mxu0 %v3572_v32  ;;  %4508 = vmatprep.subr.mxu1 %v3704_v33  ;;  %v3916_v32 = vld [vmem:[%s8155_s30 + $0x1d88] sm:$0xff]  ;;  %v3783_v33 = vld [vmem:[%s8155_s30 + $0x1960] sm:$0xff] }
 0x559   : > { %4440 = vmatpush2.msra.mxu0 %v3571_v34  ;;  %4509 = vmatpush2.msra.mxu1 %v3703_v35  ;;  %v3915_v34 = vld [vmem:[%s8155_s30 + $0x1d80] sm:$0xff]  ;;  %v3780_v35 = vld [vmem:[%s8155_s30 + $0x1948] sm:$0xff] }
 0x55a   : > { %4441 = vmatprep.subr.mxu0 %v3568_v38  ;;  %4510 = vmatprep.subr.mxu1 %v3700_v39  ;;  %v3912_v38 = vld [vmem:[%s8155_s30 + $0x1d68] sm:$0xff]  ;;  %v3779_v39 = vld [vmem:[%s8155_s30 + $0x1940] sm:$0xff] }
 0x55b   : > { %4442 = vmatpush2.msra.mxu0 %v3567_v40  ;;  %4511 = vmatpush2.msra.mxu1 %v3699_v43  ;;  %v3911_v40 = vld [vmem:[%s8155_s30 + $0x1d60] sm:$0xff]  ;;  %v3776_v43 = vld [vmem:[%s8155_s30 + $0x1928] sm:$0xff] }
 0x55c   : > { %4443 = vmatprep.subr.mxu0 %v3564_v46  ;;  %4512 = vmatprep.subr.mxu1 %v3696_v47  ;;  %v3908_v46 = vld [vmem:[%s8155_s30 + $0x1d48] sm:$0xff]  ;;  %v3775_v47 = vld [vmem:[%s8155_s30 + $0x1920] sm:$0xff] }
 0x55d   : > { %4444 = vmatpush2.msra.mxu0 %v3563_v48  ;;  %4513 = vmatpush2.msra.mxu1 %v3695_v49  ;;  %v3907_v48 = vld [vmem:[%s8155_s30 + $0x1d40] sm:$0xff]  ;;  %v3772_v49 = vld [vmem:[%s8155_s30 + $0x1908] sm:$0xff] }
 0x55e   : > { %4445 = vmatprep.subr.mxu0 %v3560_v50  ;;  %4514 = vmatprep.subr.mxu1 %v3692_v51  ;;  %v3904_v50 = vld [vmem:[%s8155_s30 + $0x1d28] sm:$0xff]  ;;  %v3771_v51 = vld [vmem:[%s8155_s30 + $0x1900] sm:$0xff] }
 0x55f   : > { %4446 = vmatpush2.msra.mxu0 %v3559_v52  ;;  %4515 = vmatpush2.msra.mxu1 %v3691_v53  ;;  %v3903_v52 = vld [vmem:[%s8155_s30 + $0x1d20] sm:$0xff]  ;;  %v3768_v53 = vld [vmem:[%s8155_s30 + $0x18e8] sm:$0xff] }
 0x560   : > { %4447 = vmatprep.subr.mxu0 %v3556_v54  ;;  %4516 = vmatprep.subr.mxu1 %v3688_v55  ;;  %v3900_v54 = vld [vmem:[%s8155_s30 + $0x1d08] sm:$0xff]  ;;  %v3767_v55 = vld [vmem:[%s8155_s30 + $0x18e0] sm:$0xff] }
 0x561   : > { %4448 = vmatpush2.msra.mxu0 %v3555_v56  ;;  %4517 = vmatpush2.msra.mxu1 %v3687_v57  ;;  %v3899_v56 = vld [vmem:[%s8155_s30 + $0x1d00] sm:$0xff]  ;;  %v3764_v57 = vld [vmem:[%s8155_s30 + $0x18c8] sm:$0xff] }
 0x562   : > { %4449 = vmatprep.subr.mxu0 %v3552_v58  ;;  %4518 = vmatprep.subr.mxu1 %v3684_v59  ;;  %v3763_v58 = vld [vmem:[%s8155_s30 + $0x18c0] sm:$0xff]  ;;  %v3756_v0 = vld [vmem:[%s8155_s30 + $0x1888] sm:$0xff] }
 0x563   : > { %4450 = vmatpush2.msra.mxu0 %v3551_v60  ;;  %4519 = vmatpush2.msra.mxu1 %v3683_v61  ;;  %v3895_v59 = vld [vmem:[%s8155_s30 + $0x1ce0] sm:$0xff]  ;;  %v3760_v60 = vld [vmem:[%s8155_s30 + $0x18a8] sm:$0xff] }
 0x564   : > { %4451 = vmatprep.subr.mxu0 %v3548_v62  ;;  %4520 = vmatprep.subr.mxu1 %v3680_v63  ;;  %v3892_v61 = vld [vmem:[%s8155_s30 + $0x1cc8] sm:$0xff]  ;;  %v3759_v62 = vld [vmem:[%s8155_s30 + $0x18a0] sm:$0xff] }
 0x565   : > { %4452 = vmatpush2.msra.mxu0 %v3547_v1  ;;  %4521 = vmatpush2.msra.mxu1 %v3679_v3  ;;  %v3891_v63 = vld [vmem:[%s8155_s30 + $0x1cc0] sm:$0xff]  ;;  %v3888_v1 = vld [vmem:[%s8155_s30 + $0x1ca8] sm:$0xff] }
 0x566   : > { %4454 = vmatmul.mubr.f32.vlgmr.msra.gmra.mxu0 %v8470_v31  ;;  %4522 = vmatprep.subr.mxu1 %v3676_v8  ;;  %v3755_v3 = vld [vmem:[%s8155_s30 + $0x1880] sm:$0xff] }
 0x567   : > { %4531 = vmatprep.subr.mxu0 %v3800_v9  ;;  %4523 = vmatpush2.msra.mxu1 %v3675_v11  ;;  %v3887_v8 = vld [vmem:[%s8155_s30 + $0x1ca0] sm:$0xff]  ;;  %v3752_v9 = vld [vmem:[%s8155_s30 + $0x1868] sm:$0xff] }
 0x568   : > { %4532 = vmatpush1.msra.mxu0 %v3799_v14  ;;  %4595 = vmatprep.mubr.f32.mxu0 %v8628_v16  ;;  %v3884_v11 = vld [vmem:[%s8155_s30 + $0x1c88] sm:$0xff]  ;;  %v3751_v14 = vld [vmem:[%s8155_s30 + $0x1860] sm:$0xff] }
 0x569   : > { %4525 = vmatmul.mubr.f32.vlgmr.msra.gmra.mxu1 %v8477_v36  ;;  %4533 = vmatprep.subr.mxu0 %v3796_v18  ;;  %v3883_v18 = vld [vmem:[%s8155_s30 + $0x1c80] sm:$0xff] }
 0x56a   : > { %4602 = vmatprep.subr.mxu1 %v3928_v19  ;;  %4534 = vmatpush1.msra.mxu0 %v3795_v20  ;;  %v3748_v19 = vld [vmem:[%s8155_s30 + $0x1848] sm:$0xff] }
 0x56b   : > { %4603 = vmatpush1.msra.mxu1 %v3927_v45  ;;  %4666 = vmatprep.mubr.f32.mxu1 %v8638_v21  ;;  %v3880_v20 = vld [vmem:[%s8155_s30 + $0x1c68] sm:$0xff]  ;;  %v3747_v45 = vld [vmem:[%s8155_s30 + $0x1840] sm:$0xff] }
 0x56c   : > { %4535 = vmatprep.subr.mxu0 %v3792_v22  ;;  %4604 = vmatprep.subr.mxu1 %v3924_v23  ;;  %v3879_v22 = vld [vmem:[%s8155_s30 + $0x1c60] sm:$0xff]  ;;  %v3744_v23 = vld [vmem:[%s8155_s30 + $0x1828] sm:$0xff] }
 0x56d   : > { %4536 = vmatpush1.msra.mxu0 %v3791_v24  ;;  %4605 = vmatpush1.msra.mxu1 %v3923_v25  ;;  %v3876_v24 = vld [vmem:[%s8155_s30 + $0x1c48] sm:$0xff]  ;;  %v3743_v25 = vld [vmem:[%s8155_s30 + $0x1820] sm:$0xff] }
 0x56e   : > { %4537 = vmatprep.subr.mxu0 %v3788_v26  ;;  %4606 = vmatprep.subr.mxu1 %v3920_v27  ;;  %v3875_v26 = vld [vmem:[%s8155_s30 + $0x1c40] sm:$0xff]  ;;  %v3740_v27 = vld [vmem:[%s8155_s30 + $0x1808] sm:$0xff] }
 0x56f   : > { %4538 = vmatpush1.msra.mxu0 %v3787_v28  ;;  %4607 = vmatpush1.msra.mxu1 %v3919_v29  ;;  %v3872_v28 = vld [vmem:[%s8155_s30 + $0x1c28] sm:$0xff]  ;;  %v3739_v29 = vld [vmem:[%s8155_s30 + $0x1800] sm:$0xff] }
 0x570   : > { %4539 = vmatprep.subr.mxu0 %v3784_v30  ;;  %4608 = vmatprep.subr.mxu1 %v3916_v32  ;;  %v3871_v30 = vld [vmem:[%s8155_s30 + $0x1c20] sm:$0xff]  ;;  %v3864_v32 = vld [vmem:[%s8155_s30 + $0x1be8] sm:$0xff] }
 0x571   : > { %4540 = vmatpush1.msra.mxu0 %v3783_v33  ;;  %4609 = vmatpush1.msra.mxu1 %v3915_v34  ;;  %v3868_v33 = vld [vmem:[%s8155_s30 + $0x1c08] sm:$0xff]  ;;  %v3863_v34 = vld [vmem:[%s8155_s30 + $0x1be0] sm:$0xff] }
 0x572   : > { %4541 = vmatprep.subr.mxu0 %v3780_v35  ;;  %4610 = vmatprep.subr.mxu1 %v3912_v38  ;;  %v3867_v35 = vld [vmem:[%s8155_s30 + $0x1c00] sm:$0xff]  ;;  %v3860_v38 = vld [vmem:[%s8155_s30 + $0x1bc8] sm:$0xff] }
 0x573   : > { %4542 = vmatpush1.msra.mxu0 %v3779_v39  ;;  %4611 = vmatpush1.msra.mxu1 %v3911_v40  ;;  %v3992_v39 = vld [vmem:[%s8155_s30 + $0x1fe8] sm:$0xff]  ;;  %v3859_v40 = vld [vmem:[%s8155_s30 + $0x1bc0] sm:$0xff] }
 0x574   : > { %4543 = vmatprep.subr.mxu0 %v3776_v43  ;;  %4612 = vmatprep.subr.mxu1 %v3908_v46  ;;  %v3991_v43 = vld [vmem:[%s8155_s30 + $0x1fe0] sm:$0xff]  ;;  %v3856_v46 = vld [vmem:[%s8155_s30 + $0x1ba8] sm:$0xff] }
 0x575   : > { %4544 = vmatpush1.msra.mxu0 %v3775_v47  ;;  %4613 = vmatpush1.msra.mxu1 %v3907_v48  ;;  %v3988_v47 = vld [vmem:[%s8155_s30 + $0x1fc8] sm:$0xff]  ;;  %v3855_v48 = vld [vmem:[%s8155_s30 + $0x1ba0] sm:$0xff] }
 0x576   : > { %4545 = vmatprep.subr.mxu0 %v3772_v49  ;;  %4614 = vmatprep.subr.mxu1 %v3904_v50  ;;  %v3987_v49 = vld [vmem:[%s8155_s30 + $0x1fc0] sm:$0xff]  ;;  %v3852_v50 = vld [vmem:[%s8155_s30 + $0x1b88] sm:$0xff] }
 0x577   : > { %4546 = vmatpush1.msra.mxu0 %v3771_v51  ;;  %4615 = vmatpush1.msra.mxu1 %v3903_v52  ;;  %v3984_v51 = vld [vmem:[%s8155_s30 + $0x1fa8] sm:$0xff]  ;;  %v3851_v52 = vld [vmem:[%s8155_s30 + $0x1b80] sm:$0xff] }
 0x578   : > { %4547 = vmatprep.subr.mxu0 %v3768_v53  ;;  %4616 = vmatprep.subr.mxu1 %v3900_v54  ;;  %v3983_v53 = vld [vmem:[%s8155_s30 + $0x1fa0] sm:$0xff]  ;;  %v3848_v54 = vld [vmem:[%s8155_s30 + $0x1b68] sm:$0xff] }
 0x579   : > { %4548 = vmatpush1.msra.mxu0 %v3767_v55  ;;  %4617 = vmatpush1.msra.mxu1 %v3899_v56  ;;  %v3980_v55 = vld [vmem:[%s8155_s30 + $0x1f88] sm:$0xff]  ;;  %v3847_v56 = vld [vmem:[%s8155_s30 + $0x1b60] sm:$0xff] }
 0x57a   : > { %4549 = vmatprep.subr.mxu0 %v3764_v57  ;;  %4618 = vmatprep.subr.mxu1 %v3896_v42  ;;  %v3979_v57 = vld [vmem:[%s8155_s30 + $0x1f80] sm:$0xff]  ;;  %v3844_v42 = vld [vmem:[%s8155_s30 + $0x1b48] sm:$0xff] }
 0x57b   : > { %4550 = vmatpush1.msra.mxu0 %v3763_v58  ;;  %4619 = vmatpush1.msra.mxu1 %v3895_v59  ;;  %v3976_v58 = vld [vmem:[%s8155_s30 + $0x1f68] sm:$0xff]  ;;  %v3843_v59 = vld [vmem:[%s8155_s30 + $0x1b40] sm:$0xff] }
 0x57c   : > { %4551 = vmatprep.subr.mxu0 %v3760_v60  ;;  %4620 = vmatprep.subr.mxu1 %v3892_v61  ;;  %v3975_v60 = vld [vmem:[%s8155_s30 + $0x1f60] sm:$0xff]  ;;  %v3840_v61 = vld [vmem:[%s8155_s30 + $0x1b28] sm:$0xff] }
 0x57d   : > { %4552 = vmatpush1.msra.mxu0 %v3759_v62  ;;  %4621 = vmatpush1.msra.mxu1 %v3891_v63  ;;  %v3972_v62 = vld [vmem:[%s8155_s30 + $0x1f48] sm:$0xff]  ;;  %v3839_v63 = vld [vmem:[%s8155_s30 + $0x1b20] sm:$0xff] }
 0x57e   : > { %4553 = vmatprep.subr.mxu0 %v3756_v0  ;;  %4622 = vmatprep.subr.mxu1 %v3888_v1  ;;  %v3971_v0 = vld [vmem:[%s8155_s30 + $0x1f40] sm:$0xff]  ;;  %v3836_v1 = vld [vmem:[%s8155_s30 + $0x1b08] sm:$0xff] }
 0x57f   : > { %4554 = vmatpush1.msra.mxu0 %v3755_v3  ;;  %4623 = vmatpush1.msra.mxu1 %v3887_v8  ;;  %v3968_v3 = vld [vmem:[%s8155_s30 + $0x1f28] sm:$0xff]  ;;  %v3835_v8 = vld [vmem:[%s8155_s30 + $0x1b00] sm:$0xff] }
 0x580   : > { %4555 = vmatprep.subr.mxu0 %v3752_v9  ;;  %4624 = vmatprep.subr.mxu1 %v3884_v11  ;;  %v3967_v9 = vld [vmem:[%s8155_s30 + $0x1f20] sm:$0xff]  ;;  %v3832_v11 = vld [vmem:[%s8155_s30 + $0x1ae8] sm:$0xff] }
 0x581   : > { %4556 = vmatpush1.msra.mxu0 %v3751_v14  ;;  %4625 = vmatpush1.msra.mxu1 %v3883_v18  ;;  %v3964_v14 = vld [vmem:[%s8155_s30 + $0x1f08] sm:$0xff]  ;;  %v3831_v18 = vld [vmem:[%s8155_s30 + $0x1ae0] sm:$0xff] }
 0x582   : > { %4557 = vmatprep.subr.mxu0 %v3748_v19  ;;  %4626 = vmatprep.subr.mxu1 %v3880_v20  ;;  %v3963_v19 = vld [vmem:[%s8155_s30 + $0x1f00] sm:$0xff]  ;;  %v3828_v20 = vld [vmem:[%s8155_s30 + $0x1ac8] sm:$0xff] }
 0x583   : > { %4558 = vmatpush1.msra.mxu0 %v3747_v45  ;;  %4627 = vmatpush1.msra.mxu1 %v3879_v22  ;;  %v3960_v45 = vld [vmem:[%s8155_s30 + $0x1ee8] sm:$0xff]  ;;  %v3827_v22 = vld [vmem:[%s8155_s30 + $0x1ac0] sm:$0xff] }
 0x584   : > { %4559 = vmatprep.subr.mxu0 %v3744_v23  ;;  %4628 = vmatprep.subr.mxu1 %v3876_v24  ;;  %v3959_v23 = vld [vmem:[%s8155_s30 + $0x1ee0] sm:$0xff]  ;;  %v3824_v24 = vld [vmem:[%s8155_s30 + $0x1aa8] sm:$0xff] }
 0x585   : > { %4560 = vmatpush1.msra.mxu0 %v3743_v25  ;;  %4629 = vmatpush1.msra.mxu1 %v3875_v26  ;;  %v3956_v25 = vld [vmem:[%s8155_s30 + $0x1ec8] sm:$0xff]  ;;  %v3823_v26 = vld [vmem:[%s8155_s30 + $0x1aa0] sm:$0xff] }
 0x586   : > { %4561 = vmatprep.subr.mxu0 %v3740_v27  ;;  %4630 = vmatprep.subr.mxu1 %v3872_v28  ;;  %v3955_v27 = vld [vmem:[%s8155_s30 + $0x1ec0] sm:$0xff]  ;;  %v3820_v28 = vld [vmem:[%s8155_s30 + $0x1a88] sm:$0xff] }
 0x587   : > { %4562 = vmatpush1.msra.mxu0 %v3739_v29  ;;  %4631 = vmatpush1.msra.mxu1 %v3871_v30  ;;  %v3952_v29 = vld [vmem:[%s8155_s30 + $0x1ea8] sm:$0xff]  ;;  %v3819_v30 = vld [vmem:[%s8155_s30 + $0x1a80] sm:$0xff] }
 0x588   : > { %4563 = vmatprep.subr.mxu0 %v3864_v32  ;;  %4632 = vmatprep.subr.mxu1 %v3868_v33  ;;  %v3951_v32 = vld [vmem:[%s8155_s30 + $0x1ea0] sm:$0xff]  ;;  %v3816_v33 = vld [vmem:[%s8155_s30 + $0x1a68] sm:$0xff] }
 0x589   : > { %4564 = vmatpush2.msra.mxu0 %v3863_v34  ;;  %4633 = vmatpush1.msra.mxu1 %v3867_v35  ;;  %v3948_v34 = vld [vmem:[%s8155_s30 + $0x1e88] sm:$0xff]  ;;  %v3815_v35 = vld [vmem:[%s8155_s30 + $0x1a60] sm:$0xff] }
 0x58a   : > { %4565 = vmatprep.subr.mxu0 %v3860_v38  ;;  %4634 = vmatprep.subr.mxu1 %v3992_v39  ;;  %v3947_v38 = vld [vmem:[%s8155_s30 + $0x1e80] sm:$0xff]  ;;  %v3812_v39 = vld [vmem:[%s8155_s30 + $0x1a48] sm:$0xff] }
 0x58b   : > { %4566 = vmatpush2.msra.mxu0 %v3859_v40  ;;  %4635 = vmatpush2.msra.mxu1 %v3991_v43  ;;  %v3944_v40 = vld [vmem:[%s8155_s30 + $0x1e68] sm:$0xff]  ;;  %v3811_v43 = vld [vmem:[%s8155_s30 + $0x1a40] sm:$0xff] }
 0x58c   : > { %4567 = vmatprep.subr.mxu0 %v3856_v46  ;;  %4636 = vmatprep.subr.mxu1 %v3988_v47  ;;  %v3943_v46 = vld [vmem:[%s8155_s30 + $0x1e60] sm:$0xff]  ;;  %v3808_v47 = vld [vmem:[%s8155_s30 + $0x1a28] sm:$0xff] }
 0x58d   : > { %4568 = vmatpush2.msra.mxu0 %v3855_v48  ;;  %4637 = vmatpush2.msra.mxu1 %v3987_v49  ;;  %v3940_v48 = vld [vmem:[%s8155_s30 + $0x1e48] sm:$0xff]  ;;  %v3807_v49 = vld [vmem:[%s8155_s30 + $0x1a20] sm:$0xff] }
 0x58e   : > { %4569 = vmatprep.subr.mxu0 %v3852_v50  ;;  %4638 = vmatprep.subr.mxu1 %v3984_v51  ;;  %v3939_v50 = vld [vmem:[%s8155_s30 + $0x1e40] sm:$0xff]  ;;  %v3804_v51 = vld [vmem:[%s8155_s30 + $0x1a08] sm:$0xff] }
 0x58f   : > { %4570 = vmatpush2.msra.mxu0 %v3851_v52  ;;  %4639 = vmatpush2.msra.mxu1 %v3983_v53  ;;  %v3936_v52 = vld [vmem:[%s8155_s30 + $0x1e28] sm:$0xff]  ;;  %v3803_v53 = vld [vmem:[%s8155_s30 + $0x1a00] sm:$0xff] }
 0x590   : > { %4571 = vmatprep.subr.mxu0 %v3848_v54  ;;  %4640 = vmatprep.subr.mxu1 %v3980_v55  ;;  %v3935_v54 = vld [vmem:[%s8155_s30 + $0x1e20] sm:$0xff]  ;;  %v3932_v55 = vld [vmem:[%s8155_s30 + $0x1e08] sm:$0xff] }
 0x591   : > { %4572 = vmatpush2.msra.mxu0 %v3847_v56  ;;  %4641 = vmatpush2.msra.mxu1 %v3979_v57  ;;  %v3034_v56 = vld [vmem:[%s8155_s30 + $0x1f8] sm:$0xff]  ;;  %v3931_v57 = vld [vmem:[%s8155_s30 + $0x1e00] sm:$0xff] }
 0x592   : > { %4573 = vmatprep.subr.mxu0 %v3844_v42  ;;  %4642 = vmatprep.subr.mxu1 %v3976_v58  ;;  %v3033_v42 = vld [vmem:[%s8155_s30 + $0x1f0] sm:$0xff]  ;;  %v3030_v58 = vld [vmem:[%s8155_s30 + $0x1d8] sm:$0xff] }
 0x593   : > { %4574 = vmatpush2.msra.mxu0 %v3843_v59  ;;  %4643 = vmatpush2.msra.mxu1 %v3975_v60  ;;  %v3162_v59 = vld [vmem:[%s8155_s30 + $0x5f8] sm:$0xff]  ;;  %v3029_v60 = vld [vmem:[%s8155_s30 + $0x1d0] sm:$0xff] }
 0x594   : > { %4575 = vmatprep.subr.mxu0 %v3840_v61  ;;  %4644 = vmatprep.subr.mxu1 %v3972_v62  ;;  %v3161_v61 = vld [vmem:[%s8155_s30 + $0x5f0] sm:$0xff]  ;;  %v3026_v62 = vld [vmem:[%s8155_s30 + $0x1b8] sm:$0xff] }
 0x595   : > { %4576 = vmatpush2.msra.mxu0 %v3839_v63  ;;  %4645 = vmatpush2.msra.mxu1 %v3971_v0  ;;  %v3158_v63 = vld [vmem:[%s8155_s30 + $0x5d8] sm:$0xff]  ;;  %v3025_v0 = vld [vmem:[%s8155_s30 + $0x1b0] sm:$0xff] }
 0x596   : > { %4577 = vmatprep.subr.mxu0 %v3836_v1  ;;  %4646 = vmatprep.subr.mxu1 %v3968_v3  ;;  %v3157_v1 = vld [vmem:[%s8155_s30 + $0x5d0] sm:$0xff]  ;;  %v3154_v3 = vld [vmem:[%s8155_s30 + $0x5b8] sm:$0xff] }
 0x597   : > { %4578 = vmatpush2.msra.mxu0 %v3835_v8  ;;  %4647 = vmatpush2.msra.mxu1 %v3967_v9  ;;  %v3021_v8 = vld [vmem:[%s8155_s30 + $0x190] sm:$0xff] }
 0x598   : > { %4579 = vmatprep.subr.mxu0 %v3832_v11  ;;  %4648 = vmatprep.subr.mxu1 %v3964_v14  ;;  %v3153_v9 = vld [vmem:[%s8155_s30 + $0x5b0] sm:$0xff]  ;;  %v3018_v11 = vld [vmem:[%s8155_s30 + $0x178] sm:$0xff] }
 0x599   : > { %4580 = vmatpush2.msra.mxu0 %v3831_v18  ;;  %4649 = vmatpush2.msra.mxu1 %v3963_v19  ;;  %v3150_v14 = vld [vmem:[%s8155_s30 + $0x598] sm:$0xff]  ;;  %v3017_v18 = vld [vmem:[%s8155_s30 + $0x170] sm:$0xff] }
 0x59a   : > { %4581 = vmatprep.subr.mxu0 %v3828_v20  ;;  %4650 = vmatprep.subr.mxu1 %v3960_v45  ;;  %v3014_v19 = vld [vmem:[%s8155_s30 + $0x158] sm:$0xff]  ;;  %v3013_v45 = vld [vmem:[%s8155_s30 + $0x150] sm:$0xff] }
 0x59b   : > { %4582 = vmatpush2.msra.mxu0 %v3827_v22  ;;  %4651 = vmatpush2.msra.mxu1 %v3959_v23  ;;  %v3146_v20 = vld [vmem:[%s8155_s30 + $0x578] sm:$0xff]  ;;  %v3145_v22 = vld [vmem:[%s8155_s30 + $0x570] sm:$0xff] }
 0x59c   : > { %4583 = vmatprep.subr.mxu0 %v3824_v24  ;;  %4652 = vmatprep.subr.mxu1 %v3956_v25  ;;  %v3010_v23 = vld [vmem:[%s8155_s30 + $0x138] sm:$0xff]  ;;  %v3009_v25 = vld [vmem:[%s8155_s30 + $0x130] sm:$0xff] }
 0x59d   : > { %4584 = vmatpush2.msra.mxu0 %v3823_v26  ;;  %4653 = vmatpush2.msra.mxu1 %v3955_v27  ;;  %v3142_v24 = vld [vmem:[%s8155_s30 + $0x558] sm:$0xff]  ;;  %v3141_v26 = vld [vmem:[%s8155_s30 + $0x550] sm:$0xff] }
 0x59e   : > { %4585 = vmatprep.subr.mxu0 %v3820_v28  ;;  %4654 = vmatprep.subr.mxu1 %v3952_v29  ;;  %v3006_v27 = vld [vmem:[%s8155_s30 + $0x118] sm:$0xff]  ;;  %v3005_v29 = vld [vmem:[%s8155_s30 + $0x110] sm:$0xff] }
 0x59f   : > { %4586 = vmatpush2.msra.mxu0 %v3819_v30  ;;  %4655 = vmatpush2.msra.mxu1 %v3951_v32  ;;  %v3138_v28 = vld [vmem:[%s8155_s30 + $0x538] sm:$0xff]  ;;  %v3137_v30 = vld [vmem:[%s8155_s30 + $0x530] sm:$0xff] }
 0x5a0   : > { %4587 = vmatprep.subr.mxu0 %v3816_v33  ;;  %4656 = vmatprep.subr.mxu1 %v3948_v34  ;;  %v3002_v32 = vld [vmem:[%s8155_s30 + $0xf8] sm:$0xff]  ;;  %v3001_v34 = vld [vmem:[%s8155_s30 + $0xf0] sm:$0xff] }
 0x5a1   : > { %4588 = vmatpush2.msra.mxu0 %v3815_v35  ;;  %4657 = vmatpush2.msra.mxu1 %v3947_v38  ;;  %v3134_v33 = vld [vmem:[%s8155_s30 + $0x518] sm:$0xff]  ;;  %v3133_v35 = vld [vmem:[%s8155_s30 + $0x510] sm:$0xff] }
 0x5a2   : > { %4589 = vmatprep.subr.mxu0 %v3812_v39  ;;  %4658 = vmatprep.subr.mxu1 %v3944_v40  ;;  %v2998_v38 = vld [vmem:[%s8155_s30 + $0xd8] sm:$0xff]  ;;  %v2997_v40 = vld [vmem:[%s8155_s30 + $0xd0] sm:$0xff] }
 0x5a3   : > { %4590 = vmatpush2.msra.mxu0 %v3811_v43  ;;  %4659 = vmatpush2.msra.mxu1 %v3943_v46  ;;  %v3130_v39 = vld [vmem:[%s8155_s30 + $0x4f8] sm:$0xff]  ;;  %v3129_v43 = vld [vmem:[%s8155_s30 + $0x4f0] sm:$0xff] }
 0x5a4   : > { %4591 = vmatprep.subr.mxu0 %v3808_v47  ;;  %4660 = vmatprep.subr.mxu1 %v3940_v48  ;;  %v2994_v46 = vld [vmem:[%s8155_s30 + $0xb8] sm:$0xff]  ;;  %v2993_v48 = vld [vmem:[%s8155_s30 + $0xb0] sm:$0xff] }
 0x5a5   : > { %4592 = vmatpush2.msra.mxu0 %v3807_v49  ;;  %4661 = vmatpush2.msra.mxu1 %v3939_v50  ;;  %v3126_v47 = vld [vmem:[%s8155_s30 + $0x4d8] sm:$0xff]  ;;  %v3125_v49 = vld [vmem:[%s8155_s30 + $0x4d0] sm:$0xff] }
 0x5a6   : > { %4593 = vmatprep.subr.mxu0 %v3804_v51  ;;  %4662 = vmatprep.subr.mxu1 %v3936_v52  ;;  %v2990_v50 = vld [vmem:[%s8155_s30 + $0x98] sm:$0xff]  ;;  %v2989_v52 = vld [vmem:[%s8155_s30 + $0x90] sm:$0xff] }
 0x5a7   : > { %4594 = vmatpush2.msra.mxu0 %v3803_v53  ;;  %4663 = vmatpush2.msra.mxu1 %v3935_v54  ;;  %v3122_v51 = vld [vmem:[%s8155_s30 + $0x4b8] sm:$0xff]  ;;  %v3121_v53 = vld [vmem:[%s8155_s30 + $0x4b0] sm:$0xff] }
 0x5a8   : > { %4596 = vmatmul.mubr.f32.vlgmr.msra.gmra.mxu0 %v8616_v4  ;;  %4664 = vmatprep.subr.mxu1 %v3932_v55  ;;  %v2986_v54 = vld [vmem:[%s8155_s30 + $0x78] sm:$0xff] }
 0x5a9   : > { %4673 = vmatprep.subr.mxu0 %v3034_v56  ;;  %4665 = vmatpush2.msra.mxu1 %v3931_v57  ;;  %v3118_v55 = vld [vmem:[%s8155_s30 + $0x498] sm:$0xff]  ;;  %v2985_v56 = vld [vmem:[%s8155_s30 + $0x70] sm:$0xff] }
 0x5aa   : > { %4674 = vmatpush1.msra.mxu0 %v3033_v42  ;;  %4737 = vmatprep.mubr.f32.mxu0 %v8316_v5  ;;  %v3022_v5 = vld [vmem:[%s8155_s30 + $0x198] sm:$0xff]  ;;  %v3117_v57 = vld [vmem:[%s8155_s30 + $0x490] sm:$0xff] }
 0x5ab   : > { %4667 = vmatmul.mubr.f32.vlgmr.msra.gmra.mxu1 %v8623_v15  ;;  %4675 = vmatprep.subr.mxu0 %v3030_v58  ;;  %v2982_v42 = vld [vmem:[%s8155_s30 + $0x58] sm:$0xff] }
 0x5ac   : > { %4744 = vmatprep.subr.mxu1 %v3162_v59  ;;  %4676 = vmatpush1.msra.mxu0 %v3029_v60  ;;  %v3114_v58 = vld [vmem:[%s8155_s30 + $0x478] sm:$0xff]  ;;  %v2981_v59 = vld [vmem:[%s8155_s30 + $0x50] sm:$0xff] }
 0x5ad   : > { %4745 = vmatpush1.msra.mxu1 %v3161_v61  ;;  %4808 = vmatprep.mubr.f32.mxu1 %v8328_v10  ;;  %v3149_v10 = vld [vmem:[%s8155_s30 + $0x590] sm:$0xff]  ;;  %v2978_v61 = vld [vmem:[%s8155_s30 + $0x38] sm:$0xff] }
 0x5ae   : > { %4677 = vmatprep.subr.mxu0 %v3026_v62  ;;  %4746 = vmatprep.subr.mxu1 %v3158_v63  ;;  %v3113_v60 = vld [vmem:[%s8155_s30 + $0x470] sm:$0xff]  ;;  %v3110_v62 = vld [vmem:[%s8155_s30 + $0x458] sm:$0xff] }
 0x5af   : > { %4678 = vmatpush1.msra.mxu0 %v3025_v0  ;;  %4747 = vmatpush1.msra.mxu1 %v3157_v1  ;;  %v2977_v63 = vld [vmem:[%s8155_s30 + $0x30] sm:$0xff]  ;;  %v2974_v1 = vld [vmem:[%s8155_s30 + $0x18] sm:$0xff] }
 0x5b0   : > { %4679 = vmatprep.subr.mxu0 %v3022_v5  ;;  %4748 = vmatprep.subr.mxu1 %v3154_v3  ;;  %v3109_v0 = vld [vmem:[%s8155_s30 + $0x450] sm:$0xff]  ;;  %v3106_v5 = vld [vmem:[%s8155_s30 + $0x438] sm:$0xff] }
 0x5b1   : > { %4680 = vmatpush1.msra.mxu0 %v3021_v8  ;;  %4749 = vmatpush1.msra.mxu1 %v3153_v9  ;;  %v2973_v3 = vld [vmem:[%s8155_s30 + $0x10] sm:$0xff]  ;;  %v3098_v9 = vld [vmem:[%s8155_s30 + $0x3f8] sm:$0xff] }
 0x5b2   : > { %4681 = vmatprep.subr.mxu0 %v3018_v11  ;;  %4750 = vmatprep.subr.mxu1 %v3150_v14  ;;  %v3105_v8 = vld [vmem:[%s8155_s30 + $0x430] sm:$0xff]  ;;  %v3102_v11 = vld [vmem:[%s8155_s30 + $0x418] sm:$0xff] }
 0x5b3   : > { %4682 = vmatpush1.msra.mxu0 %v3017_v18  ;;  %4751 = vmatpush1.msra.mxu1 %v3149_v10  ;;  %v3097_v14 = vld [vmem:[%s8155_s30 + $0x3f0] sm:$0xff]  ;;  %v3094_v10 = vld [vmem:[%s8155_s30 + $0x3d8] sm:$0xff] }
 0x5b4   : > { %4683 = vmatprep.subr.mxu0 %v3014_v19  ;;  %4752 = vmatprep.subr.mxu1 %v3146_v20  ;;  %v3101_v18 = vld [vmem:[%s8155_s30 + $0x410] sm:$0xff]  ;;  %v3226_v19 = vld [vmem:[%s8155_s30 + $0x7f8] sm:$0xff] }
 0x5b5   : > { %4684 = vmatpush1.msra.mxu0 %v3013_v45  ;;  %4753 = vmatpush1.msra.mxu1 %v3145_v22  ;;  %v3093_v20 = vld [vmem:[%s8155_s30 + $0x3d0] sm:$0xff]  ;;  %v3090_v22 = vld [vmem:[%s8155_s30 + $0x3b8] sm:$0xff] }
 0x5b6   : > { %4685 = vmatprep.subr.mxu0 %v3010_v23  ;;  %4754 = vmatprep.subr.mxu1 %v3142_v24  ;;  %v3225_v45 = vld [vmem:[%s8155_s30 + $0x7f0] sm:$0xff]  ;;  %v3222_v23 = vld [vmem:[%s8155_s30 + $0x7d8] sm:$0xff] }
 0x5b7   : > { %4686 = vmatpush1.msra.mxu0 %v3009_v25  ;;  %4755 = vmatpush1.msra.mxu1 %v3141_v26  ;;  %v3089_v24 = vld [vmem:[%s8155_s30 + $0x3b0] sm:$0xff]  ;;  %v3086_v26 = vld [vmem:[%s8155_s30 + $0x398] sm:$0xff] }
 0x5b8   : > { %4687 = vmatprep.subr.mxu0 %v3006_v27  ;;  %4756 = vmatprep.subr.mxu1 %v3138_v28  ;;  %v3221_v25 = vld [vmem:[%s8155_s30 + $0x7d0] sm:$0xff]  ;;  %v3218_v27 = vld [vmem:[%s8155_s30 + $0x7b8] sm:$0xff] }
 0x5b9   : > { %4688 = vmatpush1.msra.mxu0 %v3005_v29  ;;  %4757 = vmatpush1.msra.mxu1 %v3137_v30  ;;  %v3085_v28 = vld [vmem:[%s8155_s30 + $0x390] sm:$0xff]  ;;  %v3082_v30 = vld [vmem:[%s8155_s30 + $0x378] sm:$0xff] }
 0x5ba   : > { %4689 = vmatprep.subr.mxu0 %v3002_v32  ;;  %4758 = vmatprep.subr.mxu1 %v3134_v33  ;;  %v3217_v29 = vld [vmem:[%s8155_s30 + $0x7b0] sm:$0xff]  ;;  %v3214_v32 = vld [vmem:[%s8155_s30 + $0x798] sm:$0xff] }
 0x5bb   : > { %4690 = vmatpush1.msra.mxu0 %v3001_v34  ;;  %4759 = vmatpush1.msra.mxu1 %v3133_v35  ;;  %v3081_v33 = vld [vmem:[%s8155_s30 + $0x370] sm:$0xff]  ;;  %v3078_v35 = vld [vmem:[%s8155_s30 + $0x358] sm:$0xff] }
 0x5bc   : > { %4691 = vmatprep.subr.mxu0 %v2998_v38  ;;  %4760 = vmatprep.subr.mxu1 %v3130_v39  ;;  %v3213_v34 = vld [vmem:[%s8155_s30 + $0x790] sm:$0xff]  ;;  %v3210_v38 = vld [vmem:[%s8155_s30 + $0x778] sm:$0xff] }
 0x5bd   : > { %4692 = vmatpush1.msra.mxu0 %v2997_v40  ;;  %4761 = vmatpush1.msra.mxu1 %v3129_v43  ;;  %v3077_v39 = vld [vmem:[%s8155_s30 + $0x350] sm:$0xff]  ;;  %v3074_v43 = vld [vmem:[%s8155_s30 + $0x338] sm:$0xff] }
 0x5be   : > { %4693 = vmatprep.subr.mxu0 %v2994_v46  ;;  %4762 = vmatprep.subr.mxu1 %v3126_v47  ;;  %v3209_v40 = vld [vmem:[%s8155_s30 + $0x770] sm:$0xff]  ;;  %v3206_v46 = vld [vmem:[%s8155_s30 + $0x758] sm:$0xff] }
 0x5bf   : > { %4694 = vmatpush1.msra.mxu0 %v2993_v48  ;;  %4763 = vmatpush1.msra.mxu1 %v3125_v49  ;;  %v3073_v47 = vld [vmem:[%s8155_s30 + $0x330] sm:$0xff]  ;;  %v3070_v49 = vld [vmem:[%s8155_s30 + $0x318] sm:$0xff] }
 0x5c0   : > { %4695 = vmatprep.subr.mxu0 %v2990_v50  ;;  %4764 = vmatprep.subr.mxu1 %v3122_v51  ;;  %v3205_v48 = vld [vmem:[%s8155_s30 + $0x750] sm:$0xff]  ;;  %v3202_v50 = vld [vmem:[%s8155_s30 + $0x738] sm:$0xff] }
 0x5c1   : > { %4696 = vmatpush1.msra.mxu0 %v2989_v52  ;;  %4765 = vmatpush1.msra.mxu1 %v3121_v53  ;;  %v3069_v51 = vld [vmem:[%s8155_s30 + $0x310] sm:$0xff]  ;;  %v3066_v53 = vld [vmem:[%s8155_s30 + $0x2f8] sm:$0xff] }
 0x5c2   : > { %4697 = vmatprep.subr.mxu0 %v2986_v54  ;;  %4766 = vmatprep.subr.mxu1 %v3118_v55  ;;  %v3201_v52 = vld [vmem:[%s8155_s30 + $0x730] sm:$0xff]  ;;  %v3198_v54 = vld [vmem:[%s8155_s30 + $0x718] sm:$0xff] }
 0x5c3   : > { %4698 = vmatpush1.msra.mxu0 %v2985_v56  ;;  %4767 = vmatpush1.msra.mxu1 %v3117_v57  ;;  %v3065_v55 = vld [vmem:[%s8155_s30 + $0x2f0] sm:$0xff]  ;;  %v3062_v57 = vld [vmem:[%s8155_s30 + $0x2d8] sm:$0xff] }
 0x5c4   : > { %4699 = vmatprep.subr.mxu0 %v2982_v42  ;;  %4768 = vmatprep.subr.mxu1 %v3114_v58  ;;  %v3197_v56 = vld [vmem:[%s8155_s30 + $0x710] sm:$0xff]  ;;  %v3194_v42 = vld [vmem:[%s8155_s30 + $0x6f8] sm:$0xff] }
 0x5c5   : > { %4700 = vmatpush1.msra.mxu0 %v2981_v59  ;;  %4769 = vmatpush1.msra.mxu1 %v3113_v60  ;;  %v3061_v58 = vld [vmem:[%s8155_s30 + $0x2d0] sm:$0xff]  ;;  %v3058_v60 = vld [vmem:[%s8155_s30 + $0x2b8] sm:$0xff] }
 0x5c6   : > { %4701 = vmatprep.subr.mxu0 %v2978_v61  ;;  %4770 = vmatprep.subr.mxu1 %v3110_v62  ;;  %v3193_v59 = vld [vmem:[%s8155_s30 + $0x6f0] sm:$0xff]  ;;  %v3190_v61 = vld [vmem:[%s8155_s30 + $0x6d8] sm:$0xff] }
 0x5c7   : > { %4702 = vmatpush1.msra.mxu0 %v2977_v63  ;;  %4771 = vmatpush1.msra.mxu1 %v3109_v0  ;;  %v3057_v62 = vld [vmem:[%s8155_s30 + $0x2b0] sm:$0xff]  ;;  %v3054_v0 = vld [vmem:[%s8155_s30 + $0x298] sm:$0xff] }
 0x5c8   : > { %4703 = vmatprep.subr.mxu0 %v2974_v1  ;;  %4772 = vmatprep.subr.mxu1 %v3106_v5  ;;  %v3189_v63 = vld [vmem:[%s8155_s30 + $0x6d0] sm:$0xff]  ;;  %v3186_v1 = vld [vmem:[%s8155_s30 + $0x6b8] sm:$0xff] }
 0x5c9   : > { %4704 = vmatpush1.msra.mxu0 %v2973_v3  ;;  %4773 = vmatpush1.msra.mxu1 %v3105_v8  ;;  %v3053_v5 = vld [vmem:[%s8155_s30 + $0x290] sm:$0xff]  ;;  %v3050_v8 = vld [vmem:[%s8155_s30 + $0x278] sm:$0xff] }
 0x5ca   : > { %4705 = vmatprep.subr.mxu0 %v3098_v9  ;;  %4774 = vmatprep.subr.mxu1 %v3102_v11  ;;  %v3185_v3 = vld [vmem:[%s8155_s30 + $0x6b0] sm:$0xff]  ;;  %v3182_v9 = vld [vmem:[%s8155_s30 + $0x698] sm:$0xff] }
 0x5cb   : > { %4706 = vmatpush2.msra.mxu0 %v3097_v14  ;;  %4775 = vmatpush1.msra.mxu1 %v3101_v18  ;;  %v3049_v11 = vld [vmem:[%s8155_s30 + $0x270] sm:$0xff]  ;;  %v3046_v18 = vld [vmem:[%s8155_s30 + $0x258] sm:$0xff] }
 0x5cc   : > { %4707 = vmatprep.subr.mxu0 %v3094_v10  ;;  %4776 = vmatprep.subr.mxu1 %v3226_v19  ;;  %v3181_v14 = vld [vmem:[%s8155_s30 + $0x690] sm:$0xff]  ;;  %v3178_v10 = vld [vmem:[%s8155_s30 + $0x678] sm:$0xff] }
 0x5cd   : > { %4708 = vmatpush2.msra.mxu0 %v3093_v20  ;;  %4777 = vmatpush2.msra.mxu1 %v3225_v45  ;;  %v3045_v19 = vld [vmem:[%s8155_s30 + $0x250] sm:$0xff]  ;;  %v3042_v45 = vld [vmem:[%s8155_s30 + $0x238] sm:$0xff] }
 0x5ce   : > { %4709 = vmatprep.subr.mxu0 %v3090_v22  ;;  %4778 = vmatprep.subr.mxu1 %v3222_v23  ;;  %v3177_v20 = vld [vmem:[%s8155_s30 + $0x670] sm:$0xff]  ;;  %v3174_v22 = vld [vmem:[%s8155_s30 + $0x658] sm:$0xff] }
 0x5cf   : > { %4710 = vmatpush2.msra.mxu0 %v3089_v24  ;;  %4779 = vmatpush2.msra.mxu1 %v3221_v25  ;;  %v3041_v23 = vld [vmem:[%s8155_s30 + $0x230] sm:$0xff]  ;;  %v3038_v25 = vld [vmem:[%s8155_s30 + $0x218] sm:$0xff] }
 0x5d0   : > { %4711 = vmatprep.subr.mxu0 %v3086_v26  ;;  %4780 = vmatprep.subr.mxu1 %v3218_v27  ;;  %v3173_v24 = vld [vmem:[%s8155_s30 + $0x650] sm:$0xff]  ;;  %v3170_v26 = vld [vmem:[%s8155_s30 + $0x638] sm:$0xff] }
 0x5d1   : > { %4712 = vmatpush2.msra.mxu0 %v3085_v28  ;;  %4781 = vmatpush2.msra.mxu1 %v3217_v29  ;;  %v3037_v27 = vld [vmem:[%s8155_s30 + $0x210] sm:$0xff]  ;;  %v3166_v29 = vld [vmem:[%s8155_s30 + $0x618] sm:$0xff] }
 0x5d2   : > { %4713 = vmatprep.subr.mxu0 %v3082_v30  ;;  %4782 = vmatprep.subr.mxu1 %v3214_v32  ;;  %v3169_v28 = vld [vmem:[%s8155_s30 + $0x630] sm:$0xff]  ;;  %v3290_v30 = vld [vmem:[%s8155_s30 + $0x9f8] sm:$0xff] }
 0x5d3   : > { %4714 = vmatpush2.msra.mxu0 %v3081_v33  ;;  %4783 = vmatpush2.msra.mxu1 %v3213_v34  ;;  %v3165_v32 = vld [vmem:[%s8155_s30 + $0x610] sm:$0xff]  ;;  %v3286_v34 = vld [vmem:[%s8155_s30 + $0x9d8] sm:$0xff] }
 0x5d4   : > { %4715 = vmatprep.subr.mxu0 %v3078_v35  ;;  %4784 = vmatprep.subr.mxu1 %v3210_v38  ;;  %v3289_v33 = vld [vmem:[%s8155_s30 + $0x9f0] sm:$0xff]  ;;  %v3418_v35 = vld [vmem:[%s8155_s30 + $0xdf8] sm:$0xff] }
 0x5d5   : > { %4716 = vmatpush2.msra.mxu0 %v3077_v39  ;;  %4785 = vmatpush2.msra.mxu1 %v3209_v40  ;;  %v3285_v38 = vld [vmem:[%s8155_s30 + $0x9d0] sm:$0xff]  ;;  %v3414_v40 = vld [vmem:[%s8155_s30 + $0xdd8] sm:$0xff] }
 0x5d6   : > { %4717 = vmatprep.subr.mxu0 %v3074_v43  ;;  %4786 = vmatprep.subr.mxu1 %v3206_v46  ;;  %v3417_v39 = vld [vmem:[%s8155_s30 + $0xdf0] sm:$0xff] }
 0x5d7   : > { %4718 = vmatpush2.msra.mxu0 %v3073_v47  ;;  %4787 = vmatpush2.msra.mxu1 %v3205_v48  ;;  %v3281_v43 = vld [vmem:[%s8155_s30 + $0x9b0] sm:$0xff]  ;;  %v3410_v47 = vld [vmem:[%s8155_s30 + $0xdb8] sm:$0xff] }
 0x5d8   : > { %4719 = vmatprep.subr.mxu0 %v3070_v49  ;;  %4788 = vmatprep.subr.mxu1 %v3202_v50  ;;  %v3413_v46 = vld [vmem:[%s8155_s30 + $0xdd0] sm:$0xff]  ;;  %v3274_v49 = vld [vmem:[%s8155_s30 + $0x978] sm:$0xff] }
 0x5d9   : > { %4720 = vmatpush2.msra.mxu0 %v3069_v51  ;;  %4789 = vmatpush2.msra.mxu1 %v3201_v52  ;;  %v3409_v48 = vld [vmem:[%s8155_s30 + $0xdb0] sm:$0xff]  ;;  %v3406_v50 = vld [vmem:[%s8155_s30 + $0xd98] sm:$0xff] }
 0x5da   : > { %4721 = vmatprep.subr.mxu0 %v3066_v53  ;;  %4790 = vmatprep.subr.mxu1 %v3198_v54  ;;  %v3273_v51 = vld [vmem:[%s8155_s30 + $0x970] sm:$0xff]  ;;  %v3270_v52 = vld [vmem:[%s8155_s30 + $0x958] sm:$0xff] }
 0x5db   : > { %4722 = vmatpush2.msra.mxu0 %v3065_v55  ;;  %4791 = vmatpush2.msra.mxu1 %v3197_v56  ;;  %v3402_v53 = vld [vmem:[%s8155_s30 + $0xd78] sm:$0xff]  ;;  %v3269_v54 = vld [vmem:[%s8155_s30 + $0x950] sm:$0xff] }
 0x5dc   : > { %4723 = vmatprep.subr.mxu0 %v3062_v57  ;;  %4792 = vmatprep.subr.mxu1 %v3194_v42  ;;  %v3401_v55 = vld [vmem:[%s8155_s30 + $0xd70] sm:$0xff]  ;;  %v3266_v56 = vld [vmem:[%s8155_s30 + $0x938] sm:$0xff] }
 0x5dd   : > { %4724 = vmatpush2.msra.mxu0 %v3061_v58  ;;  %4793 = vmatpush2.msra.mxu1 %v3193_v59  ;;  %v3398_v57 = vld [vmem:[%s8155_s30 + $0xd58] sm:$0xff]  ;;  %v3265_v42 = vld [vmem:[%s8155_s30 + $0x930] sm:$0xff] }
 0x5de   : > { %4725 = vmatprep.subr.mxu0 %v3058_v60  ;;  %4794 = vmatprep.subr.mxu1 %v3190_v61  ;;  %v3397_v58 = vld [vmem:[%s8155_s30 + $0xd50] sm:$0xff]  ;;  %v3262_v59 = vld [vmem:[%s8155_s30 + $0x918] sm:$0xff] }
 0x5df   : > { %4726 = vmatpush2.msra.mxu0 %v3057_v62  ;;  %4795 = vmatpush2.msra.mxu1 %v3189_v63  ;;  %v3394_v60 = vld [vmem:[%s8155_s30 + $0xd38] sm:$0xff]  ;;  %v3261_v61 = vld [vmem:[%s8155_s30 + $0x910] sm:$0xff] }
 0x5e0   : > { %4727 = vmatprep.subr.mxu0 %v3054_v0  ;;  %4796 = vmatprep.subr.mxu1 %v3186_v1  ;;  %v3393_v62 = vld [vmem:[%s8155_s30 + $0xd30] sm:$0xff]  ;;  %v3258_v63 = vld [vmem:[%s8155_s30 + $0x8f8] sm:$0xff] }
 0x5e1   : > { %4728 = vmatpush2.msra.mxu0 %v3053_v5  ;;  %4797 = vmatpush2.msra.mxu1 %v3185_v3  ;;  %v3390_v0 = vld [vmem:[%s8155_s30 + $0xd18] sm:$0xff]  ;;  %v3257_v1 = vld [vmem:[%s8155_s30 + $0x8f0] sm:$0xff] }
 0x5e2   : > { %4729 = vmatprep.subr.mxu0 %v3050_v8  ;;  %4798 = vmatprep.subr.mxu1 %v3182_v9  ;;  %v3389_v5 = vld [vmem:[%s8155_s30 + $0xd10] sm:$0xff]  ;;  %v3254_v3 = vld [vmem:[%s8155_s30 + $0x8d8] sm:$0xff] }
 0x5e3   : > { %4730 = vmatpush2.msra.mxu0 %v3049_v11  ;;  %4799 = vmatpush2.msra.mxu1 %v3181_v14  ;;  %v3386_v8 = vld [vmem:[%s8155_s30 + $0xcf8] sm:$0xff]  ;;  %v3253_v9 = vld [vmem:[%s8155_s30 + $0x8d0] sm:$0xff] }
 0x5e4   : > { %4731 = vmatprep.subr.mxu0 %v3046_v18  ;;  %4800 = vmatprep.subr.mxu1 %v3178_v10  ;;  %v3385_v11 = vld [vmem:[%s8155_s30 + $0xcf0] sm:$0xff]  ;;  %v3250_v14 = vld [vmem:[%s8155_s30 + $0x8b8] sm:$0xff] }
 0x5e5   : > { %4732 = vmatpush2.msra.mxu0 %v3045_v19  ;;  %4801 = vmatpush2.msra.mxu1 %v3177_v20  ;;  %v3382_v18 = vld [vmem:[%s8155_s30 + $0xcd8] sm:$0xff]  ;;  %v3249_v10 = vld [vmem:[%s8155_s30 + $0x8b0] sm:$0xff] }
 0x5e6   : > { %4733 = vmatprep.subr.mxu0 %v3042_v45  ;;  %4802 = vmatprep.subr.mxu1 %v3174_v22  ;;  %v3381_v19 = vld [vmem:[%s8155_s30 + $0xcd0] sm:$0xff]  ;;  %v3246_v20 = vld [vmem:[%s8155_s30 + $0x898] sm:$0xff] }
 0x5e7   : > { %4734 = vmatpush2.msra.mxu0 %v3041_v23  ;;  %4803 = vmatpush2.msra.mxu1 %v3173_v24  ;;  %v3378_v45 = vld [vmem:[%s8155_s30 + $0xcb8] sm:$0xff]  ;;  %v3245_v22 = vld [vmem:[%s8155_s30 + $0x890] sm:$0xff] }
 0x5e8   : > { %4735 = vmatprep.subr.mxu0 %v3038_v25  ;;  %4804 = vmatprep.subr.mxu1 %v3170_v26  ;;  %v3377_v23 = vld [vmem:[%s8155_s30 + $0xcb0] sm:$0xff]  ;;  %v3242_v24 = vld [vmem:[%s8155_s30 + $0x878] sm:$0xff] }
 0x5e9   : > { %4736 = vmatpush2.msra.mxu0 %v3037_v27  ;;  %4805 = vmatpush2.msra.mxu1 %v3169_v28  ;;  %v3374_v25 = vld [vmem:[%s8155_s30 + $0xc98] sm:$0xff]  ;;  %v3241_v26 = vld [vmem:[%s8155_s30 + $0x870] sm:$0xff] }
 0x5ea   : > { %4738 = vmatmul.mubr.f32.vlgmr.msra.gmra.mxu0 %v8312_v2  ;;  %4806 = vmatprep.subr.mxu1 %v3166_v29  ;;  %v3282_v2 = vld [vmem:[%s8155_s30 + $0x9b8] sm:$0xff]  ;;  %v3373_v27 = vld [vmem:[%s8155_s30 + $0xc90] sm:$0xff] }
 0x5eb   : > { %4815 = vmatprep.subr.mxu0 %v3290_v30  ;;  %4807 = vmatpush2.msra.mxu1 %v3165_v32  ;;  %v3238_v28 = vld [vmem:[%s8155_s30 + $0x858] sm:$0xff]  ;;  %v3237_v30 = vld [vmem:[%s8155_s30 + $0x850] sm:$0xff] }
 0x5ec   : > { %4816 = vmatpush1.msra.mxu0 %v3289_v33  ;;  %4879 = vmatprep.mubr.f32.mxu0 %v8333_v12  ;;  %v3278_v12 = vld [vmem:[%s8155_s30 + $0x998] sm:$0xff]  ;;  %v3369_v32 = vld [vmem:[%s8155_s30 + $0xc70] sm:$0xff] }
 0x5ed   : > { %4809 = vmatmul.mubr.f32.vlgmr.msra.gmra.mxu1 %v8319_v6  ;;  %4817 = vmatprep.subr.mxu0 %v3286_v34  ;;  %v3277_v6 = vld [vmem:[%s8155_s30 + $0x990] sm:$0xff]  ;;  %v3370_v29 = vld [vmem:[%s8155_s30 + $0xc78] sm:$0xff] }
 0x5ee   : > { %4886 = vmatprep.subr.mxu1 %v3418_v35  ;;  %4818 = vmatpush1.msra.mxu0 %v3285_v38  ;;  %v3234_v33 = vld [vmem:[%s8155_s30 + $0x838] sm:$0xff]  ;;  %v3233_v35 = vld [vmem:[%s8155_s30 + $0x830] sm:$0xff] }
 0x5ef   : > { %4887 = vmatpush1.msra.mxu1 %v3417_v39  ;;  %4950 = vmatprep.mubr.f32.mxu1 %v8345_v17  ;;  %v3405_v17 = vld [vmem:[%s8155_s30 + $0xd90] sm:$0xff]  ;;  %v3366_v34 = vld [vmem:[%s8155_s30 + $0xc58] sm:$0xff] }
 0x5f0   : > { %4819 = vmatprep.subr.mxu0 %v3282_v2  ;;  %4888 = vmatprep.subr.mxu1 %v3414_v40  ;;  %v3365_v38 = vld [vmem:[%s8155_s30 + $0xc50] sm:$0xff]  ;;  %v3230_v39 = vld [vmem:[%s8155_s30 + $0x818] sm:$0xff] }
 0x5f1   : > { %4820 = vmatpush1.msra.mxu0 %v3281_v43  ;;  %4889 = vmatpush1.msra.mxu1 %v3413_v46  ;;  %v3362_v2 = vld [vmem:[%s8155_s30 + $0xc38] sm:$0xff]  ;;  %v3229_v40 = vld [vmem:[%s8155_s30 + $0x810] sm:$0xff] }
 0x5f2   : > { %4821 = vmatprep.subr.mxu0 %v3278_v12  ;;  %4890 = vmatprep.subr.mxu1 %v3410_v47  ;;  %v3361_v43 = vld [vmem:[%s8155_s30 + $0xc30] sm:$0xff]  ;;  %v3354_v46 = vld [vmem:[%s8155_s30 + $0xbf8] sm:$0xff] }
 0x5f3   : > { %4822 = vmatpush1.msra.mxu0 %v3277_v6  ;;  %4891 = vmatpush1.msra.mxu1 %v3409_v48  ;;  %v3358_v12 = vld [vmem:[%s8155_s30 + $0xc18] sm:$0xff]  ;;  %v3353_v47 = vld [vmem:[%s8155_s30 + $0xbf0] sm:$0xff] }
 0x5f4   : > { %4823 = vmatprep.subr.mxu0 %v3274_v49  ;;  %4892 = vmatprep.subr.mxu1 %v3406_v50  ;;  %v3357_v6 = vld [vmem:[%s8155_s30 + $0xc10] sm:$0xff]  ;;  %v3350_v48 = vld [vmem:[%s8155_s30 + $0xbd8] sm:$0xff] }
 0x5f5   : > { %4824 = vmatpush1.msra.mxu0 %v3273_v51  ;;  %4893 = vmatpush1.msra.mxu1 %v3405_v17  ;;  %v3482_v49 = vld [vmem:[%s8155_s30 + $0xff8] sm:$0xff]  ;;  %v3349_v50 = vld [vmem:[%s8155_s30 + $0xbd0] sm:$0xff] }
 0x5f6   : > { %4825 = vmatprep.subr.mxu0 %v3270_v52  ;;  %4894 = vmatprep.subr.mxu1 %v3402_v53  ;;  %v3481_v51 = vld [vmem:[%s8155_s30 + $0xff0] sm:$0xff]  ;;  %v3346_v17 = vld [vmem:[%s8155_s30 + $0xbb8] sm:$0xff] }
 0x5f7   : > { %4826 = vmatpush1.msra.mxu0 %v3269_v54  ;;  %4895 = vmatpush1.msra.mxu1 %v3401_v55  ;;  %v3478_v52 = vld [vmem:[%s8155_s30 + $0xfd8] sm:$0xff]  ;;  %v3345_v53 = vld [vmem:[%s8155_s30 + $0xbb0] sm:$0xff] }
 0x5f8   : > { %4827 = vmatprep.subr.mxu0 %v3266_v56  ;;  %4896 = vmatprep.subr.mxu1 %v3398_v57  ;;  %v3477_v54 = vld [vmem:[%s8155_s30 + $0xfd0] sm:$0xff]  ;;  %v3342_v55 = vld [vmem:[%s8155_s30 + $0xb98] sm:$0xff] }
 0x5f9   : > { %4828 = vmatpush1.msra.mxu0 %v3265_v42  ;;  %4897 = vmatpush1.msra.mxu1 %v3397_v58  ;;  %v3474_v56 = vld [vmem:[%s8155_s30 + $0xfb8] sm:$0xff]  ;;  %v3341_v57 = vld [vmem:[%s8155_s30 + $0xb90] sm:$0xff] }
 0x5fa   : > { %4829 = vmatprep.subr.mxu0 %v3262_v59  ;;  %4898 = vmatprep.subr.mxu1 %v3394_v60  ;;  %v3473_v42 = vld [vmem:[%s8155_s30 + $0xfb0] sm:$0xff]  ;;  %v3338_v58 = vld [vmem:[%s8155_s30 + $0xb78] sm:$0xff] }
 0x5fb   : > { %4830 = vmatpush1.msra.mxu0 %v3261_v61  ;;  %4899 = vmatpush1.msra.mxu1 %v3393_v62  ;;  %v3470_v59 = vld [vmem:[%s8155_s30 + $0xf98] sm:$0xff]  ;;  %v3337_v60 = vld [vmem:[%s8155_s30 + $0xb70] sm:$0xff] }
 0x5fc   : > { %4831 = vmatprep.subr.mxu0 %v3258_v63  ;;  %4900 = vmatprep.subr.mxu1 %v3390_v0  ;;  %v3469_v61 = vld [vmem:[%s8155_s30 + $0xf90] sm:$0xff]  ;;  %v3334_v62 = vld [vmem:[%s8155_s30 + $0xb58] sm:$0xff] }
 0x5fd   : > { %4832 = vmatpush1.msra.mxu0 %v3257_v1  ;;  %4901 = vmatpush1.msra.mxu1 %v3389_v5  ;;  %v3466_v63 = vld [vmem:[%s8155_s30 + $0xf78] sm:$0xff]  ;;  %v3333_v0 = vld [vmem:[%s8155_s30 + $0xb50] sm:$0xff] }
 0x5fe   : > { %4833 = vmatprep.subr.mxu0 %v3254_v3  ;;  %4902 = vmatprep.subr.mxu1 %v3386_v8  ;;  %v3465_v1 = vld [vmem:[%s8155_s30 + $0xf70] sm:$0xff]  ;;  %v3330_v5 = vld [vmem:[%s8155_s30 + $0xb38] sm:$0xff] }
 0x5ff   : > { %4834 = vmatpush1.msra.mxu0 %v3253_v9  ;;  %4903 = vmatpush1.msra.mxu1 %v3385_v11  ;;  %v3462_v3 = vld [vmem:[%s8155_s30 + $0xf58] sm:$0xff]  ;;  %v3329_v8 = vld [vmem:[%s8155_s30 + $0xb30] sm:$0xff] }
 0x600   : > { %4835 = vmatprep.subr.mxu0 %v3250_v14  ;;  %4904 = vmatprep.subr.mxu1 %v3382_v18  ;;  %v3461_v9 = vld [vmem:[%s8155_s30 + $0xf50] sm:$0xff]  ;;  %v3326_v11 = vld [vmem:[%s8155_s30 + $0xb18] sm:$0xff] }
 0x601   : > { %4836 = vmatpush1.msra.mxu0 %v3249_v10  ;;  %4905 = vmatpush1.msra.mxu1 %v3381_v19  ;;  %v3458_v14 = vld [vmem:[%s8155_s30 + $0xf38] sm:$0xff]  ;;  %v3325_v18 = vld [vmem:[%s8155_s30 + $0xb10] sm:$0xff] }
 0x602   : > { %4837 = vmatprep.subr.mxu0 %v3246_v20  ;;  %4906 = vmatprep.subr.mxu1 %v3378_v45  ;;  %v3457_v10 = vld [vmem:[%s8155_s30 + $0xf30] sm:$0xff]  ;;  %v3322_v19 = vld [vmem:[%s8155_s30 + $0xaf8] sm:$0xff] }
 0x603   : > { %4838 = vmatpush1.msra.mxu0 %v3245_v22  ;;  %4907 = vmatpush1.msra.mxu1 %v3377_v23  ;;  %v3454_v20 = vld [vmem:[%s8155_s30 + $0xf18] sm:$0xff]  ;;  %v3321_v45 = vld [vmem:[%s8155_s30 + $0xaf0] sm:$0xff] }
 0x604   : > { %4839 = vmatprep.subr.mxu0 %v3242_v24  ;;  %4908 = vmatprep.subr.mxu1 %v3374_v25  ;;  %v3453_v22 = vld [vmem:[%s8155_s30 + $0xf10] sm:$0xff]  ;;  %v3318_v23 = vld [vmem:[%s8155_s30 + $0xad8] sm:$0xff] }
 0x605   : > { %4840 = vmatpush1.msra.mxu0 %v3241_v26  ;;  %4909 = vmatpush1.msra.mxu1 %v3373_v27  ;;  %v3450_v24 = vld [vmem:[%s8155_s30 + $0xef8] sm:$0xff]  ;;  %v3317_v25 = vld [vmem:[%s8155_s30 + $0xad0] sm:$0xff] }
 0x606   : > { %4841 = vmatprep.subr.mxu0 %v3238_v28  ;;  %4910 = vmatprep.subr.mxu1 %v3370_v29  ;;  %v3449_v26 = vld [vmem:[%s8155_s30 + $0xef0] sm:$0xff]  ;;  %v3314_v27 = vld [vmem:[%s8155_s30 + $0xab8] sm:$0xff] }
 0x607   : > { %4842 = vmatpush1.msra.mxu0 %v3237_v30  ;;  %4911 = vmatpush1.msra.mxu1 %v3369_v32  ;;  %v3446_v28 = vld [vmem:[%s8155_s30 + $0xed8] sm:$0xff]  ;;  %v3313_v29 = vld [vmem:[%s8155_s30 + $0xab0] sm:$0xff] }
 0x608   : > { %4843 = vmatprep.subr.mxu0 %v3234_v33  ;;  %4912 = vmatprep.subr.mxu1 %v3366_v34  ;;  %v3445_v30 = vld [vmem:[%s8155_s30 + $0xed0] sm:$0xff]  ;;  %v3310_v32 = vld [vmem:[%s8155_s30 + $0xa98] sm:$0xff] }
 0x609   : > { %4844 = vmatpush1.msra.mxu0 %v3233_v35  ;;  %4913 = vmatpush1.msra.mxu1 %v3365_v38  ;;  %v3442_v33 = vld [vmem:[%s8155_s30 + $0xeb8] sm:$0xff]  ;;  %v3309_v34 = vld [vmem:[%s8155_s30 + $0xa90] sm:$0xff] }
 0x60a   : > { %4845 = vmatprep.subr.mxu0 %v3230_v39  ;;  %4914 = vmatprep.subr.mxu1 %v3362_v2  ;;  %v3441_v35 = vld [vmem:[%s8155_s30 + $0xeb0] sm:$0xff]  ;;  %v3306_v38 = vld [vmem:[%s8155_s30 + $0xa78] sm:$0xff] }
 0x60b   : > { %4846 = vmatpush1.msra.mxu0 %v3229_v40  ;;  %4915 = vmatpush1.msra.mxu1 %v3361_v43  ;;  %v3438_v39 = vld [vmem:[%s8155_s30 + $0xe98] sm:$0xff]  ;;  %v3305_v2 = vld [vmem:[%s8155_s30 + $0xa70] sm:$0xff] }
 0x60c   : > { %4847 = vmatprep.subr.mxu0 %v3354_v46  ;;  %4916 = vmatprep.subr.mxu1 %v3358_v12  ;;  %v3437_v40 = vld [vmem:[%s8155_s30 + $0xe90] sm:$0xff]  ;;  %v3302_v43 = vld [vmem:[%s8155_s30 + $0xa58] sm:$0xff] }
 0x60d   : > { %4848 = vmatpush2.msra.mxu0 %v3353_v47  ;;  %4917 = vmatpush1.msra.mxu1 %v3357_v6  ;;  %v3434_v46 = vld [vmem:[%s8155_s30 + $0xe78] sm:$0xff]  ;;  %v3301_v12 = vld [vmem:[%s8155_s30 + $0xa50] sm:$0xff] }
 0x60e   : > { %4849 = vmatprep.subr.mxu0 %v3350_v48  ;;  %4918 = vmatprep.subr.mxu1 %v3482_v49  ;;  %v3433_v47 = vld [vmem:[%s8155_s30 + $0xe70] sm:$0xff]  ;;  %v3298_v6 = vld [vmem:[%s8155_s30 + $0xa38] sm:$0xff] }
 0x60f   : > { %4850 = vmatpush2.msra.mxu0 %v3349_v50  ;;  %4919 = vmatpush2.msra.mxu1 %v3481_v51  ;;  %v3430_v48 = vld [vmem:[%s8155_s30 + $0xe58] sm:$0xff]  ;;  %v3297_v49 = vld [vmem:[%s8155_s30 + $0xa30] sm:$0xff] }
 0x610   : > { %4851 = vmatprep.subr.mxu0 %v3346_v17  ;;  %4920 = vmatprep.subr.mxu1 %v3478_v52  ;;  %v3429_v50 = vld [vmem:[%s8155_s30 + $0xe50] sm:$0xff]  ;;  %v3294_v51 = vld [vmem:[%s8155_s30 + $0xa18] sm:$0xff] }
 0x611   : > { %4852 = vmatpush2.msra.mxu0 %v3345_v53  ;;  %4921 = vmatpush2.msra.mxu1 %v3477_v54  ;;  %v3426_v17 = vld [vmem:[%s8155_s30 + $0xe38] sm:$0xff]  ;;  %v3293_v52 = vld [vmem:[%s8155_s30 + $0xa10] sm:$0xff] }
 0x612   : > { %4853 = vmatprep.subr.mxu0 %v3342_v55  ;;  %4922 = vmatprep.subr.mxu1 %v3474_v56  ;;  %v3425_v53 = vld [vmem:[%s8155_s30 + $0xe30] sm:$0xff]  ;;  %v3422_v54 = vld [vmem:[%s8155_s30 + $0xe18] sm:$0xff] }
 0x613   : > { %4854 = vmatpush2.msra.mxu0 %v3341_v57  ;;  %4923 = vmatpush2.msra.mxu1 %v3473_v42  ;;  %v3546_v55 = vld [vmem:[%s8155_s30 + $0x11f8] sm:$0xff]  ;;  %v3421_v56 = vld [vmem:[%s8155_s30 + $0xe10] sm:$0xff] }
 0x614   : > { %4855 = vmatprep.subr.mxu0 %v3338_v58  ;;  %4924 = vmatprep.subr.mxu1 %v3470_v59  ;;  %v3545_v57 = vld [vmem:[%s8155_s30 + $0x11f0] sm:$0xff]  ;;  %v3542_v42 = vld [vmem:[%s8155_s30 + $0x11d8] sm:$0xff] }
 0x615   : > { %4856 = vmatpush2.msra.mxu0 %v3337_v60  ;;  %4925 = vmatpush2.msra.mxu1 %v3469_v61  ;;  %v3674_v58 = vld [vmem:[%s8155_s30 + $0x15f8] sm:$0xff]  ;;  %v3541_v59 = vld [vmem:[%s8155_s30 + $0x11d0] sm:$0xff] }
 0x616   : > { %4857 = vmatprep.subr.mxu0 %v3334_v62  ;;  %4926 = vmatprep.subr.mxu1 %v3466_v63  ;;  %v3673_v60 = vld [vmem:[%s8155_s30 + $0x15f0] sm:$0xff]  ;;  %v3670_v61 = vld [vmem:[%s8155_s30 + $0x15d8] sm:$0xff] }
 0x617   : > { %4858 = vmatpush2.msra.mxu0 %v3333_v0  ;;  %4927 = vmatpush2.msra.mxu1 %v3465_v1  ;;  %v3537_v62 = vld [vmem:[%s8155_s30 + $0x11b0] sm:$0xff]  ;;  %v3666_v0 = vld [vmem:[%s8155_s30 + $0x15b8] sm:$0xff] }
 0x618   : > { %4859 = vmatprep.subr.mxu0 %v3330_v5  ;;  %4928 = vmatprep.subr.mxu1 %v3462_v3  ;;  %v3669_v63 = vld [vmem:[%s8155_s30 + $0x15d0] sm:$0xff]  ;;  %v3530_v5 = vld [vmem:[%s8155_s30 + $0x1178] sm:$0xff] }
 0x619   : > { %4860 = vmatpush2.msra.mxu0 %v3329_v8  ;;  %4929 = vmatpush2.msra.mxu1 %v3461_v9  ;;  %v3665_v1 = vld [vmem:[%s8155_s30 + $0x15b0] sm:$0xff]  ;;  %v3662_v3 = vld [vmem:[%s8155_s30 + $0x1598] sm:$0xff] }
 0x61a   : > { %4861 = vmatprep.subr.mxu0 %v3326_v11  ;;  %4930 = vmatprep.subr.mxu1 %v3458_v14  ;;  %v3529_v8 = vld [vmem:[%s8155_s30 + $0x1170] sm:$0xff]  ;;  %v3526_v9 = vld [vmem:[%s8155_s30 + $0x1158] sm:$0xff] }
 0x61b   : > { %4862 = vmatpush2.msra.mxu0 %v3325_v18  ;;  %4931 = vmatpush2.msra.mxu1 %v3457_v10  ;;  %v3658_v11 = vld [vmem:[%s8155_s30 + $0x1578] sm:$0xff]  ;;  %v3525_v14 = vld [vmem:[%s8155_s30 + $0x1150] sm:$0xff] }
 0x61c   : > { %4863 = vmatprep.subr.mxu0 %v3322_v19  ;;  %4932 = vmatprep.subr.mxu1 %v3454_v20  ;;  %v3657_v18 = vld [vmem:[%s8155_s30 + $0x1570] sm:$0xff]  ;;  %v3522_v10 = vld [vmem:[%s8155_s30 + $0x1138] sm:$0xff] }
 0x61d   : > { %4864 = vmatpush2.msra.mxu0 %v3321_v45  ;;  %4933 = vmatpush2.msra.mxu1 %v3453_v22  ;;  %v3654_v19 = vld [vmem:[%s8155_s30 + $0x1558] sm:$0xff]  ;;  %v3521_v20 = vld [vmem:[%s8155_s30 + $0x1130] sm:$0xff] }
 0x61e   : > { %4865 = vmatprep.subr.mxu0 %v3318_v23  ;;  %4934 = vmatprep.subr.mxu1 %v3450_v24  ;;  %v3653_v45 = vld [vmem:[%s8155_s30 + $0x1550] sm:$0xff]  ;;  %v3518_v22 = vld [vmem:[%s8155_s30 + $0x1118] sm:$0xff] }
 0x61f   : > { %4866 = vmatpush2.msra.mxu0 %v3317_v25  ;;  %4935 = vmatpush2.msra.mxu1 %v3449_v26  ;;  %v3650_v23 = vld [vmem:[%s8155_s30 + $0x1538] sm:$0xff]  ;;  %v3517_v24 = vld [vmem:[%s8155_s30 + $0x1110] sm:$0xff] }
 0x620   : > { %4867 = vmatprep.subr.mxu0 %v3314_v27  ;;  %4936 = vmatprep.subr.mxu1 %v3446_v28  ;;  %v3649_v25 = vld [vmem:[%s8155_s30 + $0x1530] sm:$0xff]  ;;  %v3514_v26 = vld [vmem:[%s8155_s30 + $0x10f8] sm:$0xff] }
 0x621   : > { %4868 = vmatpush2.msra.mxu0 %v3313_v29  ;;  %4937 = vmatpush2.msra.mxu1 %v3445_v30  ;;  %v3646_v27 = vld [vmem:[%s8155_s30 + $0x1518] sm:$0xff]  ;;  %v3513_v28 = vld [vmem:[%s8155_s30 + $0x10f0] sm:$0xff] }
 0x622   : > { %4869 = vmatprep.subr.mxu0 %v3310_v32  ;;  %4938 = vmatprep.subr.mxu1 %v3442_v33  ;;  %v3645_v29 = vld [vmem:[%s8155_s30 + $0x1510] sm:$0xff]  ;;  %v3510_v30 = vld [vmem:[%s8155_s30 + $0x10d8] sm:$0xff] }
 0x623   : > { %4870 = vmatpush2.msra.mxu0 %v3309_v34  ;;  %4939 = vmatpush2.msra.mxu1 %v3441_v35  ;;  %v3642_v32 = vld [vmem:[%s8155_s30 + $0x14f8] sm:$0xff]  ;;  %v3509_v33 = vld [vmem:[%s8155_s30 + $0x10d0] sm:$0xff] }
 0x624   : > { %4871 = vmatprep.subr.mxu0 %v3306_v38  ;;  %4940 = vmatprep.subr.mxu1 %v3438_v39  ;;  %v3641_v34 = vld [vmem:[%s8155_s30 + $0x14f0] sm:$0xff]  ;;  %v3506_v35 = vld [vmem:[%s8155_s30 + $0x10b8] sm:$0xff] }
 0x625   : > { %4872 = vmatpush2.msra.mxu0 %v3305_v2  ;;  %4941 = vmatpush2.msra.mxu1 %v3437_v40  ;;  %v3638_v38 = vld [vmem:[%s8155_s30 + $0x14d8] sm:$0xff]  ;;  %v3505_v39 = vld [vmem:[%s8155_s30 + $0x10b0] sm:$0xff] }
 0x626   : > { %4873 = vmatprep.subr.mxu0 %v3302_v43  ;;  %4942 = vmatprep.subr.mxu1 %v3434_v46  ;;  %v3637_v2 = vld [vmem:[%s8155_s30 + $0x14d0] sm:$0xff]  ;;  %v3502_v40 = vld [vmem:[%s8155_s30 + $0x1098] sm:$0xff] }
 0x627   : > { %4874 = vmatpush2.msra.mxu0 %v3301_v12  ;;  %4943 = vmatpush2.msra.mxu1 %v3433_v47  ;;  %v3634_v43 = vld [vmem:[%s8155_s30 + $0x14b8] sm:$0xff]  ;;  %v3501_v46 = vld [vmem:[%s8155_s30 + $0x1090] sm:$0xff] }
 0x628   : > { %4875 = vmatprep.subr.mxu0 %v3298_v6  ;;  %4944 = vmatprep.subr.mxu1 %v3430_v48  ;;  %v3633_v12 = vld [vmem:[%s8155_s30 + $0x14b0] sm:$0xff]  ;;  %v3498_v47 = vld [vmem:[%s8155_s30 + $0x1078] sm:$0xff] }
 0x629   : > { %4876 = vmatpush2.msra.mxu0 %v3297_v49  ;;  %4945 = vmatpush2.msra.mxu1 %v3429_v50  ;;  %v3630_v6 = vld [vmem:[%s8155_s30 + $0x1498] sm:$0xff]  ;;  %v3497_v48 = vld [vmem:[%s8155_s30 + $0x1070] sm:$0xff] }
 0x62a   : > { %4877 = vmatprep.subr.mxu0 %v3294_v51  ;;  %4946 = vmatprep.subr.mxu1 %v3426_v17  ;;  %v3629_v49 = vld [vmem:[%s8155_s30 + $0x1490] sm:$0xff]  ;;  %v3494_v50 = vld [vmem:[%s8155_s30 + $0x1058] sm:$0xff] }
 0x62b   : > { %4878 = vmatpush2.msra.mxu0 %v3293_v52  ;;  %4947 = vmatpush2.msra.mxu1 %v3425_v53  ;;  %v3626_v51 = vld [vmem:[%s8155_s30 + $0x1478] sm:$0xff]  ;;  %v3493_v17 = vld [vmem:[%s8155_s30 + $0x1050] sm:$0xff] }
 0x62c   : > { %4880 = vmatmul.mubr.f32.vlgmr.msra.gmra.mxu0 %v8322_v7  ;;  %4948 = vmatprep.subr.mxu1 %v3422_v54  ;;  %v3538_v7 = vld [vmem:[%s8155_s30 + $0x11b8] sm:$0xff]  ;;  %v3625_v52 = vld [vmem:[%s8155_s30 + $0x1470] sm:$0xff] }
 0x62d   : > { %4957 = vmatprep.subr.mxu0 %v3546_v55  ;;  %4949 = vmatpush2.msra.mxu1 %v3421_v56  ;;  %v3490_v53 = vld [vmem:[%s8155_s30 + $0x1038] sm:$0xff]  ;;  %v3489_v55 = vld [vmem:[%s8155_s30 + $0x1030] sm:$0xff] }
 0x62e   : > { %4958 = vmatpush1.msra.mxu0 %v3545_v57  ;;  %5021 = vmatprep.mubr.f32.mxu0 %v8482_v37  ;;  %v3534_v37 = vld [vmem:[%s8155_s30 + $0x1198] sm:$0xff]  ;;  %v3621_v56 = vld [vmem:[%s8155_s30 + $0x1450] sm:$0xff] }
 0x62f   : > { %4951 = vmatmul.mubr.f32.vlgmr.msra.gmra.mxu1 %v8336_v13  ;;  %4959 = vmatprep.subr.mxu0 %v3542_v42  ;;  %v3533_v13 = vld [vmem:[%s8155_s30 + $0x1190] sm:$0xff]  ;;  %v3622_v54 = vld [vmem:[%s8155_s30 + $0x1458] sm:$0xff] }
 0x630   : > { %5028 = vmatprep.subr.mxu1 %v3674_v58  ;;  %4960 = vmatpush1.msra.mxu0 %v3541_v59  ;;  %v3486_v57 = vld [vmem:[%s8155_s30 + $0x1018] sm:$0xff]  ;;  %v3485_v58 = vld [vmem:[%s8155_s30 + $0x1010] sm:$0xff] }
 0x631   : > { %5029 = vmatpush1.msra.mxu1 %v3673_v60  ;;  %5092 = vmatprep.mubr.f32.mxu1 %v8492_v44  ;;  %v3661_v44 = vld [vmem:[%s8155_s30 + $0x1590] sm:$0xff]  ;;  %v3618_v42 = vld [vmem:[%s8155_s30 + $0x1438] sm:$0xff] }
 0x632   : > { %4961 = vmatprep.subr.mxu0 %v3538_v7  ;;  %5030 = vmatprep.subr.mxu1 %v3670_v61  ;;  %v3617_v59 = vld [vmem:[%s8155_s30 + $0x1430] sm:$0xff]  ;;  %v3610_v60 = vld [vmem:[%s8155_s30 + $0x13f8] sm:$0xff] }
 0x633   : > { %4962 = vmatpush1.msra.mxu0 %v3537_v62  ;;  %5031 = vmatpush1.msra.mxu1 %v3669_v63  ;;  %v3614_v7 = vld [vmem:[%s8155_s30 + $0x1418] sm:$0xff]  ;;  %v3609_v61 = vld [vmem:[%s8155_s30 + $0x13f0] sm:$0xff] }
 0x634   : > { %4963 = vmatprep.subr.mxu0 %v3534_v37  ;;  %5032 = vmatprep.subr.mxu1 %v3666_v0  ;;  %v3613_v62 = vld [vmem:[%s8155_s30 + $0x1410] sm:$0xff]  ;;  %v3606_v63 = vld [vmem:[%s8155_s30 + $0x13d8] sm:$0xff] }
 0x635   : > { %4964 = vmatpush1.msra.mxu0 %v3533_v13  ;;  %5033 = vmatpush1.msra.mxu1 %v3665_v1  ;;  %v3738_v37 = vld [vmem:[%s8155_s30 + $0x17f8] sm:$0xff]  ;;  %v3605_v0 = vld [vmem:[%s8155_s30 + $0x13d0] sm:$0xff] }
 0x636   : > { %4965 = vmatprep.subr.mxu0 %v3530_v5  ;;  %5034 = vmatprep.subr.mxu1 %v3662_v3  ;;  %v3737_v13 = vld [vmem:[%s8155_s30 + $0x17f0] sm:$0xff]  ;;  %v3602_v1 = vld [vmem:[%s8155_s30 + $0x13b8] sm:$0xff] }
 0x637   : > { %4966 = vmatpush1.msra.mxu0 %v3529_v8  ;;  %5035 = vmatpush1.msra.mxu1 %v3661_v44  ;;  %v3734_v5 = vld [vmem:[%s8155_s30 + $0x17d8] sm:$0xff]  ;;  %v3601_v3 = vld [vmem:[%s8155_s30 + $0x13b0] sm:$0xff] }
 0x638   : > { %4967 = vmatprep.subr.mxu0 %v3526_v9  ;;  %5036 = vmatprep.subr.mxu1 %v3658_v11  ;;  %v3733_v8 = vld [vmem:[%s8155_s30 + $0x17d0] sm:$0xff]  ;;  %v3598_v44 = vld [vmem:[%s8155_s30 + $0x1398] sm:$0xff] }
 0x639   : > { %4968 = vmatpush1.msra.mxu0 %v3525_v14  ;;  %5037 = vmatpush1.msra.mxu1 %v3657_v18  ;;  %v3730_v9 = vld [vmem:[%s8155_s30 + $0x17b8] sm:$0xff]  ;;  %v3597_v11 = vld [vmem:[%s8155_s30 + $0x1390] sm:$0xff] }
 0x63a   : > { %4969 = vmatprep.subr.mxu0 %v3522_v10  ;;  %5038 = vmatprep.subr.mxu1 %v3654_v19  ;;  %v3729_v14 = vld [vmem:[%s8155_s30 + $0x17b0] sm:$0xff]  ;;  %v3594_v18 = vld [vmem:[%s8155_s30 + $0x1378] sm:$0xff] }
 0x63b   : > { %4970 = vmatpush1.msra.mxu0 %v3521_v20  ;;  %5039 = vmatpush1.msra.mxu1 %v3653_v45  ;;  %v3726_v10 = vld [vmem:[%s8155_s30 + $0x1798] sm:$0xff]  ;;  %v3593_v19 = vld [vmem:[%s8155_s30 + $0x1370] sm:$0xff] }
 0x63c   : > { %4971 = vmatprep.subr.mxu0 %v3518_v22  ;;  %5040 = vmatprep.subr.mxu1 %v3650_v23  ;;  %v3725_v20 = vld [vmem:[%s8155_s30 + $0x1790] sm:$0xff]  ;;  %v3590_v45 = vld [vmem:[%s8155_s30 + $0x1358] sm:$0xff] }
 0x63d   : > { %4972 = vmatpush1.msra.mxu0 %v3517_v24  ;;  %5041 = vmatpush1.msra.mxu1 %v3649_v25  ;;  %v3722_v22 = vld [vmem:[%s8155_s30 + $0x1778] sm:$0xff]  ;;  %v3589_v23 = vld [vmem:[%s8155_s30 + $0x1350] sm:$0xff] }
 0x63e   : > { %4973 = vmatprep.subr.mxu0 %v3514_v26  ;;  %5042 = vmatprep.subr.mxu1 %v3646_v27  ;;  %v3721_v24 = vld [vmem:[%s8155_s30 + $0x1770] sm:$0xff]  ;;  %v3586_v25 = vld [vmem:[%s8155_s30 + $0x1338] sm:$0xff] }
 0x63f   : > { %4974 = vmatpush1.msra.mxu0 %v3513_v28  ;;  %5043 = vmatpush1.msra.mxu1 %v3645_v29  ;;  %v3718_v26 = vld [vmem:[%s8155_s30 + $0x1758] sm:$0xff]  ;;  %v3585_v27 = vld [vmem:[%s8155_s30 + $0x1330] sm:$0xff] }
 0x640   : > { %4975 = vmatprep.subr.mxu0 %v3510_v30  ;;  %5044 = vmatprep.subr.mxu1 %v3642_v32  ;;  %v3717_v28 = vld [vmem:[%s8155_s30 + $0x1750] sm:$0xff]  ;;  %v3582_v29 = vld [vmem:[%s8155_s30 + $0x1318] sm:$0xff] }
 0x641   : > { %4976 = vmatpush1.msra.mxu0 %v3509_v33  ;;  %5045 = vmatpush1.msra.mxu1 %v3641_v34  ;;  %v3714_v30 = vld [vmem:[%s8155_s30 + $0x1738] sm:$0xff]  ;;  %v3581_v32 = vld [vmem:[%s8155_s30 + $0x1310] sm:$0xff] }
 0x642   : > { %4977 = vmatprep.subr.mxu0 %v3506_v35  ;;  %5046 = vmatprep.subr.mxu1 %v3638_v38  ;;  %v3713_v33 = vld [vmem:[%s8155_s30 + $0x1730] sm:$0xff]  ;;  %v3578_v34 = vld [vmem:[%s8155_s30 + $0x12f8] sm:$0xff] }
 0x643   : > { %4978 = vmatpush1.msra.mxu0 %v3505_v39  ;;  %5047 = vmatpush1.msra.mxu1 %v3637_v2  ;;  %v3710_v35 = vld [vmem:[%s8155_s30 + $0x1718] sm:$0xff]  ;;  %v3577_v38 = vld [vmem:[%s8155_s30 + $0x12f0] sm:$0xff] }
 0x644   : > { %4979 = vmatprep.subr.mxu0 %v3502_v40  ;;  %5048 = vmatprep.subr.mxu1 %v3634_v43  ;;  %v3709_v39 = vld [vmem:[%s8155_s30 + $0x1710] sm:$0xff]  ;;  %v3574_v2 = vld [vmem:[%s8155_s30 + $0x12d8] sm:$0xff] }
 0x645   : > { %4980 = vmatpush1.msra.mxu0 %v3501_v46  ;;  %5049 = vmatpush1.msra.mxu1 %v3633_v12  ;;  %v3706_v40 = vld [vmem:[%s8155_s30 + $0x16f8] sm:$0xff]  ;;  %v3573_v43 = vld [vmem:[%s8155_s30 + $0x12d0] sm:$0xff] }
 0x646   : > { %4981 = vmatprep.subr.mxu0 %v3498_v47  ;;  %5050 = vmatprep.subr.mxu1 %v3630_v6  ;;  %v3705_v46 = vld [vmem:[%s8155_s30 + $0x16f0] sm:$0xff]  ;;  %v3570_v12 = vld [vmem:[%s8155_s30 + $0x12b8] sm:$0xff] }
 0x647   : > { %4982 = vmatpush1.msra.mxu0 %v3497_v48  ;;  %5051 = vmatpush1.msra.mxu1 %v3629_v49  ;;  %v3702_v47 = vld [vmem:[%s8155_s30 + $0x16d8] sm:$0xff]  ;;  %v3569_v6 = vld [vmem:[%s8155_s30 + $0x12b0] sm:$0xff] }
 0x648   : > { %4983 = vmatprep.subr.mxu0 %v3494_v50  ;;  %5052 = vmatprep.subr.mxu1 %v3626_v51  ;;  %v3701_v48 = vld [vmem:[%s8155_s30 + $0x16d0] sm:$0xff]  ;;  %v3566_v49 = vld [vmem:[%s8155_s30 + $0x1298] sm:$0xff] }
 0x649   : > { %4984 = vmatpush1.msra.mxu0 %v3493_v17  ;;  %5053 = vmatpush1.msra.mxu1 %v3625_v52  ;;  %v3698_v50 = vld [vmem:[%s8155_s30 + $0x16b8] sm:$0xff]  ;;  %v3565_v51 = vld [vmem:[%s8155_s30 + $0x1290] sm:$0xff] }
 0x64a   : > { %4985 = vmatprep.subr.mxu0 %v3490_v53  ;;  %5054 = vmatprep.subr.mxu1 %v3622_v54  ;;  %v3697_v17 = vld [vmem:[%s8155_s30 + $0x16b0] sm:$0xff]  ;;  %v3562_v52 = vld [vmem:[%s8155_s30 + $0x1278] sm:$0xff] }
 0x64b   : > { %4986 = vmatpush1.msra.mxu0 %v3489_v55  ;;  %5055 = vmatpush1.msra.mxu1 %v3621_v56  ;;  %v3694_v53 = vld [vmem:[%s8155_s30 + $0x1698] sm:$0xff]  ;;  %v3561_v54 = vld [vmem:[%s8155_s30 + $0x1270] sm:$0xff] }
 0x64c   : > { %4987 = vmatprep.subr.mxu0 %v3486_v57  ;;  %5056 = vmatprep.subr.mxu1 %v3618_v42  ;;  %v3693_v55 = vld [vmem:[%s8155_s30 + $0x1690] sm:$0xff]  ;;  %v3558_v56 = vld [vmem:[%s8155_s30 + $0x1258] sm:$0xff] }
 0x64d   : > { %4988 = vmatpush1.msra.mxu0 %v3485_v58  ;;  %5057 = vmatpush1.msra.mxu1 %v3617_v59  ;;  %v3690_v57 = vld [vmem:[%s8155_s30 + $0x1678] sm:$0xff]  ;;  %v3557_v42 = vld [vmem:[%s8155_s30 + $0x1250] sm:$0xff] }
 0x64e   : > { %4989 = vmatprep.subr.mxu0 %v3610_v60  ;;  %5058 = vmatprep.subr.mxu1 %v3614_v7  ;;  %v3689_v58 = vld [vmem:[%s8155_s30 + $0x1670] sm:$0xff]  ;;  %v3554_v59 = vld [vmem:[%s8155_s30 + $0x1238] sm:$0xff] }
 0x64f   : > { %4990 = vmatpush2.msra.mxu0 %v3609_v61  ;;  %5059 = vmatpush1.msra.mxu1 %v3613_v62  ;;  %v3686_v60 = vld [vmem:[%s8155_s30 + $0x1658] sm:$0xff]  ;;  %v3553_v7 = vld [vmem:[%s8155_s30 + $0x1230] sm:$0xff] }
 0x650   : > { %4991 = vmatprep.subr.mxu0 %v3606_v63  ;;  %5060 = vmatprep.subr.mxu1 %v3738_v37  ;;  %v3685_v61 = vld [vmem:[%s8155_s30 + $0x1650] sm:$0xff]  ;;  %v3550_v62 = vld [vmem:[%s8155_s30 + $0x1218] sm:$0xff] }
 0x651   : > { %4992 = vmatpush2.msra.mxu0 %v3605_v0  ;;  %5061 = vmatpush2.msra.mxu1 %v3737_v13  ;;  %v3682_v63 = vld [vmem:[%s8155_s30 + $0x1638] sm:$0xff]  ;;  %v3549_v37 = vld [vmem:[%s8155_s30 + $0x1210] sm:$0xff] }
 0x652   : > { %4993 = vmatprep.subr.mxu0 %v3602_v1  ;;  %5062 = vmatprep.subr.mxu1 %v3734_v5  ;;  %v3681_v0 = vld [vmem:[%s8155_s30 + $0x1630] sm:$0xff]  ;;  %v3678_v13 = vld [vmem:[%s8155_s30 + $0x1618] sm:$0xff] }
 0x653   : > { %4994 = vmatpush2.msra.mxu0 %v3601_v3  ;;  %5063 = vmatpush2.msra.mxu1 %v3733_v8  ;;  %v3802_v1 = vld [vmem:[%s8155_s30 + $0x19f8] sm:$0xff]  ;;  %v3677_v5 = vld [vmem:[%s8155_s30 + $0x1610] sm:$0xff] }
 0x654   : > { %4995 = vmatprep.subr.mxu0 %v3598_v44  ;;  %5064 = vmatprep.subr.mxu1 %v3730_v9  ;;  %v3801_v3 = vld [vmem:[%s8155_s30 + $0x19f0] sm:$0xff]  ;;  %v3798_v8 = vld [vmem:[%s8155_s30 + $0x19d8] sm:$0xff] }
 0x655   : > { %4996 = vmatpush2.msra.mxu0 %v3597_v11  ;;  %5065 = vmatpush2.msra.mxu1 %v3729_v14  ;;  %v3930_v44 = vld [vmem:[%s8155_s30 + $0x1df8] sm:$0xff]  ;;  %v3797_v9 = vld [vmem:[%s8155_s30 + $0x19d0] sm:$0xff] }
 0x656   : > { %4997 = vmatprep.subr.mxu0 %v3594_v18  ;;  %5066 = vmatprep.subr.mxu1 %v3726_v10  ;;  %v3929_v11 = vld [vmem:[%s8155_s30 + $0x1df0] sm:$0xff]  ;;  %v3926_v14 = vld [vmem:[%s8155_s30 + $0x1dd8] sm:$0xff] }
 0x657   : > { %4998 = vmatpush2.msra.mxu0 %v3593_v19  ;;  %5067 = vmatpush2.msra.mxu1 %v3725_v20  ;;  %v3793_v18 = vld [vmem:[%s8155_s30 + $0x19b0] sm:$0xff]  ;;  %v3922_v19 = vld [vmem:[%s8155_s30 + $0x1db8] sm:$0xff] }
 0x658   : > { %4999 = vmatprep.subr.mxu0 %v3590_v45  ;;  %5068 = vmatprep.subr.mxu1 %v3722_v22  ;;  %v3925_v10 = vld [vmem:[%s8155_s30 + $0x1dd0] sm:$0xff]  ;;  %v3786_v45 = vld [vmem:[%s8155_s30 + $0x1978] sm:$0xff] }
 0x659   : > { %5000 = vmatpush2.msra.mxu0 %v3589_v23  ;;  %5069 = vmatpush2.msra.mxu1 %v3721_v24  ;;  %v3921_v20 = vld [vmem:[%s8155_s30 + $0x1db0] sm:$0xff]  ;;  %v3918_v22 = vld [vmem:[%s8155_s30 + $0x1d98] sm:$0xff] }
 0x65a   : > { %5001 = vmatprep.subr.mxu0 %v3586_v25  ;;  %5070 = vmatprep.subr.mxu1 %v3718_v26  ;;  %v3785_v23 = vld [vmem:[%s8155_s30 + $0x1970] sm:$0xff]  ;;  %v3782_v24 = vld [vmem:[%s8155_s30 + $0x1958] sm:$0xff] }
 0x65b   : > { %5002 = vmatpush2.msra.mxu0 %v3585_v27  ;;  %5071 = vmatpush2.msra.mxu1 %v3717_v28  ;;  %v3914_v25 = vld [vmem:[%s8155_s30 + $0x1d78] sm:$0xff]  ;;  %v3781_v26 = vld [vmem:[%s8155_s30 + $0x1950] sm:$0xff] }
 0x65c   : > { %5003 = vmatprep.subr.mxu0 %v3582_v29  ;;  %5072 = vmatprep.subr.mxu1 %v3714_v30  ;;  %v3913_v27 = vld [vmem:[%s8155_s30 + $0x1d70] sm:$0xff]  ;;  %v3778_v28 = vld [vmem:[%s8155_s30 + $0x1938] sm:$0xff] }
 0x65d   : > { %5004 = vmatpush2.msra.mxu0 %v3581_v32  ;;  %5073 = vmatpush2.msra.mxu1 %v3713_v33  ;;  %v3910_v29 = vld [vmem:[%s8155_s30 + $0x1d58] sm:$0xff]  ;;  %v3777_v30 = vld [vmem:[%s8155_s30 + $0x1930] sm:$0xff] }
 0x65e   : > { %5005 = vmatprep.subr.mxu0 %v3578_v34  ;;  %5074 = vmatprep.subr.mxu1 %v3710_v35  ;;  %v3909_v32 = vld [vmem:[%s8155_s30 + $0x1d50] sm:$0xff]  ;;  %v3774_v33 = vld [vmem:[%s8155_s30 + $0x1918] sm:$0xff] }
 0x65f   : > { %5006 = vmatpush2.msra.mxu0 %v3577_v38  ;;  %5075 = vmatpush2.msra.mxu1 %v3709_v39  ;;  %v3906_v34 = vld [vmem:[%s8155_s30 + $0x1d38] sm:$0xff]  ;;  %v3773_v35 = vld [vmem:[%s8155_s30 + $0x1910] sm:$0xff] }
 0x660   : > { %5007 = vmatprep.subr.mxu0 %v3574_v2  ;;  %5076 = vmatprep.subr.mxu1 %v3706_v40  ;;  %v3905_v38 = vld [vmem:[%s8155_s30 + $0x1d30] sm:$0xff]  ;;  %v3770_v39 = vld [vmem:[%s8155_s30 + $0x18f8] sm:$0xff] }
 0x661   : > { %5008 = vmatpush2.msra.mxu0 %v3573_v43  ;;  %5077 = vmatpush2.msra.mxu1 %v3705_v46  ;;  %v3902_v2 = vld [vmem:[%s8155_s30 + $0x1d18] sm:$0xff]  ;;  %v3769_v40 = vld [vmem:[%s8155_s30 + $0x18f0] sm:$0xff] }
 0x662   : > { %5009 = vmatprep.subr.mxu0 %v3570_v12  ;;  %5078 = vmatprep.subr.mxu1 %v3702_v47  ;;  %v3901_v43 = vld [vmem:[%s8155_s30 + $0x1d10] sm:$0xff]  ;;  %v3766_v46 = vld [vmem:[%s8155_s30 + $0x18d8] sm:$0xff] }
 0x663   : > { %5010 = vmatpush2.msra.mxu0 %v3569_v6  ;;  %5079 = vmatpush2.msra.mxu1 %v3701_v48  ;;  %v3898_v12 = vld [vmem:[%s8155_s30 + $0x1cf8] sm:$0xff]  ;;  %v3765_v47 = vld [vmem:[%s8155_s30 + $0x18d0] sm:$0xff] }
 0x664   : > { %5011 = vmatprep.subr.mxu0 %v3566_v49  ;;  %5080 = vmatprep.subr.mxu1 %v3698_v50  ;;  %v3897_v6 = vld [vmem:[%s8155_s30 + $0x1cf0] sm:$0xff]  ;;  %v3762_v48 = vld [vmem:[%s8155_s30 + $0x18b8] sm:$0xff] }
 0x665   : > { %5012 = vmatpush2.msra.mxu0 %v3565_v51  ;;  %5081 = vmatpush2.msra.mxu1 %v3697_v17  ;;  %v3894_v49 = vld [vmem:[%s8155_s30 + $0x1cd8] sm:$0xff]  ;;  %v3761_v50 = vld [vmem:[%s8155_s30 + $0x18b0] sm:$0xff] }
 0x666   : > { %5013 = vmatprep.subr.mxu0 %v3562_v52  ;;  %5082 = vmatprep.subr.mxu1 %v3694_v53  ;;  %v3893_v51 = vld [vmem:[%s8155_s30 + $0x1cd0] sm:$0xff]  ;;  %v3758_v17 = vld [vmem:[%s8155_s30 + $0x1898] sm:$0xff] }
 0x667   : > { %5014 = vmatpush2.msra.mxu0 %v3561_v54  ;;  %5083 = vmatpush2.msra.mxu1 %v3693_v55  ;;  %v3890_v52 = vld [vmem:[%s8155_s30 + $0x1cb8] sm:$0xff]  ;;  %v3757_v53 = vld [vmem:[%s8155_s30 + $0x1890] sm:$0xff] }
 0x668   : > { %5015 = vmatprep.subr.mxu0 %v3558_v56  ;;  %5084 = vmatprep.subr.mxu1 %v3690_v57  ;;  %v3889_v54 = vld [vmem:[%s8155_s30 + $0x1cb0] sm:$0xff]  ;;  %v3754_v55 = vld [vmem:[%s8155_s30 + $0x1878] sm:$0xff] }
 0x669   : > { %5016 = vmatpush2.msra.mxu0 %v3557_v42  ;;  %5085 = vmatpush2.msra.mxu1 %v3689_v58  ;;  %v3886_v56 = vld [vmem:[%s8155_s30 + $0x1c98] sm:$0xff]  ;;  %v3753_v57 = vld [vmem:[%s8155_s30 + $0x1870] sm:$0xff] }
 0x66a   : > { %5017 = vmatprep.subr.mxu0 %v3554_v59  ;;  %5086 = vmatprep.subr.mxu1 %v3686_v60  ;;  %v3885_v42 = vld [vmem:[%s8155_s30 + $0x1c90] sm:$0xff]  ;;  %v3750_v58 = vld [vmem:[%s8155_s30 + $0x1858] sm:$0xff] }
 0x66b   : > { %5018 = vmatpush2.msra.mxu0 %v3553_v7  ;;  %5087 = vmatpush2.msra.mxu1 %v3685_v61  ;;  %v3882_v59 = vld [vmem:[%s8155_s30 + $0x1c78] sm:$0xff]  ;;  %v3749_v60 = vld [vmem:[%s8155_s30 + $0x1850] sm:$0xff] }
 0x66c   : > { %5019 = vmatprep.subr.mxu0 %v3550_v62  ;;  %5088 = vmatprep.subr.mxu1 %v3682_v63  ;;  %v3881_v7 = vld [vmem:[%s8155_s30 + $0x1c70] sm:$0xff]  ;;  %v3746_v61 = vld [vmem:[%s8155_s30 + $0x1838] sm:$0xff] }
 0x66d   : > { %5020 = vmatpush2.msra.mxu0 %v3549_v37  ;;  %5089 = vmatpush2.msra.mxu1 %v3681_v0  ;;  %v3878_v62 = vld [vmem:[%s8155_s30 + $0x1c58] sm:$0xff]  ;;  %v3745_v63 = vld [vmem:[%s8155_s30 + $0x1830] sm:$0xff] }
 0x66e   : > { %5022 = vmatmul.mubr.f32.vlgmr.msra.gmra.mxu0 %v8470_v31  ;;  %5090 = vmatprep.subr.mxu1 %v3678_v13  ;;  %v3794_v31 = vld [vmem:[%s8155_s30 + $0x19b8] sm:$0xff]  ;;  %v3877_v37 = vld [vmem:[%s8155_s30 + $0x1c50] sm:$0xff] }
 0x66f   : > { %5099 = vmatprep.subr.mxu0 %v3802_v1  ;;  %5091 = vmatpush2.msra.mxu1 %v3677_v5  ;;  %v3742_v0 = vld [vmem:[%s8155_s30 + $0x1818] sm:$0xff]  ;;  %v3741_v1 = vld [vmem:[%s8155_s30 + $0x1810] sm:$0xff] }
 0x670   : > { %5100 = vmatpush1.msra.mxu0 %v3801_v3  ;;  %5163 = vmatprep.mubr.f32.mxu0 %v8628_v16  ;;  %v3790_v16 = vld [vmem:[%s8155_s30 + $0x1998] sm:$0xff]  ;;  %v3873_v5 = vld [vmem:[%s8155_s30 + $0x1c30] sm:$0xff] }
 0x671   : > { %5093 = vmatmul.mubr.f32.vlgmr.msra.gmra.mxu1 %v8477_v36  ;;  %5101 = vmatprep.subr.mxu0 %v3798_v8  ;;  %v3789_v36 = vld [vmem:[%s8155_s30 + $0x1990] sm:$0xff]  ;;  %v3874_v13 = vld [vmem:[%s8155_s30 + $0x1c38] sm:$0xff] }
 0x672   : > { %5170 = vmatprep.subr.mxu1 %v3930_v44  ;;  %5102 = vmatpush1.msra.mxu0 %v3797_v9  ;;  %v3866_v3 = vld [vmem:[%s8155_s30 + $0x1bf8] sm:$0xff]  ;;  %v4003_v44 = vsub.s32 1, %v8195_v41  ;;  %v3865_v9 = vld [vmem:[%s8155_s30 + $0x1bf0] sm:$0xff] }
 0x673   : > { %5171 = vmatpush1.msra.mxu1 %v3929_v11  ;;  %5234 = vmatprep.mubr.f32.mxu1 %v8638_v21  ;;  %v3917_v21 = vld [vmem:[%s8155_s30 + $0x1d90] sm:$0xff]  ;;  %v3870_v8 = vld [vmem:[%s8155_s30 + $0x1c18] sm:$0xff] }
 0x674   : > { %5103 = vmatprep.subr.mxu0 %v3794_v31  ;;  %5172 = vmatprep.subr.mxu1 %v3926_v14  ;;  %v3869_v11 = vld [vmem:[%s8155_s30 + $0x1c10] sm:$0xff]  ;;  %v9247_v31 = vpop.f32.mrf.mxu0  ;;  %v3862_v14 = vld [vmem:[%s8155_s30 + $0x1bd8] sm:$0xff] }
 0x675   : > { %5104 = vmatpush1.msra.mxu0 %v3793_v18  ;;  %5173 = vmatpush1.msra.mxu1 %v3925_v10  ;;  %v3994_v18 = vld [vmem:[%s8155_s30 + $0x1ff8] sm:$0xff]  ;;  %v3861_v10 = vld [vmem:[%s8155_s30 + $0x1bd0] sm:$0xff] }
 0x676   : > { %5105 = vmatprep.subr.mxu0 %v3790_v16  ;;  %5174 = vmatprep.subr.mxu1 %v3922_v19  ;;  %v3993_v16 = vld [vmem:[%s8155_s30 + $0x1ff0] sm:$0xff]  ;;  %v9253_v19 = vld [vmem:[%s2373_s14] sm:$0xf] }
 0x677   : > { %5106 = vmatpush1.msra.mxu0 %v3789_v36  ;;  %5175 = vmatpush1.msra.mxu1 %v3921_v20  ;;  %v3858_v36 = vld [vmem:[%s8155_s30 + $0x1bb8] sm:$0xff] }
 0x678   : > { %5107 = vmatprep.subr.mxu0 %v3786_v45  ;;  %5176 = vmatprep.subr.mxu1 %v3918_v22  ;;  %v3990_v20 = vld [vmem:[%s8155_s30 + $0x1fd8] sm:$0xff]  ;;  %v4004_v45 = vrot.slane %v9253_v19, %v4003_v44  ;;  %v3857_v22 = vld [vmem:[%s8155_s30 + $0x1bb0] sm:$0xff] }
 0x679   : > { %5108 = vmatpush1.msra.mxu0 %v3785_v23  ;;  %5177 = vmatpush1.msra.mxu1 %v3917_v21  ;;  %v3989_v23 = vld [vmem:[%s8155_s30 + $0x1fd0] sm:$0xff]  ;;  %v4173_v21 = vpop.f32.mrf.mxu0 }
 0x67a   : > { %5109 = vmatprep.subr.mxu0 %v3782_v24  ;;  %5178 = vmatprep.subr.mxu1 %v3914_v25  ;;  %v9260_v24 = vpop.f32.mrf.mxu1  ;;  %v3854_v25 = vld [vmem:[%s8155_s30 + $0x1b98] sm:$0xff]  ;;  %v3957_v44 = vld [vmem:[%s8155_s30 + $0x1ed0] sm:$0xff] }
 0x67b   : > { %5110 = vmatpush1.msra.mxu0 %v3781_v26  ;;  %5179 = vmatpush1.msra.mxu1 %v3913_v27  ;;  %v3986_v26 = vld [vmem:[%s8155_s30 + $0x1fb8] sm:$0xff]  ;;  %v3853_v27 = vld [vmem:[%s8155_s30 + $0x1b90] sm:$0xff] }
 0x67c   : > { %5111 = vmatprep.subr.mxu0 %v3778_v28  ;;  %5180 = vmatprep.subr.mxu1 %v3910_v29  ;;  %v3985_v28 = vld [vmem:[%s8155_s30 + $0x1fb0] sm:$0xff]  ;;  %v9266_v29 = vpop.f32.mrf.mxu0 }
 0x67d   : > { %5112 = vmatpush1.msra.mxu0 %v3777_v30  ;;  %5181 = vmatpush1.msra.mxu1 %v3909_v32  ;;  %v3850_v30 = vld [vmem:[%s8155_s30 + $0x1b78] sm:$0xff] }
 0x67e   : > { %5113 = vmatprep.subr.mxu0 %v3774_v33  ;;  %5182 = vmatprep.subr.mxu1 %v3906_v34  ;;  %v3982_v32 = vld [vmem:[%s8155_s30 + $0x1f98] sm:$0xff]  ;;  %v4174_v33 = vadd.f32 %v4173_v21, %v4004_v45  ;;  %v3849_v34 = vld [vmem:[%s8155_s30 + $0x1b70] sm:$0xff] }
 0x67f   : > { %5114 = vmatpush1.msra.mxu0 %v3773_v35  ;;  %5183 = vmatpush1.msra.mxu1 %v3905_v38  ;;  %v3981_v35 = vld [vmem:[%s8155_s30 + $0x1f90] sm:$0xff]  ;;  %v4244_v38 = vpop.f32.mrf.mxu1  ;;  %v3950_v45 = vld [vmem:[%s8155_s30 + $0x1e98] sm:$0xff] }
 0x680   : > { %5115 = vmatprep.subr.mxu0 %v3770_v39  ;;  %5184 = vmatprep.subr.mxu1 %v3902_v2  ;;  %v3846_v39 = vld [vmem:[%s8155_s30 + $0x1b58] sm:$0xff]  ;;  %v3949_v21 = vld [vmem:[%s8155_s30 + $0x1e90] sm:$0xff] }
 0x681   : > { %5116 = vmatpush1.msra.mxu0 %v3769_v40  ;;  %5185 = vmatpush1.msra.mxu1 %v3901_v43  ;;  %v3978_v2 = vld [vmem:[%s8155_s30 + $0x1f78] sm:$0xff]  ;;  %v3845_v40 = vld [vmem:[%s8155_s30 + $0x1b50] sm:$0xff] }
 0x682   : > { %5117 = vmatprep.subr.mxu0 %v3766_v46  ;;  %5186 = vmatprep.subr.mxu1 %v3898_v12  ;;  %v3977_v43 = vld [vmem:[%s8155_s30 + $0x1f70] sm:$0xff]  ;;  %v4315_v46 = vpop.f32.mrf.mxu0  ;;  %v9276_v12 = vpop.f32.mrf.mxu1 }
 0x683   : > { %5118 = vmatpush1.msra.mxu0 %v3765_v47  ;;  %5187 = vmatpush1.msra.mxu1 %v3897_v6  ;;  %v3842_v47 = vld [vmem:[%s8155_s30 + $0x1b38] sm:$0xff] }
 0x684   : > { %5119 = vmatprep.subr.mxu0 %v3762_v48  ;;  %5188 = vmatprep.subr.mxu1 %v3894_v49  ;;  %v3974_v6 = vld [vmem:[%s8155_s30 + $0x1f58] sm:$0xff]  ;;  %v4245_v48 = vadd.f32 %v4244_v38, %v4174_v33  ;;  %v3841_v49 = vld [vmem:[%s8155_s30 + $0x1b30] sm:$0xff] }
 0x685   : > { %5120 = vmatpush1.msra.mxu0 %v3761_v50  ;;  %5189 = vmatpush1.msra.mxu1 %v3893_v51  ;;  %v3973_v50 = vld [vmem:[%s8155_s30 + $0x1f50] sm:$0xff]  ;;  %v9282_v51 = vpop.f32.mrf.mxu0  ;;  %v3810_v33 = vld [vmem:[%s8155_s30 + $0x1a38] sm:$0xff] }
 0x686   : > { %5121 = vmatprep.subr.mxu0 %v3758_v17  ;;  %5190 = vmatprep.subr.mxu1 %v3890_v52  ;;  %v3838_v17 = vld [vmem:[%s8155_s30 + $0x1b18] sm:$0xff]  ;;  %v3941_v38 = vld [vmem:[%s8155_s30 + $0x1e50] sm:$0xff] }
 0x687   : > { %5122 = vmatpush1.msra.mxu0 %v3757_v53  ;;  %5191 = vmatpush1.msra.mxu1 %v3889_v54  ;;  %v3970_v52 = vld [vmem:[%s8155_s30 + $0x1f38] sm:$0xff]  ;;  %v4316_v53 = vadd.f32 %v4315_v46, %v4245_v48  ;;  %v3837_v54 = vld [vmem:[%s8155_s30 + $0x1b10] sm:$0xff] }
 0x688   : > { %5123 = vmatprep.subr.mxu0 %v3754_v55  ;;  %5192 = vmatprep.subr.mxu1 %v3886_v56  ;;  %v3969_v55 = vld [vmem:[%s8155_s30 + $0x1f30] sm:$0xff]  ;;  %v4386_v56 = vpop.f32.mrf.mxu1  ;;  %v5276_v48 = vld [vmem:[%s9341_s20 + $0xf8] sm:$0xff] }
 0x689   : > { %5124 = vmatpush1.msra.mxu0 %v3753_v57  ;;  %5193 = vmatpush1.msra.mxu1 %v3885_v42  ;;  %v3834_v57 = vld [vmem:[%s8155_s30 + $0x1af8] sm:$0xff]  ;;  %v3937_v46 = vld [vmem:[%s8155_s30 + $0x1e30] sm:$0xff] }
 0x68a   : > { %5125 = vmatprep.subr.mxu0 %v3750_v58  ;;  %5194 = vmatprep.subr.mxu1 %v3882_v59  ;;  %v3966_v42 = vld [vmem:[%s8155_s30 + $0x1f18] sm:$0xff]  ;;  %v3833_v58 = vld [vmem:[%s8155_s30 + $0x1af0] sm:$0xff] }
 0x68b   : > { %5126 = vmatpush1.msra.mxu0 %v3749_v60  ;;  %5195 = vmatpush1.msra.mxu1 %v3881_v7  ;;  %v3965_v59 = vld [vmem:[%s8155_s30 + $0x1f10] sm:$0xff]  ;;  %v4457_v60 = vpop.f32.mrf.mxu0  ;;  %v9293_v7 = vpop.f32.mrf.mxu1 }
 0x68c   : > { %5127 = vmatprep.subr.mxu0 %v3746_v61  ;;  %5196 = vmatprep.subr.mxu1 %v3878_v62  ;;  %v3830_v61 = vld [vmem:[%s8155_s30 + $0x1ad8] sm:$0xff] }
 0x68d   : > { %5128 = vmatpush1.msra.mxu0 %v3745_v63  ;;  %5197 = vmatpush1.msra.mxu1 %v3877_v37  ;;  %v3962_v62 = vld [vmem:[%s8155_s30 + $0x1ef8] sm:$0xff]  ;;  %v4387_v63 = vadd.f32 %v4386_v56, %v4316_v53  ;;  %v3829_v37 = vld [vmem:[%s8155_s30 + $0x1ad0] sm:$0xff]  ;;  %v5273_v56 = vld [vmem:[%s9341_s20 + $0xe0] sm:$0xff] }
 0x68e   : > { %5129 = vmatprep.subr.mxu0 %v3742_v0  ;;  %5198 = vmatprep.subr.mxu1 %v3874_v13  ;;  %v3961_v0 = vld [vmem:[%s8155_s30 + $0x1ef0] sm:$0xff]  ;;  %v9305_v13 = vpop.f32.mrf.mxu0 }
 0x68f   : > { %5130 = vmatpush1.msra.mxu0 %v3741_v1  ;;  %5199 = vmatpush1.msra.mxu1 %v3873_v5  ;;  %v3826_v1 = vld [vmem:[%s8155_s30 + $0x1ab8] sm:$0xff] }
 0x690   : > { %5131 = vmatprep.subr.mxu0 %v3866_v3  ;;  %5200 = vmatprep.subr.mxu1 %v3870_v8  ;;  %v3958_v5 = vld [vmem:[%s8155_s30 + $0x1ed8] sm:$0xff]  ;;  %v4458_v3 = vadd.f32 %v4457_v60, %v4387_v63  ;;  %v3825_v8 = vld [vmem:[%s8155_s30 + $0x1ab0] sm:$0xff]  ;;  %v5257_v60 = vld [vmem:[%s9341_s20 + $0x60] sm:$0xff] }
 0x691   : > { %5132 = vmatpush2.msra.mxu0 %v3865_v9  ;;  %5201 = vmatpush1.msra.mxu1 %v3869_v11  ;;  %v4528_v9 = vpop.f32.mrf.mxu1  ;;  %v3822_v11 = vld [vmem:[%s8155_s30 + $0x1a98] sm:$0xff] }
 0x692   : > { %5133 = vmatprep.subr.mxu0 %v3862_v14  ;;  %5202 = vmatprep.subr.mxu1 %v3994_v18  ;;  %v3954_v14 = vld [vmem:[%s8155_s30 + $0x1eb8] sm:$0xff]  ;;  %v3821_v18 = vld [vmem:[%s8155_s30 + $0x1a90] sm:$0xff] }
 0x693   : > { %5134 = vmatpush2.msra.mxu0 %v3861_v10  ;;  %5203 = vmatpush2.msra.mxu1 %v3993_v16  ;;  %v3953_v10 = vld [vmem:[%s8155_s30 + $0x1eb0] sm:$0xff]  ;;  %v4599_v16 = vpop.f32.mrf.mxu0  ;;  %v5256_v63 = vld [vmem:[%s9341_s20 + $0x58] sm:$0xff] }
 0x694   : > { %5135 = vmatprep.subr.mxu0 %v3858_v36  ;;  %5204 = vmatprep.subr.mxu1 %v3990_v20  ;;  %v9321_v36 = vpop.f32.mrf.mxu1  ;;  %v3818_v20 = vld [vmem:[%s8155_s30 + $0x1a78] sm:$0xff] }
 0x695   : > { %5136 = vmatpush2.msra.mxu0 %v3857_v22  ;;  %5205 = vmatpush2.msra.mxu1 %v3989_v23  ;;  %v4529_v22 = vadd.f32 %v4528_v9, %v4458_v3  ;;  %v3817_v23 = vld [vmem:[%s8155_s30 + $0x1a70] sm:$0xff]  ;;  %v5289_v3 = vld [vmem:[%s9341_s20 + $0x160] sm:$0xff] }
 0x696   : > { %5137 = vmatprep.subr.mxu0 %v3854_v25  ;;  %5206 = vmatprep.subr.mxu1 %v3986_v26  ;;  %v3814_v25 = vld [vmem:[%s8155_s30 + $0x1a58] sm:$0xff] }
 0x697   : > { %5138 = vmatpush2.msra.mxu0 %v3853_v27  ;;  %5207 = vmatpush2.msra.mxu1 %v3985_v28  ;;  %v3946_v26 = vld [vmem:[%s8155_s30 + $0x1e78] sm:$0xff]  ;;  %v4600_v27 = vadd.f32 %v4599_v16, %v4529_v22  ;;  %v3813_v28 = vld [vmem:[%s8155_s30 + $0x1a50] sm:$0xff] }
 0x698   : > { %5139 = vmatprep.subr.mxu0 %v3850_v30  ;;  %5208 = vmatprep.subr.mxu1 %v3982_v32  ;;  %v3945_v30 = vld [vmem:[%s8155_s30 + $0x1e70] sm:$0xff]  ;;  %v4670_v32 = vpop.f32.mrf.mxu1  ;;  %v5252_v22 = vld [vmem:[%s9341_s20 + $0x38] sm:$0xff] }
 0x699   : > { %5140 = vmatpush2.msra.mxu0 %v3849_v34  ;;  %5209 = vmatpush2.msra.mxu1 %v3981_v35  ;;  %v3942_v34 = vld [vmem:[%s8155_s30 + $0x1e58] sm:$0xff]  ;;  %v3809_v35 = vld [vmem:[%s8155_s30 + $0x1a30] sm:$0xff] }
 0x69a   : > { %5141 = vmatprep.subr.mxu0 %v3846_v39  ;;  %5210 = vmatprep.subr.mxu1 %v3978_v2  ;;  %v3806_v39 = vld [vmem:[%s8155_s30 + $0x1a18] sm:$0xff]  ;;  %v5287_v16 = vld [vmem:[%s9341_s20 + $0x150] sm:$0xff] }
 0x69b   : > { %5142 = vmatpush2.msra.mxu0 %v3845_v40  ;;  %5211 = vmatpush2.msra.mxu1 %v3977_v43  ;;  %v3938_v2 = vld [vmem:[%s8155_s30 + $0x1e38] sm:$0xff]  ;;  %v4671_v40 = vadd.f32 %v4670_v32, %v4600_v27  ;;  %v3805_v43 = vld [vmem:[%s8155_s30 + $0x1a10] sm:$0xff]  ;;  %v5250_v32 = vld [vmem:[%s9341_s20 + $0x28] sm:$0xff] }
 0x69c   : > { %5143 = vmatprep.subr.mxu0 %v3842_v47  ;;  %5212 = vmatprep.subr.mxu1 %v3974_v6  ;;  %v3999_v47 = vsub.s32 0, %v8195_v41  ;;  %v3934_v6 = vld [vmem:[%s8155_s30 + $0x1e18] sm:$0xff]  ;;  %v5251_v27 = vld [vmem:[%s9341_s20 + $0x30] sm:$0xff] }
 0x69d   : > { %5144 = vmatpush2.msra.mxu0 %v3841_v49  ;;  %5213 = vmatpush2.msra.mxu1 %v3973_v50  ;;  %v3933_v49 = vld [vmem:[%s8155_s30 + $0x1e10] sm:$0xff]  ;;  %v5260_v50 = vld [vmem:[%s9341_s20 + $0x78] sm:$0xff] }
 0x69e   : > { %5145 = vmatprep.subr.mxu0 %v3838_v17  ;;  %5214 = vmatprep.subr.mxu1 %v3970_v52  ;;  %v5242_v17 = vmax.f32 %v4671_v40, 0.0  ;;  %v5275_v52 = vld [vmem:[%s9341_s20 + $0xf0] sm:$0xff]  ;;  %v4000_v53 = vrot.slane %v9253_v19, %v3999_v47  ;;  %v5298_v40 = vld [vmem:[%s9341_s20 + $0x1a8] sm:$0xff] }
 0x69f   : > { %5146 = vmatpush2.msra.mxu0 %v3837_v54  ;;  %5215 = vmatpush2.msra.mxu1 %v3969_v55  ;;  %v5259_v54 = vld [vmem:[%s9341_s20 + $0x70] sm:$0xff]  ;;  %v5274_v55 = vld [vmem:[%s9341_s20 + $0xe8] sm:$0xff] }
 0x6a0   : > { %5147 = vmatprep.subr.mxu0 %v3834_v57  ;;  %5216 = vmatprep.subr.mxu1 %v3966_v42  ;;  %v5308_v57 = vld [vmem:[%s9341_s20 + $0x1f8] sm:$0xff]  ;;  %v5282_v47 = vld [vmem:[%s9341_s20 + $0x128] sm:$0xff] }
 0x6a1   : > { %5148 = vmatpush2.msra.mxu0 %v3833_v58  ;;  %5217 = vmatpush2.msra.mxu1 %v3965_v59  ;;  %v5292_v42 = vld [vmem:[%s9341_s20 + $0x178] sm:$0xff]  ;;  %v5307_v58 = vld [vmem:[%s9341_s20 + $0x1f0] sm:$0xff]  ;;  %v4172_v59 = vadd.f32 %v9247_v31, %v4000_v53  ;;  %v5297_v53 = vld [vmem:[%s9341_s20 + $0x1a0] sm:$0xff] }
 0x6a2   : > { %5149 = vmatprep.subr.mxu0 %v3830_v61  ;;  %5218 = vmatprep.subr.mxu1 %v3962_v62  ;;  %v5291_v61 = vld [vmem:[%s9341_s20 + $0x170] sm:$0xff]  ;;  %v5306_v62 = vld [vmem:[%s9341_s20 + $0x1e8] sm:$0xff] }
 0x6a3   : > { %5150 = vmatpush2.msra.mxu0 %v3829_v37  ;;  %5219 = vmatpush2.msra.mxu1 %v3961_v0  ;;  %v5290_v37 = vld [vmem:[%s9341_s20 + $0x168] sm:$0xff]  ;;  %v5271_v31 = vld [vmem:[%s9341_s20 + $0xd0] sm:$0xff]  ;;  %v5305_v0 = vld [vmem:[%s9341_s20 + $0x1e0] sm:$0xff] }
 0x6a4   : > { %5151 = vmatprep.subr.mxu0 %v3826_v1  ;;  %5220 = vmatprep.subr.mxu1 %v3958_v5  ;;  %v4243_v1 = vadd.f32 %v9260_v24, %v4172_v59  ;;  %v5255_v5 = vld [vmem:[%s9341_s20 + $0x50] sm:$0xff]  ;;  %v5288_v24 = vld [vmem:[%s9341_s20 + $0x158] sm:$0xff]  ;;  %v5277_v59 = vld [vmem:[%s9341_s20 + $0x100] sm:$0xff] }
 0x6a5   : > { %5152 = vmatpush2.msra.mxu0 %v3825_v8  ;;  %5221 = vmatpush2.msra.mxu1 %v3957_v44  ;;  %v5270_v8 = vld [vmem:[%s9341_s20 + $0xc8] sm:$0xff]  ;;  %v5304_v44 = vld [vmem:[%s9341_s20 + $0x1d8] sm:$0xff] }
 0x6a6   : > { %5153 = vmatprep.subr.mxu0 %v3822_v11  ;;  %5222 = vmatprep.subr.mxu1 %v3954_v14  ;;  %v4314_v9 = vadd.f32 %v9266_v29, %v4243_v1  ;;  %v5254_v11 = vld [vmem:[%s9341_s20 + $0x48] sm:$0xff]  ;;  %v5269_v14 = vld [vmem:[%s9341_s20 + $0xc0] sm:$0xff]  ;;  %v5268_v29 = vld [vmem:[%s9341_s20 + $0xb8] sm:$0xff] }
 0x6a7   : > { %5154 = vmatpush2.msra.mxu0 %v3821_v18  ;;  %5223 = vmatpush2.msra.mxu1 %v3953_v10  ;;  %v5303_v18 = vld [vmem:[%s9341_s20 + $0x1d0] sm:$0xff]  ;;  %v5253_v10 = vld [vmem:[%s9341_s20 + $0x40] sm:$0xff] }
 0x6a8   : > { %5155 = vmatprep.subr.mxu0 %v3818_v20  ;;  %5224 = vmatprep.subr.mxu1 %v3950_v45  ;;  %v5302_v20 = vld [vmem:[%s9341_s20 + $0x1c8] sm:$0xff]  ;;  %v4385_v45 = vadd.f32 %v9276_v12, %v4314_v9  ;;  %v5285_v12 = vld [vmem:[%s9341_s20 + $0x140] sm:$0xff] }
 0x6a9   : > { %5156 = vmatpush2.msra.mxu0 %v3817_v23  ;;  %5225 = vmatpush2.msra.mxu1 %v3949_v21  ;;  %v5286_v23 = vld [vmem:[%s9341_s20 + $0x148] sm:$0xff]  ;;  %v5267_v21 = vld [vmem:[%s9341_s20 + $0xb0] sm:$0xff] }
 0x6aa   : > { %5157 = vmatprep.subr.mxu0 %v3814_v25  ;;  %5226 = vmatprep.subr.mxu1 %v3946_v26  ;;  %v5301_v25 = vld [vmem:[%s9341_s20 + $0x1c0] sm:$0xff]  ;;  %v4456_v26 = vadd.f32 %v9282_v51, %v4385_v45 }
 0x6ab   : > { %5158 = vmatpush2.msra.mxu0 %v3813_v28  ;;  %5227 = vmatpush2.msra.mxu1 %v3945_v30  ;;  %v5266_v28 = vld [vmem:[%s9341_s20 + $0xa8] sm:$0xff]  ;;  %v5300_v30 = vld [vmem:[%s9341_s20 + $0x1b8] sm:$0xff]  ;;  %v5265_v51 = vld [vmem:[%s9341_s20 + $0xa0] sm:$0xff] }
 0x6ac   : > { %5159 = vmatprep.subr.mxu0 %v3810_v33  ;;  %5228 = vmatprep.subr.mxu1 %v3942_v34  ;;  %v5284_v33 = vld [vmem:[%s9341_s20 + $0x138] sm:$0xff]  ;;  %v5299_v34 = vld [vmem:[%s9341_s20 + $0x1b0] sm:$0xff] }
 0x6ad   : > { %5160 = vmatpush2.msra.mxu0 %v3809_v35  ;;  %5229 = vmatpush2.msra.mxu1 %v3941_v38  ;;  %v4527_v35 = vadd.f32 %v9293_v7, %v4456_v26  ;;  %v5249_v38 = vld [vmem:[%s9341_s20 + $0x20] sm:$0xff]  ;;  %v5263_v7 = vld [vmem:[%s9341_s20 + $0x90] sm:$0xff] }
 0x6ae   : > { %5161 = vmatprep.subr.mxu0 %v3806_v39  ;;  %5230 = vmatprep.subr.mxu1 %v3938_v2  ;;  %v5283_v39 = vld [vmem:[%s9341_s20 + $0x130] sm:$0xff]  ;;  %v5264_v2 = vld [vmem:[%s9341_s20 + $0x98] sm:$0xff] }
 0x6af   : > { %5162 = vmatpush2.msra.mxu0 %v3805_v43  ;;  %5231 = vmatpush2.msra.mxu1 %v3937_v46  ;;  %v4598_v43 = vadd.f32 %v9305_v13, %v4527_v35  ;;  %v5248_v46 = vld [vmem:[%s9341_s20 + $0x18] sm:$0xff] }
 0x6b0   : > { %5164 = vmatmul.mubr.f32.vlgmr.msra.gmra.mxu0 %v8616_v4  ;;  %5232 = vmatprep.subr.mxu1 %v3934_v6  ;;  %v5258_v4 = vld [vmem:[%s9341_s20 + $0x68] sm:$0xff]  ;;  %v5247_v6 = vld [vmem:[%s9341_s20 + $0x10] sm:$0xff] }
 0x6b1   : > { %5616 = vmatprep.subr.mxu0 %v5276_v48  ;;  %5233 = vmatpush2.msra.mxu1 %v3933_v49  ;;  %v5262_v48 = vld [vmem:[%s9341_s20 + $0x88] sm:$0xff]  ;;  %v4669_v13 = vadd.f32 %v9321_v36, %v4598_v43  ;;  %v5281_v36 = vld [vmem:[%s9341_s20 + $0x120] sm:$0xff] }
 0x6b2   : > { %5617 = vmatpush3.msra.mxu0 %v5260_v50  ;;  %5373 = vmatprep.mubr.f32.mxu0 %v5242_v17  ;;  %v5246_v49 = vld [vmem:[%s9341_s20 + $0x8] sm:$0xff]  ;;  %v5261_v50 = vld [vmem:[%s9341_s20 + $0x80] sm:$0xff] }
 0x6b3   : > { %5235 = vmatmul.mubr.f32.vlgmr.msra.gmra.mxu1 %v8623_v15  ;;  %5618 = vmatprep.subr.mxu0 %v5275_v52  ;;  %v5272_v15 = vld [vmem:[%s9341_s20 + $0xd8] sm:$0xff]  ;;  %v5245_v17 = vld [vmem:[%s9341_s20] sm:$0xff]  ;;  %v5241_v52 = vmax.f32 %v4669_v13, 0.0 }
 0x6b4   : > { %5619 = vmatpush3.msra.mxu0 %v5259_v54  ;;  %5651 = vmatprep.subr.mxu1 %v5308_v57  ;;  %v5296_v54 = vld [vmem:[%s9341_s20 + $0x198] sm:$0xff]  ;;  %v5294_v57 = vld [vmem:[%s9341_s20 + $0x188] sm:$0xff] }
 0x6b5   : > { %5620 = vmatprep.subr.mxu0 %v5274_v55  ;;  %5652 = vmatpush3.msra.mxu1 %v5292_v42  ;;  %v5280_v55 = vld [vmem:[%s9341_s20 + $0x118] sm:$0xff]  ;;  %v5278_v42 = vld [vmem:[%s9341_s20 + $0x108] sm:$0xff] }
 0x6b6   : > { %5621 = vmatpush3.msra.mxu0 %v5258_v4  ;;  %5653 = vmatprep.subr.mxu1 %v5307_v58  ;;  %v5295_v4 = vld [vmem:[%s9341_s20 + $0x190] sm:$0xff]  ;;  %v5293_v58 = vld [vmem:[%s9341_s20 + $0x180] sm:$0xff] }
 0x6b7   : > { %5622 = vmatprep.subr.mxu0 %v5273_v56  ;;  %5654 = vmatpush3.msra.mxu1 %v5291_v61  ;;  %v5279_v56 = vld [vmem:[%s9341_s20 + $0x110] sm:$0xff]  ;;  %v4011_v61 = vsub.s32 3, %v8195_v41 }
 0x6b8   : > { %5623 = vmatpush3.msra.mxu0 %v5257_v60  ;;  %5655 = vmatprep.subr.mxu1 %v5306_v62  ;;  %v4007_v60 = vsub.s32 2, %v8195_v41 }
 0x6b9   : > { %5624 = vmatprep.subr.mxu0 %v5272_v15  ;;  %5656 = vmatpush3.msra.mxu1 %v5290_v37  ;;  %v4739_v15 = vpop.f32.mrf.mxu0 }
 0x6ba   : > { %5625 = vmatpush3.msra.mxu0 %v5256_v63  ;;  %5657 = vmatprep.subr.mxu1 %v5305_v0  ;;  %v4008_v62 = vrot.slane %v9253_v19, %v4007_v60  ;;  %v4012_v63 = vrot.slane %v9253_v19, %v4011_v61 }
 0x6bb   : > { %5626 = vmatprep.subr.mxu0 %v5271_v31  ;;  %5658 = vmatpush3.msra.mxu1 %v5289_v3  ;;  %v4741_v37 = vpop.f32.mrf.mxu0  ;;  %v4810_v31 = vpop.f32.mrf.mxu1 }
 0x6bc   : > { %5627 = vmatpush3.msra.mxu0 %v5255_v5  ;;  %5659 = vmatprep.subr.mxu1 %v5304_v44  ;;  %v4740_v0 = vadd.f32 %v4739_v15, %v4008_v62  ;;  %v4742_v5 = vadd.f32 %v4741_v37, %v4012_v63 }
 0x6bd   : > { %5628 = vmatprep.subr.mxu0 %v5270_v8  ;;  %5660 = vmatpush3.msra.mxu1 %v5288_v24  ;;  %v4812_v3 = vpop.f32.mrf.mxu1 }
 0x6be   : > { %5629 = vmatpush3.msra.mxu0 %v5254_v11  ;;  %5661 = vmatprep.subr.mxu1 %v5303_v18  ;;  %v4811_v8 = vadd.f32 %v4810_v31, %v4740_v0  ;;  %v4813_v11 = vadd.f32 %v4812_v3, %v4742_v5 }
 0x6bf   : > { %5630 = vmatprep.subr.mxu0 %v5269_v14  ;;  %5662 = vmatpush3.msra.mxu1 %v5287_v16 }
 0x6c0   : > { %5631 = vmatpush3.msra.mxu0 %v5253_v10  ;;  %5663 = vmatprep.subr.mxu1 %v5302_v20 }
 0x6c1   : > { %5632 = vmatprep.subr.mxu0 %v5268_v29  ;;  %5664 = vmatpush3.msra.mxu1 %v5286_v23 }
 0x6c2   : > { %5633 = vmatpush3.msra.mxu0 %v5252_v22  ;;  %5665 = vmatprep.subr.mxu1 %v5301_v25 }
 0x6c3   : > { %5634 = vmatprep.subr.mxu0 %v5267_v21  ;;  %5666 = vmatpush3.msra.mxu1 %v5285_v12 }
 0x6c4   : > { %5635 = vmatpush3.msra.mxu0 %v5251_v27  ;;  %5667 = vmatprep.subr.mxu1 %v5300_v30 }
 0x6c5   : > { %5636 = vmatprep.subr.mxu0 %v5266_v28  ;;  %5668 = vmatpush3.msra.mxu1 %v5284_v33 }
 0x6c6   : > { %5637 = vmatpush3.msra.mxu0 %v5250_v32  ;;  %5669 = vmatprep.subr.mxu1 %v5299_v34 }
 0x6c7   : > { %5638 = vmatprep.subr.mxu0 %v5265_v51  ;;  %5670 = vmatpush3.msra.mxu1 %v5283_v39 }
 0x6c8   : > { %5639 = vmatpush3.msra.mxu0 %v5249_v38  ;;  %5671 = vmatprep.subr.mxu1 %v5298_v40 }
 0x6c9   : > { %5640 = vmatprep.subr.mxu0 %v5264_v2  ;;  %5672 = vmatpush3.msra.mxu1 %v5282_v47 }
 0x6ca   : > { %5641 = vmatpush3.msra.mxu0 %v5248_v46  ;;  %5673 = vmatprep.subr.mxu1 %v5297_v53 }
 0x6cb   : > { %5642 = vmatprep.subr.mxu0 %v5263_v7  ;;  %5674 = vmatpush3.msra.mxu1 %v5281_v36 }
 0x6cc   : > { %5643 = vmatpush3.msra.mxu0 %v5247_v6  ;;  %5675 = vmatprep.subr.mxu1 %v5296_v54 }
 0x6cd   : > { %5644 = vmatprep.subr.mxu0 %v5262_v48  ;;  %5676 = vmatpush3.msra.mxu1 %v5280_v55 }
 0x6ce   : > { %5645 = vmatpush3.msra.mxu0 %v5246_v49  ;;  %5677 = vmatprep.subr.mxu1 %v5295_v4 }
 0x6cf   : > { %5646 = vmatprep.subr.mxu0 %v5261_v50  ;;  %5678 = vmatpush3.msra.mxu1 %v5279_v56 }
 0x6d0   : > { %5647 = vmatpush3.msra.mxu0 %v5245_v17  ;;  %5679 = vmatprep.subr.mxu1 %v5294_v57 }
 0x6d1   : > { %5374 = vmatmul.mubr.f32.vlgmr.msra.gmra.mxu0 %v5241_v52  ;;  %5680 = vmatpush3.msra.mxu1 %v5278_v42 }
 0x6d2   : > { %5681 = vmatprep.subr.mxu1 %v5293_v58 }
 0x6d3   : > { %5682 = vmatpush3.msra.mxu1 %v5277_v59 }
 0x6ec   : > { %v4881_v1 = vpop.f32.mrf.mxu0 }
 0x6ed   : > { %v4882_v24 = vadd.f32 %v4881_v1, %v4811_v8 }
 0x6ee   : > { %v4883_v44 = vpop.f32.mrf.mxu0 }
 0x6ef   : > { %v4952_v9 = vpop.f32.mrf.mxu1  ;;  %v4884_v18 = vadd.f32 %v4883_v44, %v4813_v11 }
 0x6f0   : > { %v4953_v41 = vadd.f32 %v4952_v9, %v4882_v24 }
 0x6f1   : > { %v4954_v10 = vpop.f32.mrf.mxu1 }
 0x6f2   : > { %v4955_v20 = vadd.f32 %v4954_v10, %v4884_v18 }
 0x72e   : > { %v5023_v14 = vpop.f32.mrf.mxu0 }
 0x72f   : > { %v5024_v45 = vadd.f32 %v5023_v14, %v4953_v41 }
 0x730   : > { %v5025_v16 = vpop.f32.mrf.mxu0 }
 0x731   : > { %v5094_v29 = vpop.f32.mrf.mxu1  ;;  %v5026_v19 = vadd.f32 %v5025_v16, %v4955_v20 }
 0x732   : > { %v5095_v23 = vadd.f32 %v5094_v29, %v5024_v45 }
 0x733   : > { %v5096_v22 = vpop.f32.mrf.mxu1 }
 0x734   : > { %v5097_v25 = vadd.f32 %v5096_v22, %v5026_v19 }
 0x770   : > { %v5165_v21 = vpop.f32.mrf.mxu0 }
 0x771   : > { %v5166_v26 = vadd.f32 %v5165_v21, %v5095_v23 }
 0x772   : > { %v5167_v27 = vpop.f32.mrf.mxu0 }
 0x773   : > { %v5168_v12 = vadd.f32 %v5167_v27, %v5097_v25  ;;  %v5236_v28 = vpop.f32.mrf.mxu1 }
 0x774   : > { %v5237_v30 = vadd.f32 %v5236_v28, %v5166_v26 }
 0x775   : > { %v5238_v32 = vpop.f32.mrf.mxu1 }
 0x776   : > { %v5239_v33 = vadd.f32 %v5238_v32, %v5168_v12  ;;  %v5243_v34 = vmax.f32 %v5237_v30, 0.0 }
 0x778   : > { %v5244_v51 = vmax.f32 %v5239_v33, 0.0 }
 0x77a   : > { %5443 = vmatprep.mubr.f32.mxu1 %v5244_v51 }
 0x77b   : > { %5444 = vmatmul.mubr.f32.vlgmr.msra.gmra.mxu1 %v5243_v34 }
 0x791   : > { %v5648_v35 = vpop.f32.mrf.mxu0 }
 0x793   : > { %v5649_v38 = vpop.f32.mrf.mxu0 }
 0x794   : > { %v5650_v40 = vadd.f32 %v5649_v38, %v5648_v35 }
 0x83b   : > { %v5683_v39 = vpop.f32.mrf.mxu1 }
 0x83d   : > { %v5684_v2 = vpop.f32.mrf.mxu1 }
 0x83e   : > { %v5685_v43 = vadd.f32 %v5684_v2, %v5683_v39 }
 0x840   : > { %v5446_v46 = vadd.f32 %v5685_v43, %v5650_v40 }
 0x842   : > { %5450 = vst.msk [vmem:[%s2384_s26] sm:$0x3] %vm5449_vm3, %v5446_v46 }
 0x843 PF: > { %p14_p11 = scmp.ge.s32.totalorder %s5823_s28, 4   ;;  %s9452_s24 = smov %s5756_s25 }
 0x844   : > { %s9453_s25 = smov %s5832_s8  ;;  %s9454_s26 = smov %s5823_s28 }
 0x845   :  { %16 = sbr.rel (!%p14_p11) target bundleno = 2 (0x2), region = 113 }

</bundles_post_ra>
